<compile_context>
chip_gen: v6e
topology: v6e:2x2x1
jax: 0.10.0
libtpu: 0.0.40
codegen_flags: <defaults>
</compile_context>

<pallas_src>
import functools

import jax
import jax.numpy as jnp
from jax import lax
from jax.experimental import pallas as pl
from jax.experimental.pallas import tpu as pltpu


@functools.lru_cache(maxsize=None)
def _probe_pltpu_roll():
    """One-time probe of pltpu.roll's rotation direction on the sublane axis.

    Returns (use_xlu_roll, roll_like_jnp).  Falls back to a jnp.roll-based shift
    (guaranteed semantics, slightly more data movement) if the probe cannot run.
    """
    try:
        def _k(o_ref):
            o_ref[...] = pltpu.roll(
                lax.broadcasted_iota(jnp.int32, (384, 8), 0), 1, 0)

        probe = pl.pallas_call(
            _k, out_shape=jax.ShapeDtypeStruct((384, 8), jnp.int32))()
        v = int(jax.device_get(probe)[1, 0])
        if v == 0:          # out[k] = in[k-1]  (same convention as jnp.roll)
            return True, True
        if v == 2:          # out[k] = in[k+1]  (opposite convention)
            return True, False
        return False, True
    except Exception:       # pragma: no cover - conservative fallback
        return False, True


def _shift_rows(v, delta, n, use_xlu_roll, roll_like_jnp):
    """Cyclic row shift with jnp.roll semantics: out[k] = v[(k - delta) % n]."""
    if use_xlu_roll:
        amt = delta if roll_like_jnp else -delta
        return pltpu.roll(v, amt % n, 0)
    return jnp.roll(v, delta, 0)


def _double_conv_kernel(x_ref, mask_ref, w1_ref, s1_ref, b1_ref,
                        w2_ref, s2_ref, b2_ref, o_ref, h1_ref,
                        *, H, W, Wp, use_xlu_roll, roll_like_jnp):
    """One image: Conv3x3 -> ReLU -> BN -> Conv3x3 -> ReLU -> BN (eval-mode BN).

    Layout: the (rows x Wp) spatial grid is flattened row-major onto the sublane
    axis; channels live on the lane axis.

      x_ref   : (1, (H+2)*Wp, Cin)  zero rows top/bottom, zero columns >= W
      mask_ref: (H*Wp, 1)           1.0 for columns < W, else 0.0
      w*_ref  : (9, Cin, Cout)      tap index k = dy*3 + dx
      s*/b*   : (1, C)              folded eval-mode BN scale / shift (f32)
      o_ref   : (1, H*Wp, Cout)     halo columns hold garbage, cropped in wrapper
      h1_ref  : ((H+2)*Wp, Cmid)    VMEM-resident intermediate (never hits HBM)
    """
    HWp = H * Wp
    cmid = w1_ref.shape[2]

    def conv3x3(load_slab, w_ref):
        # 9 MXU matmuls grouped by dx; each dy slab (8-aligned contiguous read)
        # is loaded once and reused by its three taps.
        parts = [None, None, None]
        for dy in range(3):
            slab = load_slab(dy)                                 # (H*Wp, Cin)
            for dx in range(3):
                p = jnp.dot(slab, w_ref[dy * 3 + dx],
                            preferred_element_type=jnp.float32)
                parts[dx] = p if parts[dx] is None else parts[dx] + p
        # dx column shifts as cyclic row rotations (XLU); the wrap only ever
        # brings zero halo columns into rows that survive the final crop.
        acc = parts[1]
        acc = acc + _shift_rows(parts[0], +1, HWp, use_xlu_roll, roll_like_jnp)
        acc = acc + _shift_rows(parts[2], -1, HWp, use_xlu_roll, roll_like_jnp)
        return acc

    # ---- conv1 -> ReLU -> folded BN; zero the >=W halo columns ---------------
    acc1 = conv3x3(lambda dy: x_ref[0, pl.ds(dy * Wp, HWp), :], w1_ref)
    h1 = (jnp.maximum(acc1, 0.0) * s1_ref[...] + b1_ref[...]) * mask_ref[...]

    # Stage the intermediate: zero only the two 1-row halo strips, then one
    # full-width, 8-aligned, unmasked interior store.
    h1_ref[pl.ds(0, Wp), :] = jnp.zeros((Wp, cmid), h1_ref.dtype)
    h1_ref[pl.ds((H + 1) * Wp, Wp), :] = jnp.zeros((Wp, cmid), h1_ref.dtype)
    h1_ref[pl.ds(Wp, HWp), :] = h1.astype(h1_ref.dtype)

    # ---- conv2 -> ReLU -> folded BN -------------------------------------------
    acc2 = conv3x3(lambda dy: h1_ref[pl.ds(dy * Wp, HWp), :], w2_ref)
    out = jnp.maximum(acc2, 0.0) * s2_ref[...] + b2_ref[...]
    o_ref[0] = out.astype(o_ref.dtype)


def _fold_bn(gamma, beta, mean, var, eps):
    s = gamma * lax.rsqrt(var + eps)
    return s, beta - mean * s


@functools.partial(
    jax.jit,
    static_argnames=("eps", "compute_dtype", "use_xlu_roll", "roll_like_jnp"))
def _double_conv_impl(x, w1, g1, beta1, m1, v1, w2, g2, beta2, m2, v2,
                      eps, compute_dtype, use_xlu_roll, roll_like_jnp):
    N, cin, H, W = x.shape
    cmid = w1.shape[0]
    cout = w2.shape[0]
    cdt = jnp.dtype(compute_dtype) if compute_dtype is not None else x.dtype

    # Padded row width: >= W+1 zero halo columns and a multiple of 8 so every
    # slab read / interior store stays sublane-aligned and unmasked.
    Wp = ((W + 1 + 7) // 8) * 8
    HWp = H * Wp

    s1, b1 = _fold_bn(g1, beta1, m1, v1, eps)
    s2, b2 = _fold_bn(g2, beta2, m2, v2, eps)

    # NCHW -> NHWC (channels on lanes), 1 zero row top/bottom, Wp-W zero columns
    # on the right, then flatten spatial dims row-major (a free bitcast reshape).
    x_nhwc = jnp.transpose(x, (0, 2, 3, 1)).astype(cdt)
    x_pad = jnp.pad(x_nhwc, ((0, 0), (1, 1), (0, Wp - W), (0, 0)))
    x_flat = x_pad.reshape(N, (H + 2) * Wp, cin)

    # Column mask (1.0 for real columns, 0.0 for the halo), lane-broadcast in-kernel.
    colmask = jnp.tile((jnp.arange(Wp) < W).astype(jnp.float32), H)
    colmask = colmask.reshape(HWp, 1)

    # (Cout, Cin, 3, 3) -> (9, Cin, Cout); tap index k = dy*3 + dx.
    w1k = jnp.transpose(w1, (2, 3, 1, 0)).reshape(9, cin, cmid).astype(cdt)
    w2k = jnp.transpose(w2, (2, 3, 1, 0)).reshape(9, cmid, cout).astype(cdt)

    kernel = functools.partial(
        _double_conv_kernel, H=H, W=W, Wp=Wp,
        use_xlu_roll=use_xlu_roll, roll_like_jnp=roll_like_jnp)

    csize = jnp.dtype(cdt).itemsize
    osize = jnp.dtype(x.dtype).itemsize
    in_block = (H + 2) * Wp * cin * csize
    out_block = HWp * cout * osize
    scratch_b = (H + 2) * Wp * cmid * csize
    acc_live = 4 * HWp * max(cmid, cout) * 4
    weights_b = 9 * (cin * cmid + cmid * cout) * csize
    vmem_est = 2 * (in_block + out_block) + scratch_b + acc_live + weights_b
    vmem_limit = int(min(64 * 1024 * 1024,
                         max(32 * 1024 * 1024, int(vmem_est * 1.5))))

    cost = pl.CostEstimate(
        flops=2 * N * H * Wp * 9 * (cin * cmid + cmid * cout),
        transcendentals=0,
        bytes_accessed=int(x_flat.size * csize + N * HWp * cout * osize
                           + (w1k.size + w2k.size) * csize
                           + 2 * (cmid + cout) * 4),
    )

    out = pl.pallas_call(
        kernel,
        out_shape=jax.ShapeDtypeStruct((N, HWp, cout), x.dtype),
        grid_spec=pltpu.PrefetchScalarGridSpec(
            num_scalar_prefetch=0,
            grid=(N,),
            in_specs=[
                pl.BlockSpec((1, (H + 2) * Wp, cin), lambda n: (n, 0, 0)),
                pl.BlockSpec((HWp, 1), lambda n: (0, 0)),
                pl.BlockSpec((9, cin, cmid), lambda n: (0, 0, 0)),
                pl.BlockSpec((1, cmid), lambda n: (0, 0)),
                pl.BlockSpec((1, cmid), lambda n: (0, 0)),
                pl.BlockSpec((9, cmid, cout), lambda n: (0, 0, 0)),
                pl.BlockSpec((1, cout), lambda n: (0, 0)),
                pl.BlockSpec((1, cout), lambda n: (0, 0)),
            ],
            out_specs=pl.BlockSpec((1, HWp, cout), lambda n: (n, 0, 0)),
            scratch_shapes=[pltpu.VMEM(((H + 2) * Wp, cmid), cdt)],
        ),
        compiler_params=pltpu.CompilerParams(
            dimension_semantics=("parallel",),
            vmem_limit_bytes=vmem_limit),
        cost_estimate=cost,
    )(x_flat, colmask, w1k,
      s1.reshape(1, cmid).astype(jnp.float32),
      b1.reshape(1, cmid).astype(jnp.float32),
      w2k,
      s2.reshape(1, cout).astype(jnp.float32),
      b2.reshape(1, cout).astype(jnp.float32))

    # Crop halo columns + restore NCHW in one fused XLA copy.
    return jnp.transpose(out.reshape(N, H, Wp, cout)[:, :, :W, :], (0, 3, 1, 2))


def double_conv(x, w1, g1, beta1, m1, v1, w2, g2, beta2, m2, v2,
                eps=1e-5, compute_dtype=None):
    """x: (N, Cin, H, W) NCHW; w1/w2: (Cout, Cin, 3, 3) PyTorch layout."""
    use_xlu_roll, roll_like_jnp = _probe_pltpu_roll()   # eager, cached
    return _double_conv_impl(
        x, w1, g1, beta1, m1, v1, w2, g2, beta2, m2, v2,
        eps=eps, compute_dtype=compute_dtype,
        use_xlu_roll=use_xlu_roll, roll_like_jnp=roll_like_jnp)


def double_conv_ref(x, w1, g1, beta1, m1, v1, w2, g2, beta2, m2, v2, eps=1e-5):
    # Pure-JAX reference mirroring the PyTorch forward (eval-mode BatchNorm).
    dn = ("NCHW", "OIHW", "NCHW")
    y = lax.conv_general_dilated(x, w1, (1, 1), ((1, 1), (1, 1)),
                                 dimension_numbers=dn)
    y = jnp.maximum(y, 0.0)
    y = ((y - m1[None, :, None, None])
         * lax.rsqrt(v1[None, :, None, None] + eps)
         * g1[None, :, None, None] + beta1[None, :, None, None])
    y = lax.conv_general_dilated(y, w2, (1, 1), ((1, 1), (1, 1)),
                                 dimension_numbers=dn)
    y = jnp.maximum(y, 0.0)
    y = ((y - m2[None, :, None, None])
         * lax.rsqrt(v2[None, :, None, None] + eps)
         * g2[None, :, None, None] + beta2[None, :, None, None])
    return y


if __name__ == "__main__":
    key = jax.random.PRNGKey(0)
    ks = jax.random.split(key, 11)

    N, Cin, Cout, H, W = 2, 4, 8, 16, 16
    x = jax.random.normal(ks[0], (N, Cin, H, W), jnp.float32)

    # Conv2d weights (PyTorch layout, bias=False).
    bound1 = 1.0 / jnp.sqrt(jnp.float32(Cin * 9))
    w1 = jax.random.uniform(ks[1], (Cout, Cin, 3, 3), jnp.float32, -bound1, bound1)
    bound2 = 1.0 / jnp.sqrt(jnp.float32(Cout * 9))
    w2 = jax.random.uniform(ks[2], (Cout, Cout, 3, 3), jnp.float32, -bound2, bound2)

    # BatchNorm2d (eval-mode) parameters: gamma, beta, running_mean, running_var.
    g1 = jax.random.uniform(ks[3], (Cout,), jnp.float32, 0.5, 1.5)
    beta1 = 0.1 * jax.random.normal(ks[4], (Cout,), jnp.float32)
    m1 = 0.1 * jax.random.normal(ks[5], (Cout,), jnp.float32)
    v1 = jax.random.uniform(ks[6], (Cout,), jnp.float32, 0.5, 1.5)

    g2 = jax.random.uniform(ks[7], (Cout,), jnp.float32, 0.5, 1.5)
    beta2 = 0.1 * jax.random.normal(ks[8], (Cout,), jnp.float32)
    m2 = 0.1 * jax.random.normal(ks[9], (Cout,), jnp.float32)
    v2 = jax.random.uniform(ks[10], (Cout,), jnp.float32, 0.5, 1.5)

    out = double_conv(x, w1, g1, beta1, m1, v1, w2, g2, beta2, m2, v2)
    out = jax.block_until_ready(out)

    ref = double_conv_ref(x, w1, g1, beta1, m1, v1, w2, g2, beta2, m2, v2)
    assert out.shape == (N, Cout, H, W)
    max_err = jnp.max(jnp.abs(out - ref))
    assert jnp.allclose(out, ref, atol=1e-4, rtol=1e-4), (
        f"mismatch vs reference, max abs err = {max_err}")

    print("KERNEL_OK")
</pallas_src>

<mosaic_0001>
module attributes {stable_mosaic.version = 11 : i64} {
  func.func @_double_conv_kernel(%arg0: i32, %arg1: memref<1x432x4xf32, #tpu.memory_space<vmem>>, %arg2: memref<384x1xf32, #tpu.memory_space<vmem>>, %arg3: memref<9x4x8xf32, #tpu.memory_space<vmem>>, %arg4: memref<1x8xf32, #tpu.memory_space<vmem>>, %arg5: memref<1x8xf32, #tpu.memory_space<vmem>>, %arg6: memref<9x8x8xf32, #tpu.memory_space<vmem>>, %arg7: memref<1x8xf32, #tpu.memory_space<vmem>>, %arg8: memref<1x8xf32, #tpu.memory_space<vmem>>, %arg9: memref<1x384x8xf32, #tpu.memory_space<vmem>>, %arg10: memref<432x8xf32, #tpu.memory_space<vmem>>) attributes {dimension_semantics = [#tpu.dimension_semantics<parallel>], iteration_bounds = array<i64: 2>, scalar_prefetch = 0 : i64, scratch_operands = 1 : i64, tpu.core_type = #tpu.core_type<tc>, window_params = [{transform_indices = @transform_0, window_bounds = array<i64: 1, 432, 4>}, {pipeline_mode = #tpu.pipeline_mode<synchronous>, transform_indices = @transform_1, window_bounds = array<i64: 384, 1>}, {pipeline_mode = #tpu.pipeline_mode<synchronous>, transform_indices = @transform_2, window_bounds = array<i64: 9, 4, 8>}, {pipeline_mode = #tpu.pipeline_mode<synchronous>, transform_indices = @transform_3, window_bounds = array<i64: 1, 8>}, {pipeline_mode = #tpu.pipeline_mode<synchronous>, transform_indices = @transform_4, window_bounds = array<i64: 1, 8>}, {pipeline_mode = #tpu.pipeline_mode<synchronous>, transform_indices = @transform_5, window_bounds = array<i64: 9, 8, 8>}, {pipeline_mode = #tpu.pipeline_mode<synchronous>, transform_indices = @transform_6, window_bounds = array<i64: 1, 8>}, {pipeline_mode = #tpu.pipeline_mode<synchronous>, transform_indices = @transform_7, window_bounds = array<i64: 1, 8>}, {transform_indices = @transform_8, window_bounds = array<i64: 1, 384, 8>}]} {
    %c0 = arith.constant 0 : index
    %c0_0 = arith.constant 0 : index
    %c0_1 = arith.constant 0 : index
    %0 = vector.load %arg1[%c0, %c0_0, %c0_1] : memref<1x432x4xf32, #tpu.memory_space<vmem>>, vector<1x384x4xf32>
    %1 = vector.shape_cast %0 : vector<1x384x4xf32> to vector<384x4xf32>
    %c0_2 = arith.constant 0 : index
    %c0_3 = arith.constant 0 : index
    %c0_4 = arith.constant 0 : index
    %2 = vector.load %arg3[%c0_2, %c0_3, %c0_4] : memref<9x4x8xf32, #tpu.memory_space<vmem>>, vector<1x4x8xf32>
    %3 = vector.shape_cast %2 : vector<1x4x8xf32> to vector<4x8xf32>
    %cst = arith.constant dense<0.000000e+00> : vector<384x8xf32>
    %4 = tpu.matmul %1, %3, %cst {dimension_numbers = #tpu.dot_dimension_numbers<[1], [0], [0], [1], [0, 0, 1, 1], [], []>} : vector<384x4xf32>, vector<4x8xf32>, vector<384x8xf32> -> vector<384x8xf32>
    %c1 = arith.constant 1 : index
    %c0_5 = arith.constant 0 : index
    %c0_6 = arith.constant 0 : index
    %5 = vector.load %arg3[%c1, %c0_5, %c0_6] : memref<9x4x8xf32, #tpu.memory_space<vmem>>, vector<1x4x8xf32>
    %6 = vector.shape_cast %5 : vector<1x4x8xf32> to vector<4x8xf32>
    %cst_7 = arith.constant dense<0.000000e+00> : vector<384x8xf32>
    %7 = tpu.matmul %1, %6, %cst_7 {dimension_numbers = #tpu.dot_dimension_numbers<[1], [0], [0], [1], [0, 0, 1, 1], [], []>} : vector<384x4xf32>, vector<4x8xf32>, vector<384x8xf32> -> vector<384x8xf32>
    %c2 = arith.constant 2 : index
    %c0_8 = arith.constant 0 : index
    %c0_9 = arith.constant 0 : index
    %8 = vector.load %arg3[%c2, %c0_8, %c0_9] : memref<9x4x8xf32, #tpu.memory_space<vmem>>, vector<1x4x8xf32>
    %9 = vector.shape_cast %8 : vector<1x4x8xf32> to vector<4x8xf32>
    %cst_10 = arith.constant dense<0.000000e+00> : vector<384x8xf32>
    %10 = tpu.matmul %1, %9, %cst_10 {dimension_numbers = #tpu.dot_dimension_numbers<[1], [0], [0], [1], [0, 0, 1, 1], [], []>} : vector<384x4xf32>, vector<4x8xf32>, vector<384x8xf32> -> vector<384x8xf32>
    %c0_11 = arith.constant 0 : index
    %c24 = arith.constant 24 : index
    %c0_12 = arith.constant 0 : index
    %11 = vector.load %arg1[%c0_11, %c24, %c0_12] : memref<1x432x4xf32, #tpu.memory_space<vmem>>, vector<1x384x4xf32>
    %12 = vector.shape_cast %11 : vector<1x384x4xf32> to vector<384x4xf32>
    %c3 = arith.constant 3 : index
    %c0_13 = arith.constant 0 : index
    %c0_14 = arith.constant 0 : index
    %13 = vector.load %arg3[%c3, %c0_13, %c0_14] : memref<9x4x8xf32, #tpu.memory_space<vmem>>, vector<1x4x8xf32>
    %14 = vector.shape_cast %13 : vector<1x4x8xf32> to vector<4x8xf32>
    %cst_15 = arith.constant dense<0.000000e+00> : vector<384x8xf32>
    %15 = tpu.matmul %12, %14, %cst_15 {dimension_numbers = #tpu.dot_dimension_numbers<[1], [0], [0], [1], [0, 0, 1, 1], [], []>} : vector<384x4xf32>, vector<4x8xf32>, vector<384x8xf32> -> vector<384x8xf32>
    %16 = arith.addf %4, %15 : vector<384x8xf32>
    %c4 = arith.constant 4 : index
    %c0_16 = arith.constant 0 : index
    %c0_17 = arith.constant 0 : index
    %17 = vector.load %arg3[%c4, %c0_16, %c0_17] : memref<9x4x8xf32, #tpu.memory_space<vmem>>, vector<1x4x8xf32>
    %18 = vector.shape_cast %17 : vector<1x4x8xf32> to vector<4x8xf32>
    %cst_18 = arith.constant dense<0.000000e+00> : vector<384x8xf32>
    %19 = tpu.matmul %12, %18, %cst_18 {dimension_numbers = #tpu.dot_dimension_numbers<[1], [0], [0], [1], [0, 0, 1, 1], [], []>} : vector<384x4xf32>, vector<4x8xf32>, vector<384x8xf32> -> vector<384x8xf32>
    %20 = arith.addf %7, %19 : vector<384x8xf32>
    %c5 = arith.constant 5 : index
    %c0_19 = arith.constant 0 : index
    %c0_20 = arith.constant 0 : index
    %21 = vector.load %arg3[%c5, %c0_19, %c0_20] : memref<9x4x8xf32, #tpu.memory_space<vmem>>, vector<1x4x8xf32>
    %22 = vector.shape_cast %21 : vector<1x4x8xf32> to vector<4x8xf32>
    %cst_21 = arith.constant dense<0.000000e+00> : vector<384x8xf32>
    %23 = tpu.matmul %12, %22, %cst_21 {dimension_numbers = #tpu.dot_dimension_numbers<[1], [0], [0], [1], [0, 0, 1, 1], [], []>} : vector<384x4xf32>, vector<4x8xf32>, vector<384x8xf32> -> vector<384x8xf32>
    %24 = arith.addf %10, %23 : vector<384x8xf32>
    %c0_22 = arith.constant 0 : index
    %c48 = arith.constant 48 : index
    %c0_23 = arith.constant 0 : index
    %25 = vector.load %arg1[%c0_22, %c48, %c0_23] : memref<1x432x4xf32, #tpu.memory_space<vmem>>, vector<1x384x4xf32>
    %26 = vector.shape_cast %25 : vector<1x384x4xf32> to vector<384x4xf32>
    %c6 = arith.constant 6 : index
    %c0_24 = arith.constant 0 : index
    %c0_25 = arith.constant 0 : index
    %27 = vector.load %arg3[%c6, %c0_24, %c0_25] : memref<9x4x8xf32, #tpu.memory_space<vmem>>, vector<1x4x8xf32>
    %28 = vector.shape_cast %27 : vector<1x4x8xf32> to vector<4x8xf32>
    %cst_26 = arith.constant dense<0.000000e+00> : vector<384x8xf32>
    %29 = tpu.matmul %26, %28, %cst_26 {dimension_numbers = #tpu.dot_dimension_numbers<[1], [0], [0], [1], [0, 0, 1, 1], [], []>} : vector<384x4xf32>, vector<4x8xf32>, vector<384x8xf32> -> vector<384x8xf32>
    %30 = arith.addf %16, %29 : vector<384x8xf32>
    %c7 = arith.constant 7 : index
    %c0_27 = arith.constant 0 : index
    %c0_28 = arith.constant 0 : index
    %31 = vector.load %arg3[%c7, %c0_27, %c0_28] : memref<9x4x8xf32, #tpu.memory_space<vmem>>, vector<1x4x8xf32>
    %32 = vector.shape_cast %31 : vector<1x4x8xf32> to vector<4x8xf32>
    %cst_29 = arith.constant dense<0.000000e+00> : vector<384x8xf32>
    %33 = tpu.matmul %26, %32, %cst_29 {dimension_numbers = #tpu.dot_dimension_numbers<[1], [0], [0], [1], [0, 0, 1, 1], [], []>} : vector<384x4xf32>, vector<4x8xf32>, vector<384x8xf32> -> vector<384x8xf32>
    %34 = arith.addf %20, %33 : vector<384x8xf32>
    %c8 = arith.constant 8 : index
    %c0_30 = arith.constant 0 : index
    %c0_31 = arith.constant 0 : index
    %35 = vector.load %arg3[%c8, %c0_30, %c0_31] : memref<9x4x8xf32, #tpu.memory_space<vmem>>, vector<1x4x8xf32>
    %36 = vector.shape_cast %35 : vector<1x4x8xf32> to vector<4x8xf32>
    %cst_32 = arith.constant dense<0.000000e+00> : vector<384x8xf32>
    %37 = tpu.matmul %26, %36, %cst_32 {dimension_numbers = #tpu.dot_dimension_numbers<[1], [0], [0], [1], [0, 0, 1, 1], [], []>} : vector<384x4xf32>, vector<4x8xf32>, vector<384x8xf32> -> vector<384x8xf32>
    %38 = arith.addf %24, %37 : vector<384x8xf32>
    %39 = vector.extract_strided_slice %30 {offsets = [383, 0], sizes = [1, 8], strides = [1, 1]} : vector<384x8xf32> to vector<1x8xf32>
    %40 = vector.extract_strided_slice %30 {offsets = [0, 0], sizes = [383, 8], strides = [1, 1]} : vector<384x8xf32> to vector<383x8xf32>
    %41 = tpu.concatenate %39, %40 in 0 : vector<1x8xf32>, vector<383x8xf32> -> vector<384x8xf32>
    %42 = arith.addf %34, %41 : vector<384x8xf32>
    %43 = vector.extract_strided_slice %38 {offsets = [1, 0], sizes = [383, 8], strides = [1, 1]} : vector<384x8xf32> to vector<383x8xf32>
    %44 = vector.extract_strided_slice %38 {offsets = [0, 0], sizes = [1, 8], strides = [1, 1]} : vector<384x8xf32> to vector<1x8xf32>
    %45 = tpu.concatenate %43, %44 in 0 : vector<383x8xf32>, vector<1x8xf32> -> vector<384x8xf32>
    %46 = arith.addf %42, %45 : vector<384x8xf32>
    %cst_33 = arith.constant 0.000000e+00 : f32
    %47 = vector.broadcast %cst_33 : f32 to vector<384x8xf32>
    %48 = arith.maximumf %46, %47 : vector<384x8xf32>
    %c0_34 = arith.constant 0 : index
    %c0_35 = arith.constant 0 : index
    %49 = vector.load %arg4[%c0_34, %c0_35] : memref<1x8xf32, #tpu.memory_space<vmem>>, vector<1x8xf32>
    %50 = vector.broadcast %49 : vector<1x8xf32> to vector<384x8xf32>
    %51 = arith.mulf %48, %50 : vector<384x8xf32>
    %c0_36 = arith.constant 0 : index
    %c0_37 = arith.constant 0 : index
    %52 = vector.load %arg5[%c0_36, %c0_37] : memref<1x8xf32, #tpu.memory_space<vmem>>, vector<1x8xf32>
    %53 = vector.broadcast %52 : vector<1x8xf32> to vector<384x8xf32>
    %54 = arith.addf %51, %53 : vector<384x8xf32>
    %c0_38 = arith.constant 0 : index
    %c0_39 = arith.constant 0 : index
    %55 = vector.load %arg2[%c0_38, %c0_39] : memref<384x1xf32, #tpu.memory_space<vmem>>, vector<384x1xf32>
    %56 = vector.broadcast %55 : vector<384x1xf32> to vector<384x8xf32>
    %57 = arith.mulf %54, %56 : vector<384x8xf32>
    %cst_40 = arith.constant 0.000000e+00 : f32
    %58 = vector.broadcast %cst_40 : f32 to vector<24x8xf32>
    %c0_41 = arith.constant 0 : index
    %c0_42 = arith.constant 0 : index
    %59 = vector.load %arg10[%c0_41, %c0_42] : memref<432x8xf32, #tpu.memory_space<vmem>>, vector<24x8xf32>
    tpu.vector_store %arg10[%c0_41, %c0_42], %58 {strides = array<i32>} : memref<432x8xf32, #tpu.memory_space<vmem>>, vector<24x8xf32>,
    %cst_43 = arith.constant 0.000000e+00 : f32
    %60 = vector.broadcast %cst_43 : f32 to vector<24x8xf32>
    %c408 = arith.constant 408 : index
    %c0_44 = arith.constant 0 : index
    %61 = vector.load %arg10[%c408, %c0_44] : memref<432x8xf32, #tpu.memory_space<vmem>>, vector<24x8xf32>
    tpu.vector_store %arg10[%c408, %c0_44], %60 {strides = array<i32>} : memref<432x8xf32, #tpu.memory_space<vmem>>, vector<24x8xf32>,
    %c24_45 = arith.constant 24 : index
    %c0_46 = arith.constant 0 : index
    %62 = vector.load %arg10[%c24_45, %c0_46] : memref<432x8xf32, #tpu.memory_space<vmem>>, vector<384x8xf32>
    tpu.vector_store %arg10[%c24_45, %c0_46], %57 {strides = array<i32>} : memref<432x8xf32, #tpu.memory_space<vmem>>, vector<384x8xf32>,
    %c0_47 = arith.constant 0 : index
    %c0_48 = arith.constant 0 : index
    %63 = vector.load %arg10[%c0_47, %c0_48] : memref<432x8xf32, #tpu.memory_space<vmem>>, vector<384x8xf32>
    %c0_49 = arith.constant 0 : index
    %c0_50 = arith.constant 0 : index
    %c0_51 = arith.constant 0 : index
    %64 = vector.load %arg6[%c0_49, %c0_50, %c0_51] : memref<9x8x8xf32, #tpu.memory_space<vmem>>, vector<1x8x8xf32>
    %65 = vector.shape_cast %64 : vector<1x8x8xf32> to vector<8x8xf32>
    %cst_52 = arith.constant dense<0.000000e+00> : vector<384x8xf32>
    %66 = tpu.matmul %63, %65, %cst_52 {dimension_numbers = #tpu.dot_dimension_numbers<[1], [0], [0], [1], [0, 0, 1, 1], [], []>} : vector<384x8xf32>, vector<8x8xf32>, vector<384x8xf32> -> vector<384x8xf32>
    %c1_53 = arith.constant 1 : index
    %c0_54 = arith.constant 0 : index
    %c0_55 = arith.constant 0 : index
    %67 = vector.load %arg6[%c1_53, %c0_54, %c0_55] : memref<9x8x8xf32, #tpu.memory_space<vmem>>, vector<1x8x8xf32>
    %68 = vector.shape_cast %67 : vector<1x8x8xf32> to vector<8x8xf32>
    %cst_56 = arith.constant dense<0.000000e+00> : vector<384x8xf32>
    %69 = tpu.matmul %63, %68, %cst_56 {dimension_numbers = #tpu.dot_dimension_numbers<[1], [0], [0], [1], [0, 0, 1, 1], [], []>} : vector<384x8xf32>, vector<8x8xf32>, vector<384x8xf32> -> vector<384x8xf32>
    %c2_57 = arith.constant 2 : index
    %c0_58 = arith.constant 0 : index
    %c0_59 = arith.constant 0 : index
    %70 = vector.load %arg6[%c2_57, %c0_58, %c0_59] : memref<9x8x8xf32, #tpu.memory_space<vmem>>, vector<1x8x8xf32>
    %71 = vector.shape_cast %70 : vector<1x8x8xf32> to vector<8x8xf32>
    %cst_60 = arith.constant dense<0.000000e+00> : vector<384x8xf32>
    %72 = tpu.matmul %63, %71, %cst_60 {dimension_numbers = #tpu.dot_dimension_numbers<[1], [0], [0], [1], [0, 0, 1, 1], [], []>} : vector<384x8xf32>, vector<8x8xf32>, vector<384x8xf32> -> vector<384x8xf32>
    %c24_61 = arith.constant 24 : index
    %c0_62 = arith.constant 0 : index
    %73 = vector.load %arg10[%c24_61, %c0_62] : memref<432x8xf32, #tpu.memory_space<vmem>>, vector<384x8xf32>
    %c3_63 = arith.constant 3 : index
    %c0_64 = arith.constant 0 : index
    %c0_65 = arith.constant 0 : index
    %74 = vector.load %arg6[%c3_63, %c0_64, %c0_65] : memref<9x8x8xf32, #tpu.memory_space<vmem>>, vector<1x8x8xf32>
    %75 = vector.shape_cast %74 : vector<1x8x8xf32> to vector<8x8xf32>
    %cst_66 = arith.constant dense<0.000000e+00> : vector<384x8xf32>
    %76 = tpu.matmul %73, %75, %cst_66 {dimension_numbers = #tpu.dot_dimension_numbers<[1], [0], [0], [1], [0, 0, 1, 1], [], []>} : vector<384x8xf32>, vector<8x8xf32>, vector<384x8xf32> -> vector<384x8xf32>
    %77 = arith.addf %66, %76 : vector<384x8xf32>
    %c4_67 = arith.constant 4 : index
    %c0_68 = arith.constant 0 : index
    %c0_69 = arith.constant 0 : index
    %78 = vector.load %arg6[%c4_67, %c0_68, %c0_69] : memref<9x8x8xf32, #tpu.memory_space<vmem>>, vector<1x8x8xf32>
    %79 = vector.shape_cast %78 : vector<1x8x8xf32> to vector<8x8xf32>
    %cst_70 = arith.constant dense<0.000000e+00> : vector<384x8xf32>
    %80 = tpu.matmul %73, %79, %cst_70 {dimension_numbers = #tpu.dot_dimension_numbers<[1], [0], [0], [1], [0, 0, 1, 1], [], []>} : vector<384x8xf32>, vector<8x8xf32>, vector<384x8xf32> -> vector<384x8xf32>
    %81 = arith.addf %69, %80 : vector<384x8xf32>
    %c5_71 = arith.constant 5 : index
    %c0_72 = arith.constant 0 : index
    %c0_73 = arith.constant 0 : index
    %82 = vector.load %arg6[%c5_71, %c0_72, %c0_73] : memref<9x8x8xf32, #tpu.memory_space<vmem>>, vector<1x8x8xf32>
    %83 = vector.shape_cast %82 : vector<1x8x8xf32> to vector<8x8xf32>
    %cst_74 = arith.constant dense<0.000000e+00> : vector<384x8xf32>
    %84 = tpu.matmul %73, %83, %cst_74 {dimension_numbers = #tpu.dot_dimension_numbers<[1], [0], [0], [1], [0, 0, 1, 1], [], []>} : vector<384x8xf32>, vector<8x8xf32>, vector<384x8xf32> -> vector<384x8xf32>
    %85 = arith.addf %72, %84 : vector<384x8xf32>
    %c48_75 = arith.constant 48 : index
    %c0_76 = arith.constant 0 : index
    %86 = vector.load %arg10[%c48_75, %c0_76] : memref<432x8xf32, #tpu.memory_space<vmem>>, vector<384x8xf32>
    %c6_77 = arith.constant 6 : index
    %c0_78 = arith.constant 0 : index
    %c0_79 = arith.constant 0 : index
    %87 = vector.load %arg6[%c6_77, %c0_78, %c0_79] : memref<9x8x8xf32, #tpu.memory_space<vmem>>, vector<1x8x8xf32>
    %88 = vector.shape_cast %87 : vector<1x8x8xf32> to vector<8x8xf32>
    %cst_80 = arith.constant dense<0.000000e+00> : vector<384x8xf32>
    %89 = tpu.matmul %86, %88, %cst_80 {dimension_numbers = #tpu.dot_dimension_numbers<[1], [0], [0], [1], [0, 0, 1, 1], [], []>} : vector<384x8xf32>, vector<8x8xf32>, vector<384x8xf32> -> vector<384x8xf32>
    %90 = arith.addf %77, %89 : vector<384x8xf32>
    %c7_81 = arith.constant 7 : index
    %c0_82 = arith.constant 0 : index
    %c0_83 = arith.constant 0 : index
    %91 = vector.load %arg6[%c7_81, %c0_82, %c0_83] : memref<9x8x8xf32, #tpu.memory_space<vmem>>, vector<1x8x8xf32>
    %92 = vector.shape_cast %91 : vector<1x8x8xf32> to vector<8x8xf32>
    %cst_84 = arith.constant dense<0.000000e+00> : vector<384x8xf32>
    %93 = tpu.matmul %86, %92, %cst_84 {dimension_numbers = #tpu.dot_dimension_numbers<[1], [0], [0], [1], [0, 0, 1, 1], [], []>} : vector<384x8xf32>, vector<8x8xf32>, vector<384x8xf32> -> vector<384x8xf32>
    %94 = arith.addf %81, %93 : vector<384x8xf32>
    %c8_85 = arith.constant 8 : index
    %c0_86 = arith.constant 0 : index
    %c0_87 = arith.constant 0 : index
    %95 = vector.load %arg6[%c8_85, %c0_86, %c0_87] : memref<9x8x8xf32, #tpu.memory_space<vmem>>, vector<1x8x8xf32>
    %96 = vector.shape_cast %95 : vector<1x8x8xf32> to vector<8x8xf32>
    %cst_88 = arith.constant dense<0.000000e+00> : vector<384x8xf32>
    %97 = tpu.matmul %86, %96, %cst_88 {dimension_numbers = #tpu.dot_dimension_numbers<[1], [0], [0], [1], [0, 0, 1, 1], [], []>} : vector<384x8xf32>, vector<8x8xf32>, vector<384x8xf32> -> vector<384x8xf32>
    %98 = arith.addf %85, %97 : vector<384x8xf32>
    %99 = vector.extract_strided_slice %90 {offsets = [383, 0], sizes = [1, 8], strides = [1, 1]} : vector<384x8xf32> to vector<1x8xf32>
    %100 = vector.extract_strided_slice %90 {offsets = [0, 0], sizes = [383, 8], strides = [1, 1]} : vector<384x8xf32> to vector<383x8xf32>
    %101 = tpu.concatenate %99, %100 in 0 : vector<1x8xf32>, vector<383x8xf32> -> vector<384x8xf32>
    %102 = arith.addf %94, %101 : vector<384x8xf32>
    %103 = vector.extract_strided_slice %98 {offsets = [1, 0], sizes = [383, 8], strides = [1, 1]} : vector<384x8xf32> to vector<383x8xf32>
    %104 = vector.extract_strided_slice %98 {offsets = [0, 0], sizes = [1, 8], strides = [1, 1]} : vector<384x8xf32> to vector<1x8xf32>
    %105 = tpu.concatenate %103, %104 in 0 : vector<383x8xf32>, vector<1x8xf32> -> vector<384x8xf32>
    %106 = arith.addf %102, %105 : vector<384x8xf32>
    %cst_89 = arith.constant 0.000000e+00 : f32
    %107 = vector.broadcast %cst_89 : f32 to vector<384x8xf32>
    %108 = arith.maximumf %106, %107 : vector<384x8xf32>
    %c0_90 = arith.constant 0 : index
    %c0_91 = arith.constant 0 : index
    %109 = vector.load %arg7[%c0_90, %c0_91] : memref<1x8xf32, #tpu.memory_space<vmem>>, vector<1x8xf32>
    %110 = vector.broadcast %109 : vector<1x8xf32> to vector<384x8xf32>
    %111 = arith.mulf %108, %110 : vector<384x8xf32>
    %c0_92 = arith.constant 0 : index
    %c0_93 = arith.constant 0 : index
    %112 = vector.load %arg8[%c0_92, %c0_93] : memref<1x8xf32, #tpu.memory_space<vmem>>, vector<1x8xf32>
    %113 = vector.broadcast %112 : vector<1x8xf32> to vector<384x8xf32>
    %114 = arith.addf %111, %113 : vector<384x8xf32>
    %c0_94 = arith.constant 0 : index
    %c0_95 = arith.constant 0 : index
    %c0_96 = arith.constant 0 : index
    %115 = vector.load %arg9[%c0_94, %c0_95, %c0_96] : memref<1x384x8xf32, #tpu.memory_space<vmem>>, vector<1x384x8xf32>
    %116 = vector.shape_cast %115 : vector<1x384x8xf32> to vector<384x8xf32>
    %117 = vector.shape_cast %114 : vector<384x8xf32> to vector<1x384x8xf32>
    tpu.vector_store %arg9[%c0_94, %c0_95, %c0_96], %117 {strides = array<i32>} : memref<1x384x8xf32, #tpu.memory_space<vmem>>, vector<1x384x8xf32>,
    return
  }
  func.func @transform_0(%arg0: i32) -> (i32, i32, i32) {
    %c0_i32 = arith.constant 0 : i32
    %c0_i32_0 = arith.constant 0 : i32
    %c0_i32_1 = arith.constant 0 : i32
    return %arg0, %c0_i32, %c0_i32_0 : i32, i32, i32
  }
  func.func @transform_1(%arg0: i32) -> (i32, i32) {
    %c0_i32 = arith.constant 0 : i32
    %c0_i32_0 = arith.constant 0 : i32
    %c0_i32_1 = arith.constant 0 : i32
    return %c0_i32, %c0_i32_0 : i32, i32
  }
  func.func @transform_2(%arg0: i32) -> (i32, i32, i32) {
    %c0_i32 = arith.constant 0 : i32
    %c0_i32_0 = arith.constant 0 : i32
    %c0_i32_1 = arith.constant 0 : i32
    %c0_i32_2 = arith.constant 0 : i32
    return %c0_i32, %c0_i32_0, %c0_i32_1 : i32, i32, i32
  }
  func.func @transform_3(%arg0: i32) -> (i32, i32) {
    %c0_i32 = arith.constant 0 : i32
    %c0_i32_0 = arith.constant 0 : i32
    %c0_i32_1 = arith.constant 0 : i32
    return %c0_i32, %c0_i32_0 : i32, i32
  }
  func.func @transform_4(%arg0: i32) -> (i32, i32) {
    %c0_i32 = arith.constant 0 : i32
    %c0_i32_0 = arith.constant 0 : i32
    %c0_i32_1 = arith.constant 0 : i32
    return %c0_i32, %c0_i32_0 : i32, i32
  }
  func.func @transform_5(%arg0: i32) -> (i32, i32, i32) {
    %c0_i32 = arith.constant 0 : i32
    %c0_i32_0 = arith.constant 0 : i32
    %c0_i32_1 = arith.constant 0 : i32
    %c0_i32_2 = arith.constant 0 : i32
    return %c0_i32, %c0_i32_0, %c0_i32_1 : i32, i32, i32
  }
  func.func @transform_6(%arg0: i32) -> (i32, i32) {
    %c0_i32 = arith.constant 0 : i32
    %c0_i32_0 = arith.constant 0 : i32
    %c0_i32_1 = arith.constant 0 : i32
    return %c0_i32, %c0_i32_0 : i32, i32
  }
  func.func @transform_7(%arg0: i32) -> (i32, i32) {
    %c0_i32 = arith.constant 0 : i32
    %c0_i32_0 = arith.constant 0 : i32
    %c0_i32_1 = arith.constant 0 : i32
    return %c0_i32, %c0_i32_0 : i32, i32
  }
  func.func @transform_8(%arg0: i32) -> (i32, i32, i32) {
    %c0_i32 = arith.constant 0 : i32
    %c0_i32_0 = arith.constant 0 : i32
    %c0_i32_1 = arith.constant 0 : i32
    return %arg0, %c0_i32, %c0_i32_0 : i32, i32, i32
  }
}

</mosaic_0001>

<bundles_post_ra>
// kernel: tile.8
= control target key start
LH: loop header
LB: loop body
LE: loop exit
PB: predicated region body
PF: predicated region fallthrough
CT: control target
= control target key end

     0   :  { %s28_s0 = inlined_call_operand.vmem [shape: f32[24], index: 0, kind: input, shape index: {}]   ;;  %s29_s1 = inlined_call_operand.vmem [shape: f32[16,24], index: 1, kind: output, shape index: {}]  }
   0x1   :  { %v4_v0 = vld [vmem:[%s28_s0] ss:$0 sm:$0xff] }
   0x2   :  { %5 = vst [vmem:[%s29_s1] sm:$0xff] %v4_v0  ;;  %8 = vst [vmem:[%s29_s1 + $0x8] sm:$0xff] %v4_v0 }

// kernel: tile.0
= control target key start
LH: loop header
LB: loop body
LE: loop exit
PB: predicated region body
PF: predicated region fallthrough
CT: control target
= control target key end

     0   :  { %s821_s8 = smov 126   ;;  %s822_s9 = smov 127   ;;  %vm3_vm0 = vcmask 7168   ;;  %s1630_s0 = inlined_call_operand.vmem [shape: f32[16,24], index: 0, kind: input, shape index: {}]   ;;  %s1631_s1 = inlined_call_operand.vmem [shape: f32[384,1], index: 1, kind: output, shape index: {}]  }
   0x1   :  { %v38_v0 = vld.sshfl [vmem:[%s1630_s0] sm:$0xff pattern:$0x56741230]   ;;  %v604_v1 = vld.sshfl [vmem:[%s1630_s0 + $0x8] sm:$0xff pattern:$0x56741230]  }
   0x2   :  { %39 = vrot.lane.b32.xlu1 %v38_v0, %s821_s8  ;;  %14 = vrot.lane.b32.xlu0 %v38_v0, %s822_s9  ;;  %s823_s12 = smov 125   ;;  %s824_s13 = smov 124   ;;  %v658_v2 = vld.sshfl [vmem:[%s1630_s0 + $0x8] sm:$0xff pattern:$0x67452301]   ;;  %v2_v6 = vld [vmem:[%s1630_s0] sm:$0xff]  }
   0x3   :  { %s825_s14 = smov 123   ;;  %s826_s15 = smov 122   ;;  %v188_v3 = vld.sshfl [vmem:[%s1630_s0] sm:$0xff pattern:$0x67452301]   ;;  %v588_v7 = vld [vmem:[%s1630_s0 + $0x8] sm:$0xff]  }
   0x4   :  { %s827_s16 = smov 121   ;;  %s828_s21 = smov 120   ;;  %v730_v4 = vld.sshfl [vmem:[%s1630_s0 + $0x8] sm:$0xff pattern:$0x74563012]  }
   0x5   :  { %s829_s22 = smov 119   ;;  %s830_s23 = smov 118   ;;  %v388_v5 = vld.sshfl [vmem:[%s1630_s0] sm:$0xff pattern:$0x74563012]  }
   0x6   :  { %52 = vrot.lane.b32.xlu1 %v604_v1, %s821_s8  ;;  %27 = vrot.lane.b32.xlu0 %v604_v1, %s822_s9  ;;  %s831_s24 = smov 117   ;;  %s832_s25 = smov 116   ;;  %4 = vst.msk [vmem:[%s1631_s1] ss:$24 sm:$0xf] %vm3_vm0, %v2_v6  }
   0x7   :  { %s833_s26 = smov 115   ;;  %s834_s27 = smov 114   ;;  %5 = vst.msk [vmem:[%s1631_s1] ss:$24 sm:$0xf0] %vm3_vm0, %v2_v6  }
   0x8   :  { %s835_s28 = smov 113   ;;  %s836_s4 = smov 112   ;;  %589 = vst.msk [vmem:[%s1631_s1 + $0xc0] ss:$24 sm:$0xf] %vm3_vm0, %v588_v7  }
   0x9   :  { %s837_s5 = smov 111   ;;  %s838_s6 = smov 110   ;;  %590 = vst.msk [vmem:[%s1631_s1 + $0xc0] ss:$24 sm:$0xf0] %vm3_vm0, %v588_v7  }
   0xa   :  { %77 = vrot.lane.b32.xlu1 %v604_v1, %s823_s12  ;;  %64 = vrot.lane.b32.xlu0 %v38_v0, %s823_s12  ;;  %s839_s7 = smov 109   ;;  %s840_s19 = smov 108  }
   0xb   :  { %s841_s20 = smov 107  }
   0xe   :  { %102 = vrot.lane.b32.xlu1 %v604_v1, %s824_s13  ;;  %89 = vrot.lane.b32.xlu0 %v38_v0, %s824_s13 }
  0x12   :  { %127 = vrot.lane.b32.xlu1 %v604_v1, %s825_s14  ;;  %114 = vrot.lane.b32.xlu0 %v38_v0, %s825_s14 }
  0x16   :  { %152 = vrot.lane.b32.xlu1 %v604_v1, %s826_s15  ;;  %139 = vrot.lane.b32.xlu0 %v38_v0, %s826_s15 }
  0x1a   :  { %177 = vrot.lane.b32.xlu1 %v604_v1, %s827_s16  ;;  %164 = vrot.lane.b32.xlu0 %v38_v0, %s827_s16 }
  0x1e   :  { %202 = vrot.lane.b32.xlu1 %v658_v2, %s828_s21  ;;  %189 = vrot.lane.b32.xlu0 %v188_v3, %s828_s21  ;;  %s842_s21 = smov 106  }
  0x22   :  { %227 = vrot.lane.b32.xlu1 %v658_v2, %s829_s22  ;;  %214 = vrot.lane.b32.xlu0 %v188_v3, %s829_s22  ;;  %s843_s22 = smov 105  }
  0x26   :  { %252 = vrot.lane.b32.xlu1 %v658_v2, %s830_s23  ;;  %239 = vrot.lane.b32.xlu0 %v188_v3, %s830_s23 }
  0x2a   :  { %277 = vrot.lane.b32.xlu1 %v658_v2, %s831_s24  ;;  %264 = vrot.lane.b32.xlu0 %v188_v3, %s831_s24 }
  0x2e   :  { %302 = vrot.lane.b32.xlu1 %v658_v2, %s832_s25  ;;  %289 = vrot.lane.b32.xlu0 %v188_v3, %s832_s25 }
  0x32   :  { %327 = vrot.lane.b32.xlu1 %v658_v2, %s833_s26  ;;  %314 = vrot.lane.b32.xlu0 %v188_v3, %s833_s26 }
  0x36   :  { %352 = vrot.lane.b32.xlu1 %v658_v2, %s834_s27  ;;  %339 = vrot.lane.b32.xlu0 %v188_v3, %s834_s27 }
  0x3a   :  { %377 = vrot.lane.b32.xlu1 %v658_v2, %s835_s28  ;;  %364 = vrot.lane.b32.xlu0 %v188_v3, %s835_s28 }
  0x3e   :  { %402 = vrot.lane.b32.xlu1 %v730_v4, %s836_s4  ;;  %389 = vrot.lane.b32.xlu0 %v388_v5, %s836_s4 }
  0x42   :  { %427 = vrot.lane.b32.xlu1 %v730_v4, %s837_s5  ;;  %414 = vrot.lane.b32.xlu0 %v388_v5, %s837_s5 }
  0x46   :  { %452 = vrot.lane.b32.xlu1 %v730_v4, %s838_s6  ;;  %439 = vrot.lane.b32.xlu0 %v388_v5, %s838_s6 }
  0x4a   :  { %477 = vrot.lane.b32.xlu1 %v730_v4, %s839_s7  ;;  %464 = vrot.lane.b32.xlu0 %v388_v5, %s839_s7 }
  0x4e   :  { %502 = vrot.lane.b32.xlu1 %v730_v4, %s840_s19  ;;  %489 = vrot.lane.b32.xlu0 %v388_v5, %s840_s19 }
  0x52   :  { %527 = vrot.lane.b32.xlu1 %v730_v4, %s841_s20  ;;  %514 = vrot.lane.b32.xlu0 %v388_v5, %s841_s20 }
  0x56   :  { %552 = vrot.lane.b32.xlu1 %v730_v4, %s842_s21  ;;  %539 = vrot.lane.b32.xlu0 %v388_v5, %s842_s21 }
  0x5a   :  { %577 = vrot.lane.b32.xlu1 %v730_v4, %s843_s22  ;;  %564 = vrot.lane.b32.xlu0 %v388_v5, %s843_s22 }
  0x74   :  { %v40_v8 = vpop.permute.xlu1 %39   ;;  %v15_v9 = vpop.permute.xlu0 %14  }
  0x75   :  { %600 = vst.msk [vmem:[%s1631_s1 + $0x2] ss:$72 sm:$0x3] %vm3_vm0, %v40_v8   ;;  %601 = vst.msk [vmem:[%s1631_s1 + $0x62] ss:$-24 sm:$0xc] %vm3_vm0, %v40_v8  }
  0x76   :  { %602 = vst.msk [vmem:[%s1631_s1 - $0xbe] ss:$72 sm:$0x30] %vm3_vm0, %v40_v8   ;;  %603 = vst.msk [vmem:[%s1631_s1 + $0x122] ss:$-24 sm:$0xc0] %vm3_vm0, %v40_v8  }
  0x77   :  { %591 = vst.msk [vmem:[%s1631_s1 + $0x1] ss:$72 sm:$0x3] %vm3_vm0, %v15_v9   ;;  %592 = vst.msk [vmem:[%s1631_s1 + $0x61] ss:$-24 sm:$0xc] %vm3_vm0, %v15_v9  }
  0x78   :  { %593 = vst.msk [vmem:[%s1631_s1 - $0xbf] ss:$72 sm:$0x30] %vm3_vm0, %v15_v9   ;;  %594 = vst.msk [vmem:[%s1631_s1 + $0x121] ss:$-24 sm:$0xc0] %vm3_vm0, %v15_v9   ;;  %v53_v10 = vpop.permute.xlu1 %52   ;;  %v28_v11 = vpop.permute.xlu0 %27  }
  0x79   :  { %605 = vst.msk [vmem:[%s1631_s1 + $0xc2] ss:$72 sm:$0x3] %vm3_vm0, %v53_v10   ;;  %606 = vst.msk [vmem:[%s1631_s1 + $0x122] ss:$-24 sm:$0xc] %vm3_vm0, %v53_v10  }
  0x7a   :  { %607 = vst.msk [vmem:[%s1631_s1 + $0x2] ss:$72 sm:$0x30] %vm3_vm0, %v53_v10   ;;  %608 = vst.msk [vmem:[%s1631_s1 + $0x1e2] ss:$-24 sm:$0xc0] %vm3_vm0, %v53_v10  }
  0x7b   :  { %596 = vst.msk [vmem:[%s1631_s1 + $0xc1] ss:$72 sm:$0x3] %vm3_vm0, %v28_v11   ;;  %597 = vst.msk [vmem:[%s1631_s1 + $0x121] ss:$-24 sm:$0xc] %vm3_vm0, %v28_v11  }
  0x7c   :  { %598 = vst.msk [vmem:[%s1631_s1 + $0x1] ss:$72 sm:$0x30] %vm3_vm0, %v28_v11   ;;  %599 = vst.msk [vmem:[%s1631_s1 + $0x1e1] ss:$-24 sm:$0xc0] %vm3_vm0, %v28_v11   ;;  %v78_v12 = vpop.permute.xlu1 %77   ;;  %v65_v13 = vpop.permute.xlu0 %64  }
  0x7d   :  { %614 = vst.msk [vmem:[%s1631_s1 + $0xc3] ss:$72 sm:$0x3] %vm3_vm0, %v78_v12   ;;  %615 = vst.msk [vmem:[%s1631_s1 + $0x123] ss:$-24 sm:$0xc] %vm3_vm0, %v78_v12  }
  0x7e   :  { %616 = vst.msk [vmem:[%s1631_s1 + $0x3] ss:$72 sm:$0x30] %vm3_vm0, %v78_v12   ;;  %617 = vst.msk [vmem:[%s1631_s1 + $0x1e3] ss:$-24 sm:$0xc0] %vm3_vm0, %v78_v12  }
  0x7f   :  { %609 = vst.msk [vmem:[%s1631_s1 + $0x3] ss:$72 sm:$0x3] %vm3_vm0, %v65_v13   ;;  %610 = vst.msk [vmem:[%s1631_s1 + $0x63] ss:$-24 sm:$0xc] %vm3_vm0, %v65_v13  }
  0x80   :  { %611 = vst.msk [vmem:[%s1631_s1 - $0xbd] ss:$72 sm:$0x30] %vm3_vm0, %v65_v13   ;;  %612 = vst.msk [vmem:[%s1631_s1 + $0x123] ss:$-24 sm:$0xc0] %vm3_vm0, %v65_v13   ;;  %v103_v14 = vpop.permute.xlu1 %102   ;;  %v90_v15 = vpop.permute.xlu0 %89  }
  0x81   :  { %623 = vst.msk [vmem:[%s1631_s1 + $0xc4] ss:$72 sm:$0x3] %vm3_vm0, %v103_v14   ;;  %624 = vst.msk [vmem:[%s1631_s1 + $0x124] ss:$-24 sm:$0xc] %vm3_vm0, %v103_v14  }
  0x82   :  { %625 = vst.msk [vmem:[%s1631_s1 + $0x4] ss:$72 sm:$0x30] %vm3_vm0, %v103_v14   ;;  %626 = vst.msk [vmem:[%s1631_s1 + $0x1e4] ss:$-24 sm:$0xc0] %vm3_vm0, %v103_v14  }
  0x83   :  { %618 = vst.msk [vmem:[%s1631_s1 + $0x4] ss:$72 sm:$0x3] %vm3_vm0, %v90_v15   ;;  %619 = vst.msk [vmem:[%s1631_s1 + $0x64] ss:$-24 sm:$0xc] %vm3_vm0, %v90_v15  }
  0x84   :  { %620 = vst.msk [vmem:[%s1631_s1 - $0xbc] ss:$72 sm:$0x30] %vm3_vm0, %v90_v15   ;;  %621 = vst.msk [vmem:[%s1631_s1 + $0x124] ss:$-24 sm:$0xc0] %vm3_vm0, %v90_v15   ;;  %v128_v16 = vpop.permute.xlu1 %127   ;;  %v115_v17 = vpop.permute.xlu0 %114  }
  0x85   :  { %632 = vst.msk [vmem:[%s1631_s1 + $0xc5] ss:$72 sm:$0x3] %vm3_vm0, %v128_v16   ;;  %633 = vst.msk [vmem:[%s1631_s1 + $0x125] ss:$-24 sm:$0xc] %vm3_vm0, %v128_v16  }
  0x86   :  { %634 = vst.msk [vmem:[%s1631_s1 + $0x5] ss:$72 sm:$0x30] %vm3_vm0, %v128_v16   ;;  %635 = vst.msk [vmem:[%s1631_s1 + $0x1e5] ss:$-24 sm:$0xc0] %vm3_vm0, %v128_v16  }
  0x87   :  { %627 = vst.msk [vmem:[%s1631_s1 + $0x5] ss:$72 sm:$0x3] %vm3_vm0, %v115_v17   ;;  %628 = vst.msk [vmem:[%s1631_s1 + $0x65] ss:$-24 sm:$0xc] %vm3_vm0, %v115_v17  }
  0x88   :  { %629 = vst.msk [vmem:[%s1631_s1 - $0xbb] ss:$72 sm:$0x30] %vm3_vm0, %v115_v17   ;;  %630 = vst.msk [vmem:[%s1631_s1 + $0x125] ss:$-24 sm:$0xc0] %vm3_vm0, %v115_v17   ;;  %v153_v18 = vpop.permute.xlu1 %152   ;;  %v140_v19 = vpop.permute.xlu0 %139  }
  0x89   :  { %641 = vst.msk [vmem:[%s1631_s1 + $0xc6] ss:$72 sm:$0x3] %vm3_vm0, %v153_v18   ;;  %642 = vst.msk [vmem:[%s1631_s1 + $0x126] ss:$-24 sm:$0xc] %vm3_vm0, %v153_v18  }
  0x8a   :  { %643 = vst.msk [vmem:[%s1631_s1 + $0x6] ss:$72 sm:$0x30] %vm3_vm0, %v153_v18   ;;  %644 = vst.msk [vmem:[%s1631_s1 + $0x1e6] ss:$-24 sm:$0xc0] %vm3_vm0, %v153_v18  }
  0x8b   :  { %636 = vst.msk [vmem:[%s1631_s1 + $0x6] ss:$72 sm:$0x3] %vm3_vm0, %v140_v19   ;;  %637 = vst.msk [vmem:[%s1631_s1 + $0x66] ss:$-24 sm:$0xc] %vm3_vm0, %v140_v19  }
  0x8c   :  { %638 = vst.msk [vmem:[%s1631_s1 - $0xba] ss:$72 sm:$0x30] %vm3_vm0, %v140_v19   ;;  %639 = vst.msk [vmem:[%s1631_s1 + $0x126] ss:$-24 sm:$0xc0] %vm3_vm0, %v140_v19   ;;  %v178_v20 = vpop.permute.xlu1 %177   ;;  %v165_v21 = vpop.permute.xlu0 %164  }
  0x8d   :  { %650 = vst.msk [vmem:[%s1631_s1 + $0xc7] ss:$72 sm:$0x3] %vm3_vm0, %v178_v20   ;;  %651 = vst.msk [vmem:[%s1631_s1 + $0x127] ss:$-24 sm:$0xc] %vm3_vm0, %v178_v20  }
  0x8e   :  { %652 = vst.msk [vmem:[%s1631_s1 + $0x7] ss:$72 sm:$0x30] %vm3_vm0, %v178_v20   ;;  %653 = vst.msk [vmem:[%s1631_s1 + $0x1e7] ss:$-24 sm:$0xc0] %vm3_vm0, %v178_v20  }
  0x8f   :  { %645 = vst.msk [vmem:[%s1631_s1 + $0x7] ss:$72 sm:$0x3] %vm3_vm0, %v165_v21   ;;  %646 = vst.msk [vmem:[%s1631_s1 + $0x67] ss:$-24 sm:$0xc] %vm3_vm0, %v165_v21  }
  0x90   :  { %647 = vst.msk [vmem:[%s1631_s1 - $0xb9] ss:$72 sm:$0x30] %vm3_vm0, %v165_v21   ;;  %648 = vst.msk [vmem:[%s1631_s1 + $0x127] ss:$-24 sm:$0xc0] %vm3_vm0, %v165_v21   ;;  %v203_v22 = vpop.permute.xlu1 %202   ;;  %v190_v23 = vpop.permute.xlu0 %189  }
  0x91   :  { %659 = vst.msk [vmem:[%s1631_s1 + $0xe0] ss:$-24 sm:$0x3] %vm3_vm0, %v203_v22   ;;  %660 = vst.msk [vmem:[%s1631_s1 + $0x140] ss:$-24 sm:$0xc] %vm3_vm0, %v203_v22  }
  0x92   :  { %661 = vst.msk [vmem:[%s1631_s1 + $0x1a0] ss:$-24 sm:$0x30] %vm3_vm0, %v203_v22   ;;  %662 = vst.msk [vmem:[%s1631_s1 + $0x200] ss:$-24 sm:$0xc0] %vm3_vm0, %v203_v22  }
  0x93   :  { %654 = vst.msk [vmem:[%s1631_s1 + $0x20] ss:$-24 sm:$0x3] %vm3_vm0, %v190_v23   ;;  %655 = vst.msk [vmem:[%s1631_s1 + $0x80] ss:$-24 sm:$0xc] %vm3_vm0, %v190_v23  }
  0x94   :  { %656 = vst.msk [vmem:[%s1631_s1 + $0xe0] ss:$-24 sm:$0x30] %vm3_vm0, %v190_v23   ;;  %657 = vst.msk [vmem:[%s1631_s1 + $0x140] ss:$-24 sm:$0xc0] %vm3_vm0, %v190_v23   ;;  %v228_v24 = vpop.permute.xlu1 %227   ;;  %v215_v25 = vpop.permute.xlu0 %214  }
  0x95   :  { %668 = vst.msk [vmem:[%s1631_s1 + $0xe1] ss:$-24 sm:$0x3] %vm3_vm0, %v228_v24   ;;  %669 = vst.msk [vmem:[%s1631_s1 + $0x141] ss:$-24 sm:$0xc] %vm3_vm0, %v228_v24  }
  0x96   :  { %670 = vst.msk [vmem:[%s1631_s1 + $0x1a1] ss:$-24 sm:$0x30] %vm3_vm0, %v228_v24   ;;  %671 = vst.msk [vmem:[%s1631_s1 + $0x201] ss:$-24 sm:$0xc0] %vm3_vm0, %v228_v24  }
  0x97   :  { %663 = vst.msk [vmem:[%s1631_s1 + $0x21] ss:$-24 sm:$0x3] %vm3_vm0, %v215_v25   ;;  %664 = vst.msk [vmem:[%s1631_s1 + $0x81] ss:$-24 sm:$0xc] %vm3_vm0, %v215_v25  }
  0x98   :  { %665 = vst.msk [vmem:[%s1631_s1 + $0xe1] ss:$-24 sm:$0x30] %vm3_vm0, %v215_v25   ;;  %666 = vst.msk [vmem:[%s1631_s1 + $0x141] ss:$-24 sm:$0xc0] %vm3_vm0, %v215_v25   ;;  %v253_v26 = vpop.permute.xlu1 %252   ;;  %v240_v27 = vpop.permute.xlu0 %239  }
  0x99   :  { %677 = vst.msk [vmem:[%s1631_s1 + $0xe2] ss:$-24 sm:$0x3] %vm3_vm0, %v253_v26   ;;  %678 = vst.msk [vmem:[%s1631_s1 + $0x142] ss:$-24 sm:$0xc] %vm3_vm0, %v253_v26  }
  0x9a   :  { %679 = vst.msk [vmem:[%s1631_s1 + $0x1a2] ss:$-24 sm:$0x30] %vm3_vm0, %v253_v26   ;;  %680 = vst.msk [vmem:[%s1631_s1 + $0x202] ss:$-24 sm:$0xc0] %vm3_vm0, %v253_v26  }
  0x9b   :  { %672 = vst.msk [vmem:[%s1631_s1 + $0x22] ss:$-24 sm:$0x3] %vm3_vm0, %v240_v27   ;;  %673 = vst.msk [vmem:[%s1631_s1 + $0x82] ss:$-24 sm:$0xc] %vm3_vm0, %v240_v27  }
  0x9c   :  { %674 = vst.msk [vmem:[%s1631_s1 + $0xe2] ss:$-24 sm:$0x30] %vm3_vm0, %v240_v27   ;;  %675 = vst.msk [vmem:[%s1631_s1 + $0x142] ss:$-24 sm:$0xc0] %vm3_vm0, %v240_v27   ;;  %v278_v28 = vpop.permute.xlu1 %277   ;;  %v265_v29 = vpop.permute.xlu0 %264  }
  0x9d   :  { %686 = vst.msk [vmem:[%s1631_s1 + $0xe3] ss:$-24 sm:$0x3] %vm3_vm0, %v278_v28   ;;  %687 = vst.msk [vmem:[%s1631_s1 + $0x143] ss:$-24 sm:$0xc] %vm3_vm0, %v278_v28  }
  0x9e   :  { %688 = vst.msk [vmem:[%s1631_s1 + $0x1a3] ss:$-24 sm:$0x30] %vm3_vm0, %v278_v28   ;;  %689 = vst.msk [vmem:[%s1631_s1 + $0x203] ss:$-24 sm:$0xc0] %vm3_vm0, %v278_v28  }
  0x9f   :  { %681 = vst.msk [vmem:[%s1631_s1 + $0x23] ss:$-24 sm:$0x3] %vm3_vm0, %v265_v29   ;;  %682 = vst.msk [vmem:[%s1631_s1 + $0x83] ss:$-24 sm:$0xc] %vm3_vm0, %v265_v29  }
  0xa0   :  { %683 = vst.msk [vmem:[%s1631_s1 + $0xe3] ss:$-24 sm:$0x30] %vm3_vm0, %v265_v29   ;;  %684 = vst.msk [vmem:[%s1631_s1 + $0x143] ss:$-24 sm:$0xc0] %vm3_vm0, %v265_v29   ;;  %v303_v30 = vpop.permute.xlu1 %302   ;;  %v290_v31 = vpop.permute.xlu0 %289  }
  0xa1   :  { %695 = vst.msk [vmem:[%s1631_s1 + $0xe4] ss:$-24 sm:$0x3] %vm3_vm0, %v303_v30   ;;  %696 = vst.msk [vmem:[%s1631_s1 + $0x144] ss:$-24 sm:$0xc] %vm3_vm0, %v303_v30  }
  0xa2   :  { %697 = vst.msk [vmem:[%s1631_s1 + $0x1a4] ss:$-24 sm:$0x30] %vm3_vm0, %v303_v30   ;;  %698 = vst.msk [vmem:[%s1631_s1 + $0x204] ss:$-24 sm:$0xc0] %vm3_vm0, %v303_v30  }
  0xa3   :  { %690 = vst.msk [vmem:[%s1631_s1 + $0x24] ss:$-24 sm:$0x3] %vm3_vm0, %v290_v31   ;;  %691 = vst.msk [vmem:[%s1631_s1 + $0x84] ss:$-24 sm:$0xc] %vm3_vm0, %v290_v31  }
  0xa4   :  { %692 = vst.msk [vmem:[%s1631_s1 + $0xe4] ss:$-24 sm:$0x30] %vm3_vm0, %v290_v31   ;;  %693 = vst.msk [vmem:[%s1631_s1 + $0x144] ss:$-24 sm:$0xc0] %vm3_vm0, %v290_v31   ;;  %v328_v32 = vpop.permute.xlu1 %327   ;;  %v315_v33 = vpop.permute.xlu0 %314  }
  0xa5   :  { %704 = vst.msk [vmem:[%s1631_s1 + $0xe5] ss:$-24 sm:$0x3] %vm3_vm0, %v328_v32   ;;  %705 = vst.msk [vmem:[%s1631_s1 + $0x145] ss:$-24 sm:$0xc] %vm3_vm0, %v328_v32  }
  0xa6   :  { %706 = vst.msk [vmem:[%s1631_s1 + $0x1a5] ss:$-24 sm:$0x30] %vm3_vm0, %v328_v32   ;;  %707 = vst.msk [vmem:[%s1631_s1 + $0x205] ss:$-24 sm:$0xc0] %vm3_vm0, %v328_v32  }
  0xa7   :  { %699 = vst.msk [vmem:[%s1631_s1 + $0x25] ss:$-24 sm:$0x3] %vm3_vm0, %v315_v33   ;;  %700 = vst.msk [vmem:[%s1631_s1 + $0x85] ss:$-24 sm:$0xc] %vm3_vm0, %v315_v33  }
  0xa8   :  { %701 = vst.msk [vmem:[%s1631_s1 + $0xe5] ss:$-24 sm:$0x30] %vm3_vm0, %v315_v33   ;;  %702 = vst.msk [vmem:[%s1631_s1 + $0x145] ss:$-24 sm:$0xc0] %vm3_vm0, %v315_v33   ;;  %v353_v34 = vpop.permute.xlu1 %352   ;;  %v340_v35 = vpop.permute.xlu0 %339  }
  0xa9   :  { %713 = vst.msk [vmem:[%s1631_s1 + $0xe6] ss:$-24 sm:$0x3] %vm3_vm0, %v353_v34   ;;  %714 = vst.msk [vmem:[%s1631_s1 + $0x146] ss:$-24 sm:$0xc] %vm3_vm0, %v353_v34  }
  0xaa   :  { %715 = vst.msk [vmem:[%s1631_s1 + $0x1a6] ss:$-24 sm:$0x30] %vm3_vm0, %v353_v34   ;;  %716 = vst.msk [vmem:[%s1631_s1 + $0x206] ss:$-24 sm:$0xc0] %vm3_vm0, %v353_v34  }
  0xab   :  { %708 = vst.msk [vmem:[%s1631_s1 + $0x26] ss:$-24 sm:$0x3] %vm3_vm0, %v340_v35   ;;  %709 = vst.msk [vmem:[%s1631_s1 + $0x86] ss:$-24 sm:$0xc] %vm3_vm0, %v340_v35  }
  0xac   :  { %710 = vst.msk [vmem:[%s1631_s1 + $0xe6] ss:$-24 sm:$0x30] %vm3_vm0, %v340_v35   ;;  %711 = vst.msk [vmem:[%s1631_s1 + $0x146] ss:$-24 sm:$0xc0] %vm3_vm0, %v340_v35   ;;  %v378_v36 = vpop.permute.xlu1 %377   ;;  %v365_v37 = vpop.permute.xlu0 %364  }
  0xad   :  { %722 = vst.msk [vmem:[%s1631_s1 + $0xe7] ss:$-24 sm:$0x3] %vm3_vm0, %v378_v36   ;;  %723 = vst.msk [vmem:[%s1631_s1 + $0x147] ss:$-24 sm:$0xc] %vm3_vm0, %v378_v36  }
  0xae   :  { %724 = vst.msk [vmem:[%s1631_s1 + $0x1a7] ss:$-24 sm:$0x30] %vm3_vm0, %v378_v36   ;;  %725 = vst.msk [vmem:[%s1631_s1 + $0x207] ss:$-24 sm:$0xc0] %vm3_vm0, %v378_v36  }
  0xaf   :  { %717 = vst.msk [vmem:[%s1631_s1 + $0x27] ss:$-24 sm:$0x3] %vm3_vm0, %v365_v37   ;;  %718 = vst.msk [vmem:[%s1631_s1 + $0x87] ss:$-24 sm:$0xc] %vm3_vm0, %v365_v37  }
  0xb0   :  { %719 = vst.msk [vmem:[%s1631_s1 + $0xe7] ss:$-24 sm:$0x30] %vm3_vm0, %v365_v37   ;;  %720 = vst.msk [vmem:[%s1631_s1 + $0x147] ss:$-24 sm:$0xc0] %vm3_vm0, %v365_v37   ;;  %v403_v38 = vpop.permute.xlu1 %402   ;;  %v390_v39 = vpop.permute.xlu0 %389  }
  0xb1   :  { %731 = vst.msk [vmem:[%s1631_s1 + $0x100] ss:$-24 sm:$0x7] %vm3_vm0, %v403_v38   ;;  %732 = vst.msk [vmem:[%s1631_s1 + $0x40] ss:$72 sm:$0x18] %vm3_vm0, %v403_v38  }
  0xb2   :  { %733 = vst.msk [vmem:[%s1631_s1 + $0x1c0] ss:$-24 sm:$0x60] %vm3_vm0, %v403_v38   ;;  %734 = vst.msk [vmem:[%s1631_s1 + $0x171] sm:$0x80] %vm3_vm0, %v403_v38  }
  0xb3   :  { %726 = vst.msk [vmem:[%s1631_s1 + $0x40] ss:$-24 sm:$0x7] %vm3_vm0, %v390_v39   ;;  %727 = vst.msk [vmem:[%s1631_s1 - $0x80] ss:$72 sm:$0x18] %vm3_vm0, %v390_v39  }
  0xb4   :  { %728 = vst.msk [vmem:[%s1631_s1 + $0x100] ss:$-24 sm:$0x60] %vm3_vm0, %v390_v39   ;;  %729 = vst.msk [vmem:[%s1631_s1 + $0xb1] sm:$0x80] %vm3_vm0, %v390_v39   ;;  %v428_v40 = vpop.permute.xlu1 %427   ;;  %v415_v41 = vpop.permute.xlu0 %414  }
  0xb5   :  { %740 = vst.msk [vmem:[%s1631_s1 + $0x101] ss:$-24 sm:$0x7] %vm3_vm0, %v428_v40   ;;  %741 = vst.msk [vmem:[%s1631_s1 + $0x41] ss:$72 sm:$0x18] %vm3_vm0, %v428_v40  }
  0xb6   :  { %742 = vst.msk [vmem:[%s1631_s1 + $0x1c1] ss:$-24 sm:$0x60] %vm3_vm0, %v428_v40   ;;  %743 = vst.msk [vmem:[%s1631_s1 + $0x172] sm:$0x80] %vm3_vm0, %v428_v40  }
  0xb7   :  { %735 = vst.msk [vmem:[%s1631_s1 + $0x41] ss:$-24 sm:$0x7] %vm3_vm0, %v415_v41   ;;  %736 = vst.msk [vmem:[%s1631_s1 - $0x7f] ss:$72 sm:$0x18] %vm3_vm0, %v415_v41  }
  0xb8   :  { %737 = vst.msk [vmem:[%s1631_s1 + $0x101] ss:$-24 sm:$0x60] %vm3_vm0, %v415_v41   ;;  %738 = vst.msk [vmem:[%s1631_s1 + $0xb2] sm:$0x80] %vm3_vm0, %v415_v41   ;;  %v453_v42 = vpop.permute.xlu1 %452   ;;  %v440_v43 = vpop.permute.xlu0 %439  }
  0xb9   :  { %749 = vst.msk [vmem:[%s1631_s1 + $0x102] ss:$-24 sm:$0x7] %vm3_vm0, %v453_v42   ;;  %750 = vst.msk [vmem:[%s1631_s1 + $0x42] ss:$72 sm:$0x18] %vm3_vm0, %v453_v42  }
  0xba   :  { %751 = vst.msk [vmem:[%s1631_s1 + $0x1c2] ss:$-24 sm:$0x60] %vm3_vm0, %v453_v42   ;;  %752 = vst.msk [vmem:[%s1631_s1 + $0x173] sm:$0x80] %vm3_vm0, %v453_v42  }
  0xbb   :  { %744 = vst.msk [vmem:[%s1631_s1 + $0x42] ss:$-24 sm:$0x7] %vm3_vm0, %v440_v43   ;;  %745 = vst.msk [vmem:[%s1631_s1 - $0x7e] ss:$72 sm:$0x18] %vm3_vm0, %v440_v43  }
  0xbc   :  { %746 = vst.msk [vmem:[%s1631_s1 + $0x102] ss:$-24 sm:$0x60] %vm3_vm0, %v440_v43   ;;  %747 = vst.msk [vmem:[%s1631_s1 + $0xb3] sm:$0x80] %vm3_vm0, %v440_v43   ;;  %v478_v44 = vpop.permute.xlu1 %477   ;;  %v465_v45 = vpop.permute.xlu0 %464  }
  0xbd   :  { %758 = vst.msk [vmem:[%s1631_s1 + $0x103] ss:$-24 sm:$0x7] %vm3_vm0, %v478_v44   ;;  %759 = vst.msk [vmem:[%s1631_s1 + $0x43] ss:$72 sm:$0x18] %vm3_vm0, %v478_v44  }
  0xbe   :  { %760 = vst.msk [vmem:[%s1631_s1 + $0x1c3] ss:$-24 sm:$0x60] %vm3_vm0, %v478_v44   ;;  %761 = vst.msk [vmem:[%s1631_s1 + $0x174] sm:$0x80] %vm3_vm0, %v478_v44  }
  0xbf   :  { %753 = vst.msk [vmem:[%s1631_s1 + $0x43] ss:$-24 sm:$0x7] %vm3_vm0, %v465_v45   ;;  %754 = vst.msk [vmem:[%s1631_s1 - $0x7d] ss:$72 sm:$0x18] %vm3_vm0, %v465_v45  }
  0xc0   :  { %755 = vst.msk [vmem:[%s1631_s1 + $0x103] ss:$-24 sm:$0x60] %vm3_vm0, %v465_v45   ;;  %756 = vst.msk [vmem:[%s1631_s1 + $0xb4] sm:$0x80] %vm3_vm0, %v465_v45   ;;  %v503_v46 = vpop.permute.xlu1 %502   ;;  %v490_v47 = vpop.permute.xlu0 %489  }
  0xc1   :  { %767 = vst.msk [vmem:[%s1631_s1 + $0x104] ss:$-24 sm:$0x7] %vm3_vm0, %v503_v46   ;;  %768 = vst.msk [vmem:[%s1631_s1 + $0x44] ss:$72 sm:$0x18] %vm3_vm0, %v503_v46  }
  0xc2   :  { %769 = vst.msk [vmem:[%s1631_s1 + $0x1c4] ss:$-24 sm:$0x60] %vm3_vm0, %v503_v46   ;;  %770 = vst.msk [vmem:[%s1631_s1 + $0x175] sm:$0x80] %vm3_vm0, %v503_v46  }
  0xc3   :  { %762 = vst.msk [vmem:[%s1631_s1 + $0x44] ss:$-24 sm:$0x7] %vm3_vm0, %v490_v47   ;;  %763 = vst.msk [vmem:[%s1631_s1 - $0x7c] ss:$72 sm:$0x18] %vm3_vm0, %v490_v47  }
  0xc4   :  { %764 = vst.msk [vmem:[%s1631_s1 + $0x104] ss:$-24 sm:$0x60] %vm3_vm0, %v490_v47   ;;  %765 = vst.msk [vmem:[%s1631_s1 + $0xb5] sm:$0x80] %vm3_vm0, %v490_v47   ;;  %v528_v48 = vpop.permute.xlu1 %527   ;;  %v515_v49 = vpop.permute.xlu0 %514  }
  0xc5   :  { %776 = vst.msk [vmem:[%s1631_s1 + $0x105] ss:$-24 sm:$0x7] %vm3_vm0, %v528_v48   ;;  %777 = vst.msk [vmem:[%s1631_s1 + $0x45] ss:$72 sm:$0x18] %vm3_vm0, %v528_v48  }
  0xc6   :  { %778 = vst.msk [vmem:[%s1631_s1 + $0x1c5] ss:$-24 sm:$0x60] %vm3_vm0, %v528_v48   ;;  %779 = vst.msk [vmem:[%s1631_s1 + $0x176] sm:$0x80] %vm3_vm0, %v528_v48  }
  0xc7   :  { %771 = vst.msk [vmem:[%s1631_s1 + $0x45] ss:$-24 sm:$0x7] %vm3_vm0, %v515_v49   ;;  %772 = vst.msk [vmem:[%s1631_s1 - $0x7b] ss:$72 sm:$0x18] %vm3_vm0, %v515_v49  }
  0xc8   :  { %773 = vst.msk [vmem:[%s1631_s1 + $0x105] ss:$-24 sm:$0x60] %vm3_vm0, %v515_v49   ;;  %774 = vst.msk [vmem:[%s1631_s1 + $0xb6] sm:$0x80] %vm3_vm0, %v515_v49   ;;  %v553_v50 = vpop.permute.xlu1 %552   ;;  %v540_v51 = vpop.permute.xlu0 %539  }
  0xc9   :  { %785 = vst.msk [vmem:[%s1631_s1 + $0x106] ss:$-24 sm:$0x7] %vm3_vm0, %v553_v50   ;;  %786 = vst.msk [vmem:[%s1631_s1 + $0x46] ss:$72 sm:$0x18] %vm3_vm0, %v553_v50  }
  0xca   :  { %787 = vst.msk [vmem:[%s1631_s1 + $0x1c6] ss:$-24 sm:$0x60] %vm3_vm0, %v553_v50   ;;  %788 = vst.msk [vmem:[%s1631_s1 + $0x177] sm:$0x80] %vm3_vm0, %v553_v50  }
  0xcb   :  { %780 = vst.msk [vmem:[%s1631_s1 + $0x46] ss:$-24 sm:$0x7] %vm3_vm0, %v540_v51   ;;  %781 = vst.msk [vmem:[%s1631_s1 - $0x7a] ss:$72 sm:$0x18] %vm3_vm0, %v540_v51  }
  0xcc   :  { %782 = vst.msk [vmem:[%s1631_s1 + $0x106] ss:$-24 sm:$0x60] %vm3_vm0, %v540_v51   ;;  %783 = vst.msk [vmem:[%s1631_s1 + $0xb7] sm:$0x80] %vm3_vm0, %v540_v51   ;;  %v578_v52 = vpop.permute.xlu1 %577   ;;  %v565_v53 = vpop.permute.xlu0 %564  }
  0xcd   :  { %794 = vst.msk [vmem:[%s1631_s1 + $0x107] ss:$-24 sm:$0x7] %vm3_vm0, %v578_v52   ;;  %795 = vst.msk [vmem:[%s1631_s1 + $0x47] ss:$72 sm:$0x18] %vm3_vm0, %v578_v52  }
  0xce   :  { %796 = vst.msk [vmem:[%s1631_s1 + $0x1c7] ss:$-24 sm:$0x60] %vm3_vm0, %v578_v52   ;;  %797 = vst.msk [vmem:[%s1631_s1 + $0x178] sm:$0x80] %vm3_vm0, %v578_v52  }
  0xcf   :  { %789 = vst.msk [vmem:[%s1631_s1 + $0x47] ss:$-24 sm:$0x7] %vm3_vm0, %v565_v53   ;;  %790 = vst.msk [vmem:[%s1631_s1 - $0x79] ss:$72 sm:$0x18] %vm3_vm0, %v565_v53  }
  0xd0   :  { %791 = vst.msk [vmem:[%s1631_s1 + $0x107] ss:$-24 sm:$0x60] %vm3_vm0, %v565_v53   ;;  %792 = vst.msk [vmem:[%s1631_s1 + $0xb8] sm:$0x80] %vm3_vm0, %v565_v53  }

// kernel: _double_conv_impl.1
= control target key start
LH: loop header
LB: loop body
LE: loop exit
PB: predicated region body
PF: predicated region fallthrough
CT: control target
= control target key end

     0   :  { %s11933_s27 = smov 0   ;;  %s16452_s0 = inlined_call_operand.vmem [shape: f32[2,432,4], index: 0, kind: input, shape index: {}]   ;;  %s16453_s1 = inlined_call_operand.vmem [shape: f32[384,1], index: 1, kind: input, shape index: {}]   ;;  %s16454_s2 = inlined_call_operand.vmem [shape: f32[9,4,8], index: 2, kind: input, shape index: {}]   ;;  %s16455_s3 = inlined_call_operand.vmem [shape: f32[1,8], index: 3, kind: input, shape index: {}]   ;;  %s16456_s4 = inlined_call_operand.vmem [shape: f32[1,8], index: 4, kind: input, shape index: {}]   ;;  %s16457_s5 = inlined_call_operand.vmem [shape: f32[9,8,8], index: 5, kind: input, shape index: {}]   ;;  %s16458_s6 = inlined_call_operand.vmem [shape: f32[1,8], index: 6, kind: input, shape index: {}]   ;;  %s16459_s7 = inlined_call_operand.vmem [shape: f32[1,8], index: 7, kind: input, shape index: {}]   ;;  %s16460_s8 = inlined_call_operand.vmem [shape: f32[2,384,8], index: 8, kind: output, shape index: {}]  }
   0x1 LB: > { %s8715_s28 = sadd.s32 4294967295, %s11884_s27   ;;  %p8719_p0 = scmp.ge.s32.totalorder %s11884_s27, 1  ;;  %s11884_s27 = sphi %s11933_s27, %s18_s27  }
   0x2   : > { %p262_p1 = scmp.lt.s32.totalorder %s11884_s27, 3 }
   0x4   : > { %p263_p2 = pnand %p8719_p0, %p262_p1 }
   0x6   : > { %266 = sbr.rel (%p263_p2) target bundleno = 1315 (0x523), region = 52 }
   0xb   : > { %v8724_v0 = vld [vmem:[%s16454_s2 + $0xc] sm:$0xf]  ;;  %vm509_vm0 = vcmask 1043456   ;;  %v354_v1 = vld [vmem:[%s16454_s2] sm:$0xf]  ;;  %p296_p3 = scmp.lt.s32.totalorder %s8715_s28, 1 }
   0xc   : > { %10499 = vmatprep.subr.msk.mxu0 %vm509_vm0, %v8724_v0  ;;  %10573 = vmatprep.subr.msk.mxu1 %vm509_vm0, %v354_v1  ;;  %v8823_v2 = vld [vmem:[%s16454_s2 + $0x10] sm:$0xf]  ;;  %v8722_v3 = vld [vmem:[%s16454_s2 + $0x4] sm:$0xf]  ;;  %vm364_vm1 = vcmask 31744   ;;  %vm4615_vm2 = vcmask 64512  }
   0xd   : > { %10500 = vmatpush3.msk.msra.mxu0 %vm509_vm0, %v8724_v0  ;;  %s17139_s28 = smov (!%p296_p3, %s8715_s28), 1  ;;  %10574 = vmatpush3.msk.msra.mxu1 %vm509_vm0, %v354_v1  ;;  %v11996_v10 = vld [vmem:[%s16454_s2 + $0x14] sm:$0xf]  ;;  %v8723_v41 = vld [vmem:[%s16454_s2 + $0x8] sm:$0xf]  ;;  %vm3687_vm3 = vcmask 1040384  }
   0xe   : > { %10647 = vmatprep.subr.msk.mxu0 %vm509_vm0, %v8823_v2  ;;  %10721 = vmatprep.subr.msk.mxu1 %vm509_vm0, %v8722_v3  ;;  %s11831_s15 = smul.u32 432, %s17139_s28  ;;  %v12336_v57 = vld [vmem:[%s16454_s2 + $0x18] sm:$0xf]  ;;  %v9071_v58 = vld [vmem:[%s16454_s2 + $0x1c] sm:$0xf]  ;;  %vm3927_vm4 = vcmask 1046528  }
   0xf   : > { %v12542_v61 = vld [vmem:[%s16454_s2 + $0x20] sm:$0xf]  ;;  %s11832_s17 = smul.u32 384, %s17139_s28 }
  0x10   : > { %s11965_s18 = scalar_lea.vmem %s16452_s0, %s11831_s15 }
  0x11   : > { %v11968_v4 = vld [vmem:[%s11965_s18 + $0x18] sm:$0xff]  ;;  %v11971_v5 = vld [vmem:[%s11965_s18] sm:$0xff]  ;;  %v11981_v7 = vld [vmem:[%s11965_s18 + $0x8] sm:$0xff]  ;;  %s16122_s24 = scalar_lea.vmem %s16460_s8, %s11832_s17 }
  0x12   : > { %v11974_v6 = vld [vmem:[%s11965_s18 + $0x20] sm:$0xff]  ;;  %10501 = vmatprep.mubr.msk.f32.mxu0 %vm364_vm1, %v11968_v4  ;;  %10575 = vmatprep.mubr.msk.f32.mxu1 %vm364_vm1, %v11971_v5  ;;  %v11984_v8 = vld [vmem:[%s11965_s18 + $0x28] sm:$0xff]  ;;  %v11987_v9 = vld [vmem:[%s11965_s18 + $0x10] sm:$0xff] }
  0x13   : > { %10502 = vmatmul.mubr.msk.f32.vlgmr.msra.gmra.mxu0 %vm364_vm1, %v11974_v6  ;;  %10576 = vmatmul.mubr.msk.f32.vlgmr.msra.gmra.mxu1 %vm364_vm1, %v11981_v7  ;;  %v12002_v11 = vld [vmem:[%s11965_s18 + $0x30] sm:$0xff]  ;;  %v12007_v12 = vld [vmem:[%s11965_s18 + $0x38] sm:$0xff]  ;;  %v12021_v13 = vld [vmem:[%s11965_s18 + $0x40] sm:$0xff] }
  0x14   : > { %10648 = vmatpush3.msk.msra.mxu0 %vm509_vm0, %v8823_v2  ;;  %10504 = vmatprep.mubr.msk.f32.mxu0 %vm364_vm1, %v11984_v8  ;;  %v12024_v14 = vld [vmem:[%s11965_s18 + $0x48] sm:$0xff]  ;;  %v12035_v15 = vld [vmem:[%s11965_s18 + $0x50] sm:$0xff]  ;;  %v12038_v16 = vld [vmem:[%s11965_s18 + $0x58] sm:$0xff] }
  0x15   : > { %10578 = vmatprep.mubr.msk.f32.mxu1 %vm364_vm1, %v11987_v9  ;;  %10722 = vmatpush3.msk.msra.mxu1 %vm509_vm0, %v8722_v3  ;;  %v12049_v17 = vld [vmem:[%s11965_s18 + $0x60] sm:$0xff]  ;;  %v12052_v18 = vld [vmem:[%s11965_s18 + $0x68] sm:$0xff]  ;;  %v12063_v19 = vld [vmem:[%s11965_s18 + $0x70] sm:$0xff] }
  0x16   : > { %10795 = vmatprep.subr.msk.mxu0 %vm509_vm0, %v11996_v10  ;;  %v12066_v20 = vld [vmem:[%s11965_s18 + $0x78] sm:$0xff]  ;;  %v12077_v21 = vld [vmem:[%s11965_s18 + $0x80] sm:$0xff]  ;;  %v12080_v22 = vld [vmem:[%s11965_s18 + $0x88] sm:$0xff]  ;;  %10869 = vmatprep.subr.msk.mxu1 %vm509_vm0, %v8723_v41 }
  0x17   : > { %10505 = vmatmul.mubr.msk.f32.gmra.mxu0 %vm364_vm1, %v12002_v11  ;;  %10579 = vmatmul.mubr.msk.f32.gmra.mxu1 %vm364_vm1, %v11968_v4  ;;  %v12091_v23 = vld [vmem:[%s11965_s18 + $0x90] sm:$0xff]  ;;  %v12094_v24 = vld [vmem:[%s11965_s18 + $0x98] sm:$0xff]  ;;  %v12105_v25 = vld [vmem:[%s11965_s18 + $0xa0] sm:$0xff] }
  0x18   : > { %10507 = vmatprep.mubr.msk.f32.mxu0 %vm364_vm1, %v12007_v12  ;;  %10581 = vmatprep.mubr.msk.f32.mxu1 %vm364_vm1, %v11974_v6  ;;  %v12108_v26 = vld [vmem:[%s11965_s18 + $0xa8] sm:$0xff]  ;;  %v12119_v27 = vld [vmem:[%s11965_s18 + $0xb0] sm:$0xff]  ;;  %v12122_v28 = vld [vmem:[%s11965_s18 + $0xb8] sm:$0xff] }
  0x19   : > { %v12133_v29 = vld [vmem:[%s11965_s18 + $0xc0] sm:$0xff]  ;;  %v12136_v30 = vld [vmem:[%s11965_s18 + $0xc8] sm:$0xff]  ;;  %v12147_v31 = vld [vmem:[%s11965_s18 + $0xd0] sm:$0xff] }
  0x1a   : > { %v12150_v32 = vld [vmem:[%s11965_s18 + $0xd8] sm:$0xff]  ;;  %v12161_v33 = vld [vmem:[%s11965_s18 + $0xe0] sm:$0xff]  ;;  %v12164_v34 = vld [vmem:[%s11965_s18 + $0xe8] sm:$0xff] }
  0x1b   : > { %10508 = vmatmul.mubr.msk.f32.gmra.mxu0 %vm364_vm1, %v12021_v13  ;;  %10582 = vmatmul.mubr.msk.f32.gmra.mxu1 %vm364_vm1, %v11984_v8  ;;  %v12175_v35 = vld [vmem:[%s11965_s18 + $0xf0] sm:$0xff]  ;;  %v12178_v36 = vld [vmem:[%s11965_s18 + $0xf8] sm:$0xff]  ;;  %v12189_v37 = vld [vmem:[%s11965_s18 + $0x100] sm:$0xff] }
  0x1c   : > { %10510 = vmatprep.mubr.msk.f32.mxu0 %vm364_vm1, %v12024_v14  ;;  %10584 = vmatprep.mubr.msk.f32.mxu1 %vm364_vm1, %v12002_v11  ;;  %v12192_v38 = vld [vmem:[%s11965_s18 + $0x108] sm:$0xff]  ;;  %v12203_v39 = vld [vmem:[%s11965_s18 + $0x110] sm:$0xff]  ;;  %v12206_v40 = vld [vmem:[%s11965_s18 + $0x118] sm:$0xff] }
  0x1d   : > { %v12220_v42 = vld [vmem:[%s11965_s18 + $0x120] sm:$0xff]  ;;  %v12223_v43 = vld [vmem:[%s11965_s18 + $0x128] sm:$0xff]  ;;  %v12235_v44 = vld [vmem:[%s11965_s18 + $0x130] sm:$0xff] }
  0x1e   : > { %v12238_v45 = vld [vmem:[%s11965_s18 + $0x138] sm:$0xff]  ;;  %v12249_v46 = vld [vmem:[%s11965_s18 + $0x140] sm:$0xff]  ;;  %v12252_v47 = vld [vmem:[%s11965_s18 + $0x148] sm:$0xff] }
  0x1f   : > { %10511 = vmatmul.mubr.msk.f32.gmra.mxu0 %vm364_vm1, %v12035_v15  ;;  %10585 = vmatmul.mubr.msk.f32.gmra.mxu1 %vm364_vm1, %v12007_v12  ;;  %v12263_v48 = vld [vmem:[%s11965_s18 + $0x150] sm:$0xff]  ;;  %v12266_v49 = vld [vmem:[%s11965_s18 + $0x158] sm:$0xff]  ;;  %v12277_v50 = vld [vmem:[%s11965_s18 + $0x160] sm:$0xff] }
  0x20   : > { %10513 = vmatprep.mubr.msk.f32.mxu0 %vm364_vm1, %v12038_v16  ;;  %10587 = vmatprep.mubr.msk.f32.mxu1 %vm364_vm1, %v12021_v13  ;;  %v12280_v51 = vld [vmem:[%s11965_s18 + $0x168] sm:$0xff]  ;;  %v12291_v52 = vld [vmem:[%s11965_s18 + $0x170] sm:$0xff]  ;;  %v12294_v53 = vld [vmem:[%s11965_s18 + $0x178] sm:$0xff] }
  0x21   : > { %v12305_v54 = vld [vmem:[%s11965_s18 + $0x180] sm:$0xff]  ;;  %v12308_v55 = vld [vmem:[%s11965_s18 + $0x188] sm:$0xff]  ;;  %v12319_v56 = vld [vmem:[%s11965_s18 + $0x190] sm:$0xff] }
  0x23   : > { %10514 = vmatmul.mubr.msk.f32.gmra.mxu0 %vm364_vm1, %v12049_v17  ;;  %10588 = vmatmul.mubr.msk.f32.gmra.mxu1 %vm364_vm1, %v12024_v14 }
  0x24   : > { %10516 = vmatprep.mubr.msk.f32.mxu0 %vm364_vm1, %v12052_v18  ;;  %10590 = vmatprep.mubr.msk.f32.mxu1 %vm364_vm1, %v12035_v15 }
  0x27   : > { %10517 = vmatmul.mubr.msk.f32.gmra.mxu0 %vm364_vm1, %v12063_v19  ;;  %10591 = vmatmul.mubr.msk.f32.gmra.mxu1 %vm364_vm1, %v12038_v16 }
  0x28   : > { %10519 = vmatprep.mubr.msk.f32.mxu0 %vm364_vm1, %v12066_v20  ;;  %10593 = vmatprep.mubr.msk.f32.mxu1 %vm364_vm1, %v12049_v17 }
  0x2b   : > { %10520 = vmatmul.mubr.msk.f32.gmra.mxu0 %vm364_vm1, %v12077_v21  ;;  %10594 = vmatmul.mubr.msk.f32.gmra.mxu1 %vm364_vm1, %v12052_v18 }
  0x2c   : > { %10522 = vmatprep.mubr.msk.f32.mxu0 %vm364_vm1, %v12080_v22  ;;  %10596 = vmatprep.mubr.msk.f32.mxu1 %vm364_vm1, %v12063_v19 }
  0x2f   : > { %10523 = vmatmul.mubr.msk.f32.gmra.mxu0 %vm364_vm1, %v12091_v23  ;;  %10597 = vmatmul.mubr.msk.f32.gmra.mxu1 %vm364_vm1, %v12066_v20 }
  0x30   : > { %10525 = vmatprep.mubr.msk.f32.mxu0 %vm364_vm1, %v12094_v24  ;;  %10599 = vmatprep.mubr.msk.f32.mxu1 %vm364_vm1, %v12077_v21 }
  0x33   : > { %10526 = vmatmul.mubr.msk.f32.gmra.mxu0 %vm364_vm1, %v12105_v25  ;;  %10600 = vmatmul.mubr.msk.f32.gmra.mxu1 %vm364_vm1, %v12080_v22 }
  0x34   : > { %10528 = vmatprep.mubr.msk.f32.mxu0 %vm364_vm1, %v12108_v26  ;;  %10602 = vmatprep.mubr.msk.f32.mxu1 %vm364_vm1, %v12091_v23 }
  0x37   : > { %10529 = vmatmul.mubr.msk.f32.gmra.mxu0 %vm364_vm1, %v12119_v27  ;;  %10603 = vmatmul.mubr.msk.f32.gmra.mxu1 %vm364_vm1, %v12094_v24 }
  0x38   : > { %10531 = vmatprep.mubr.msk.f32.mxu0 %vm364_vm1, %v12122_v28  ;;  %10605 = vmatprep.mubr.msk.f32.mxu1 %vm364_vm1, %v12105_v25 }
  0x3b   : > { %10532 = vmatmul.mubr.msk.f32.gmra.mxu0 %vm364_vm1, %v12133_v29  ;;  %10606 = vmatmul.mubr.msk.f32.gmra.mxu1 %vm364_vm1, %v12108_v26 }
  0x3c   : > { %10534 = vmatprep.mubr.msk.f32.mxu0 %vm364_vm1, %v12136_v30  ;;  %10608 = vmatprep.mubr.msk.f32.mxu1 %vm364_vm1, %v12119_v27 }
  0x3f   : > { %10535 = vmatmul.mubr.msk.f32.gmra.mxu0 %vm364_vm1, %v12147_v31  ;;  %10609 = vmatmul.mubr.msk.f32.gmra.mxu1 %vm364_vm1, %v12122_v28 }
  0x40   : > { %10537 = vmatprep.mubr.msk.f32.mxu0 %vm364_vm1, %v12150_v32  ;;  %10611 = vmatprep.mubr.msk.f32.mxu1 %vm364_vm1, %v12133_v29 }
  0x43   : > { %10538 = vmatmul.mubr.msk.f32.gmra.mxu0 %vm364_vm1, %v12161_v33  ;;  %10612 = vmatmul.mubr.msk.f32.gmra.mxu1 %vm364_vm1, %v12136_v30 }
  0x44   : > { %10540 = vmatprep.mubr.msk.f32.mxu0 %vm364_vm1, %v12164_v34  ;;  %10614 = vmatprep.mubr.msk.f32.mxu1 %vm364_vm1, %v12147_v31 }
  0x47   : > { %10541 = vmatmul.mubr.msk.f32.gmra.mxu0 %vm364_vm1, %v12175_v35  ;;  %10615 = vmatmul.mubr.msk.f32.gmra.mxu1 %vm364_vm1, %v12150_v32 }
  0x48   : > { %10543 = vmatprep.mubr.msk.f32.mxu0 %vm364_vm1, %v12178_v36  ;;  %10617 = vmatprep.mubr.msk.f32.mxu1 %vm364_vm1, %v12161_v33 }
  0x4b   : > { %10544 = vmatmul.mubr.msk.f32.gmra.mxu0 %vm364_vm1, %v12189_v37  ;;  %10618 = vmatmul.mubr.msk.f32.gmra.mxu1 %vm364_vm1, %v12164_v34 }
  0x4c   : > { %10546 = vmatprep.mubr.msk.f32.mxu0 %vm364_vm1, %v12192_v38  ;;  %10620 = vmatprep.mubr.msk.f32.mxu1 %vm364_vm1, %v12175_v35 }
  0x4f   : > { %10547 = vmatmul.mubr.msk.f32.gmra.mxu0 %vm364_vm1, %v12203_v39  ;;  %10621 = vmatmul.mubr.msk.f32.gmra.mxu1 %vm364_vm1, %v12178_v36 }
  0x50   : > { %10549 = vmatprep.mubr.msk.f32.mxu0 %vm364_vm1, %v12206_v40  ;;  %10623 = vmatprep.mubr.msk.f32.mxu1 %vm364_vm1, %v12189_v37 }
  0x53   : > { %10550 = vmatmul.mubr.msk.f32.gmra.mxu0 %vm364_vm1, %v12220_v42  ;;  %10624 = vmatmul.mubr.msk.f32.gmra.mxu1 %vm364_vm1, %v12192_v38 }
  0x54   : > { %10552 = vmatprep.mubr.msk.f32.mxu0 %vm364_vm1, %v12223_v43  ;;  %10626 = vmatprep.mubr.msk.f32.mxu1 %vm364_vm1, %v12203_v39 }
  0x57   : > { %10553 = vmatmul.mubr.msk.f32.gmra.mxu0 %vm364_vm1, %v12235_v44  ;;  %10627 = vmatmul.mubr.msk.f32.gmra.mxu1 %vm364_vm1, %v12206_v40 }
  0x58   : > { %10555 = vmatprep.mubr.msk.f32.mxu0 %vm364_vm1, %v12238_v45  ;;  %10629 = vmatprep.mubr.msk.f32.mxu1 %vm364_vm1, %v12220_v42 }
  0x5b   : > { %10556 = vmatmul.mubr.msk.f32.gmra.mxu0 %vm364_vm1, %v12249_v46  ;;  %10630 = vmatmul.mubr.msk.f32.gmra.mxu1 %vm364_vm1, %v12223_v43 }
  0x5c   : > { %10558 = vmatprep.mubr.msk.f32.mxu0 %vm364_vm1, %v12252_v47  ;;  %10632 = vmatprep.mubr.msk.f32.mxu1 %vm364_vm1, %v12235_v44 }
  0x5f   : > { %10559 = vmatmul.mubr.msk.f32.gmra.mxu0 %vm364_vm1, %v12263_v48  ;;  %10633 = vmatmul.mubr.msk.f32.gmra.mxu1 %vm364_vm1, %v12238_v45 }
  0x60   : > { %10561 = vmatprep.mubr.msk.f32.mxu0 %vm364_vm1, %v12266_v49  ;;  %10635 = vmatprep.mubr.msk.f32.mxu1 %vm364_vm1, %v12249_v46 }
  0x63   : > { %10562 = vmatmul.mubr.msk.f32.gmra.mxu0 %vm364_vm1, %v12277_v50  ;;  %10636 = vmatmul.mubr.msk.f32.gmra.mxu1 %vm364_vm1, %v12252_v47 }
  0x64   : > { %10564 = vmatprep.mubr.msk.f32.mxu0 %vm364_vm1, %v12280_v51  ;;  %10638 = vmatprep.mubr.msk.f32.mxu1 %vm364_vm1, %v12263_v48 }
  0x67   : > { %10565 = vmatmul.mubr.msk.f32.gmra.mxu0 %vm364_vm1, %v12291_v52  ;;  %10639 = vmatmul.mubr.msk.f32.gmra.mxu1 %vm364_vm1, %v12266_v49 }
  0x68   : > { %10567 = vmatprep.mubr.msk.f32.mxu0 %vm364_vm1, %v12294_v53  ;;  %10641 = vmatprep.mubr.msk.f32.mxu1 %vm364_vm1, %v12277_v50 }
  0x6b   : > { %10568 = vmatmul.mubr.msk.f32.gmra.mxu0 %vm364_vm1, %v12305_v54  ;;  %10642 = vmatmul.mubr.msk.f32.gmra.mxu1 %vm364_vm1, %v12280_v51 }
  0x6c   : > { %10570 = vmatprep.mubr.msk.f32.mxu0 %vm364_vm1, %v12308_v55  ;;  %10644 = vmatprep.mubr.msk.f32.mxu1 %vm364_vm1, %v12291_v52 }
  0x6f   : > { %10571 = vmatmul.mubr.msk.f32.gmra.mxu0 %vm364_vm1, %v12319_v56  ;;  %10645 = vmatmul.mubr.msk.f32.gmra.mxu1 %vm364_vm1, %v12294_v53 }
  0x70   : > { %10649 = vmatprep.mubr.msk.f32.mxu0 %vm364_vm1, %v11968_v4  ;;  %10723 = vmatprep.mubr.msk.f32.mxu1 %vm364_vm1, %v11971_v5 }
  0x73   : > { %10650 = vmatmul.mubr.msk.f32.vlgmr.msra.gmra.mxu0 %vm364_vm1, %v11974_v6  ;;  %10724 = vmatmul.mubr.msk.f32.vlgmr.msra.gmra.mxu1 %vm364_vm1, %v11981_v7 }
  0x74   : > { %10796 = vmatpush3.msk.msra.mxu0 %vm509_vm0, %v11996_v10  ;;  %10652 = vmatprep.mubr.msk.f32.mxu0 %vm364_vm1, %v11984_v8 }
  0x75   : > { %10726 = vmatprep.mubr.msk.f32.mxu1 %vm364_vm1, %v11987_v9  ;;  %10870 = vmatpush3.msk.msra.mxu1 %vm509_vm0, %v8723_v41 }
  0x76   : > { %10943 = vmatprep.subr.msk.mxu0 %vm509_vm0, %v12336_v57  ;;  %11017 = vmatprep.subr.msk.mxu1 %vm509_vm0, %v9071_v58 }
  0x77   : > { %10653 = vmatmul.mubr.msk.f32.gmra.mxu0 %vm364_vm1, %v12002_v11  ;;  %10727 = vmatmul.mubr.msk.f32.gmra.mxu1 %vm364_vm1, %v11968_v4 }
  0x78   : > { %10655 = vmatprep.mubr.msk.f32.mxu0 %vm364_vm1, %v12007_v12  ;;  %10729 = vmatprep.mubr.msk.f32.mxu1 %vm364_vm1, %v11974_v6 }
  0x7b   : > { %10656 = vmatmul.mubr.msk.f32.gmra.mxu0 %vm364_vm1, %v12021_v13  ;;  %10730 = vmatmul.mubr.msk.f32.gmra.mxu1 %vm364_vm1, %v11984_v8 }
  0x7c   : > { %10658 = vmatprep.mubr.msk.f32.mxu0 %vm364_vm1, %v12024_v14  ;;  %10732 = vmatprep.mubr.msk.f32.mxu1 %vm364_vm1, %v12002_v11 }
  0x7f   : > { %10659 = vmatmul.mubr.msk.f32.gmra.mxu0 %vm364_vm1, %v12035_v15  ;;  %10733 = vmatmul.mubr.msk.f32.gmra.mxu1 %vm364_vm1, %v12007_v12 }
  0x80   : > { %10661 = vmatprep.mubr.msk.f32.mxu0 %vm364_vm1, %v12038_v16  ;;  %10735 = vmatprep.mubr.msk.f32.mxu1 %vm364_vm1, %v12021_v13 }
  0x83   : > { %10662 = vmatmul.mubr.msk.f32.gmra.mxu0 %vm364_vm1, %v12049_v17  ;;  %10736 = vmatmul.mubr.msk.f32.gmra.mxu1 %vm364_vm1, %v12024_v14 }
  0x84   : > { %10664 = vmatprep.mubr.msk.f32.mxu0 %vm364_vm1, %v12052_v18  ;;  %10738 = vmatprep.mubr.msk.f32.mxu1 %vm364_vm1, %v12035_v15 }
  0x87   : > { %10665 = vmatmul.mubr.msk.f32.gmra.mxu0 %vm364_vm1, %v12063_v19  ;;  %10739 = vmatmul.mubr.msk.f32.gmra.mxu1 %vm364_vm1, %v12038_v16 }
  0x88   : > { %10667 = vmatprep.mubr.msk.f32.mxu0 %vm364_vm1, %v12066_v20  ;;  %10741 = vmatprep.mubr.msk.f32.mxu1 %vm364_vm1, %v12049_v17 }
  0x8b   : > { %10668 = vmatmul.mubr.msk.f32.gmra.mxu0 %vm364_vm1, %v12077_v21  ;;  %10742 = vmatmul.mubr.msk.f32.gmra.mxu1 %vm364_vm1, %v12052_v18 }
  0x8c   : > { %10670 = vmatprep.mubr.msk.f32.mxu0 %vm364_vm1, %v12080_v22  ;;  %10744 = vmatprep.mubr.msk.f32.mxu1 %vm364_vm1, %v12063_v19 }
  0x8f   : > { %10671 = vmatmul.mubr.msk.f32.gmra.mxu0 %vm364_vm1, %v12091_v23  ;;  %10745 = vmatmul.mubr.msk.f32.gmra.mxu1 %vm364_vm1, %v12066_v20 }
  0x90   : > { %10673 = vmatprep.mubr.msk.f32.mxu0 %vm364_vm1, %v12094_v24  ;;  %10747 = vmatprep.mubr.msk.f32.mxu1 %vm364_vm1, %v12077_v21 }
  0x93   : > { %10674 = vmatmul.mubr.msk.f32.gmra.mxu0 %vm364_vm1, %v12105_v25  ;;  %10748 = vmatmul.mubr.msk.f32.gmra.mxu1 %vm364_vm1, %v12080_v22 }
  0x94   : > { %10676 = vmatprep.mubr.msk.f32.mxu0 %vm364_vm1, %v12108_v26  ;;  %10750 = vmatprep.mubr.msk.f32.mxu1 %vm364_vm1, %v12091_v23 }
  0x97   : > { %10677 = vmatmul.mubr.msk.f32.gmra.mxu0 %vm364_vm1, %v12119_v27  ;;  %10751 = vmatmul.mubr.msk.f32.gmra.mxu1 %vm364_vm1, %v12094_v24 }
  0x98   : > { %10679 = vmatprep.mubr.msk.f32.mxu0 %vm364_vm1, %v12122_v28  ;;  %10753 = vmatprep.mubr.msk.f32.mxu1 %vm364_vm1, %v12105_v25 }
  0x9b   : > { %10680 = vmatmul.mubr.msk.f32.gmra.mxu0 %vm364_vm1, %v12133_v29  ;;  %10754 = vmatmul.mubr.msk.f32.gmra.mxu1 %vm364_vm1, %v12108_v26 }
  0x9c   : > { %10682 = vmatprep.mubr.msk.f32.mxu0 %vm364_vm1, %v12136_v30  ;;  %10756 = vmatprep.mubr.msk.f32.mxu1 %vm364_vm1, %v12119_v27 }
  0x9f   : > { %10683 = vmatmul.mubr.msk.f32.gmra.mxu0 %vm364_vm1, %v12147_v31  ;;  %10757 = vmatmul.mubr.msk.f32.gmra.mxu1 %vm364_vm1, %v12122_v28 }
  0xa0   : > { %10685 = vmatprep.mubr.msk.f32.mxu0 %vm364_vm1, %v12150_v32  ;;  %10759 = vmatprep.mubr.msk.f32.mxu1 %vm364_vm1, %v12133_v29 }
  0xa3   : > { %10686 = vmatmul.mubr.msk.f32.gmra.mxu0 %vm364_vm1, %v12161_v33  ;;  %10760 = vmatmul.mubr.msk.f32.gmra.mxu1 %vm364_vm1, %v12136_v30 }
  0xa4   : > { %10688 = vmatprep.mubr.msk.f32.mxu0 %vm364_vm1, %v12164_v34  ;;  %10762 = vmatprep.mubr.msk.f32.mxu1 %vm364_vm1, %v12147_v31 }
  0xa7   : > { %10689 = vmatmul.mubr.msk.f32.gmra.mxu0 %vm364_vm1, %v12175_v35  ;;  %10763 = vmatmul.mubr.msk.f32.gmra.mxu1 %vm364_vm1, %v12150_v32 }
  0xa8   : > { %10691 = vmatprep.mubr.msk.f32.mxu0 %vm364_vm1, %v12178_v36  ;;  %10765 = vmatprep.mubr.msk.f32.mxu1 %vm364_vm1, %v12161_v33 }
  0xab   : > { %10692 = vmatmul.mubr.msk.f32.gmra.mxu0 %vm364_vm1, %v12189_v37  ;;  %10766 = vmatmul.mubr.msk.f32.gmra.mxu1 %vm364_vm1, %v12164_v34 }
  0xac   : > { %10694 = vmatprep.mubr.msk.f32.mxu0 %vm364_vm1, %v12192_v38  ;;  %10768 = vmatprep.mubr.msk.f32.mxu1 %vm364_vm1, %v12175_v35 }
  0xaf   : > { %10695 = vmatmul.mubr.msk.f32.gmra.mxu0 %vm364_vm1, %v12203_v39  ;;  %10769 = vmatmul.mubr.msk.f32.gmra.mxu1 %vm364_vm1, %v12178_v36 }
  0xb0   : > { %10697 = vmatprep.mubr.msk.f32.mxu0 %vm364_vm1, %v12206_v40  ;;  %10771 = vmatprep.mubr.msk.f32.mxu1 %vm364_vm1, %v12189_v37 }
  0xb3   : > { %10698 = vmatmul.mubr.msk.f32.gmra.mxu0 %vm364_vm1, %v12220_v42  ;;  %10772 = vmatmul.mubr.msk.f32.gmra.mxu1 %vm364_vm1, %v12192_v38 }
  0xb4   : > { %10700 = vmatprep.mubr.msk.f32.mxu0 %vm364_vm1, %v12223_v43  ;;  %10774 = vmatprep.mubr.msk.f32.mxu1 %vm364_vm1, %v12203_v39 }
  0xb7   : > { %10701 = vmatmul.mubr.msk.f32.gmra.mxu0 %vm364_vm1, %v12235_v44  ;;  %10775 = vmatmul.mubr.msk.f32.gmra.mxu1 %vm364_vm1, %v12206_v40 }
  0xb8   : > { %10703 = vmatprep.mubr.msk.f32.mxu0 %vm364_vm1, %v12238_v45  ;;  %10777 = vmatprep.mubr.msk.f32.mxu1 %vm364_vm1, %v12220_v42 }
  0xbb   : > { %10704 = vmatmul.mubr.msk.f32.gmra.mxu0 %vm364_vm1, %v12249_v46  ;;  %10778 = vmatmul.mubr.msk.f32.gmra.mxu1 %vm364_vm1, %v12223_v43 }
  0xbc   : > { %10706 = vmatprep.mubr.msk.f32.mxu0 %vm364_vm1, %v12252_v47  ;;  %10780 = vmatprep.mubr.msk.f32.mxu1 %vm364_vm1, %v12235_v44 }
  0xbf   : > { %10707 = vmatmul.mubr.msk.f32.gmra.mxu0 %vm364_vm1, %v12263_v48  ;;  %10781 = vmatmul.mubr.msk.f32.gmra.mxu1 %vm364_vm1, %v12238_v45 }
  0xc0   : > { %10709 = vmatprep.mubr.msk.f32.mxu0 %vm364_vm1, %v12266_v49  ;;  %10783 = vmatprep.mubr.msk.f32.mxu1 %vm364_vm1, %v12249_v46 }
  0xc3   : > { %10710 = vmatmul.mubr.msk.f32.gmra.mxu0 %vm364_vm1, %v12277_v50  ;;  %10784 = vmatmul.mubr.msk.f32.gmra.mxu1 %vm364_vm1, %v12252_v47 }
  0xc4   : > { %10712 = vmatprep.mubr.msk.f32.mxu0 %vm364_vm1, %v12280_v51  ;;  %10786 = vmatprep.mubr.msk.f32.mxu1 %vm364_vm1, %v12263_v48 }
  0xc7   : > { %10713 = vmatmul.mubr.msk.f32.gmra.mxu0 %vm364_vm1, %v12291_v52  ;;  %10787 = vmatmul.mubr.msk.f32.gmra.mxu1 %vm364_vm1, %v12266_v49 }
  0xc8   : > { %10715 = vmatprep.mubr.msk.f32.mxu0 %vm364_vm1, %v12294_v53  ;;  %10789 = vmatprep.mubr.msk.f32.mxu1 %vm364_vm1, %v12277_v50 }
  0xcb   : > { %10716 = vmatmul.mubr.msk.f32.gmra.mxu0 %vm364_vm1, %v12305_v54  ;;  %10790 = vmatmul.mubr.msk.f32.gmra.mxu1 %vm364_vm1, %v12280_v51 }
  0xcc   : > { %10718 = vmatprep.mubr.msk.f32.mxu0 %vm364_vm1, %v12308_v55  ;;  %10792 = vmatprep.mubr.msk.f32.mxu1 %vm364_vm1, %v12291_v52 }
  0xcf   : > { %10719 = vmatmul.mubr.msk.f32.gmra.mxu0 %vm364_vm1, %v12319_v56  ;;  %10793 = vmatmul.mubr.msk.f32.gmra.mxu1 %vm364_vm1, %v12294_v53 }
  0xd0   : > { %10797 = vmatprep.mubr.msk.f32.mxu0 %vm364_vm1, %v11968_v4  ;;  %10871 = vmatprep.mubr.msk.f32.mxu1 %vm364_vm1, %v11971_v5 }
  0xd3   : > { %v10503_v59 = vpop.f32.mrf.mxu0  ;;  %v10577_v60 = vpop.f32.mrf.mxu1  ;;  %10798 = vmatmul.mubr.msk.f32.vlgmr.msra.gmra.mxu0 %vm364_vm1, %v11974_v6  ;;  %10872 = vmatmul.mubr.msk.f32.vlgmr.msra.gmra.mxu1 %vm364_vm1, %v11981_v7 }
  0xd4   : > { %v12544_v62 = vadd.f32 %v10577_v60, %v10503_v59  ;;  %10944 = vmatpush3.msk.msra.mxu0 %vm509_vm0, %v12336_v57  ;;  %10800 = vmatprep.mubr.msk.f32.mxu0 %vm364_vm1, %v11984_v8 }
  0xd5   : > { %v579_v63 = vpop.f32.mrf.mxu0  ;;  %v896_v0 = vpop.f32.mrf.mxu1  ;;  %10874 = vmatprep.mubr.msk.f32.mxu1 %vm364_vm1, %v11987_v9  ;;  %11018 = vmatpush3.msk.msra.mxu1 %vm509_vm0, %v9071_v58 }
  0xd6   : > { %v12553_v1 = vadd.f32 %v896_v0, %v579_v63  ;;  %11091 = vmatprep.subr.msk.mxu0 %vm509_vm0, %v12542_v61 }
  0xd7   : > { %v10506_v2 = vpop.f32.mrf.mxu0  ;;  %v10580_v3 = vpop.f32.mrf.mxu1  ;;  %10801 = vmatmul.mubr.msk.f32.gmra.mxu0 %vm364_vm1, %v12002_v11  ;;  %10875 = vmatmul.mubr.msk.f32.gmra.mxu1 %vm364_vm1, %v11968_v4 }
  0xd8   : > { %v12561_v5 = vadd.f32 %v10580_v3, %v10506_v2  ;;  %10803 = vmatprep.mubr.msk.f32.mxu0 %vm364_vm1, %v12007_v12  ;;  %10877 = vmatprep.mubr.msk.f32.mxu1 %vm364_vm1, %v11974_v6 }
  0xd9   : > { %v589_v7 = vpop.f32.mrf.mxu0  ;;  %v906_v9 = vpop.f32.mrf.mxu1 }
  0xda   : > { %v12567_v10 = vadd.f32 %v906_v9, %v589_v7 }
  0xdb   : > { %v10509_v41 = vpop.f32.mrf.mxu0  ;;  %v10583_v57 = vpop.f32.mrf.mxu1  ;;  %10804 = vmatmul.mubr.msk.f32.gmra.mxu0 %vm364_vm1, %v12021_v13  ;;  %10878 = vmatmul.mubr.msk.f32.gmra.mxu1 %vm364_vm1, %v11984_v8 }
  0xdc   : > { %v12573_v4 = vadd.f32 %v10583_v57, %v10509_v41  ;;  %10806 = vmatprep.mubr.msk.f32.mxu0 %vm364_vm1, %v12024_v14  ;;  %10880 = vmatprep.mubr.msk.f32.mxu1 %vm364_vm1, %v12002_v11 }
  0xdd   : > { %v599_v6 = vpop.f32.mrf.mxu0  ;;  %v916_v58 = vpop.f32.mrf.mxu1 }
  0xde   : > { %v12579_v59 = vadd.f32 %v916_v58, %v599_v6 }
  0xdf   : > { %v10512_v60 = vpop.f32.mrf.mxu0  ;;  %v10586_v63 = vpop.f32.mrf.mxu1  ;;  %10807 = vmatmul.mubr.msk.f32.gmra.mxu0 %vm364_vm1, %v12035_v15  ;;  %10881 = vmatmul.mubr.msk.f32.gmra.mxu1 %vm364_vm1, %v12007_v12 }
  0xe0   : > { %16465 = vst [vmem:[#allocation3_spill] sm:$0xff] %v12579_v59  ;;  %v12585_v8 = vadd.f32 %v10586_v63, %v10512_v60  ;;  %10809 = vmatprep.mubr.msk.f32.mxu0 %vm364_vm1, %v12038_v16  ;;  %10883 = vmatprep.mubr.msk.f32.mxu1 %vm364_vm1, %v12021_v13 }
  0xe1   : > { %v609_v11 = vpop.f32.mrf.mxu0  ;;  %v926_v0 = vpop.f32.mrf.mxu1 }
  0xe2   : > { %16466 = vst [vmem:[#allocation4_spill] sm:$0xff] %v12585_v8  ;;  %v12591_v2 = vadd.f32 %v926_v0, %v609_v11 }
  0xe3   : > { %v10515_v3 = vpop.f32.mrf.mxu0  ;;  %v10589_v7 = vpop.f32.mrf.mxu1  ;;  %10810 = vmatmul.mubr.msk.f32.gmra.mxu0 %vm364_vm1, %v12049_v17  ;;  %10884 = vmatmul.mubr.msk.f32.gmra.mxu1 %vm364_vm1, %v12024_v14 }
  0xe4   : > { %16467 = vst [vmem:[#allocation5_spill] sm:$0xff] %v12591_v2  ;;  %v12597_v12 = vadd.f32 %v10589_v7, %v10515_v3  ;;  %10812 = vmatprep.mubr.msk.f32.mxu0 %vm364_vm1, %v12052_v18  ;;  %10886 = vmatprep.mubr.msk.f32.mxu1 %vm364_vm1, %v12035_v15 }
  0xe5   : > { %v619_v13 = vpop.f32.mrf.mxu0  ;;  %v936_v9 = vpop.f32.mrf.mxu1 }
  0xe6   : > { %16468 = vst [vmem:[#allocation6_spill] sm:$0xff] %v12597_v12  ;;  %v12603_v41 = vadd.f32 %v936_v9, %v619_v13 }
  0xe7   : > { %v10518_v57 = vpop.f32.mrf.mxu0  ;;  %v10592_v6 = vpop.f32.mrf.mxu1  ;;  %10813 = vmatmul.mubr.msk.f32.gmra.mxu0 %vm364_vm1, %v12063_v19  ;;  %10887 = vmatmul.mubr.msk.f32.gmra.mxu1 %vm364_vm1, %v12038_v16 }
  0xe8   : > { %16469 = vst [vmem:[#allocation7_spill] sm:$0xff] %v12603_v41  ;;  %v12609_v14 = vadd.f32 %v10592_v6, %v10518_v57  ;;  %10815 = vmatprep.mubr.msk.f32.mxu0 %vm364_vm1, %v12066_v20  ;;  %10889 = vmatprep.mubr.msk.f32.mxu1 %vm364_vm1, %v12049_v17 }
  0xe9   : > { %v629_v15 = vpop.f32.mrf.mxu0  ;;  %v946_v58 = vpop.f32.mrf.mxu1 }
  0xea   : > { %16470 = vst [vmem:[#allocation8_spill] sm:$0xff] %v12609_v14  ;;  %v12615_v60 = vadd.f32 %v946_v58, %v629_v15 }
  0xeb   : > { %v10521_v63 = vpop.f32.mrf.mxu0  ;;  %v10595_v11 = vpop.f32.mrf.mxu1  ;;  %10816 = vmatmul.mubr.msk.f32.gmra.mxu0 %vm364_vm1, %v12077_v21  ;;  %10890 = vmatmul.mubr.msk.f32.gmra.mxu1 %vm364_vm1, %v12052_v18 }
  0xec   : > { %16471 = vst [vmem:[#allocation9_spill] sm:$0xff] %v12615_v60  ;;  %v12621_v16 = vadd.f32 %v10595_v11, %v10521_v63  ;;  %10818 = vmatprep.mubr.msk.f32.mxu0 %vm364_vm1, %v12080_v22  ;;  %10892 = vmatprep.mubr.msk.f32.mxu1 %vm364_vm1, %v12063_v19 }
  0xed   : > { %v639_v17 = vpop.f32.mrf.mxu0  ;;  %v956_v0 = vpop.f32.mrf.mxu1 }
  0xee   : > { %16472 = vst [vmem:[#allocation10_spill] sm:$0xff] %v12621_v16  ;;  %v12627_v3 = vadd.f32 %v956_v0, %v639_v17 }
  0xef   : > { %v10524_v7 = vpop.f32.mrf.mxu0  ;;  %v10598_v13 = vpop.f32.mrf.mxu1  ;;  %10819 = vmatmul.mubr.msk.f32.gmra.mxu0 %vm364_vm1, %v12091_v23  ;;  %10893 = vmatmul.mubr.msk.f32.gmra.mxu1 %vm364_vm1, %v12066_v20 }
  0xf0   : > { %16473 = vst [vmem:[#allocation11_spill] sm:$0xff] %v12627_v3  ;;  %v12633_v18 = vadd.f32 %v10598_v13, %v10524_v7  ;;  %10821 = vmatprep.mubr.msk.f32.mxu0 %vm364_vm1, %v12094_v24  ;;  %10895 = vmatprep.mubr.msk.f32.mxu1 %vm364_vm1, %v12077_v21 }
  0xf1   : > { %v649_v19 = vpop.f32.mrf.mxu0  ;;  %v966_v9 = vpop.f32.mrf.mxu1 }
  0xf2   : > { %16474 = vst [vmem:[#allocation12_spill] sm:$0xff] %v12633_v18  ;;  %v12639_v57 = vadd.f32 %v966_v9, %v649_v19 }
  0xf3   : > { %v10527_v6 = vpop.f32.mrf.mxu0  ;;  %v10601_v15 = vpop.f32.mrf.mxu1  ;;  %10822 = vmatmul.mubr.msk.f32.gmra.mxu0 %vm364_vm1, %v12105_v25  ;;  %10896 = vmatmul.mubr.msk.f32.gmra.mxu1 %vm364_vm1, %v12080_v22 }
  0xf4   : > { %16475 = vst [vmem:[#allocation13_spill] sm:$0xff] %v12639_v57  ;;  %v12645_v20 = vadd.f32 %v10601_v15, %v10527_v6  ;;  %10824 = vmatprep.mubr.msk.f32.mxu0 %vm364_vm1, %v12108_v26  ;;  %10898 = vmatprep.mubr.msk.f32.mxu1 %vm364_vm1, %v12091_v23  ;;  %v4323_v57 = vld [vmem:[%s16453_s1 + $0x160] sm:$0xff] }
  0xf5   : > { %v659_v21 = vpop.f32.mrf.mxu0  ;;  %v976_v58 = vpop.f32.mrf.mxu1 }
  0xf6   : > { %16476 = vst [vmem:[#allocation14_spill] sm:$0xff] %v12645_v20  ;;  %v12651_v63 = vadd.f32 %v976_v58, %v659_v21 }
  0xf7   : > { %v10530_v11 = vpop.f32.mrf.mxu0  ;;  %v10604_v17 = vpop.f32.mrf.mxu1  ;;  %10825 = vmatmul.mubr.msk.f32.gmra.mxu0 %vm364_vm1, %v12119_v27  ;;  %10899 = vmatmul.mubr.msk.f32.gmra.mxu1 %vm364_vm1, %v12094_v24 }
  0xf8   : > { %16477 = vst [vmem:[#allocation15_spill] sm:$0xff] %v12651_v63  ;;  %v12657_v22 = vadd.f32 %v10604_v17, %v10530_v11  ;;  %10827 = vmatprep.mubr.msk.f32.mxu0 %vm364_vm1, %v12122_v28  ;;  %10901 = vmatprep.mubr.msk.f32.mxu1 %vm364_vm1, %v12105_v25  ;;  %v4319_v63 = vld [vmem:[%s16453_s1 + $0x140] sm:$0xff] }
  0xf9   : > { %v669_v23 = vpop.f32.mrf.mxu0  ;;  %v986_v0 = vpop.f32.mrf.mxu1 }
  0xfa   : > { %16478 = vst [vmem:[#allocation16_spill] sm:$0xff] %v12657_v22  ;;  %v12663_v7 = vadd.f32 %v986_v0, %v669_v23 }
  0xfb   : > { %v10533_v13 = vpop.f32.mrf.mxu0  ;;  %v10607_v19 = vpop.f32.mrf.mxu1  ;;  %10828 = vmatmul.mubr.msk.f32.gmra.mxu0 %vm364_vm1, %v12133_v29  ;;  %10902 = vmatmul.mubr.msk.f32.gmra.mxu1 %vm364_vm1, %v12108_v26 }
  0xfc   : > { %16479 = vst [vmem:[#allocation17_spill] sm:$0xff] %v12663_v7  ;;  %v12669_v24 = vadd.f32 %v10607_v19, %v10533_v13  ;;  %10830 = vmatprep.mubr.msk.f32.mxu0 %vm364_vm1, %v12136_v30  ;;  %10904 = vmatprep.mubr.msk.f32.mxu1 %vm364_vm1, %v12119_v27 }
  0xfd   : > { %v679_v25 = vpop.f32.mrf.mxu0  ;;  %v996_v9 = vpop.f32.mrf.mxu1 }
  0xfe   : > { %16480 = vst [vmem:[#allocation18_spill] sm:$0xff] %v12669_v24  ;;  %v12675_v6 = vadd.f32 %v996_v9, %v679_v25 }
  0xff   : > { %v10536_v15 = vpop.f32.mrf.mxu0  ;;  %v10610_v21 = vpop.f32.mrf.mxu1  ;;  %10831 = vmatmul.mubr.msk.f32.gmra.mxu0 %vm364_vm1, %v12147_v31  ;;  %10905 = vmatmul.mubr.msk.f32.gmra.mxu1 %vm364_vm1, %v12122_v28 }
 0x100   : > { %16481 = vst [vmem:[#allocation19_spill] sm:$0xff] %v12675_v6  ;;  %v12681_v26 = vadd.f32 %v10610_v21, %v10536_v15  ;;  %10833 = vmatprep.mubr.msk.f32.mxu0 %vm364_vm1, %v12150_v32  ;;  %10907 = vmatprep.mubr.msk.f32.mxu1 %vm364_vm1, %v12133_v29  ;;  %v11886_v21 = vmov 0   ;;  %v13113_v6 = vld [vmem:[%s11965_s18 + $0xd0] sm:$0xff] }
 0x101   : > { %v689_v27 = vpop.f32.mrf.mxu0  ;;  %v1006_v58 = vpop.f32.mrf.mxu1  ;;  %11843 = vset.pattern.permute.xlu0 %v11886_v21  ;;  %11844 = vset.pattern.permute.xlu1 %v11886_v21 }
 0x102   : > { %16482 = vst [vmem:[#allocation20_spill] sm:$0xff] %v12681_v26  ;;  %v12687_v11 = vadd.f32 %v1006_v58, %v689_v27  ;;  %v4279_v27 = vld [vmem:[%s16453_s1] sm:$0xff] }
 0x103   : > { %v10539_v17 = vpop.f32.mrf.mxu0  ;;  %v10613_v23 = vpop.f32.mrf.mxu1  ;;  %10834 = vmatmul.mubr.msk.f32.gmra.mxu0 %vm364_vm1, %v12161_v33  ;;  %10908 = vmatmul.mubr.msk.f32.gmra.mxu1 %vm364_vm1, %v12136_v30  ;;  %v4315_v26 = vld [vmem:[%s16453_s1 + $0x120] sm:$0xff] }
 0x104   : > { %16483 = vst [vmem:[#allocation21_spill] sm:$0xff] %v12687_v11  ;;  %v12693_v28 = vadd.f32 %v10613_v23, %v10539_v17  ;;  %10836 = vmatprep.mubr.msk.f32.mxu0 %vm364_vm1, %v12164_v34  ;;  %10910 = vmatprep.mubr.msk.f32.mxu1 %vm364_vm1, %v12147_v31 }
 0x105   : > { %v699_v29 = vpop.f32.mrf.mxu0  ;;  %v1016_v0 = vpop.f32.mrf.mxu1  ;;  %4329 = vperm.xlu0 %11843, %v4279_v27   ;;  %v4282_v27 = vld [vmem:[%s16453_s1 + $0x18] sm:$0xff] }
 0x106   : > { %16484 = vst [vmem:[#allocation22_spill] sm:$0xff] %v12693_v28  ;;  %v12699_v13 = vadd.f32 %v1016_v0, %v699_v29  ;;  %v4281_v0 = vld [vmem:[%s16453_s1 + $0x10] sm:$0xff] }
 0x107   : > { %v10542_v19 = vpop.f32.mrf.mxu0  ;;  %v10616_v25 = vpop.f32.mrf.mxu1  ;;  %10837 = vmatmul.mubr.msk.f32.gmra.mxu0 %vm364_vm1, %v12175_v35  ;;  %10911 = vmatmul.mubr.msk.f32.gmra.mxu1 %vm364_vm1, %v12150_v32 }
 0x108   : > { %16485 = vst [vmem:[#allocation23_spill] sm:$0xff] %v12699_v13  ;;  %v12705_v30 = vadd.f32 %v10616_v25, %v10542_v19  ;;  %10839 = vmatprep.mubr.msk.f32.mxu0 %vm364_vm1, %v12178_v36  ;;  %10913 = vmatprep.mubr.msk.f32.mxu1 %vm364_vm1, %v12161_v33  ;;  %v13089_v13 = vld [vmem:[%s11965_s18 + $0xc0] sm:$0xff] }
 0x109   : > { %v709_v31 = vpop.f32.mrf.mxu0  ;;  %v1026_v9 = vpop.f32.mrf.mxu1  ;;  %4339 = vperm.xlu1 %11844, %v4281_v0  }
 0x10a   : > { %16486 = vst [vmem:[#allocation24_spill] sm:$0xff] %v12705_v30  ;;  %v12711_v15 = vadd.f32 %v1026_v9, %v709_v31  ;;  %v4313_v30 = vld [vmem:[%s16453_s1 + $0x110] sm:$0xff] }
 0x10b   : > { %v10545_v32 = vpop.f32.mrf.mxu0  ;;  %v10619_v58 = vpop.f32.mrf.mxu1  ;;  %10840 = vmatmul.mubr.msk.f32.gmra.mxu0 %vm364_vm1, %v12189_v37  ;;  %10914 = vmatmul.mubr.msk.f32.gmra.mxu1 %vm364_vm1, %v12164_v34  ;;  %v4280_v34 = vld [vmem:[%s16453_s1 + $0x8] sm:$0xff] }
 0x10c   : > { %16487 = vst [vmem:[#allocation25_spill] sm:$0xff] %v12711_v15  ;;  %v12720_v33 = vadd.f32 %v10619_v58, %v10545_v32  ;;  %10842 = vmatprep.mubr.msk.f32.mxu0 %vm364_vm1, %v12192_v38  ;;  %10916 = vmatprep.mubr.msk.f32.mxu1 %vm364_vm1, %v12175_v35 }
 0x10d   : > { %v719_v17 = vpop.f32.mrf.mxu0  ;;  %v1036_v23 = vpop.f32.mrf.mxu1  ;;  %4334 = vperm.xlu0 %11843, %v4280_v34   ;;  %4344 = vperm.xlu1 %11844, %v4282_v27   ;;  %v4284_v34 = vld [vmem:[%s16453_s1 + $0x28] sm:$0xff] }
 0x10e   : > { %16488 = vst [vmem:[#allocation26_spill] sm:$0xff] %v12720_v33  ;;  %v12726_v29 = vadd.f32 %v1036_v23, %v719_v17 }
 0x10f   : > { %v10548_v19 = vpop.f32.mrf.mxu0  ;;  %v10622_v25 = vpop.f32.mrf.mxu1  ;;  %10843 = vmatmul.mubr.msk.f32.gmra.mxu0 %vm364_vm1, %v12203_v39  ;;  %10917 = vmatmul.mubr.msk.f32.gmra.mxu1 %vm364_vm1, %v12178_v36  ;;  %v4283_v36 = vld [vmem:[%s16453_s1 + $0x20] sm:$0xff] }
 0x110   : > { %16489 = vst [vmem:[#allocation27_spill] sm:$0xff] %v12726_v29  ;;  %v12738_v35 = vadd.f32 %v10622_v25, %v10548_v19  ;;  %10845 = vmatprep.mubr.msk.f32.mxu0 %vm364_vm1, %v12206_v40  ;;  %10919 = vmatprep.mubr.msk.f32.mxu1 %vm364_vm1, %v12189_v37  ;;  %v13065_v29 = vld [vmem:[%s11965_s18 + $0xb0] sm:$0xff] }
 0x111   : > { %v729_v31 = vpop.f32.mrf.mxu0  ;;  %v1046_v9 = vpop.f32.mrf.mxu1  ;;  %4349 = vperm.xlu0 %11843, %v4283_v36   ;;  %4354 = vperm.xlu1 %11844, %v4284_v34   ;;  %v4286_v36 = vld [vmem:[%s16453_s1 + $0x38] sm:$0xff] }
 0x112   : > { %16490 = vst [vmem:[#allocation28_spill] sm:$0xff] %v12738_v35  ;;  %v12744_v21 = vadd.f32 %v1046_v9, %v729_v31  ;;  %v4311_v35 = vld [vmem:[%s16453_s1 + $0x100] sm:$0xff] }
 0x113   : > { %v10551_v32 = vpop.f32.mrf.mxu0  ;;  %v10625_v58 = vpop.f32.mrf.mxu1  ;;  %10846 = vmatmul.mubr.msk.f32.gmra.mxu0 %vm364_vm1, %v12220_v42  ;;  %10920 = vmatmul.mubr.msk.f32.gmra.mxu1 %vm364_vm1, %v12192_v38  ;;  %v4285_v38 = vld [vmem:[%s16453_s1 + $0x30] sm:$0xff] }
 0x114   : > { %16491 = vst [vmem:[#allocation29_spill] sm:$0xff] %v12744_v21  ;;  %v12756_v37 = vadd.f32 %v10625_v58, %v10551_v32  ;;  %10848 = vmatprep.mubr.msk.f32.mxu0 %vm364_vm1, %v12223_v43  ;;  %10922 = vmatprep.mubr.msk.f32.mxu1 %vm364_vm1, %v12203_v39 }
 0x115   : > { %v739_v17 = vpop.f32.mrf.mxu0  ;;  %v1056_v23 = vpop.f32.mrf.mxu1  ;;  %4359 = vperm.xlu0 %11843, %v4285_v38   ;;  %4364 = vperm.xlu1 %11844, %v4286_v36   ;;  %v4288_v38 = vld [vmem:[%s16453_s1 + $0x48] sm:$0xff] }
 0x116   : > { %16492 = vst [vmem:[#allocation30_spill] sm:$0xff] %v12756_v37  ;;  %v12762_v0 = vadd.f32 %v1056_v23, %v739_v17 }
 0x117   : > { %v10554_v19 = vpop.f32.mrf.mxu0  ;;  %v10628_v25 = vpop.f32.mrf.mxu1  ;;  %10849 = vmatmul.mubr.msk.f32.gmra.mxu0 %vm364_vm1, %v12235_v44  ;;  %10923 = vmatmul.mubr.msk.f32.gmra.mxu1 %vm364_vm1, %v12206_v40  ;;  %v4287_v40 = vld [vmem:[%s16453_s1 + $0x40] sm:$0xff] }
 0x118   : > { %16493 = vst [vmem:[#allocation31_spill] sm:$0xff] %v12762_v0  ;;  %v12774_v39 = vadd.f32 %v10628_v25, %v10554_v19  ;;  %10851 = vmatprep.mubr.msk.f32.mxu0 %vm364_vm1, %v12238_v45  ;;  %10925 = vmatprep.mubr.msk.f32.mxu1 %vm364_vm1, %v12220_v42  ;;  %v13041_v0 = vld [vmem:[%s11965_s18 + $0xa0] sm:$0xff] }
 0x119   : > { %v749_v31 = vpop.f32.mrf.mxu0  ;;  %v1066_v9 = vpop.f32.mrf.mxu1  ;;  %4369 = vperm.xlu0 %11843, %v4287_v40   ;;  %4374 = vperm.xlu1 %11844, %v4288_v38   ;;  %v4290_v40 = vld [vmem:[%s16453_s1 + $0x58] sm:$0xff] }
 0x11a   : > { %16494 = vst [vmem:[#allocation32_spill] sm:$0xff] %v12774_v39  ;;  %v12780_v27 = vadd.f32 %v1066_v9, %v749_v31  ;;  %v4309_v39 = vld [vmem:[%s16453_s1 + $0xf0] sm:$0xff] }
 0x11b   : > { %v10557_v32 = vpop.f32.mrf.mxu0  ;;  %v10631_v58 = vpop.f32.mrf.mxu1  ;;  %10852 = vmatmul.mubr.msk.f32.gmra.mxu0 %vm364_vm1, %v12249_v46  ;;  %10926 = vmatmul.mubr.msk.f32.gmra.mxu1 %vm364_vm1, %v12223_v43  ;;  %v4289_v43 = vld [vmem:[%s16453_s1 + $0x50] sm:$0xff] }
 0x11c   : > { %16495 = vst [vmem:[#allocation33_spill] sm:$0xff] %v12780_v27  ;;  %v12792_v42 = vadd.f32 %v10631_v58, %v10557_v32  ;;  %10854 = vmatprep.mubr.msk.f32.mxu0 %vm364_vm1, %v12252_v47  ;;  %10928 = vmatprep.mubr.msk.f32.mxu1 %vm364_vm1, %v12235_v44 }
 0x11d   : > { %v759_v17 = vpop.f32.mrf.mxu0  ;;  %v1076_v23 = vpop.f32.mrf.mxu1  ;;  %4379 = vperm.xlu0 %11843, %v4289_v43   ;;  %4384 = vperm.xlu1 %11844, %v4290_v40   ;;  %v4292_v43 = vld [vmem:[%s16453_s1 + $0x68] sm:$0xff] }
 0x11e   : > { %16496 = vst [vmem:[#allocation34_spill] sm:$0xff] %v12792_v42  ;;  %v12798_v34 = vadd.f32 %v1076_v23, %v759_v17 }
 0x11f   : > { %v10560_v19 = vpop.f32.mrf.mxu0  ;;  %v10634_v25 = vpop.f32.mrf.mxu1  ;;  %10855 = vmatmul.mubr.msk.f32.gmra.mxu0 %vm364_vm1, %v12263_v48  ;;  %10929 = vmatmul.mubr.msk.f32.gmra.mxu1 %vm364_vm1, %v12238_v45  ;;  %v4291_v45 = vld [vmem:[%s16453_s1 + $0x60] sm:$0xff] }
 0x120   : > { %16497 = vst [vmem:[#allocation35_spill] sm:$0xff] %v12798_v34  ;;  %v12810_v44 = vadd.f32 %v10634_v25, %v10560_v19  ;;  %10857 = vmatprep.mubr.msk.f32.mxu0 %vm364_vm1, %v12266_v49  ;;  %10931 = vmatprep.mubr.msk.f32.mxu1 %vm364_vm1, %v12249_v46  ;;  %v13017_v34 = vld [vmem:[%s11965_s18 + $0x90] sm:$0xff] }
 0x121   : > { %v769_v31 = vpop.f32.mrf.mxu0  ;;  %v1086_v9 = vpop.f32.mrf.mxu1  ;;  %4389 = vperm.xlu0 %11843, %v4291_v45   ;;  %4394 = vperm.xlu1 %11844, %v4292_v43   ;;  %v4294_v45 = vld [vmem:[%s16453_s1 + $0x78] sm:$0xff] }
 0x122   : > { %16498 = vst [vmem:[#allocation36_spill] sm:$0xff] %v12810_v44  ;;  %v12816_v36 = vadd.f32 %v1086_v9, %v769_v31  ;;  %v4307_v44 = vld [vmem:[%s16453_s1 + $0xe0] sm:$0xff] }
 0x123   : > { %v10563_v32 = vpop.f32.mrf.mxu0  ;;  %v10637_v58 = vpop.f32.mrf.mxu1  ;;  %10858 = vmatmul.mubr.msk.f32.gmra.mxu0 %vm364_vm1, %v12277_v50  ;;  %10932 = vmatmul.mubr.msk.f32.gmra.mxu1 %vm364_vm1, %v12252_v47  ;;  %v4293_v47 = vld [vmem:[%s16453_s1 + $0x70] sm:$0xff] }
 0x124   : > { %16499 = vst [vmem:[#allocation37_spill] sm:$0xff] %v12816_v36  ;;  %v12828_v46 = vadd.f32 %v10637_v58, %v10563_v32  ;;  %10860 = vmatprep.mubr.msk.f32.mxu0 %vm364_vm1, %v12280_v51  ;;  %10934 = vmatprep.mubr.msk.f32.mxu1 %vm364_vm1, %v12263_v48 }
 0x125   : > { %v779_v17 = vpop.f32.mrf.mxu0  ;;  %v1096_v23 = vpop.f32.mrf.mxu1  ;;  %4399 = vperm.xlu0 %11843, %v4293_v47   ;;  %4404 = vperm.xlu1 %11844, %v4294_v45  }
 0x126   : > { %16500 = vst [vmem:[#allocation38_spill] sm:$0xff] %v12828_v46  ;;  %v12834_v38 = vadd.f32 %v1096_v23, %v779_v17 }
 0x127   : > { %v10566_v19 = vpop.f32.mrf.mxu0  ;;  %v10640_v25 = vpop.f32.mrf.mxu1  ;;  %10861 = vmatmul.mubr.msk.f32.gmra.mxu0 %vm364_vm1, %v12291_v52  ;;  %10935 = vmatmul.mubr.msk.f32.gmra.mxu1 %vm364_vm1, %v12266_v49  ;;  %v4295_v49 = vld [vmem:[%s16453_s1 + $0x80] sm:$0xff] }
 0x128   : > { %16501 = vst [vmem:[#allocation39_spill] sm:$0xff] %v12834_v38  ;;  %v12846_v48 = vadd.f32 %v10640_v25, %v10566_v19  ;;  %10863 = vmatprep.mubr.msk.f32.mxu0 %vm364_vm1, %v12294_v53  ;;  %10937 = vmatprep.mubr.msk.f32.mxu1 %vm364_vm1, %v12277_v50  ;;  %v12885_v19 = vld [vmem:[%s11965_s18 + $0x30] sm:$0xff]  ;;  %v12993_v38 = vld [vmem:[%s11965_s18 + $0x80] sm:$0xff] }
 0x129   : > { %v789_v31 = vpop.f32.mrf.mxu0  ;;  %v1106_v9 = vpop.f32.mrf.mxu1  ;;  %4409 = vperm.xlu0 %11843, %v4295_v49   ;;  %v12897_v49 = vld [vmem:[%s11965_s18 + $0x38] sm:$0xff] }
 0x12a   : > { %16502 = vst [vmem:[#allocation40_spill] sm:$0xff] %v12846_v48  ;;  %v12852_v40 = vadd.f32 %v1106_v9, %v789_v31 }
 0x12b   : > { %v10569_v32 = vpop.f32.mrf.mxu0  ;;  %v10643_v58 = vpop.f32.mrf.mxu1  ;;  %10864 = vmatmul.mubr.msk.f32.gmra.mxu0 %vm364_vm1, %v12305_v54  ;;  %10938 = vmatmul.mubr.msk.f32.gmra.mxu1 %vm364_vm1, %v12280_v51  ;;  %v4296_v54 = vld [vmem:[%s16453_s1 + $0x88] sm:$0xff]  ;;  %v4297_v51 = vld [vmem:[%s16453_s1 + $0x90] sm:$0xff] }
 0x12c   : > { %16503 = vst [vmem:[#allocation41_spill] sm:$0xff] %v12852_v40  ;;  %v12864_v50 = vadd.f32 %v10643_v58, %v10569_v32  ;;  %10866 = vmatprep.mubr.msk.f32.mxu0 %vm364_vm1, %v12308_v55  ;;  %10940 = vmatprep.mubr.msk.f32.mxu1 %vm364_vm1, %v12291_v52  ;;  %v4299_v32 = vld [vmem:[%s16453_s1 + $0xa0] sm:$0xff]  ;;  %v12974_v40 = vld [vmem:[%s11965_s18 + $0x68] sm:$0xff] }
 0x12d   : > { %v799_v17 = vpop.f32.mrf.mxu0  ;;  %v1116_v23 = vpop.f32.mrf.mxu1  ;;  %4414 = vperm.xlu1 %11844, %v4296_v54   ;;  %4419 = vperm.xlu0 %11843, %v4297_v51  }
 0x12e   : > { %16504 = vst [vmem:[#allocation42_spill] sm:$0xff] %v12864_v50  ;;  %v12870_v43 = vadd.f32 %v1116_v23, %v799_v17  ;;  %v12911_v17 = vld [vmem:[%s11965_s18 + $0x40] sm:$0xff] }
 0x12f   : > { %v10572_v47 = vpop.f32.mrf.mxu0  ;;  %v10646_v55 = vpop.f32.mrf.mxu1  ;;  %10867 = vmatmul.mubr.msk.f32.gmra.mxu0 %vm364_vm1, %v12319_v56  ;;  %10941 = vmatmul.mubr.msk.f32.gmra.mxu1 %vm364_vm1, %v12294_v53  ;;  %v4298_v53 = vld [vmem:[%s16453_s1 + $0x98] sm:$0xff] }
 0x130   : > { %16505 = vst [vmem:[#allocation43_spill] sm:$0xff] %v12870_v43  ;;  %v12882_v52 = vadd.f32 %v10646_v55, %v10572_v47  ;;  %10945 = vmatprep.mubr.msk.f32.mxu0 %vm364_vm1, %v12885_v19  ;;  %11019 = vmatprep.mubr.msk.f32.mxu1 %vm364_vm1, %v12885_v19  ;;  %v4300_v47 = vld [vmem:[%s16453_s1 + $0xa8] sm:$0xff] }
 0x131   : > { %v809_v25 = vpop.f32.mrf.mxu0  ;;  %v1126_v31 = vpop.f32.mrf.mxu1  ;;  %4424 = vperm.xlu1 %11844, %v4298_v53   ;;  %4429 = vperm.xlu0 %11843, %v4299_v32  }
 0x132   : > { %16506 = vst [vmem:[#allocation44_spill] sm:$0xff] %v12882_v52  ;;  %v12891_v9 = vadd.f32 %v1126_v31, %v809_v25  ;;  %v12923_v25 = vld [vmem:[%s11965_s18 + $0x48] sm:$0xff]  ;;  %v4301_v31 = vld [vmem:[%s16453_s1 + $0xb0] sm:$0xff] }
 0x133   : > { %v10651_v56 = vpop.f32.mrf.mxu0  ;;  %v10725_v45 = vpop.f32.mrf.mxu1  ;;  %10946 = vmatmul.mubr.msk.f32.vlgmr.msra.gmra.mxu0 %vm364_vm1, %v12897_v49  ;;  %11020 = vmatmul.mubr.msk.f32.vlgmr.msra.gmra.mxu1 %vm364_vm1, %v12897_v49  ;;  %v12966_v52 = vld [vmem:[%s11965_s18 + $0x70] sm:$0xff] }
 0x134   : > { %16507 = vst [vmem:[#allocation45_spill] sm:$0xff] %v12891_v9  ;;  %v12906_v58 = vadd.f32 %v10725_v45, %v10651_v56  ;;  %11092 = vmatpush3.msk.msra.mxu0 %vm509_vm0, %v12542_v61  ;;  %10948 = vmatprep.mubr.msk.f32.mxu0 %vm364_vm1, %v12911_v17  ;;  %v12935_v56 = vld [vmem:[%s11965_s18 + $0x50] sm:$0xff] }
 0x135   : > { %v1206_v23 = vpop.f32.mrf.mxu0  ;;  %v1514_v54 = vpop.f32.mrf.mxu1  ;;  %11022 = vmatprep.mubr.msk.f32.mxu1 %vm364_vm1, %v12911_v17  ;;  %4434 = vperm.xlu1 %11844, %v4300_v47   ;;  %v4303_v47 = vld [vmem:[%s16453_s1 + $0xc0] sm:$0xff] }
 0x136   : > { %v12917_v51 = vadd.f32 %v1514_v54, %v1206_v23  ;;  %4439 = vperm.xlu0 %11843, %v4301_v31   ;;  %v4302_v54 = vld [vmem:[%s16453_s1 + $0xb8] sm:$0xff] }
 0x137   : > { %v10654_v61 = vpop.f32.mrf.mxu0  ;;  %v10728_v55 = vpop.f32.mrf.mxu1  ;;  %10949 = vmatmul.mubr.msk.f32.gmra.mxu0 %vm364_vm1, %v12923_v25  ;;  %11023 = vmatmul.mubr.msk.f32.gmra.mxu1 %vm364_vm1, %v12923_v25 }
 0x138   : > { %16508 = vst [vmem:[#allocation46_spill] sm:$0xff] %v12917_v51  ;;  %v12932_v53 = vadd.f32 %v10728_v55, %v10654_v61  ;;  %10951 = vmatprep.mubr.msk.f32.mxu0 %vm364_vm1, %v12935_v56  ;;  %11025 = vmatprep.mubr.msk.f32.mxu1 %vm364_vm1, %v12935_v56  ;;  %v12947_v51 = vld [vmem:[%s11965_s18 + $0x58] sm:$0xff] }
 0x139   : > { %v1216_v45 = vpop.f32.mrf.mxu0  ;;  %v1524_v32 = vpop.f32.mrf.mxu1  ;;  %4444 = vperm.xlu1 %11844, %v4302_v54  }
 0x13a   : > { %v12941_v23 = vadd.f32 %v1524_v32, %v1216_v45  ;;  %v12959_v45 = vld [vmem:[%s11965_s18 + $0x60] sm:$0xff]  ;;  %4449 = vperm.xlu0 %11843, %v4303_v47   ;;  %v12990_v47 = vld [vmem:[%s11965_s18 + $0x78] sm:$0xff] }
 0x13b   : > { %v10657_v61 = vpop.f32.mrf.mxu0  ;;  %v10731_v55 = vpop.f32.mrf.mxu1  ;;  %10952 = vmatmul.mubr.msk.f32.gmra.mxu0 %vm364_vm1, %v12947_v51  ;;  %11026 = vmatmul.mubr.msk.f32.gmra.mxu1 %vm364_vm1, %v12947_v51 }
 0x13c   : > { %16509 = vst [vmem:[#allocation47_spill] sm:$0xff] %v12941_v23  ;;  %v12956_v31 = vadd.f32 %v10731_v55, %v10657_v61  ;;  %10954 = vmatprep.mubr.msk.f32.mxu0 %vm364_vm1, %v12959_v45  ;;  %11028 = vmatprep.mubr.msk.f32.mxu1 %vm364_vm1, %v12959_v45  ;;  %v4304_v61 = vld [vmem:[%s16453_s1 + $0xc8] sm:$0xff] }
 0x13d   : > { %v1226_v32 = vpop.f32.mrf.mxu0  ;;  %v1534_v9 = vpop.f32.mrf.mxu1  ;;  %4454 = vperm.xlu1 %11844, %v4304_v61  }
 0x13e   : > { %16510 = vst [vmem:[#allocation48_spill] sm:$0xff] %v12956_v31  ;;  %v12968_v43 = vadd.f32 %v1534_v9, %v1226_v32  ;;  %v4305_v9 = vld [vmem:[%s16453_s1 + $0xd0] sm:$0xff] }
 0x13f   : > { %v10660_v55 = vpop.f32.mrf.mxu0  ;;  %v10734_v50 = vpop.f32.mrf.mxu1  ;;  %10955 = vmatmul.mubr.msk.f32.gmra.mxu0 %vm364_vm1, %v12974_v40  ;;  %11029 = vmatmul.mubr.msk.f32.gmra.mxu1 %vm364_vm1, %v12974_v40 }
 0x140   : > { %16511 = vst [vmem:[#allocation49_spill] sm:$0xff] %v12968_v43  ;;  %v12983_v54 = vadd.f32 %v10734_v50, %v10660_v55  ;;  %10957 = vmatprep.mubr.msk.f32.mxu0 %vm364_vm1, %v12966_v52  ;;  %11031 = vmatprep.mubr.msk.f32.mxu1 %vm364_vm1, %v12966_v52  ;;  %v4306_v50 = vld [vmem:[%s16453_s1 + $0xd8] sm:$0xff] }
 0x141   : > { %v1236_v32 = vpop.f32.mrf.mxu0  ;;  %v1544_v48 = vpop.f32.mrf.mxu1  ;;  %4459 = vperm.xlu0 %11843, %v4305_v9   ;;  %4464 = vperm.xlu1 %11844, %v4306_v50  }
 0x142   : > { %16512 = vst [vmem:[#allocation50_spill] sm:$0xff] %v12983_v54  ;;  %v12995_v46 = vadd.f32 %v1544_v48, %v1236_v32  ;;  %v13014_v48 = vld [vmem:[%s11965_s18 + $0x88] sm:$0xff] }
 0x143   : > { %v10663_v55 = vpop.f32.mrf.mxu0  ;;  %v10737_v36 = vpop.f32.mrf.mxu1  ;;  %10958 = vmatmul.mubr.msk.f32.gmra.mxu0 %vm364_vm1, %v12990_v47  ;;  %11032 = vmatmul.mubr.msk.f32.gmra.mxu1 %vm364_vm1, %v12990_v47 }
 0x144   : > { %16513 = vst [vmem:[#allocation51_spill] sm:$0xff] %v12995_v46  ;;  %v13007_v61 = vadd.f32 %v10737_v36, %v10663_v55  ;;  %10960 = vmatprep.mubr.msk.f32.mxu0 %vm364_vm1, %v12993_v38  ;;  %11034 = vmatprep.mubr.msk.f32.mxu1 %vm364_vm1, %v12993_v38  ;;  %v4308_v36 = vld [vmem:[%s16453_s1 + $0xe8] sm:$0xff] }
 0x145   : > { %v1246_v9 = vpop.f32.mrf.mxu0  ;;  %v1554_v32 = vpop.f32.mrf.mxu1  ;;  %4469 = vperm.xlu0 %11843, %v4307_v44   ;;  %v13038_v44 = vld [vmem:[%s11965_s18 + $0x98] sm:$0xff]  ;;  %4474 = vperm.xlu1 %11844, %v4308_v36  }
 0x146   : > { %16514 = vst [vmem:[#allocation52_spill] sm:$0xff] %v13007_v61  ;;  %v13019_v42 = vadd.f32 %v1554_v32, %v1246_v9 }
 0x147   : > { %v10666_v55 = vpop.f32.mrf.mxu0  ;;  %v10740_v27 = vpop.f32.mrf.mxu1  ;;  %10961 = vmatmul.mubr.msk.f32.gmra.mxu0 %vm364_vm1, %v13014_v48  ;;  %11035 = vmatmul.mubr.msk.f32.gmra.mxu1 %vm364_vm1, %v13014_v48 }
 0x148   : > { %16515 = vst [vmem:[#allocation53_spill] sm:$0xff] %v13019_v42  ;;  %v13031_v50 = vadd.f32 %v10740_v27, %v10666_v55  ;;  %10963 = vmatprep.mubr.msk.f32.mxu0 %vm364_vm1, %v13017_v34  ;;  %11037 = vmatprep.mubr.msk.f32.mxu1 %vm364_vm1, %v13017_v34  ;;  %v4310_v27 = vld [vmem:[%s16453_s1 + $0xf8] sm:$0xff] }
 0x149   : > { %v1256_v9 = vpop.f32.mrf.mxu0  ;;  %v1564_v32 = vpop.f32.mrf.mxu1  ;;  %4479 = vperm.xlu0 %11843, %v4309_v39   ;;  %v13062_v39 = vld [vmem:[%s11965_s18 + $0xa8] sm:$0xff]  ;;  %4484 = vperm.xlu1 %11844, %v4310_v27  }
 0x14a   : > { %16516 = vst [vmem:[#allocation54_spill] sm:$0xff] %v13031_v50  ;;  %v13043_v37 = vadd.f32 %v1564_v32, %v1256_v9 }
 0x14b   : > { %v10669_v55 = vpop.f32.mrf.mxu0  ;;  %v10743_v21 = vpop.f32.mrf.mxu1  ;;  %10964 = vmatmul.mubr.msk.f32.gmra.mxu0 %vm364_vm1, %v13038_v44  ;;  %11038 = vmatmul.mubr.msk.f32.gmra.mxu1 %vm364_vm1, %v13038_v44 }
 0x14c   : > { %16517 = vst [vmem:[#allocation55_spill] sm:$0xff] %v13043_v37  ;;  %v13055_v36 = vadd.f32 %v10743_v21, %v10669_v55  ;;  %10966 = vmatprep.mubr.msk.f32.mxu0 %vm364_vm1, %v13041_v0  ;;  %11040 = vmatprep.mubr.msk.f32.mxu1 %vm364_vm1, %v13041_v0  ;;  %v4312_v21 = vld [vmem:[%s16453_s1 + $0x108] sm:$0xff] }
 0x14d   : > { %v1266_v9 = vpop.f32.mrf.mxu0  ;;  %v1574_v32 = vpop.f32.mrf.mxu1  ;;  %4489 = vperm.xlu0 %11843, %v4311_v35   ;;  %v13086_v35 = vld [vmem:[%s11965_s18 + $0xb8] sm:$0xff]  ;;  %4494 = vperm.xlu1 %11844, %v4312_v21  }
 0x14e   : > { %16518 = vst [vmem:[#allocation56_spill] sm:$0xff] %v13055_v36  ;;  %v13067_v33 = vadd.f32 %v1574_v32, %v1266_v9  ;;  %v4325_v36 = vld [vmem:[%s16453_s1 + $0x170] sm:$0xff] }
 0x14f   : > { %v10672_v55 = vpop.f32.mrf.mxu0  ;;  %v10746_v15 = vpop.f32.mrf.mxu1  ;;  %10967 = vmatmul.mubr.msk.f32.gmra.mxu0 %vm364_vm1, %v13062_v39  ;;  %11041 = vmatmul.mubr.msk.f32.gmra.mxu1 %vm364_vm1, %v13062_v39 }
 0x150   : > { %16519 = vst [vmem:[#allocation57_spill] sm:$0xff] %v13067_v33  ;;  %v13079_v27 = vadd.f32 %v10746_v15, %v10672_v55  ;;  %10969 = vmatprep.mubr.msk.f32.mxu0 %vm364_vm1, %v13065_v29  ;;  %11043 = vmatprep.mubr.msk.f32.mxu1 %vm364_vm1, %v13065_v29  ;;  %v4314_v15 = vld [vmem:[%s16453_s1 + $0x118] sm:$0xff] }
 0x151   : > { %v1276_v9 = vpop.f32.mrf.mxu0  ;;  %v1584_v32 = vpop.f32.mrf.mxu1  ;;  %4499 = vperm.xlu0 %11843, %v4313_v30   ;;  %v13110_v30 = vld [vmem:[%s11965_s18 + $0xc8] sm:$0xff]  ;;  %4504 = vperm.xlu1 %11844, %v4314_v15  }
 0x152   : > { %16520 = vst [vmem:[#allocation58_spill] sm:$0xff] %v13079_v27  ;;  %v13091_v28 = vadd.f32 %v1584_v32, %v1276_v9  ;;  %v4321_v27 = vld [vmem:[%s16453_s1 + $0x150] sm:$0xff] }
 0x153   : > { %v10675_v55 = vpop.f32.mrf.mxu0  ;;  %v10749_v11 = vpop.f32.mrf.mxu1  ;;  %10970 = vmatmul.mubr.msk.f32.gmra.mxu0 %vm364_vm1, %v13086_v35  ;;  %11044 = vmatmul.mubr.msk.f32.gmra.mxu1 %vm364_vm1, %v13086_v35 }
 0x154   : > { %16521 = vst [vmem:[#allocation59_spill] sm:$0xff] %v13091_v28  ;;  %v13103_v21 = vadd.f32 %v10749_v11, %v10675_v55  ;;  %10972 = vmatprep.mubr.msk.f32.mxu0 %vm364_vm1, %v13089_v13  ;;  %11046 = vmatprep.mubr.msk.f32.mxu1 %vm364_vm1, %v13089_v13  ;;  %v4316_v11 = vld [vmem:[%s16453_s1 + $0x128] sm:$0xff] }
 0x155   : > { %v1286_v9 = vpop.f32.mrf.mxu0  ;;  %v1594_v32 = vpop.f32.mrf.mxu1  ;;  %4509 = vperm.xlu0 %11843, %v4315_v26   ;;  %v13134_v26 = vld [vmem:[%s11965_s18 + $0xd8] sm:$0xff]  ;;  %4514 = vperm.xlu1 %11844, %v4316_v11  }
 0x156   : > { %16522 = vst [vmem:[#allocation60_spill] sm:$0xff] %v13103_v21  ;;  %v13115_v24 = vadd.f32 %v1594_v32, %v1286_v9  ;;  %v4317_v21 = vld [vmem:[%s16453_s1 + $0x130] sm:$0xff] }
 0x157   : > { %v10678_v55 = vpop.f32.mrf.mxu0  ;;  %v10752_v7 = vpop.f32.mrf.mxu1  ;;  %10973 = vmatmul.mubr.msk.f32.gmra.mxu0 %vm364_vm1, %v13110_v30  ;;  %11047 = vmatmul.mubr.msk.f32.gmra.mxu1 %vm364_vm1, %v13110_v30 }
 0x158   : > { %16523 = vst [vmem:[#allocation61_spill] sm:$0xff] %v13115_v24  ;;  %v13127_v15 = vadd.f32 %v10752_v7, %v10678_v55  ;;  %10975 = vmatprep.mubr.msk.f32.mxu0 %vm364_vm1, %v13113_v6  ;;  %11049 = vmatprep.mubr.msk.f32.mxu1 %vm364_vm1, %v13113_v6  ;;  %v13137_v24 = vld [vmem:[%s11965_s18 + $0xe0] sm:$0xff]  ;;  %v4318_v7 = vld [vmem:[%s16453_s1 + $0x138] sm:$0xff] }
 0x159   : > { %v1296_v9 = vpop.f32.mrf.mxu0  ;;  %v1604_v32 = vpop.f32.mrf.mxu1  ;;  %4519 = vperm.xlu0 %11843, %v4317_v21   ;;  %v13158_v21 = vld [vmem:[%s11965_s18 + $0xe8] sm:$0xff]  ;;  %4524 = vperm.xlu1 %11844, %v4318_v7  }
 0x15a   : > { %16524 = vst [vmem:[#allocation62_spill] sm:$0xff] %v13127_v15  ;;  %v13139_v22 = vadd.f32 %v1604_v32, %v1296_v9 }
 0x15b   : > { %v10681_v55 = vpop.f32.mrf.mxu0  ;;  %v10755_v15 = vpop.f32.mrf.mxu1  ;;  %10976 = vmatmul.mubr.msk.f32.gmra.mxu0 %vm364_vm1, %v13134_v26  ;;  %11050 = vmatmul.mubr.msk.f32.gmra.mxu1 %vm364_vm1, %v13134_v26 }
 0x15c   : > { %16525 = vst [vmem:[#allocation63_spill] sm:$0xff] %v13139_v22  ;;  %v13151_v11 = vadd.f32 %v10755_v15, %v10681_v55  ;;  %10978 = vmatprep.mubr.msk.f32.mxu0 %vm364_vm1, %v13137_v24  ;;  %11052 = vmatprep.mubr.msk.f32.mxu1 %vm364_vm1, %v13137_v24  ;;  %v13161_v22 = vld [vmem:[%s11965_s18 + $0xf0] sm:$0xff]  ;;  %v4320_v15 = vld [vmem:[%s16453_s1 + $0x148] sm:$0xff] }
 0x15d   : > { %v1306_v9 = vpop.f32.mrf.mxu0  ;;  %v1614_v32 = vpop.f32.mrf.mxu1  ;;  %4529 = vperm.xlu0 %11843, %v4319_v63   ;;  %v13182_v63 = vld [vmem:[%s11965_s18 + $0xf8] sm:$0xff]  ;;  %4534 = vperm.xlu1 %11844, %v4320_v15  }
 0x15e   : > { %16526 = vst [vmem:[#allocation64_spill] sm:$0xff] %v13151_v11  ;;  %v13163_v28 = vadd.f32 %v1614_v32, %v1306_v9 }
 0x15f   : > { %v10684_v55 = vpop.f32.mrf.mxu0  ;;  %v10758_v11 = vpop.f32.mrf.mxu1  ;;  %10979 = vmatmul.mubr.msk.f32.gmra.mxu0 %vm364_vm1, %v13158_v21  ;;  %11053 = vmatmul.mubr.msk.f32.gmra.mxu1 %vm364_vm1, %v13158_v21 }
 0x160   : > { %16527 = vst [vmem:[#allocation65_spill] sm:$0xff] %v13163_v28  ;;  %v13175_v7 = vadd.f32 %v10758_v11, %v10684_v55  ;;  %10981 = vmatprep.mubr.msk.f32.mxu0 %vm364_vm1, %v13161_v22  ;;  %11055 = vmatprep.mubr.msk.f32.mxu1 %vm364_vm1, %v13161_v22  ;;  %v13185_v28 = vld [vmem:[%s11965_s18 + $0x100] sm:$0xff]  ;;  %v4322_v11 = vld [vmem:[%s16453_s1 + $0x158] sm:$0xff] }
 0x161   : > { %v1316_v9 = vpop.f32.mrf.mxu0  ;;  %v1624_v32 = vpop.f32.mrf.mxu1  ;;  %4539 = vperm.xlu0 %11843, %v4321_v27   ;;  %v13206_v27 = vld [vmem:[%s11965_s18 + $0x108] sm:$0xff]  ;;  %4544 = vperm.xlu1 %11844, %v4322_v11  }
 0x162   : > { %16528 = vst [vmem:[#allocation66_spill] sm:$0xff] %v13175_v7  ;;  %v13187_v20 = vadd.f32 %v1624_v32, %v1316_v9 }
 0x163   : > { %v10687_v55 = vpop.f32.mrf.mxu0  ;;  %v10761_v7 = vpop.f32.mrf.mxu1  ;;  %10982 = vmatmul.mubr.msk.f32.gmra.mxu0 %vm364_vm1, %v13182_v63  ;;  %11056 = vmatmul.mubr.msk.f32.gmra.mxu1 %vm364_vm1, %v13182_v63 }
 0x164   : > { %16529 = vst [vmem:[#allocation67_spill] sm:$0xff] %v13187_v20  ;;  %v13199_v15 = vadd.f32 %v10761_v7, %v10687_v55  ;;  %10984 = vmatprep.mubr.msk.f32.mxu0 %vm364_vm1, %v13185_v28  ;;  %11058 = vmatprep.mubr.msk.f32.mxu1 %vm364_vm1, %v13185_v28  ;;  %v13209_v20 = vld [vmem:[%s11965_s18 + $0x110] sm:$0xff]  ;;  %v4324_v7 = vld [vmem:[%s16453_s1 + $0x168] sm:$0xff] }
 0x165   : > { %v1326_v9 = vpop.f32.mrf.mxu0  ;;  %v1634_v32 = vpop.f32.mrf.mxu1  ;;  %4549 = vperm.xlu0 %11843, %v4323_v57   ;;  %v13230_v57 = vld [vmem:[%s11965_s18 + $0x118] sm:$0xff]  ;;  %4554 = vperm.xlu1 %11844, %v4324_v7  }
 0x166   : > { %16530 = vst [vmem:[#allocation68_spill] sm:$0xff] %v13199_v15  ;;  %v13211_v33 = vadd.f32 %v1634_v32, %v1326_v9 }
 0x167   : > { %v10690_v55 = vpop.f32.mrf.mxu0  ;;  %v10764_v15 = vpop.f32.mrf.mxu1  ;;  %10985 = vmatmul.mubr.msk.f32.gmra.mxu0 %vm364_vm1, %v13206_v27  ;;  %11059 = vmatmul.mubr.msk.f32.gmra.mxu1 %vm364_vm1, %v13206_v27 }
 0x168   : > { %16531 = vst [vmem:[#allocation69_spill] sm:$0xff] %v13211_v33  ;;  %v13223_v11 = vadd.f32 %v10764_v15, %v10690_v55  ;;  %10987 = vmatprep.mubr.msk.f32.mxu0 %vm364_vm1, %v13209_v20  ;;  %11061 = vmatprep.mubr.msk.f32.mxu1 %vm364_vm1, %v13209_v20  ;;  %v13233_v33 = vld [vmem:[%s11965_s18 + $0x120] sm:$0xff]  ;;  %v4326_v15 = vld [vmem:[%s16453_s1 + $0x178] sm:$0xff] }
 0x169   : > { %v1336_v9 = vpop.f32.mrf.mxu0  ;;  %v1644_v32 = vpop.f32.mrf.mxu1  ;;  %4559 = vperm.xlu0 %11843, %v4325_v36   ;;  %v13251_v36 = vld [vmem:[%s11965_s18 + $0x128] sm:$0xff]  ;;  %4564 = vperm.xlu1 %11844, %v4326_v15   ;;  %v13269_v15 = vld [vmem:[%s11965_s18 + $0x138] sm:$0xff] }
 0x16a   : > { %16532 = vst [vmem:[#allocation70_spill] sm:$0xff] %v13223_v11  ;;  %v13235_v18 = vadd.f32 %v1644_v32, %v1336_v9  ;;  %v13254_v32 = vld [vmem:[%s11965_s18 + $0x130] sm:$0xff] }
 0x16b   : > { %v10693_v55 = vpop.f32.mrf.mxu0  ;;  %v10767_v11 = vpop.f32.mrf.mxu1  ;;  %10988 = vmatmul.mubr.msk.f32.gmra.mxu0 %vm364_vm1, %v13230_v57  ;;  %11062 = vmatmul.mubr.msk.f32.gmra.mxu1 %vm364_vm1, %v13230_v57 }
 0x16c   : > { %16533 = vst [vmem:[#allocation71_spill] sm:$0xff] %v13235_v18  ;;  %v13244_v3 = vadd.f32 %v10767_v11, %v10693_v55  ;;  %10990 = vmatprep.mubr.msk.f32.mxu0 %vm364_vm1, %v13233_v33  ;;  %11064 = vmatprep.mubr.msk.f32.mxu1 %vm364_vm1, %v13233_v33 }
 0x16d   : > { %v1346_v7 = vpop.f32.mrf.mxu0  ;;  %v1654_v9 = vpop.f32.mrf.mxu1 }
 0x16e   : > { %16534 = vst [vmem:[#allocation72_spill] sm:$0xff] %v13244_v3  ;;  %v13256_v18 = vadd.f32 %v1654_v9, %v1346_v7 }
 0x16f   : > { %v10696_v37 = vpop.f32.mrf.mxu0  ;;  %v10770_v11 = vpop.f32.mrf.mxu1  ;;  %10991 = vmatmul.mubr.msk.f32.gmra.mxu0 %vm364_vm1, %v13251_v36  ;;  %11065 = vmatmul.mubr.msk.f32.gmra.mxu1 %vm364_vm1, %v13251_v36 }
 0x170   : > { %16535 = vst [vmem:[#allocation73_spill] sm:$0xff] %v13256_v18  ;;  %v13262_v55 = vadd.f32 %v10770_v11, %v10696_v37  ;;  %10993 = vmatprep.mubr.msk.f32.mxu0 %vm364_vm1, %v13254_v32  ;;  %11067 = vmatprep.mubr.msk.f32.mxu1 %vm364_vm1, %v13254_v32  ;;  %v13272_v18 = vld [vmem:[%s11965_s18 + $0x140] sm:$0xff]  ;;  %v13287_v11 = vld [vmem:[%s11965_s18 + $0x148] sm:$0xff] }
 0x171   : > { %v1356_v7 = vpop.f32.mrf.mxu0  ;;  %v1664_v9 = vpop.f32.mrf.mxu1 }
 0x172   : > { %16536 = vst [vmem:[#allocation74_spill] sm:$0xff] %v13262_v55  ;;  %v13274_v3 = vadd.f32 %v1664_v9, %v1356_v7 }
 0x173   : > { %v10699_v50 = vpop.f32.mrf.mxu0  ;;  %v10773_v16 = vpop.f32.mrf.mxu1  ;;  %10994 = vmatmul.mubr.msk.f32.gmra.mxu0 %vm364_vm1, %v13269_v15  ;;  %11068 = vmatmul.mubr.msk.f32.gmra.mxu1 %vm364_vm1, %v13269_v15 }
 0x174   : > { %16537 = vst [vmem:[#allocation75_spill] sm:$0xff] %v13274_v3  ;;  %v13280_v37 = vadd.f32 %v10773_v16, %v10699_v50  ;;  %10996 = vmatprep.mubr.msk.f32.mxu0 %vm364_vm1, %v13272_v18  ;;  %11070 = vmatprep.mubr.msk.f32.mxu1 %vm364_vm1, %v13272_v18  ;;  %v13294_v3 = vld [vmem:[%s11965_s18 + $0x150] sm:$0xff]  ;;  %v13307_v50 = vld [vmem:[%s11965_s18 + $0x158] sm:$0xff] }
 0x175   : > { %v13289_v7 = vpop.f32.mrf.mxu0  ;;  %v13291_v9 = vpop.f32.mrf.mxu1 }
 0x176   : > { %16538 = vst [vmem:[#allocation76_spill] sm:$0xff] %v13280_v37  ;;  %16539 = vst [vmem:[#allocation77_spill] sm:$0xff] %v13289_v7  ;;  %v13314_v7 = vld [vmem:[%s11965_s18 + $0x160] sm:$0xff] }
 0x177   : > { %16540 = vst [vmem:[#allocation78_spill] sm:$0xff] %v13291_v9  ;;  %v10702_v55 = vpop.f32.mrf.mxu0  ;;  %v10776_v60 = vpop.f32.mrf.mxu1  ;;  %10997 = vmatmul.mubr.msk.f32.gmra.mxu0 %vm364_vm1, %v13287_v11  ;;  %11071 = vmatmul.mubr.msk.f32.gmra.mxu1 %vm364_vm1, %v13287_v11 }
 0x178   : > { %v13300_v16 = vadd.f32 %v10776_v60, %v10702_v55  ;;  %10999 = vmatprep.mubr.msk.f32.mxu0 %vm364_vm1, %v13294_v3  ;;  %11073 = vmatprep.mubr.msk.f32.mxu1 %vm364_vm1, %v13294_v3  ;;  %v13327_v55 = vld [vmem:[%s11965_s18 + $0x168] sm:$0xff] }
 0x179   : > { %v13309_v37 = vpop.f32.mrf.mxu0  ;;  %v13311_v9 = vpop.f32.mrf.mxu1 }
 0x17a   : > { %16541 = vst [vmem:[#allocation79_spill] sm:$0xff] %v13300_v16  ;;  %16542 = vst [vmem:[#allocation80_spill] sm:$0xff] %v13309_v37  ;;  %v13334_v37 = vld [vmem:[%s11965_s18 + $0x170] sm:$0xff] }
 0x17b   : > { %16543 = vst [vmem:[#allocation81_spill] sm:$0xff] %v13311_v9  ;;  %v10705_v42 = vpop.f32.mrf.mxu0  ;;  %v10779_v61 = vpop.f32.mrf.mxu1  ;;  %11000 = vmatmul.mubr.msk.f32.gmra.mxu0 %vm364_vm1, %v13307_v50  ;;  %11074 = vmatmul.mubr.msk.f32.gmra.mxu1 %vm364_vm1, %v13307_v50 }
 0x17c   : > { %v13320_v60 = vadd.f32 %v10779_v61, %v10705_v42  ;;  %11002 = vmatprep.mubr.msk.f32.mxu0 %vm364_vm1, %v13314_v7  ;;  %11076 = vmatprep.mubr.msk.f32.mxu1 %vm364_vm1, %v13314_v7  ;;  %v13347_v61 = vld [vmem:[%s11965_s18 + $0x178] sm:$0xff] }
 0x17d   : > { %v13329_v16 = vpop.f32.mrf.mxu0  ;;  %v13331_v9 = vpop.f32.mrf.mxu1 }
 0x17e   : > { %16544 = vst [vmem:[#allocation82_spill] sm:$0xff] %v13320_v60  ;;  %16545 = vst [vmem:[#allocation83_spill] sm:$0xff] %v13329_v16  ;;  %v13354_v16 = vld [vmem:[%s11965_s18 + $0x180] sm:$0xff] }
 0x17f   : > { %16546 = vst [vmem:[#allocation84_spill] sm:$0xff] %v13331_v9  ;;  %v10708_v14 = vpop.f32.mrf.mxu0  ;;  %v10782_v41 = vpop.f32.mrf.mxu1  ;;  %11003 = vmatmul.mubr.msk.f32.gmra.mxu0 %vm364_vm1, %v13327_v55  ;;  %11077 = vmatmul.mubr.msk.f32.gmra.mxu1 %vm364_vm1, %v13327_v55 }
 0x180   : > { %v13340_v42 = vadd.f32 %v10782_v41, %v10708_v14  ;;  %11005 = vmatprep.mubr.msk.f32.mxu0 %vm364_vm1, %v13334_v37  ;;  %11079 = vmatprep.mubr.msk.f32.mxu1 %vm364_vm1, %v13334_v37  ;;  %v13367_v14 = vld [vmem:[%s11965_s18 + $0x188] sm:$0xff] }
 0x181   : > { %v13349_v60 = vpop.f32.mrf.mxu0  ;;  %v13351_v9 = vpop.f32.mrf.mxu1 }
 0x182   : > { %16547 = vst [vmem:[#allocation85_spill] sm:$0xff] %v13340_v42  ;;  %16548 = vst [vmem:[#allocation86_spill] sm:$0xff] %v13349_v60  ;;  %v13374_v60 = vld [vmem:[%s11965_s18 + $0x190] sm:$0xff] }
 0x183   : > { %16549 = vst [vmem:[#allocation87_spill] sm:$0xff] %v13351_v9  ;;  %v10711_v46 = vpop.f32.mrf.mxu0  ;;  %v10785_v54 = vpop.f32.mrf.mxu1  ;;  %11006 = vmatmul.mubr.msk.f32.gmra.mxu0 %vm364_vm1, %v13347_v61  ;;  %11080 = vmatmul.mubr.msk.f32.gmra.mxu1 %vm364_vm1, %v13347_v61 }
 0x184   : > { %v13360_v41 = vadd.f32 %v10785_v54, %v10711_v46  ;;  %11008 = vmatprep.mubr.msk.f32.mxu0 %vm364_vm1, %v13354_v16  ;;  %11082 = vmatprep.mubr.msk.f32.mxu1 %vm364_vm1, %v13354_v16  ;;  %v13387_v54 = vld [vmem:[%s11965_s18 + $0x198] sm:$0xff] }
 0x185   : > { %v13369_v42 = vpop.f32.mrf.mxu0  ;;  %v13371_v9 = vpop.f32.mrf.mxu1 }
 0x186   : > { %16550 = vst [vmem:[#allocation88_spill] sm:$0xff] %v13360_v41  ;;  %16551 = vst [vmem:[#allocation89_spill] sm:$0xff] %v13369_v42  ;;  %v13394_v42 = vld [vmem:[%s11965_s18 + $0x1a0] sm:$0xff] }
 0x187   : > { %16552 = vst [vmem:[#allocation90_spill] sm:$0xff] %v13371_v9  ;;  %v10714_v12 = vpop.f32.mrf.mxu0  ;;  %v10788_v2 = vpop.f32.mrf.mxu1  ;;  %11009 = vmatmul.mubr.msk.f32.gmra.mxu0 %vm364_vm1, %v13367_v14  ;;  %11083 = vmatmul.mubr.msk.f32.gmra.mxu1 %vm364_vm1, %v13367_v14 }
 0x188   : > { %v13380_v46 = vadd.f32 %v10788_v2, %v10714_v12  ;;  %11011 = vmatprep.mubr.msk.f32.mxu0 %vm364_vm1, %v13374_v60  ;;  %11085 = vmatprep.mubr.msk.f32.mxu1 %vm364_vm1, %v13374_v60  ;;  %v13407_v12 = vld [vmem:[%s11965_s18 + $0x1a8] sm:$0xff] }
 0x189   : > { %v13389_v41 = vpop.f32.mrf.mxu0  ;;  %v13391_v9 = vpop.f32.mrf.mxu1 }
 0x18a   : > { %16553 = vst [vmem:[#allocation91_spill] sm:$0xff] %v13380_v46  ;;  %16554 = vst [vmem:[#allocation92_spill] sm:$0xff] %v13389_v41 }
 0x18b   : > { %16555 = vst [vmem:[#allocation93_spill] sm:$0xff] %v13391_v9  ;;  %v10717_v43 = vpop.f32.mrf.mxu0  ;;  %v10791_v31 = vpop.f32.mrf.mxu1  ;;  %11012 = vmatmul.mubr.msk.f32.gmra.mxu0 %vm364_vm1, %v13387_v54  ;;  %11086 = vmatmul.mubr.msk.f32.gmra.mxu1 %vm364_vm1, %v13387_v54 }
 0x18c   : > { %v13400_v2 = vadd.f32 %v10791_v31, %v10717_v43  ;;  %11014 = vmatprep.mubr.msk.f32.mxu0 %vm364_vm1, %v13394_v42  ;;  %11088 = vmatprep.mubr.msk.f32.mxu1 %vm364_vm1, %v13394_v42 }
 0x18d   : > { %v13409_v46 = vpop.f32.mrf.mxu0  ;;  %v13411_v9 = vpop.f32.mrf.mxu1 }
 0x18e   : > { %16556 = vst [vmem:[#allocation94_spill] sm:$0xff] %v13400_v2  ;;  %16557 = vst [vmem:[#allocation95_spill] sm:$0xff] %v13409_v46 }
 0x18f   : > { %16558 = vst [vmem:[#allocation96_spill] sm:$0xff] %v13411_v9  ;;  %v10720_v41 = vpop.f32.mrf.mxu0  ;;  %v10794_v8 = vpop.f32.mrf.mxu1  ;;  %11015 = vmatmul.mubr.msk.f32.gmra.mxu0 %vm364_vm1, %v13407_v12  ;;  %11089 = vmatmul.mubr.msk.f32.gmra.mxu1 %vm364_vm1, %v13407_v12  ;;  %v9175_v9 = vld [vmem:[%s16457_s5 + $0x18] sm:$0xff] }
 0x190   : > { %v13417_v43 = vadd.f32 %v10794_v8, %v10720_v41  ;;  %11093 = vmatprep.mubr.msk.f32.mxu0 %vm364_vm1, %v12885_v19  ;;  %11165 = vmatprep.subr.mxu1 %v9175_v9 }
 0x191   : > { %v13421_v31 = vpop.f32.mrf.mxu0  ;;  %v13423_v2 = vpop.f32.mrf.mxu1  ;;  %11166 = vmatpush3.msra.mxu1 %v9175_v9 }
 0x192   : > { %16559 = vst [vmem:[#allocation97_spill] sm:$0xff] %v13417_v43 }
 0x193   : > { %v10799_v46 = vpop.f32.mrf.mxu0  ;;  %v10873_v59 = vpop.f32.mrf.mxu1  ;;  %11094 = vmatmul.mubr.msk.f32.vlgmr.msra.gmra.mxu0 %vm364_vm1, %v12897_v49 }
 0x194   : > { %v13430_v23 = vadd.f32 %v10873_v59, %v10799_v46  ;;  %11096 = vmatprep.mubr.msk.f32.mxu0 %vm364_vm1, %v12911_v17 }
 0x195   : > { %v13434_v8 = vpop.f32.mrf.mxu0  ;;  %v13436_v19 = vpop.f32.mrf.mxu1 }
 0x196   : > { %16560 = vst [vmem:[#allocation98_spill] sm:$0xff] %v13430_v23 }
 0x197   : > { %v10802_v41 = vpop.f32.mrf.mxu0  ;;  %v10876_v43 = vpop.f32.mrf.mxu1  ;;  %11097 = vmatmul.mubr.msk.f32.gmra.mxu0 %vm364_vm1, %v12923_v25 }
 0x198   : > { %v13440_v49 = vadd.f32 %v10876_v43, %v10802_v41  ;;  %11099 = vmatprep.mubr.msk.f32.mxu0 %vm364_vm1, %v12935_v56 }
 0x199   : > { %v13444_v59 = vpop.f32.mrf.mxu0  ;;  %v13446_v46 = vpop.f32.mrf.mxu1 }
 0x19a   : > { %16561 = vst [vmem:[#allocation99_spill] sm:$0xff] %v13440_v49 }
 0x19b   : > { %v10805_v17 = vpop.f32.mrf.mxu0  ;;  %v10879_v23 = vpop.f32.mrf.mxu1  ;;  %11100 = vmatmul.mubr.msk.f32.gmra.mxu0 %vm364_vm1, %v12947_v51 }
 0x19c   : > { %v13450_v9 = vadd.f32 %v10879_v23, %v10805_v17  ;;  %11102 = vmatprep.mubr.msk.f32.mxu0 %vm364_vm1, %v12959_v45 }
 0x19d   : > { %v13454_v25 = vpop.f32.mrf.mxu0  ;;  %v13456_v43 = vpop.f32.mrf.mxu1 }
 0x19e   : > { %16562 = vst [vmem:[#allocation100_spill] sm:$0xff] %v13450_v9 }
 0x19f   : > { %v10808_v41 = vpop.f32.mrf.mxu0  ;;  %v10882_v56 = vpop.f32.mrf.mxu1  ;;  %11103 = vmatmul.mubr.msk.f32.gmra.mxu0 %vm364_vm1, %v12974_v40 }
 0x1a0   : > { %v13460_v49 = vadd.f32 %v10882_v56, %v10808_v41  ;;  %11105 = vmatprep.mubr.msk.f32.mxu0 %vm364_vm1, %v12966_v52 }
 0x1a1   : > { %v13464_v51 = vpop.f32.mrf.mxu0  ;;  %v13466_v23 = vpop.f32.mrf.mxu1 }
 0x1a2   : > { %16563 = vst [vmem:[#allocation101_spill] sm:$0xff] %v13460_v49 }
 0x1a3   : > { %v10811_v17 = vpop.f32.mrf.mxu0  ;;  %v10885_v45 = vpop.f32.mrf.mxu1  ;;  %11106 = vmatmul.mubr.msk.f32.gmra.mxu0 %vm364_vm1, %v12990_v47 }
 0x1a4   : > { %v13470_v9 = vadd.f32 %v10885_v45, %v10811_v17  ;;  %11108 = vmatprep.mubr.msk.f32.mxu0 %vm364_vm1, %v12993_v38 }
 0x1a5   : > { %v13474_v40 = vpop.f32.mrf.mxu0  ;;  %v13476_v41 = vpop.f32.mrf.mxu1 }
 0x1a6   : > { %16564 = vst [vmem:[#allocation102_spill] sm:$0xff] %v13470_v9 }
 0x1a7   : > { %v10814_v56 = vpop.f32.mrf.mxu0  ;;  %v10888_v52 = vpop.f32.mrf.mxu1  ;;  %11109 = vmatmul.mubr.msk.f32.gmra.mxu0 %vm364_vm1, %v13014_v48 }
 0x1a8   : > { %v13480_v49 = vadd.f32 %v10888_v52, %v10814_v56  ;;  %11111 = vmatprep.mubr.msk.f32.mxu0 %vm364_vm1, %v13017_v34 }
 0x1a9   : > { %v13484_v47 = vpop.f32.mrf.mxu0  ;;  %v13486_v17 = vpop.f32.mrf.mxu1 }
 0x1aa   : > { %16565 = vst [vmem:[#allocation103_spill] sm:$0xff] %v13480_v49 }
 0x1ab   : > { %v10817_v45 = vpop.f32.mrf.mxu0  ;;  %v10891_v38 = vpop.f32.mrf.mxu1  ;;  %11112 = vmatmul.mubr.msk.f32.gmra.mxu0 %vm364_vm1, %v13038_v44 }
 0x1ac   : > { %v13490_v9 = vadd.f32 %v10891_v38, %v10817_v45  ;;  %11114 = vmatprep.mubr.msk.f32.mxu0 %vm364_vm1, %v13041_v0 }
 0x1ad   : > { %v13494_v48 = vpop.f32.mrf.mxu0  ;;  %v13496_v56 = vpop.f32.mrf.mxu1 }
 0x1ae   : > { %16566 = vst [vmem:[#allocation104_spill] sm:$0xff] %v13490_v9 }
 0x1af   : > { %v10820_v52 = vpop.f32.mrf.mxu0  ;;  %v10894_v34 = vpop.f32.mrf.mxu1  ;;  %11115 = vmatmul.mubr.msk.f32.gmra.mxu0 %vm364_vm1, %v13062_v39 }
 0x1b0   : > { %v13500_v49 = vadd.f32 %v10894_v34, %v10820_v52  ;;  %11117 = vmatprep.mubr.msk.f32.mxu0 %vm364_vm1, %v13065_v29 }
 0x1b1   : > { %v13504_v44 = vpop.f32.mrf.mxu0  ;;  %v13506_v45 = vpop.f32.mrf.mxu1 }
 0x1b2   : > { %16567 = vst [vmem:[#allocation105_spill] sm:$0xff] %v13500_v49 }
 0x1b3   : > { %v10823_v38 = vpop.f32.mrf.mxu0  ;;  %v10897_v0 = vpop.f32.mrf.mxu1  ;;  %11118 = vmatmul.mubr.msk.f32.gmra.mxu0 %vm364_vm1, %v13086_v35 }
 0x1b4   : > { %v13510_v9 = vadd.f32 %v10897_v0, %v10823_v38  ;;  %11120 = vmatprep.mubr.msk.f32.mxu0 %vm364_vm1, %v13089_v13 }
 0x1b5   : > { %v13514_v39 = vpop.f32.mrf.mxu0  ;;  %v13516_v52 = vpop.f32.mrf.mxu1 }
 0x1b6   : > { %16568 = vst [vmem:[#allocation106_spill] sm:$0xff] %v13510_v9 }
 0x1b7   : > { %v10826_v34 = vpop.f32.mrf.mxu0  ;;  %v10900_v29 = vpop.f32.mrf.mxu1  ;;  %11121 = vmatmul.mubr.msk.f32.gmra.mxu0 %vm364_vm1, %v13110_v30 }
 0x1b8   : > { %v13520_v49 = vadd.f32 %v10900_v29, %v10826_v34  ;;  %11123 = vmatprep.mubr.msk.f32.mxu0 %vm364_vm1, %v13113_v6 }
 0x1b9   : > { %v13524_v35 = vpop.f32.mrf.mxu0  ;;  %v13526_v38 = vpop.f32.mrf.mxu1 }
 0x1ba   : > { %16569 = vst [vmem:[#allocation107_spill] sm:$0xff] %v13520_v49 }
 0x1bb   : > { %v10829_v0 = vpop.f32.mrf.mxu0  ;;  %v10903_v13 = vpop.f32.mrf.mxu1  ;;  %11124 = vmatmul.mubr.msk.f32.gmra.mxu0 %vm364_vm1, %v13134_v26 }
 0x1bc   : > { %v13530_v9 = vadd.f32 %v10903_v13, %v10829_v0  ;;  %11126 = vmatprep.mubr.msk.f32.mxu0 %vm364_vm1, %v13137_v24 }
 0x1bd   : > { %v13534_v30 = vpop.f32.mrf.mxu0  ;;  %v13536_v34 = vpop.f32.mrf.mxu1 }
 0x1be   : > { %16570 = vst [vmem:[#allocation108_spill] sm:$0xff] %v13530_v9 }
 0x1bf   : > { %v10832_v29 = vpop.f32.mrf.mxu0  ;;  %v10906_v6 = vpop.f32.mrf.mxu1  ;;  %11127 = vmatmul.mubr.msk.f32.gmra.mxu0 %vm364_vm1, %v13158_v21 }
 0x1c0   : > { %v13540_v49 = vadd.f32 %v10906_v6, %v10832_v29  ;;  %11129 = vmatprep.mubr.msk.f32.mxu0 %vm364_vm1, %v13161_v22 }
 0x1c1   : > { %v13544_v26 = vpop.f32.mrf.mxu0  ;;  %v13546_v0 = vpop.f32.mrf.mxu1 }
 0x1c2   : > { %16571 = vst [vmem:[#allocation109_spill] sm:$0xff] %v13540_v49 }
 0x1c3   : > { %v10835_v13 = vpop.f32.mrf.mxu0  ;;  %v10909_v24 = vpop.f32.mrf.mxu1  ;;  %11130 = vmatmul.mubr.msk.f32.gmra.mxu0 %vm364_vm1, %v13182_v63 }
 0x1c4   : > { %v13550_v9 = vadd.f32 %v10909_v24, %v10835_v13  ;;  %11132 = vmatprep.mubr.msk.f32.mxu0 %vm364_vm1, %v13185_v28 }
 0x1c5   : > { %v13554_v21 = vpop.f32.mrf.mxu0  ;;  %v13556_v29 = vpop.f32.mrf.mxu1 }
 0x1c6   : > { %16572 = vst [vmem:[#allocation110_spill] sm:$0xff] %v13550_v9 }
 0x1c7   : > { %v10838_v6 = vpop.f32.mrf.mxu0  ;;  %v10912_v22 = vpop.f32.mrf.mxu1  ;;  %11133 = vmatmul.mubr.msk.f32.gmra.mxu0 %vm364_vm1, %v13206_v27 }
 0x1c8   : > { %v13560_v49 = vadd.f32 %v10912_v22, %v10838_v6  ;;  %11135 = vmatprep.mubr.msk.f32.mxu0 %vm364_vm1, %v13209_v20 }
 0x1c9   : > { %v13564_v63 = vpop.f32.mrf.mxu0  ;;  %v13566_v13 = vpop.f32.mrf.mxu1 }
 0x1ca   : > { %16573 = vst [vmem:[#allocation111_spill] sm:$0xff] %v13560_v49 }
 0x1cb   : > { %v10841_v24 = vpop.f32.mrf.mxu0  ;;  %v10915_v28 = vpop.f32.mrf.mxu1  ;;  %11136 = vmatmul.mubr.msk.f32.gmra.mxu0 %vm364_vm1, %v13230_v57 }
 0x1cc   : > { %v13570_v9 = vadd.f32 %v10915_v28, %v10841_v24  ;;  %11138 = vmatprep.mubr.msk.f32.mxu0 %vm364_vm1, %v13233_v33 }
 0x1cd   : > { %v13574_v27 = vpop.f32.mrf.mxu0  ;;  %v13576_v6 = vpop.f32.mrf.mxu1 }
 0x1ce   : > { %16574 = vst [vmem:[#allocation112_spill] sm:$0xff] %v13570_v9 }
 0x1cf   : > { %v10844_v22 = vpop.f32.mrf.mxu0  ;;  %v10918_v20 = vpop.f32.mrf.mxu1  ;;  %11139 = vmatmul.mubr.msk.f32.gmra.mxu0 %vm364_vm1, %v13251_v36 }
 0x1d0   : > { %v13580_v49 = vadd.f32 %v10918_v20, %v10844_v22  ;;  %11141 = vmatprep.mubr.msk.f32.mxu0 %vm364_vm1, %v13254_v32 }
 0x1d1   : > { %v13584_v57 = vpop.f32.mrf.mxu0  ;;  %v13586_v24 = vpop.f32.mrf.mxu1 }
 0x1d2   : > { %16575 = vst [vmem:[#allocation113_spill] sm:$0xff] %v13580_v49  ;;  %16576 = vst [vmem:[#allocation114_spill] sm:$0xff] %v13584_v57 }
 0x1d3   : > { %16577 = vst [vmem:[#allocation115_spill] sm:$0xff] %v13586_v24  ;;  %v10847_v28 = vpop.f32.mrf.mxu0  ;;  %v10921_v33 = vpop.f32.mrf.mxu1  ;;  %11142 = vmatmul.mubr.msk.f32.gmra.mxu0 %vm364_vm1, %v13269_v15 }
 0x1d4   : > { %v13590_v9 = vadd.f32 %v10921_v33, %v10847_v28  ;;  %11144 = vmatprep.mubr.msk.f32.mxu0 %vm364_vm1, %v13272_v18 }
 0x1d5   : > { %v13594_v36 = vpop.f32.mrf.mxu0  ;;  %v13596_v22 = vpop.f32.mrf.mxu1 }
 0x1d6   : > { %16578 = vst [vmem:[#allocation116_spill] sm:$0xff] %v13590_v9  ;;  %16579 = vst [vmem:[#allocation117_spill] sm:$0xff] %v13594_v36 }
 0x1d7   : > { %16580 = vst [vmem:[#allocation118_spill] sm:$0xff] %v13596_v22  ;;  %v10850_v20 = vpop.f32.mrf.mxu0  ;;  %v10924_v32 = vpop.f32.mrf.mxu1  ;;  %11145 = vmatmul.mubr.msk.f32.gmra.mxu0 %vm364_vm1, %v13287_v11  ;;  %v16612_v22 = vld [vmem:[#allocation6_spill] sm:$0xff] }
 0x1d8   : > { %v13600_v49 = vadd.f32 %v10924_v32, %v10850_v20  ;;  %11147 = vmatprep.mubr.msk.f32.mxu0 %vm364_vm1, %v13294_v3 }
 0x1d9   : > { %v13604_v15 = vpop.f32.mrf.mxu0  ;;  %v13606_v28 = vpop.f32.mrf.mxu1 }
 0x1da   : > { %16581 = vst [vmem:[#allocation119_spill] sm:$0xff] %v13600_v49  ;;  %16582 = vst [vmem:[#allocation120_spill] sm:$0xff] %v13604_v15 }
 0x1db   : > { %16583 = vst [vmem:[#allocation121_spill] sm:$0xff] %v13606_v28  ;;  %v10853_v33 = vpop.f32.mrf.mxu0  ;;  %v10927_v18 = vpop.f32.mrf.mxu1  ;;  %11148 = vmatmul.mubr.msk.f32.gmra.mxu0 %vm364_vm1, %v13307_v50  ;;  %v16603_v28 = vld [vmem:[#allocation3_spill] sm:$0xff] }
 0x1dc   : > { %v13610_v9 = vadd.f32 %v10927_v18, %v10853_v33  ;;  %11150 = vmatprep.mubr.msk.f32.mxu0 %vm364_vm1, %v13314_v7  ;;  %v11887_v7 = vmov 0.0  }
 0x1dd   : > { %v13614_v11 = vpop.f32.mrf.mxu0  ;;  %v13616_v20 = vpop.f32.mrf.mxu1  ;;  %4616 = vst.msk [vmem:[#allocation2] sm:$0xff] %vm4615_vm2, %v11887_v7  ;;  %4617 = vst.msk [vmem:[#allocation2 + $0x8] sm:$0xff] %vm4615_vm2, %v11887_v7 }
 0x1de   : > { %16584 = vst [vmem:[#allocation122_spill] sm:$0xff] %v13610_v9  ;;  %16585 = vst [vmem:[#allocation123_spill] sm:$0xff] %v13614_v11 }
 0x1df   : > { %16586 = vst [vmem:[#allocation124_spill] sm:$0xff] %v13616_v20  ;;  %v10856_v32 = vpop.f32.mrf.mxu0  ;;  %v10930_v3 = vpop.f32.mrf.mxu1  ;;  %11151 = vmatmul.mubr.msk.f32.gmra.mxu0 %vm364_vm1, %v13327_v55  ;;  %4618 = vst.msk [vmem:[#allocation2 + $0x10] sm:$0xff] %vm4615_vm2, %v11887_v7 }
 0x1e0   : > { %v13620_v49 = vadd.f32 %v10930_v3, %v10856_v32  ;;  %11153 = vmatprep.mubr.msk.f32.mxu0 %vm364_vm1, %v13334_v37  ;;  %4619 = vst.msk [vmem:[#allocation2 + $0x198] sm:$0xff] %vm4615_vm2, %v11887_v7  ;;  %4620 = vst.msk [vmem:[#allocation2 + $0x1a0] sm:$0xff] %vm4615_vm2, %v11887_v7 }
 0x1e1   : > { %v13624_v50 = vpop.f32.mrf.mxu0  ;;  %v13626_v33 = vpop.f32.mrf.mxu1  ;;  %4621 = vst.msk [vmem:[#allocation2 + $0x1a8] sm:$0xff] %vm4615_vm2, %v11887_v7 }
 0x1e2   : > { %16587 = vst [vmem:[#allocation125_spill] sm:$0xff] %v13620_v49  ;;  %16588 = vst [vmem:[#allocation126_spill] sm:$0xff] %v13624_v50 }
 0x1e3   : > { %16589 = vst [vmem:[#allocation127_spill] sm:$0xff] %v13626_v33  ;;  %v10859_v55 = vpop.f32.mrf.mxu0  ;;  %v10933_v37 = vpop.f32.mrf.mxu1  ;;  %11154 = vmatmul.mubr.msk.f32.gmra.mxu0 %vm364_vm1, %v13347_v61  ;;  %v4718_v61 = vld [vmem:[%s16457_s5] sm:$0xff] }
 0x1e4   : > { %v13636_v18 = vadd.f32 %v10933_v37, %v10859_v55  ;;  %11156 = vmatprep.mubr.msk.f32.mxu0 %vm364_vm1, %v13354_v16  ;;  %11239 = vmatprep.subr.mxu0 %v4718_v61 }
 0x1e5   : > { %v13640_v32 = vpop.f32.mrf.mxu0  ;;  %v13642_v3 = vpop.f32.mrf.mxu1  ;;  %11240 = vmatpush3.msra.mxu0 %v4718_v61 }
 0x1e6   : > { %16590 = vst [vmem:[#allocation128_spill] sm:$0xff] %v13636_v18  ;;  %16591 = vst [vmem:[#allocation129_spill] sm:$0xff] %v13640_v32 }
 0x1e7   : > { %16592 = vst [vmem:[#allocation130_spill] sm:$0xff] %v13642_v3  ;;  %v10862_v49 = vpop.f32.mrf.mxu0  ;;  %v10936_v9 = vpop.f32.mrf.mxu1  ;;  %11157 = vmatmul.mubr.msk.f32.gmra.mxu0 %vm364_vm1, %v13367_v14 }
 0x1e8   : > { %v13646_v7 = vadd.f32 %v10936_v9, %v10862_v49  ;;  %11159 = vmatprep.mubr.msk.f32.mxu0 %vm364_vm1, %v13374_v60  ;;  %v4670_v9 = vld [vmem:[#allocation2] sm:$0xff] }
 0x1e9   : > { %v13653_v55 = vpop.f32.mrf.mxu0  ;;  %v13655_v16 = vpop.f32.mrf.mxu1 }
 0x1ea   : > { %16593 = vst [vmem:[#allocation131_spill] sm:$0xff] %v13646_v7  ;;  %16594 = vst [vmem:[#allocation132_spill] sm:$0xff] %v13653_v55 }
 0x1eb   : > { %16595 = vst [vmem:[#allocation133_spill] sm:$0xff] %v13655_v16  ;;  %v10865_v37 = vpop.f32.mrf.mxu0  ;;  %v10939_v18 = vpop.f32.mrf.mxu1  ;;  %11160 = vmatmul.mubr.msk.f32.gmra.mxu0 %vm364_vm1, %v13387_v54  ;;  %v4671_v54 = vld [vmem:[#allocation2 + $0x8] sm:$0xff] }
 0x1ec   : > { %v13659_v14 = vadd.f32 %v10939_v18, %v10865_v37  ;;  %11162 = vmatprep.mubr.msk.f32.mxu0 %vm364_vm1, %v13394_v42  ;;  %v4672_v42 = vld [vmem:[#allocation2 + $0x10] sm:$0xff] }
 0x1ed   : > { %v13663_v60 = vpop.f32.mrf.mxu0  ;;  %v13665_v49 = vpop.f32.mrf.mxu1 }
 0x1ee   : > { %16596 = vst [vmem:[#allocation134_spill] sm:$0xff] %v13659_v14  ;;  %16597 = vst [vmem:[#allocation135_spill] sm:$0xff] %v13663_v60 }
 0x1ef   : > { %16598 = vst [vmem:[#allocation136_spill] sm:$0xff] %v13665_v49  ;;  %v10868_v7 = vpop.f32.mrf.mxu0  ;;  %v10942_v55 = vpop.f32.mrf.mxu1  ;;  %11163 = vmatmul.mubr.msk.f32.gmra.mxu0 %vm364_vm1, %v13407_v12 }
 0x1f0   : > { %v13669_v61 = vadd.f32 %v10942_v55, %v10868_v7  ;;  %11241 = vmatprep.mubr.msk.f32.mxu0 %vm4615_vm2, %v4670_v9 }
 0x1f1   : > { %v13672_v18 = vpop.f32.mrf.mxu0  ;;  %v13674_v37 = vpop.f32.mrf.mxu1 }
 0x1f2   : > { %16599 = vst [vmem:[#allocation137_spill] sm:$0xff] %v13669_v61  ;;  %16600 = vst [vmem:[#allocation138_spill] sm:$0xff] %v13672_v18 }
 0x1f3   : > { %16601 = vst [vmem:[#allocation139_spill] sm:$0xff] %v13674_v37  ;;  %v10947_v14 = vpop.f32.mrf.mxu0  ;;  %v11021_v60 = vpop.f32.mrf.mxu1  ;;  %11242 = vmatmul.mubr.msk.f32.vlgmr.msra.gmra.mxu0 %vm4615_vm2, %v4671_v54 }
 0x1f4   : > { %v2874_v49 = vadd.f32 %v10947_v14, %v12544_v62  ;;  %11244 = vmatprep.mubr.msk.f32.mxu0 %vm4615_vm2, %v4672_v42  ;;  %v3232_v54 = vadd.f32 %v11021_v60, %v12906_v58 }
 0x1f5   : > { %v2634_v16 = vpop.f32.mrf.mxu0  ;;  %v13679_v12 = vpop.f32.mrf.mxu1 }
 0x1f6   : > { %v13682_v7 = vadd.f32 %v2634_v16, %v12553_v1  ;;  %v3689_v61 = vrot.slane %v2874_v49, 7 }
 0x1f7   : > { %v10950_v55 = vpop.f32.mrf.mxu0  ;;  %v11024_v9 = vpop.f32.mrf.mxu1 }
 0x1f8   : > { %v16461_v37 = vrot.slane %v13682_v7, 7  ;;  %v2876_v18 = vadd.f32 %v10950_v55, %v12561_v5  ;;  %v3234_v5 = vadd.f32 %v11024_v9, %v12932_v53  ;;  %v16602_v55 = vld [vmem:[#allocation47_spill] sm:$0xff] }
 0x1f9   : > { %v2644_v3 = vpop.f32.mrf.mxu0  ;;  %v3002_v62 = vpop.f32.mrf.mxu1 }
 0x1fa   : > { %v3690_v14 = vsel %vm3687_vm3, %v16461_v37, %v3689_v61  ;;  %v2875_v42 = vadd.f32 %v2644_v3, %v12567_v10  ;;  %v3693_v33 = vrot.slane %v2876_v18, 7  ;;  %v3233_v58 = vadd.f32 %v3002_v62, %v16602_v55  ;;  %v16606_v62 = vld [vmem:[#allocation4_spill] sm:$0xff] }
 0x1fb   : > { %v13691_v1 = vadd.f32 %v3690_v14, %v3232_v54  ;;  %v10953_v16 = vpop.f32.mrf.mxu0  ;;  %v11027_v32 = vpop.f32.mrf.mxu1 }
 0x1fc   : > { %v3691_v49 = vrot.slane %v2875_v42, 7  ;;  %v2878_v50 = vadd.f32 %v10953_v16, %v12573_v4  ;;  %v13706_v4 = vld [vmem:[%s16457_s5 + $0x20] sm:$0xff] }
 0x1fd   : > { %v2654_v60 = vpop.f32.mrf.mxu0  ;;  %v3012_v20 = vpop.f32.mrf.mxu1  ;;  %16605 = vst [vmem:[#allocation3_spill] sm:$0xff] %v13706_v4  ;;  %11313 = vmatprep.subr.mxu1 %v13706_v4 }
 0x1fe   : > { %v3694_v11 = vsel %vm3687_vm3, %v3691_v49, %v3693_v33  ;;  %v3692_v37 = vsel %vm3687_vm3, %v3689_v61, %v3691_v49  ;;  %v2877_v10 = vadd.f32 %v2654_v60, %v16603_v28  ;;  %v3697_v53 = vrot.slane %v2878_v50, 7  ;;  %v16607_v61 = vld [vmem:[#allocation48_spill] sm:$0xff]  ;;  %v16608_v28 = vld [vmem:[#allocation49_spill] sm:$0xff] }
 0x1ff   : > { %v13699_v3 = vadd.f32 %v3694_v11, %v3234_v5  ;;  %v13701_v54 = vadd.f32 %v3692_v37, %v3233_v58  ;;  %v10956_v18 = vpop.f32.mrf.mxu0  ;;  %v11030_v14 = vpop.f32.mrf.mxu1  ;;  %v3236_v16 = vadd.f32 %v11027_v32, %v16607_v61  ;;  %v3235_v11 = vadd.f32 %v3012_v20, %v16608_v28  ;;  %v16609_v58 = vld [vmem:[#allocation5_spill] sm:$0xff]  ;;  %v16613_v61 = vld [vmem:[#allocation50_spill] sm:$0xff]  ;;  %v16614_v28 = vld [vmem:[#allocation51_spill] sm:$0xff] }
 0x200   : > { %v3695_v9 = vrot.slane %v2877_v10, 7  ;;  %v2880_v42 = vadd.f32 %v10956_v18, %v16606_v62  ;;  %v3238_v20 = vadd.f32 %v11030_v14, %v16613_v61  ;;  %v16620_v61 = vld [vmem:[#allocation53_spill] sm:$0xff] }
 0x201   : > { %16604 = vst [vmem:[#allocation47_spill] sm:$0xff] %v13699_v3  ;;  %v2664_v49 = vpop.f32.mrf.mxu0  ;;  %v3022_v37 = vpop.f32.mrf.mxu1 }
 0x202   : > { %v3698_v5 = vsel %vm3687_vm3, %v3695_v9, %v3697_v53  ;;  %v3696_v55 = vsel %vm3687_vm3, %v3693_v33, %v3695_v9  ;;  %v2879_v60 = vadd.f32 %v2664_v49, %v16609_v58  ;;  %v3701_v62 = vrot.slane %v2880_v42, 7  ;;  %v13842_v3 = vpop.permute.xlu0 %4329 }
 0x203   : > { %v13715_v15 = vadd.f32 %v3698_v5, %v3236_v16  ;;  %v13717_v50 = vadd.f32 %v3696_v55, %v3235_v11  ;;  %v10959_v10 = vpop.f32.mrf.mxu0  ;;  %v11033_v18 = vpop.f32.mrf.mxu1  ;;  %v3237_v36 = vadd.f32 %v3022_v37, %v16614_v28  ;;  %v16615_v16 = vld [vmem:[#allocation7_spill] sm:$0xff] }
 0x204   : > { %v3699_v4 = vrot.slane %v2879_v60, 7  ;;  %v2882_v32 = vadd.f32 %v10959_v10, %v16612_v22  ;;  %v16618_v60 = vld [vmem:[#allocation8_spill] sm:$0xff] }
 0x205   : > { %16610 = vst [vmem:[#allocation4_spill] sm:$0xff] %v13715_v15  ;;  %16611 = vst [vmem:[#allocation48_spill] sm:$0xff] %v13717_v50  ;;  %v2674_v24 = vpop.f32.mrf.mxu0  ;;  %v3032_v57 = vpop.f32.mrf.mxu1  ;;  %v16619_v10 = vld [vmem:[#allocation52_spill] sm:$0xff] }
 0x206   : > { %v3702_v33 = vsel %vm3687_vm3, %v3699_v4, %v3701_v62  ;;  %v3700_v9 = vsel %vm3687_vm3, %v3697_v53, %v3699_v4  ;;  %v2881_v49 = vadd.f32 %v2674_v24, %v16615_v16  ;;  %v3705_v58 = vrot.slane %v2882_v32, 7  ;;  %v16621_v53 = vld [vmem:[#allocation9_spill] sm:$0xff] }
 0x207   : > { %v13725_v11 = vadd.f32 %v3702_v33, %v3238_v20  ;;  %v13727_v5 = vadd.f32 %v3700_v9, %v3237_v36  ;;  %v10962_v42 = vpop.f32.mrf.mxu0  ;;  %v11036_v55 = vpop.f32.mrf.mxu1  ;;  %v3240_v37 = vadd.f32 %v11033_v18, %v16619_v10  ;;  %v3239_v28 = vadd.f32 %v3032_v57, %v16620_v61  ;;  %v16626_v10 = vld [vmem:[#allocation55_spill] sm:$0xff] }
 0x208   : > { %v3703_v22 = vrot.slane %v2881_v49, 7  ;;  %v2884_v14 = vadd.f32 %v10962_v42, %v16618_v60  ;;  %v16624_v42 = vld [vmem:[#allocation10_spill] sm:$0xff] }
 0x209   : > { %16616 = vst [vmem:[#allocation49_spill] sm:$0xff] %v13725_v11  ;;  %16617 = vst [vmem:[#allocation5_spill] sm:$0xff] %v13727_v5  ;;  %v2684_v15 = vpop.f32.mrf.mxu0  ;;  %v3042_v50 = vpop.f32.mrf.mxu1  ;;  %v16625_v60 = vld [vmem:[#allocation54_spill] sm:$0xff] }
 0x20a   : > { %v3706_v4 = vsel %vm3687_vm3, %v3703_v22, %v3705_v58  ;;  %v3704_v24 = vsel %vm3687_vm3, %v3701_v62, %v3703_v22  ;;  %v2883_v20 = vadd.f32 %v2684_v15, %v16621_v53  ;;  %v3709_v16 = vrot.slane %v2884_v14, 7  ;;  %v16627_v22 = vld [vmem:[#allocation11_spill] sm:$0xff] }
 0x20b   : > { %v13735_v36 = vadd.f32 %v3706_v4, %v3240_v37  ;;  %v13737_v33 = vadd.f32 %v3704_v24, %v3239_v28  ;;  %v10965_v32 = vpop.f32.mrf.mxu0  ;;  %v11039_v9 = vpop.f32.mrf.mxu1  ;;  %v3242_v57 = vadd.f32 %v11036_v55, %v16625_v60  ;;  %v3241_v61 = vadd.f32 %v3042_v50, %v16626_v10  ;;  %v16632_v60 = vld [vmem:[#allocation57_spill] sm:$0xff] }
 0x20c   : > { %v3707_v49 = vrot.slane %v2883_v20, 7  ;;  %v2886_v18 = vadd.f32 %v10965_v32, %v16624_v42  ;;  %v16630_v32 = vld [vmem:[#allocation12_spill] sm:$0xff] }
 0x20d   : > { %16622 = vst [vmem:[#allocation6_spill] sm:$0xff] %v13735_v36  ;;  %16623 = vst [vmem:[#allocation50_spill] sm:$0xff] %v13737_v33  ;;  %v2694_v11 = vpop.f32.mrf.mxu0  ;;  %v3052_v5 = vpop.f32.mrf.mxu1  ;;  %v16631_v42 = vld [vmem:[#allocation56_spill] sm:$0xff] }
 0x20e   : > { %v3710_v62 = vsel %vm3687_vm3, %v3707_v49, %v3709_v16  ;;  %v3708_v15 = vsel %vm3687_vm3, %v3705_v58, %v3707_v49  ;;  %v2885_v37 = vadd.f32 %v2694_v11, %v16627_v22  ;;  %v3713_v53 = vrot.slane %v2886_v18, 7  ;;  %v16633_v49 = vld [vmem:[#allocation13_spill] sm:$0xff] }
 0x20f   : > { %v13745_v28 = vadd.f32 %v3710_v62, %v3242_v57  ;;  %v13747_v4 = vadd.f32 %v3708_v15, %v3241_v61  ;;  %v10968_v14 = vpop.f32.mrf.mxu0  ;;  %v11042_v24 = vpop.f32.mrf.mxu1  ;;  %v3244_v50 = vadd.f32 %v11039_v9, %v16631_v42  ;;  %v3243_v10 = vadd.f32 %v3052_v5, %v16632_v60  ;;  %v16638_v42 = vld [vmem:[#allocation59_spill] sm:$0xff] }
 0x210   : > { %v3711_v20 = vrot.slane %v2885_v37, 7  ;;  %v2888_v55 = vadd.f32 %v10968_v14, %v16630_v32  ;;  %v16636_v14 = vld [vmem:[#allocation14_spill] sm:$0xff] }
 0x211   : > { %16628 = vst [vmem:[#allocation51_spill] sm:$0xff] %v13745_v28  ;;  %16629 = vst [vmem:[#allocation7_spill] sm:$0xff] %v13747_v4  ;;  %v2704_v36 = vpop.f32.mrf.mxu0  ;;  %v3062_v33 = vpop.f32.mrf.mxu1  ;;  %v16637_v32 = vld [vmem:[#allocation58_spill] sm:$0xff] }
 0x212   : > { %v3714_v58 = vsel %vm3687_vm3, %v3711_v20, %v3713_v53  ;;  %v3712_v11 = vsel %vm3687_vm3, %v3709_v16, %v3711_v20  ;;  %v2887_v57 = vadd.f32 %v2704_v36, %v16633_v49  ;;  %v3717_v22 = vrot.slane %v2888_v55, 7  ;;  %v16639_v20 = vld [vmem:[#allocation15_spill] sm:$0xff] }
 0x213   : > { %v13755_v61 = vadd.f32 %v3714_v58, %v3244_v50  ;;  %v13757_v62 = vadd.f32 %v3712_v11, %v3243_v10  ;;  %v10971_v18 = vpop.f32.mrf.mxu0  ;;  %v11045_v15 = vpop.f32.mrf.mxu1  ;;  %v3246_v5 = vadd.f32 %v11042_v24, %v16637_v32  ;;  %v3245_v60 = vadd.f32 %v3062_v33, %v16638_v42  ;;  %v16644_v32 = vld [vmem:[#allocation61_spill] sm:$0xff] }
 0x214   : > { %v3715_v37 = vrot.slane %v2887_v57, 7  ;;  %v2890_v9 = vadd.f32 %v10971_v18, %v16636_v14  ;;  %v16642_v18 = vld [vmem:[#allocation16_spill] sm:$0xff]  ;;  %16687 = vst [vmem:[#allocation61_spill] sm:$0xff] %v13842_v3 }
 0x215   : > { %16634 = vst [vmem:[#allocation8_spill] sm:$0xff] %v13755_v61  ;;  %16635 = vst [vmem:[#allocation52_spill] sm:$0xff] %v13757_v62  ;;  %v2714_v28 = vpop.f32.mrf.mxu0  ;;  %v3072_v4 = vpop.f32.mrf.mxu1  ;;  %v16643_v14 = vld [vmem:[#allocation60_spill] sm:$0xff] }
 0x216   : > { %v3718_v16 = vsel %vm3687_vm3, %v3715_v37, %v3717_v22  ;;  %v3716_v36 = vsel %vm3687_vm3, %v3713_v53, %v3715_v37  ;;  %v2889_v50 = vadd.f32 %v2714_v28, %v16639_v20  ;;  %v3721_v49 = vrot.slane %v2890_v9, 7  ;;  %v16645_v37 = vld [vmem:[#allocation17_spill] sm:$0xff] }
 0x217   : > { %v13765_v10 = vadd.f32 %v3718_v16, %v3246_v5  ;;  %v13767_v58 = vadd.f32 %v3716_v36, %v3245_v60  ;;  %v10974_v55 = vpop.f32.mrf.mxu0  ;;  %v11048_v11 = vpop.f32.mrf.mxu1  ;;  %v3248_v33 = vadd.f32 %v11045_v15, %v16643_v14  ;;  %v3247_v42 = vadd.f32 %v3072_v4, %v16644_v32  ;;  %v16650_v14 = vld [vmem:[#allocation63_spill] sm:$0xff] }
 0x218   : > { %v3719_v57 = vrot.slane %v2889_v50, 7  ;;  %v2892_v24 = vadd.f32 %v10974_v55, %v16642_v18  ;;  %v16648_v55 = vld [vmem:[#allocation18_spill] sm:$0xff] }
 0x219   : > { %16640 = vst [vmem:[#allocation53_spill] sm:$0xff] %v13765_v10  ;;  %16641 = vst [vmem:[#allocation9_spill] sm:$0xff] %v13767_v58  ;;  %v2724_v61 = vpop.f32.mrf.mxu0  ;;  %v3082_v62 = vpop.f32.mrf.mxu1  ;;  %v16649_v18 = vld [vmem:[#allocation62_spill] sm:$0xff] }
 0x21a   : > { %v3722_v53 = vsel %vm3687_vm3, %v3719_v57, %v3721_v49  ;;  %v3720_v28 = vsel %vm3687_vm3, %v3717_v22, %v3719_v57  ;;  %v2891_v5 = vadd.f32 %v2724_v61, %v16645_v37  ;;  %v3725_v20 = vrot.slane %v2892_v24, 7  ;;  %v16651_v57 = vld [vmem:[#allocation19_spill] sm:$0xff] }
 0x21b   : > { %v13775_v60 = vadd.f32 %v3722_v53, %v3248_v33  ;;  %v13777_v16 = vadd.f32 %v3720_v28, %v3247_v42  ;;  %v10977_v9 = vpop.f32.mrf.mxu0  ;;  %v11051_v36 = vpop.f32.mrf.mxu1  ;;  %v3250_v4 = vadd.f32 %v11048_v11, %v16649_v18  ;;  %v3249_v32 = vadd.f32 %v3082_v62, %v16650_v14  ;;  %v16656_v18 = vld [vmem:[#allocation65_spill] sm:$0xff] }
 0x21c   : > { %v3723_v50 = vrot.slane %v2891_v5, 7  ;;  %v2894_v15 = vadd.f32 %v10977_v9, %v16648_v55  ;;  %v16654_v9 = vld [vmem:[#allocation20_spill] sm:$0xff] }
 0x21d   : > { %16646 = vst [vmem:[#allocation10_spill] sm:$0xff] %v13775_v60  ;;  %16647 = vst [vmem:[#allocation54_spill] sm:$0xff] %v13777_v16  ;;  %v2734_v10 = vpop.f32.mrf.mxu0  ;;  %v3092_v58 = vpop.f32.mrf.mxu1  ;;  %v16655_v55 = vld [vmem:[#allocation64_spill] sm:$0xff] }
 0x21e   : > { %v3726_v22 = vsel %vm3687_vm3, %v3723_v50, %v3725_v20  ;;  %v3724_v61 = vsel %vm3687_vm3, %v3721_v49, %v3723_v50  ;;  %v2893_v33 = vadd.f32 %v2734_v10, %v16651_v57  ;;  %v3729_v37 = vrot.slane %v2894_v15, 7  ;;  %v16657_v50 = vld [vmem:[#allocation21_spill] sm:$0xff] }
 0x21f   : > { %v13785_v42 = vadd.f32 %v3726_v22, %v3250_v4  ;;  %v13787_v53 = vadd.f32 %v3724_v61, %v3249_v32  ;;  %v10980_v24 = vpop.f32.mrf.mxu0  ;;  %v11054_v28 = vpop.f32.mrf.mxu1  ;;  %v3252_v62 = vadd.f32 %v11051_v36, %v16655_v55  ;;  %v3251_v14 = vadd.f32 %v3092_v58, %v16656_v18  ;;  %v16662_v55 = vld [vmem:[#allocation67_spill] sm:$0xff] }
 0x220   : > { %v3727_v5 = vrot.slane %v2893_v33, 7  ;;  %v2896_v11 = vadd.f32 %v10980_v24, %v16654_v9  ;;  %v16660_v24 = vld [vmem:[#allocation22_spill] sm:$0xff] }
 0x221   : > { %16652 = vst [vmem:[#allocation55_spill] sm:$0xff] %v13785_v42  ;;  %16653 = vst [vmem:[#allocation11_spill] sm:$0xff] %v13787_v53  ;;  %v2744_v60 = vpop.f32.mrf.mxu0  ;;  %v3102_v16 = vpop.f32.mrf.mxu1  ;;  %v16661_v9 = vld [vmem:[#allocation66_spill] sm:$0xff] }
 0x222   : > { %v3730_v49 = vsel %vm3687_vm3, %v3727_v5, %v3729_v37  ;;  %v3728_v10 = vsel %vm3687_vm3, %v3725_v20, %v3727_v5  ;;  %v2895_v4 = vadd.f32 %v2744_v60, %v16657_v50  ;;  %v3733_v57 = vrot.slane %v2896_v11, 7  ;;  %v16663_v5 = vld [vmem:[#allocation23_spill] sm:$0xff] }
 0x223   : > { %v13795_v32 = vadd.f32 %v3730_v49, %v3252_v62  ;;  %v13797_v22 = vadd.f32 %v3728_v10, %v3251_v14  ;;  %v10983_v15 = vpop.f32.mrf.mxu0  ;;  %v11057_v61 = vpop.f32.mrf.mxu1  ;;  %v3254_v58 = vadd.f32 %v11054_v28, %v16661_v9  ;;  %v3253_v18 = vadd.f32 %v3102_v16, %v16662_v55  ;;  %v16668_v9 = vld [vmem:[#allocation69_spill] sm:$0xff] }
 0x224   : > { %v3731_v33 = vrot.slane %v2895_v4, 7  ;;  %v2898_v36 = vadd.f32 %v10983_v15, %v16660_v24  ;;  %v16666_v15 = vld [vmem:[#allocation24_spill] sm:$0xff] }
 0x225   : > { %16658 = vst [vmem:[#allocation12_spill] sm:$0xff] %v13795_v32  ;;  %16659 = vst [vmem:[#allocation56_spill] sm:$0xff] %v13797_v22  ;;  %v2754_v42 = vpop.f32.mrf.mxu0  ;;  %v3112_v53 = vpop.f32.mrf.mxu1  ;;  %v16667_v24 = vld [vmem:[#allocation68_spill] sm:$0xff] }
 0x226   : > { %v3734_v20 = vsel %vm3687_vm3, %v3731_v33, %v3733_v57  ;;  %v3732_v60 = vsel %vm3687_vm3, %v3729_v37, %v3731_v33  ;;  %v2897_v62 = vadd.f32 %v2754_v42, %v16663_v5  ;;  %v3737_v50 = vrot.slane %v2898_v36, 7  ;;  %v16669_v33 = vld [vmem:[#allocation25_spill] sm:$0xff] }
 0x227   : > { %v13805_v14 = vadd.f32 %v3734_v20, %v3254_v58  ;;  %v13807_v49 = vadd.f32 %v3732_v60, %v3253_v18  ;;  %v10986_v11 = vpop.f32.mrf.mxu0  ;;  %v11060_v10 = vpop.f32.mrf.mxu1  ;;  %v3256_v16 = vadd.f32 %v11057_v61, %v16667_v24  ;;  %v3255_v55 = vadd.f32 %v3112_v53, %v16668_v9  ;;  %v16674_v24 = vld [vmem:[#allocation71_spill] sm:$0xff] }
 0x228   : > { %v3735_v4 = vrot.slane %v2897_v62, 7  ;;  %v2900_v28 = vadd.f32 %v10986_v11, %v16666_v15  ;;  %v16672_v11 = vld [vmem:[#allocation26_spill] sm:$0xff] }
 0x229   : > { %16664 = vst [vmem:[#allocation57_spill] sm:$0xff] %v13805_v14  ;;  %16665 = vst [vmem:[#allocation13_spill] sm:$0xff] %v13807_v49  ;;  %v2764_v32 = vpop.f32.mrf.mxu0  ;;  %v3122_v22 = vpop.f32.mrf.mxu1  ;;  %v16673_v15 = vld [vmem:[#allocation70_spill] sm:$0xff] }
 0x22a   : > { %v3738_v37 = vsel %vm3687_vm3, %v3735_v4, %v3737_v50  ;;  %v3736_v42 = vsel %vm3687_vm3, %v3733_v57, %v3735_v4  ;;  %v2899_v58 = vadd.f32 %v2764_v32, %v16669_v33  ;;  %v3741_v5 = vrot.slane %v2900_v28, 7  ;;  %v16675_v4 = vld [vmem:[#allocation27_spill] sm:$0xff] }
 0x22b   : > { %v13815_v18 = vadd.f32 %v3738_v37, %v3256_v16  ;;  %v13817_v20 = vadd.f32 %v3736_v42, %v3255_v55  ;;  %v10989_v36 = vpop.f32.mrf.mxu0  ;;  %v11063_v60 = vpop.f32.mrf.mxu1  ;;  %v3258_v53 = vadd.f32 %v11060_v10, %v16673_v15  ;;  %v3257_v9 = vadd.f32 %v3122_v22, %v16674_v24  ;;  %v16680_v15 = vld [vmem:[#allocation73_spill] sm:$0xff] }
 0x22c   : > { %v3739_v62 = vrot.slane %v2899_v58, 7  ;;  %v2902_v61 = vadd.f32 %v10989_v36, %v16672_v11  ;;  %v16678_v36 = vld [vmem:[#allocation28_spill] sm:$0xff] }
 0x22d   : > { %16670 = vst [vmem:[#allocation14_spill] sm:$0xff] %v13815_v18  ;;  %16671 = vst [vmem:[#allocation58_spill] sm:$0xff] %v13817_v20  ;;  %v2774_v14 = vpop.f32.mrf.mxu0  ;;  %v3132_v49 = vpop.f32.mrf.mxu1  ;;  %v16679_v11 = vld [vmem:[#allocation72_spill] sm:$0xff] }
 0x22e   : > { %v3742_v57 = vsel %vm3687_vm3, %v3739_v62, %v3741_v5  ;;  %v3740_v32 = vsel %vm3687_vm3, %v3737_v50, %v3739_v62  ;;  %v2901_v16 = vadd.f32 %v2774_v14, %v16675_v4  ;;  %v3745_v33 = vrot.slane %v2902_v61, 7  ;;  %v16681_v62 = vld [vmem:[#allocation29_spill] sm:$0xff] }
 0x22f   : > { %v13825_v55 = vadd.f32 %v3742_v57, %v3258_v53  ;;  %v13827_v37 = vadd.f32 %v3740_v32, %v3257_v9  ;;  %v10992_v28 = vpop.f32.mrf.mxu0  ;;  %v11066_v42 = vpop.f32.mrf.mxu1  ;;  %v3260_v22 = vadd.f32 %v11063_v60, %v16679_v11  ;;  %v3259_v24 = vadd.f32 %v3132_v49, %v16680_v15  ;;  %v16686_v11 = vld [vmem:[#allocation75_spill] sm:$0xff] }
 0x230   : > { %v3743_v58 = vrot.slane %v2901_v16, 7  ;;  %v2904_v10 = vadd.f32 %v10992_v28, %v16678_v36  ;;  %v16684_v28 = vld [vmem:[#allocation30_spill] sm:$0xff] }
 0x231   : > { %16676 = vst [vmem:[#allocation59_spill] sm:$0xff] %v13825_v55  ;;  %16677 = vst [vmem:[#allocation15_spill] sm:$0xff] %v13827_v37  ;;  %v2784_v18 = vpop.f32.mrf.mxu0  ;;  %v3142_v20 = vpop.f32.mrf.mxu1  ;;  %v16685_v36 = vld [vmem:[#allocation74_spill] sm:$0xff] }
 0x232   : > { %v3746_v50 = vsel %vm3687_vm3, %v3743_v58, %v3745_v33  ;;  %v3744_v14 = vsel %vm3687_vm3, %v3741_v5, %v3743_v58  ;;  %v2903_v53 = vadd.f32 %v2784_v18, %v16681_v62  ;;  %v3749_v4 = vrot.slane %v2904_v10, 7  ;;  %v13844_v5 = vpop.permute.xlu1 %4339  ;;  %v16690_v10 = vld [vmem:[#allocation77_spill] sm:$0xff] }
 0x233   : > { %v13835_v9 = vadd.f32 %v3746_v50, %v3260_v22  ;;  %v13837_v57 = vadd.f32 %v3744_v14, %v3259_v24  ;;  %v10995_v61 = vpop.f32.mrf.mxu0  ;;  %v11069_v32 = vpop.f32.mrf.mxu1  ;;  %v3262_v49 = vadd.f32 %v11066_v42, %v16685_v36  ;;  %v3261_v15 = vadd.f32 %v3142_v20, %v16686_v11  ;;  %16688 = vst [vmem:[#allocation17_spill] sm:$0xff] %v13844_v5  ;;  %v16689_v22 = vld [vmem:[#allocation31_spill] sm:$0xff]  ;;  %v16691_v50 = vld [vmem:[#allocation78_spill] sm:$0xff]  ;;  %v16694_v36 = vld [vmem:[#allocation32_spill] sm:$0xff] }
 0x234   : > { %v3747_v16 = vrot.slane %v2903_v53, 7  ;;  %v2906_v60 = vadd.f32 %v10995_v61, %v16684_v28  ;;  %v1675_v14 = vadd.f32 %v16691_v50, %v16690_v10 }
 0x235   : > { %16682 = vst [vmem:[#allocation16_spill] sm:$0xff] %v13835_v9  ;;  %16683 = vst [vmem:[#allocation60_spill] sm:$0xff] %v13837_v57  ;;  %v2794_v55 = vpop.f32.mrf.mxu0  ;;  %v3152_v37 = vpop.f32.mrf.mxu1  ;;  %v16695_v9 = vld [vmem:[#allocation76_spill] sm:$0xff] }
 0x236   : > { %v3750_v18 = vsel %vm3687_vm3, %v3747_v16, %v3749_v4  ;;  %v3748_v58 = vsel %vm3687_vm3, %v3745_v33, %v3747_v16  ;;  %v2905_v24 = vadd.f32 %v2794_v55, %v16689_v22  ;;  %v3753_v61 = vrot.slane %v2906_v60, 7  ;;  %v16696_v22 = vld [vmem:[#allocation33_spill] sm:$0xff] }
 0x237   : > { %v13851_v62 = vadd.f32 %v3750_v18, %v3262_v49  ;;  %v13853_v42 = vadd.f32 %v3748_v58, %v3261_v15  ;;  %v10998_v20 = vpop.f32.mrf.mxu0  ;;  %v11072_v53 = vpop.f32.mrf.mxu1  ;;  %v3264_v57 = vadd.f32 %v11069_v32, %v16695_v9  ;;  %v3263_v5 = vadd.f32 %v3152_v37, %v1675_v14  ;;  %v16697_v18 = vld [vmem:[#allocation80_spill] sm:$0xff]  ;;  %v16698_v15 = vld [vmem:[#allocation81_spill] sm:$0xff]  ;;  %v16703_v14 = vld [vmem:[#allocation34_spill] sm:$0xff] }
 0x238   : > { %v3751_v28 = vrot.slane %v2905_v24, 7  ;;  %v2908_v11 = vadd.f32 %v10998_v20, %v16694_v36  ;;  %v1685_v58 = vadd.f32 %v16698_v15, %v16697_v18  ;;  %v13866_v20 = vpop.permute.xlu0 %4334  ;;  %v13868_v37 = vpop.permute.xlu1 %4344  ;;  %v16706_v18 = vld [vmem:[#allocation83_spill] sm:$0xff]  ;;  %v16707_v15 = vld [vmem:[#allocation84_spill] sm:$0xff] }
 0x239   : > { %16692 = vst [vmem:[#allocation18_spill] sm:$0xff] %v13851_v62  ;;  %16693 = vst [vmem:[#allocation62_spill] sm:$0xff] %v13853_v42  ;;  %v2804_v3 = vpop.f32.mrf.mxu0  ;;  %v3162_v33 = vpop.f32.mrf.mxu1 }
 0x23a   : > { %v3754_v55 = vsel %vm3687_vm3, %v3751_v28, %v3753_v61  ;;  %v3752_v16 = vsel %vm3687_vm3, %v3749_v4, %v3751_v28  ;;  %v2907_v49 = vadd.f32 %v2804_v3, %v16696_v22  ;;  %16701 = vst [vmem:[#allocation20_spill] sm:$0xff] %v13866_v20  ;;  %16702 = vst [vmem:[#allocation64_spill] sm:$0xff] %v13868_v37  ;;  %v3757_v9 = vrot.slane %v2908_v11, 7  ;;  %v16704_v4 = vld [vmem:[#allocation79_spill] sm:$0xff] }
 0x23b   : > { %v13862_v10 = vadd.f32 %v3754_v55, %v3264_v57  ;;  %v13864_v60 = vadd.f32 %v3752_v16, %v3263_v5  ;;  %v11001_v24 = vpop.f32.mrf.mxu0  ;;  %v11075_v50 = vpop.f32.mrf.mxu1  ;;  %v3266_v28 = vadd.f32 %v11072_v53, %v16704_v4  ;;  %v3265_v3 = vadd.f32 %v3162_v33, %v1685_v58  ;;  %v16705_v55 = vld [vmem:[#allocation35_spill] sm:$0xff]  ;;  %v16710_v33 = vld [vmem:[#allocation36_spill] sm:$0xff]  ;;  %v16711_v4 = vld [vmem:[#allocation82_spill] sm:$0xff] }
 0x23c   : > { %v3755_v32 = vrot.slane %v2907_v49, 7  ;;  %v2910_v36 = vadd.f32 %v11001_v24, %v16703_v14  ;;  %v3268_v42 = vadd.f32 %v11075_v50, %v16711_v4 }
 0x23d   : > { %16699 = vst [vmem:[#allocation63_spill] sm:$0xff] %v13862_v10  ;;  %16700 = vst [vmem:[#allocation19_spill] sm:$0xff] %v13864_v60  ;;  %v2814_v22 = vpop.f32.mrf.mxu0  ;;  %v3172_v62 = vpop.f32.mrf.mxu1  ;;  %v1695_v10 = vadd.f32 %v16707_v15, %v16706_v18 }
 0x23e   : > { %v3758_v57 = vsel %vm3687_vm3, %v3755_v32, %v3757_v9  ;;  %v3756_v5 = vsel %vm3687_vm3, %v3753_v61, %v3755_v32  ;;  %v2909_v16 = vadd.f32 %v2814_v22, %v16705_v55  ;;  %v3761_v14 = vrot.slane %v2910_v36, 7  ;;  %v13883_v32 = vpop.permute.xlu0 %4349  ;;  %v13885_v22 = vpop.permute.xlu1 %4354  ;;  %v16715_v55 = vld [vmem:[#allocation86_spill] sm:$0xff]  ;;  %v16716_v36 = vld [vmem:[#allocation87_spill] sm:$0xff] }
 0x23f   : > { %v13877_v60 = vadd.f32 %v3758_v57, %v3266_v28  ;;  %v13879_v11 = vadd.f32 %v3756_v5, %v3265_v3  ;;  %v11004_v49 = vpop.f32.mrf.mxu0  ;;  %v11078_v24 = vpop.f32.mrf.mxu1  ;;  %v3267_v37 = vadd.f32 %v3172_v62, %v1695_v10  ;;  %16712 = vst [vmem:[#allocation22_spill] sm:$0xff] %v13883_v32  ;;  %16713 = vst [vmem:[#allocation66_spill] sm:$0xff] %v13885_v22  ;;  %v16714_v57 = vld [vmem:[#allocation37_spill] sm:$0xff] }
 0x240   : > { %v3759_v53 = vrot.slane %v2909_v16, 7  ;;  %v2912_v58 = vadd.f32 %v11004_v49, %v16710_v33  ;;  %v1705_v16 = vadd.f32 %v16716_v36, %v16715_v55  ;;  %v16719_v33 = vld [vmem:[#allocation38_spill] sm:$0xff] }
 0x241   : > { %16708 = vst [vmem:[#allocation65_spill] sm:$0xff] %v13877_v60  ;;  %16709 = vst [vmem:[#allocation21_spill] sm:$0xff] %v13879_v11  ;;  %v2824_v20 = vpop.f32.mrf.mxu0  ;;  %v3182_v61 = vpop.f32.mrf.mxu1  ;;  %v16720_v60 = vld [vmem:[#allocation85_spill] sm:$0xff] }
 0x242   : > { %v3762_v28 = vsel %vm3687_vm3, %v3759_v53, %v3761_v14  ;;  %v3760_v3 = vsel %vm3687_vm3, %v3757_v9, %v3759_v53  ;;  %v2911_v5 = vadd.f32 %v2824_v20, %v16714_v57  ;;  %v3765_v50 = vrot.slane %v2912_v58, 7  ;;  %v16721_v57 = vld [vmem:[#allocation39_spill] sm:$0xff] }
 0x243   : > { %v13892_v18 = vadd.f32 %v3762_v28, %v3268_v42  ;;  %v13894_v15 = vadd.f32 %v3760_v3, %v3267_v37  ;;  %v11007_v62 = vpop.f32.mrf.mxu0  ;;  %v11081_v10 = vpop.f32.mrf.mxu1  ;;  %v3270_v11 = vadd.f32 %v11078_v24, %v16720_v60  ;;  %v3269_v22 = vadd.f32 %v3182_v61, %v1705_v16  ;;  %v16722_v28 = vld [vmem:[#allocation89_spill] sm:$0xff]  ;;  %v16723_v37 = vld [vmem:[#allocation90_spill] sm:$0xff]  ;;  %v16728_v16 = vld [vmem:[#allocation40_spill] sm:$0xff] }
 0x244   : > { %v3763_v49 = vrot.slane %v2911_v5, 7  ;;  %v2914_v4 = vadd.f32 %v11007_v62, %v16719_v33  ;;  %v1715_v3 = vadd.f32 %v16723_v37, %v16722_v28  ;;  %v13907_v62 = vpop.permute.xlu0 %4359  ;;  %v13909_v60 = vpop.permute.xlu1 %4364 }
 0x245   : > { %16717 = vst [vmem:[#allocation67_spill] sm:$0xff] %v13892_v18  ;;  %16718 = vst [vmem:[#allocation23_spill] sm:$0xff] %v13894_v15  ;;  %v2834_v32 = vpop.f32.mrf.mxu0  ;;  %v3192_v9 = vpop.f32.mrf.mxu1  ;;  %v16736_v15 = vld [vmem:[#allocation91_spill] sm:$0xff] }
 0x246   : > { %v3766_v20 = vsel %vm3687_vm3, %v3763_v49, %v3765_v50  ;;  %v3764_v53 = vsel %vm3687_vm3, %v3761_v14, %v3763_v49  ;;  %v2913_v42 = vadd.f32 %v2834_v32, %v16721_v57  ;;  %16726 = vst [vmem:[#allocation69_spill] sm:$0xff] %v13907_v62  ;;  %16727 = vst [vmem:[#allocation25_spill] sm:$0xff] %v13909_v60  ;;  %v3769_v24 = vrot.slane %v2914_v4, 7  ;;  %v16729_v14 = vld [vmem:[#allocation88_spill] sm:$0xff] }
 0x247   : > { %v13903_v55 = vadd.f32 %v3766_v20, %v3270_v11  ;;  %v13905_v58 = vadd.f32 %v3764_v53, %v3269_v22  ;;  %v11010_v5 = vpop.f32.mrf.mxu0  ;;  %v11084_v36 = vpop.f32.mrf.mxu1  ;;  %v3272_v49 = vadd.f32 %v11081_v10, %v16729_v14  ;;  %v3271_v32 = vadd.f32 %v3192_v9, %v1715_v3  ;;  %v9173_v11 = vld [vmem:[%s16457_s5 + $0x8] sm:$0xff]  ;;  %v16730_v53 = vld [vmem:[#allocation41_spill] sm:$0xff]  ;;  %v16731_v4 = vld [vmem:[#allocation92_spill] sm:$0xff] }
 0x248   : > { %v3767_v61 = vrot.slane %v2913_v42, 7  ;;  %v2916_v33 = vadd.f32 %v11010_v5, %v16728_v16  ;;  %11387 = vmatprep.subr.mxu0 %v9173_v11  ;;  %v16732_v42 = vld [vmem:[#allocation93_spill] sm:$0xff]  ;;  %v3274_v60 = vadd.f32 %v11084_v36, %v16736_v15  ;;  %v13929_v62 = vpop.permute.xlu1 %4374 }
 0x249   : > { %16724 = vst [vmem:[#allocation24_spill] sm:$0xff] %v13903_v55  ;;  %16725 = vst [vmem:[#allocation68_spill] sm:$0xff] %v13905_v58  ;;  %v2844_v57 = vpop.f32.mrf.mxu0  ;;  %v3202_v18 = vpop.f32.mrf.mxu1  ;;  %v1725_v37 = vadd.f32 %v16732_v42, %v16731_v4  ;;  %11388 = vmatpush3.msra.mxu0 %v9173_v11  ;;  %v16735_v55 = vld [vmem:[#allocation42_spill] sm:$0xff]  ;;  %v16740_v11 = vld [vmem:[#allocation95_spill] sm:$0xff] }
 0x24a   : > { %v3770_v22 = vsel %vm3687_vm3, %v3767_v61, %v3769_v24  ;;  %v3768_v20 = vsel %vm3687_vm3, %v3765_v50, %v3767_v61  ;;  %v2915_v28 = vadd.f32 %v2844_v57, %v16730_v53  ;;  %v3773_v16 = vrot.slane %v2916_v33, 7  ;;  %v13927_v53 = vpop.permute.xlu0 %4369  ;;  %16738 = vst [vmem:[#allocation27_spill] sm:$0xff] %v13929_v62  ;;  %v16741_v33 = vld [vmem:[#allocation96_spill] sm:$0xff] }
 0x24b   : > { %v13921_v5 = vadd.f32 %v3770_v22, %v3272_v49  ;;  %v13923_v10 = vadd.f32 %v3768_v20, %v3271_v32  ;;  %v11013_v9 = vpop.f32.mrf.mxu0  ;;  %v11087_v3 = vpop.f32.mrf.mxu1  ;;  %v3273_v50 = vadd.f32 %v3202_v18, %v1725_v37  ;;  %16737 = vst [vmem:[#allocation71_spill] sm:$0xff] %v13927_v53  ;;  %v16739_v22 = vld [vmem:[#allocation43_spill] sm:$0xff]  ;;  %v16742_v37 = vld [vmem:[#allocation44_spill] sm:$0xff] }
 0x24c   : > { %v3771_v14 = vrot.slane %v2915_v28, 7  ;;  %v2918_v58 = vadd.f32 %v11013_v9, %v16735_v55  ;;  %v1735_v28 = vadd.f32 %v16741_v33, %v16740_v11 }
 0x24d   : > { %16733 = vst [vmem:[#allocation26_spill] sm:$0xff] %v13921_v5  ;;  %16734 = vst [vmem:[#allocation70_spill] sm:$0xff] %v13923_v10  ;;  %v2854_v61 = vpop.f32.mrf.mxu0  ;;  %v3212_v57 = vpop.f32.mrf.mxu1  ;;  %v16743_v5 = vld [vmem:[#allocation94_spill] sm:$0xff] }
 0x24e   : > { %v3774_v49 = vsel %vm3687_vm3, %v3771_v14, %v3773_v16  ;;  %v3772_v32 = vsel %vm3687_vm3, %v3769_v24, %v3771_v14  ;;  %v2917_v20 = vadd.f32 %v2854_v61, %v16739_v22  ;;  %v3777_v36 = vrot.slane %v2918_v58, 7  ;;  %v16744_v22 = vld [vmem:[#allocation45_spill] sm:$0xff] }
 0x24f   : > { %v13936_v4 = vadd.f32 %v3774_v49, %v3274_v60  ;;  %v13938_v55 = vadd.f32 %v3772_v32, %v3273_v50  ;;  %v11016_v18 = vpop.f32.mrf.mxu0  ;;  %v11090_v15 = vpop.f32.mrf.mxu1  ;;  %v3276_v10 = vadd.f32 %v11087_v3, %v16743_v5  ;;  %v3275_v62 = vadd.f32 %v3212_v57, %v1735_v28  ;;  %v16745_v32 = vld [vmem:[#allocation46_spill] sm:$0xff] }
 0x250   : > { %v3775_v42 = vrot.slane %v2917_v20, 7  ;;  %v2920_v9 = vadd.f32 %v11016_v18, %v16742_v37  ;;  %v1745_v50 = vadd.f32 %v13423_v2, %v13421_v31  ;;  %v3231_v58 = vadd.f32 %v13679_v12, %v16745_v32  ;;  %v13955_v57 = vpop.permute.xlu1 %4384  ;;  %v16747_v28 = vld [vmem:[#allocation98_spill] sm:$0xff]  ;;  %v13961_v31 = vpop.permute.xlu0 %4379 }
 0x251   : > { %v2864_v53 = vpop.f32.mrf.mxu0  ;;  %v3222_v49 = vpop.f32.mrf.mxu1  ;;  %v2133_v3 = vadd.f32 %v13436_v19, %v13434_v8 }
 0x252   : > { %v3778_v24 = vsel %vm3687_vm3, %v3775_v42, %v3777_v36  ;;  %v3776_v14 = vsel %vm3687_vm3, %v3773_v16, %v3775_v42  ;;  %v3638_v61 = vrot.slane %v2920_v9, 7  ;;  %v2919_v60 = vadd.f32 %v2864_v53, %v16744_v22 }
 0x253   : > { %v13949_v20 = vadd.f32 %v3778_v24, %v3276_v10  ;;  %v13951_v11 = vadd.f32 %v3776_v14, %v3275_v62  ;;  %v11095_v5 = vpop.f32.mrf.mxu0  ;;  %v16746_v16 = vrot.slane %v13682_v7, 7  ;;  %v16748_v10 = vld [vmem:[#allocation97_spill] sm:$0xff]  ;;  %v3277_v62 = vadd.f32 %v3222_v49, %v1745_v50 }
 0x254   : > { %v3779_v33 = vrot.slane %v2919_v60, 7  ;;  %v3590_v2 = vadd.f32 %v11095_v5, %v16747_v28  ;;  %v3278_v18 = vadd.f32 %v11090_v15, %v16748_v10  ;;  %v2143_v14 = vadd.f32 %v13446_v46, %v13444_v59  ;;  %v16749_v60 = vld [vmem:[#allocation99_spill] sm:$0xff] }
 0x255   : > { %v3830_v53 = vsel %vm3687_vm3, %v3638_v61, %v16746_v16  ;;  %v3350_v42 = vpop.f32.mrf.mxu0  ;;  %v2163_v5 = vadd.f32 %v13466_v23, %v13464_v51  ;;  %v13987_v59 = vadd.f32 %v13476_v41, %v13474_v40  ;;  %v13991_v46 = vadd.f32 %v13486_v17, %v13484_v47  ;;  %v14002_v51 = vld [vmem:[%s16455_s3] ss:$0 sm:$0xff]  ;;  %v16750_v41 = vld [vmem:[#allocation100_spill] sm:$0xff] }
 0x256   : > { %v3831_v12 = vadd.f32 %v3830_v53, %v3231_v58  ;;  %v3781_v37 = vsel %vm3687_vm3, %v3779_v33, %v3638_v61  ;;  %v3780_v8 = vsel %vm3687_vm3, %v3777_v36, %v3779_v33  ;;  %v13966_v19 = vadd.f32 %v3350_v42, %v2133_v3  ;;  %v13978_v61 = vpop.permute.xlu1 %4394  ;;  %v13993_v3 = vpop.permute.xlu0 %4389  ;;  %v16751_v42 = vld [vmem:[#allocation101_spill] sm:$0xff] }
 0x257   : > { %v13968_v9 = vadd.f32 %v3781_v37, %v3278_v18  ;;  %v13970_v7 = vadd.f32 %v3780_v8, %v3277_v62  ;;  %v11098_v24 = vpop.f32.mrf.mxu0  ;;  %v3929_v22 = vrot.slane %v3590_v2, 1  ;;  %v2153_v36 = vadd.f32 %v13456_v43, %v13454_v25  ;;  %v14024_v2 = vld [vmem:[%s16456_s4] ss:$0 sm:$0xff] }
 0x258   : > { %v16463_v15 = vrot.slane %v13966_v19, 1  ;;  %v3592_v49 = vadd.f32 %v11098_v24, %v16749_v60  ;;  %v13997_v16 = vadd.f32 %v13496_v56, %v13494_v48  ;;  %v14007_v47 = vadd.f32 %v13506_v45, %v13504_v44  ;;  %v16752_v60 = vld [vmem:[#allocation61_spill] sm:$0xff] }
 0x259   : > { %v3360_v50 = vpop.f32.mrf.mxu0  ;;  %v14011_v17 = vadd.f32 %v13516_v52, %v13514_v39  ;;  %v14015_v48 = vadd.f32 %v13526_v38, %v13524_v35  ;;  %v14019_v28 = vadd.f32 %v13536_v34, %v13534_v30  ;;  %v14030_v52 = vadd.f32 %v13546_v0, %v13544_v26 }
 0x25a   : > { %v3930_v32 = vsel %vm3927_vm4, %v16463_v15, %v3929_v22  ;;  %v3591_v58 = vadd.f32 %v3360_v50, %v2143_v14  ;;  %v3933_v23 = vrot.slane %v3592_v49, 1  ;;  %v14039_v10 = vpop.permute.xlu1 %4404  ;;  %v14044_v26 = vadd.f32 %v13566_v13, %v13564_v63  ;;  %v14046_v0 = vpop.permute.xlu0 %4399  ;;  %v16753_v50 = vld [vmem:[#allocation47_spill] sm:$0xff] }
 0x25b   : > { %v4073_v25 = vadd.f32 %v3930_v32, %v3831_v12  ;;  %v11101_v43 = vpop.f32.mrf.mxu0  ;;  %v14037_v12 = vadd.f32 %v13556_v29, %v13554_v21  ;;  %v14051_v21 = vadd.f32 %v13576_v6, %v13574_v27  ;;  %v16756_v27 = vld [vmem:[#allocation48_spill] sm:$0xff] }
 0x25c   : > { %v3931_v40 = vrot.slane %v3591_v58, 1  ;;  %v3594_v53 = vadd.f32 %v11101_v43, %v16750_v41  ;;  %v16754_v58 = vld [vmem:[#allocation114_spill] sm:$0xff] }
 0x25d   : > { %v4121_v56 = vmax.f32 %v4073_v25, 0.0  ;;  %v3370_v33 = vpop.f32.mrf.mxu0  ;;  %v16755_v25 = vld [vmem:[#allocation115_spill] sm:$0xff] }
 0x25e   : > { %v3932_v44 = vsel %vm3927_vm4, %v3929_v22, %v3931_v40  ;;  %v3934_v45 = vsel %vm3927_vm4, %v3931_v40, %v3933_v23  ;;  %v3593_v39 = vadd.f32 %v3370_v33, %v2153_v36  ;;  %v3937_v18 = vrot.slane %v3594_v53, 1 }
 0x25f   : > { %v4176_v35 = vmul.f32 %v14002_v51, %v4121_v56  ;;  %v4074_v38 = vadd.f32 %v3932_v44, %v13691_v1  ;;  %v4075_v30 = vadd.f32 %v3934_v45, %v13701_v54  ;;  %v11104_v34 = vpop.f32.mrf.mxu0  ;;  %v14061_v43 = vadd.f32 %v16755_v25, %v16754_v58  ;;  %v16757_v56 = vld [vmem:[#allocation102_spill] sm:$0xff]  ;;  %v16758_v45 = vld [vmem:[#allocation117_spill] sm:$0xff]  ;;  %v16767_v58 = vld [vmem:[#allocation124_spill] sm:$0xff] }
 0x260   : > { %v3935_v62 = vrot.slane %v3593_v39, 1  ;;  %v3596_v37 = vadd.f32 %v11104_v34, %v16751_v42  ;;  %v16759_v39 = vld [vmem:[#allocation118_spill] sm:$0xff]  ;;  %v14076_v42 = vpop.permute.xlu0 %4409 }
 0x261   : > { %v4231_v1 = vadd.f32 %v14024_v2, %v4176_v35  ;;  %v4122_v54 = vmax.f32 %v4074_v38, 0.0  ;;  %v4123_v8 = vmax.f32 %v4075_v30, 0.0  ;;  %v3380_v24 = vpop.f32.mrf.mxu0  ;;  %v14070_v35 = vadd.f32 %v16759_v39, %v16758_v45  ;;  %v14072_v38 = vpop.permute.xlu1 %4414  ;;  %v16768_v45 = vld [vmem:[#allocation103_spill] sm:$0xff] }
 0x262   : > { %v3936_v29 = vsel %vm3927_vm4, %v3933_v23, %v3935_v62  ;;  %v3938_v14 = vsel %vm3927_vm4, %v3935_v62, %v3937_v18  ;;  %v3595_v22 = vadd.f32 %v3380_v24, %v2163_v5  ;;  %v3941_v40 = vrot.slane %v3596_v37, 1  ;;  %v16760_v37 = vld [vmem:[#allocation20_spill] sm:$0xff] }
 0x263   : > { %v4567_v49 = vmul.f32 %v16752_v60, %v4231_v1  ;;  %v4177_v63 = vmul.f32 %v14002_v51, %v4122_v54  ;;  %v4178_v13 = vmul.f32 %v14002_v51, %v4123_v8  ;;  %v4076_v36 = vadd.f32 %v3936_v29, %v16753_v50  ;;  %v11107_v32 = vpop.f32.mrf.mxu0  ;;  %v16761_v54 = vld [vmem:[#allocation17_spill] sm:$0xff]  ;;  %v16762_v29 = vld [vmem:[#allocation4_spill] sm:$0xff] }
 0x264   : > { %v4077_v6 = vadd.f32 %v3938_v14, %v16756_v27  ;;  %v3939_v23 = vrot.slane %v3595_v22, 1  ;;  %v3598_v33 = vadd.f32 %v11107_v32, %v16757_v56  ;;  %v16763_v60 = vld [vmem:[#allocation120_spill] sm:$0xff]  ;;  %v16766_v32 = vld [vmem:[#allocation123_spill] sm:$0xff] }
 0x265   : > { %4622 = vst.msk [vmem:[#allocation2 + $0x18] sm:$0xff] %vm4615_vm2, %v4567_v49  ;;  %v4232_v5 = vadd.f32 %v14024_v2, %v4177_v63  ;;  %v4233_v41 = vadd.f32 %v14024_v2, %v4178_v13  ;;  %v4124_v53 = vmax.f32 %v4076_v36, 0.0  ;;  %v3390_v44 = vpop.f32.mrf.mxu0  ;;  %v16764_v49 = vld [vmem:[#allocation121_spill] sm:$0xff]  ;;  %v14091_v25 = vadd.f32 %v16767_v58, %v16766_v32 }
 0x266   : > { %v4125_v30 = vmax.f32 %v4077_v6, 0.0  ;;  %v3940_v34 = vsel %vm3927_vm4, %v3937_v18, %v3939_v23  ;;  %v3942_v62 = vsel %vm3927_vm4, %v3939_v23, %v3941_v40  ;;  %v14084_v63 = vadd.f32 %v16764_v49, %v16763_v60  ;;  %v16765_v18 = vld [vmem:[#allocation5_spill] sm:$0xff]  ;;  %v14111_v49 = vpop.permute.xlu0 %4419 }
 0x267   : > { %v4568_v1 = vmul.f32 %v16760_v37, %v4232_v5  ;;  %v4569_v8 = vmul.f32 %v16761_v54, %v4233_v41  ;;  %v4179_v24 = vmul.f32 %v14002_v51, %v4124_v53  ;;  %v4078_v14 = vadd.f32 %v3940_v34, %v16762_v29  ;;  %v11110_v22 = vpop.f32.mrf.mxu0  ;;  %v16771_v34 = vld [vmem:[#allocation64_spill] sm:$0xff] }
 0x268   : > { %v4180_v13 = vmul.f32 %v14002_v51, %v4125_v30  ;;  %v4079_v50 = vadd.f32 %v3942_v62, %v16765_v18  ;;  %v3597_v36 = vadd.f32 %v3390_v44, %v13987_v59  ;;  %v3945_v23 = vrot.slane %v3598_v33, 1  ;;  %v16769_v59 = vld [vmem:[#allocation126_spill] sm:$0xff]  ;;  %v16770_v44 = vld [vmem:[#allocation127_spill] sm:$0xff]  ;;  %v16773_v18 = vld [vmem:[#allocation49_spill] sm:$0xff] }
 0x269   : > { %4623 = vst.msk [vmem:[#allocation2 + $0x20] sm:$0xff] %vm4615_vm2, %v4568_v1  ;;  %4624 = vst.msk [vmem:[#allocation2 + $0x28] sm:$0xff] %vm4615_vm2, %v4569_v8  ;;  %v4234_v27 = vadd.f32 %v14024_v2, %v4179_v24  ;;  %v4126_v6 = vmax.f32 %v4078_v14, 0.0  ;;  %v3400_v5 = vpop.f32.mrf.mxu0  ;;  %v3600_v39 = vadd.f32 %v11110_v22, %v16768_v45  ;;  %v14100_v30 = vadd.f32 %v16770_v44, %v16769_v59  ;;  %v14105_v8 = vpop.permute.xlu1 %4424  ;;  %v16772_v33 = vld [vmem:[#allocation22_spill] sm:$0xff] }
 0x26a   : > { %v4235_v41 = vadd.f32 %v14024_v2, %v4180_v13  ;;  %v4127_v53 = vmax.f32 %v4079_v50, 0.0  ;;  %v3943_v56 = vrot.slane %v3597_v36, 1  ;;  %v3599_v1 = vadd.f32 %v3400_v5, %v13991_v46  ;;  %v16774_v50 = vld [vmem:[#allocation50_spill] sm:$0xff] }
 0x26b   : > { %v4570_v62 = vmul.f32 %v16771_v34, %v4234_v27  ;;  %v4181_v37 = vmul.f32 %v14002_v51, %v4126_v6  ;;  %v11113_v54 = vpop.f32.mrf.mxu0  ;;  %v3949_v27 = vrot.slane %v3600_v39, 1  ;;  %v16775_v6 = vld [vmem:[#allocation104_spill] sm:$0xff] }
 0x26c   : > { %v4571_v24 = vmul.f32 %v16772_v33, %v4235_v41  ;;  %v4182_v29 = vmul.f32 %v14002_v51, %v4127_v53  ;;  %v3944_v14 = vsel %vm3927_vm4, %v3941_v40, %v3943_v56  ;;  %v3946_v22 = vsel %vm3927_vm4, %v3943_v56, %v3945_v23  ;;  %v4673_v60 = vld [vmem:[#allocation2 + $0x18] sm:$0xff]  ;;  %v16776_v53 = vld [vmem:[#allocation66_spill] sm:$0xff]  ;;  %v16779_v33 = vld [vmem:[#allocation69_spill] sm:$0xff] }
 0x26d   : > { %4625 = vst.msk [vmem:[#allocation2 + $0x30] sm:$0xff] %vm4615_vm2, %v4570_v62  ;;  %v4236_v13 = vadd.f32 %v14024_v2, %v4181_v37  ;;  %v4080_v46 = vadd.f32 %v3944_v14, %v16773_v18  ;;  %v4081_v36 = vadd.f32 %v3946_v22, %v16774_v50  ;;  %v3947_v32 = vrot.slane %v3599_v1, 1  ;;  %v3410_v58 = vpop.f32.mrf.mxu0  ;;  %11167 = vmatprep.mubr.msk.f32.mxu1 %vm4615_vm2, %v4673_v60  ;;  %v16777_v62 = vld [vmem:[#allocation129_spill] sm:$0xff]  ;;  %v16778_v37 = vld [vmem:[#allocation130_spill] sm:$0xff] }
 0x26e   : > { %11245 = vmatmul.mubr.msk.f32.gmra.mxu0 %vm4615_vm2, %v4673_v60  ;;  %4626 = vst.msk [vmem:[#allocation2 + $0x38] sm:$0xff] %vm4615_vm2, %v4571_v24  ;;  %v4237_v40 = vadd.f32 %v14024_v2, %v4182_v29  ;;  %v14122_v5 = vadd.f32 %v11113_v54, %v16775_v6  ;;  %v3601_v41 = vadd.f32 %v3410_v58, %v13997_v16  ;;  %v16780_v29 = vld [vmem:[#allocation6_spill] sm:$0xff] }
 0x26f   : > { %v4572_v56 = vmul.f32 %v16776_v53, %v4236_v13  ;;  %v4128_v45 = vmax.f32 %v4080_v46, 0.0  ;;  %v4129_v59 = vmax.f32 %v4081_v36, 0.0  ;;  %v3948_v44 = vsel %vm3927_vm4, %v3945_v23, %v3947_v32  ;;  %v11116_v34 = vpop.f32.mrf.mxu0  ;;  %v9369_v16 = vld [vmem:[%s16457_s5 + $0x28] sm:$0xff]  ;;  %v16781_v13 = vld [vmem:[#allocation7_spill] sm:$0xff]  ;;  %v14143_v36 = vpop.permute.xlu1 %4434 }
 0x270   : > { %v14129_v1 = vadd.f32 %v16778_v37, %v16777_v62  ;;  %v4573_v24 = vmul.f32 %v16779_v33, %v4237_v40  ;;  %v3950_v39 = vsel %vm3927_vm4, %v3947_v32, %v3949_v27  ;;  %v4082_v54 = vadd.f32 %v3948_v44, %v16780_v29  ;;  %v4674_v14 = vld [vmem:[#allocation2 + $0x20] sm:$0xff]  ;;  %v4675_v22 = vld [vmem:[#allocation2 + $0x28] sm:$0xff]  ;;  %v16784_v37 = vld [vmem:[#allocation51_spill] sm:$0xff] }
 0x271   : > { %4627 = vst.msk [vmem:[#allocation2 + $0x40] sm:$0xff] %vm4615_vm2, %v4572_v56  ;;  %v4183_v23 = vmul.f32 %v14002_v51, %v4128_v45  ;;  %v4184_v60 = vmul.f32 %v14002_v51, %v4129_v59  ;;  %v4083_v18 = vadd.f32 %v3950_v39, %v16781_v13  ;;  %v3951_v46 = vrot.slane %v3601_v41, 1  ;;  %v3420_v50 = vpop.f32.mrf.mxu0  ;;  %11168 = vmatmul.mubr.msk.f32.vlgmr.msra.gmra.mxu1 %vm4615_vm2, %v4674_v14  ;;  %v16782_v40 = vld [vmem:[#allocation105_spill] sm:$0xff]  ;;  %v16783_v56 = vld [vmem:[#allocation3_spill] sm:$0xff]  ;;  %v14153_v41 = vpop.permute.xlu0 %4429 }
 0x272   : > { %11247 = vmatprep.mubr.msk.f32.mxu0 %vm4615_vm2, %v4674_v14  ;;  %4628 = vst.msk [vmem:[#allocation2 + $0x48] sm:$0xff] %vm4615_vm2, %v4573_v24  ;;  %v4130_v32 = vmax.f32 %v4082_v54, 0.0  ;;  %v3953_v58 = vrot.slane %v14122_v5, 1  ;;  %v14148_v6 = vadd.f32 %v11116_v34, %v16782_v40  ;;  %v3603_v53 = vadd.f32 %v3420_v50, %v14007_v47  ;;  %11314 = vmatpush3.msra.mxu1 %v16783_v56  ;;  %v16785_v29 = vld [vmem:[#allocation25_spill] sm:$0xff]  ;;  %v16786_v14 = vld [vmem:[#allocation71_spill] sm:$0xff] }
 0x273   : > { %11170 = vmatprep.mubr.msk.f32.mxu1 %vm4615_vm2, %v4675_v22  ;;  %v4238_v45 = vadd.f32 %v14024_v2, %v4183_v23  ;;  %v4239_v59 = vadd.f32 %v14024_v2, %v4184_v60  ;;  %v4131_v44 = vmax.f32 %v4083_v18, 0.0  ;;  %v3952_v62 = vsel %vm3927_vm4, %v3949_v27, %v3951_v46  ;;  %11248 = vmatmul.mubr.msk.f32.gmra.mxu0 %vm4615_vm2, %v4675_v22  ;;  %v11119_v5 = vpop.f32.mrf.mxu0  ;;  %v16787_v27 = vld [vmem:[#allocation52_spill] sm:$0xff]  ;;  %v16790_v56 = vld [vmem:[#allocation133_spill] sm:$0xff] }
 0x274   : > { %11461 = vmatprep.subr.mxu1 %v9369_v16  ;;  %v4185_v34 = vmul.f32 %v14002_v51, %v4130_v32  ;;  %v3954_v47 = vsel %vm3927_vm4, %v3951_v46, %v3953_v58  ;;  %v4084_v33 = vadd.f32 %v3952_v62, %v16784_v37  ;;  %v3957_v24 = vrot.slane %v14148_v6, 1  ;;  %v4676_v39 = vld [vmem:[#allocation2 + $0x30] sm:$0xff]  ;;  %v16788_v32 = vld [vmem:[#allocation106_spill] sm:$0xff]  ;;  %v16789_v6 = vld [vmem:[#allocation132_spill] sm:$0xff] }
 0x275   : > { %v4574_v54 = vmul.f32 %v16785_v29, %v4238_v45  ;;  %v4575_v23 = vmul.f32 %v16786_v14, %v4239_v59  ;;  %v4186_v60 = vmul.f32 %v14002_v51, %v4131_v44  ;;  %v4085_v13 = vadd.f32 %v3954_v47, %v16787_v27  ;;  %v3430_v22 = vpop.f32.mrf.mxu0  ;;  %11171 = vmatmul.mubr.msk.f32.gmra.mxu1 %vm4615_vm2, %v4676_v39  ;;  %v4677_v16 = vld [vmem:[#allocation2 + $0x38] sm:$0xff]  ;;  %v16793_v27 = vld [vmem:[#allocation9_spill] sm:$0xff] }
 0x276   : > { %v4240_v18 = vadd.f32 %v14024_v2, %v4185_v34  ;;  %v4132_v46 = vmax.f32 %v4084_v33, 0.0  ;;  %v3955_v50 = vrot.slane %v3603_v53, 1  ;;  %v14170_v40 = vadd.f32 %v11119_v5, %v16788_v32  ;;  %11250 = vmatprep.mubr.msk.f32.mxu0 %vm4615_vm2, %v4676_v39  ;;  %11173 = vmatprep.mubr.msk.f32.mxu1 %vm4615_vm2, %v4677_v16  ;;  %v14183_v5 = vpop.permute.xlu1 %4444  ;;  %v16791_v34 = vld [vmem:[#allocation27_spill] sm:$0xff] }
 0x277   : > { %v14176_v45 = vadd.f32 %v16790_v56, %v16789_v6  ;;  %4629 = vst.msk [vmem:[#allocation2 + $0x50] sm:$0xff] %vm4615_vm2, %v4574_v54  ;;  %4630 = vst.msk [vmem:[#allocation2 + $0x58] sm:$0xff] %vm4615_vm2, %v4575_v23  ;;  %v4241_v59 = vadd.f32 %v14024_v2, %v4186_v60  ;;  %v4133_v44 = vmax.f32 %v4085_v13, 0.0  ;;  %v3605_v53 = vadd.f32 %v3430_v22, %v14011_v17  ;;  %v11122_v62 = vpop.f32.mrf.mxu0  ;;  %v14189_v54 = vpop.permute.xlu0 %4439  ;;  %v16792_v23 = vld [vmem:[#allocation8_spill] sm:$0xff] }
 0x278   : > { %11251 = vmatmul.mubr.msk.f32.gmra.mxu0 %vm4615_vm2, %v4677_v16  ;;  %v4576_v47 = vmul.f32 %v16791_v34, %v4240_v18  ;;  %v4187_v37 = vmul.f32 %v14002_v51, %v4132_v46  ;;  %v3956_v33 = vsel %vm3927_vm4, %v3953_v58, %v3955_v50  ;;  %v3958_v39 = vsel %vm3927_vm4, %v3955_v50, %v3957_v24  ;;  %v4678_v29 = vld [vmem:[#allocation2 + $0x40] sm:$0xff]  ;;  %v16794_v50 = vld [vmem:[#allocation107_spill] sm:$0xff] }
 0x279   : > { %v4577_v14 = vmul.f32 %v13961_v31, %v4241_v59  ;;  %v4188_v17 = vmul.f32 %v14002_v51, %v4133_v44  ;;  %v4086_v60 = vadd.f32 %v3956_v33, %v16792_v23  ;;  %v4087_v13 = vadd.f32 %v3958_v39, %v16793_v27  ;;  %v3440_v22 = vpop.f32.mrf.mxu0  ;;  %11174 = vmatmul.mubr.msk.f32.gmra.mxu1 %vm4615_vm2, %v4678_v29  ;;  %v14196_v16 = vld [vmem:[#allocation2 + $0x48] sm:$0xff]  ;;  %v16795_v39 = vld [vmem:[#allocation53_spill] sm:$0xff]  ;;  %v16797_v23 = vld [vmem:[#allocation108_spill] sm:$0xff] }
 0x27a   : > { %4631 = vst.msk [vmem:[#allocation2 + $0x60] sm:$0xff] %vm4615_vm2, %v4576_v47  ;;  %v4242_v58 = vadd.f32 %v14024_v2, %v4187_v37  ;;  %v3961_v18 = vrot.slane %v14170_v40, 1  ;;  %v3959_v46 = vrot.slane %v3605_v53, 1  ;;  %v14202_v31 = vadd.f32 %v11122_v62, %v16794_v50  ;;  %11253 = vmatprep.mubr.msk.f32.mxu0 %vm4615_vm2, %v4678_v29  ;;  %11176 = vmatprep.mubr.msk.f32.mxu1 %vm4615_vm2, %v14196_v16 }
 0x27b   : > { %4632 = vst.msk [vmem:[#allocation2 + $0x68] sm:$0xff] %vm4615_vm2, %v4577_v14  ;;  %v4243_v32 = vadd.f32 %v14024_v2, %v4188_v17  ;;  %v4134_v6 = vmax.f32 %v4086_v60, 0.0  ;;  %v4135_v56 = vmax.f32 %v4087_v13, 0.0  ;;  %v3607_v59 = vadd.f32 %v3440_v22, %v14015_v48  ;;  %v11125_v40 = vpop.f32.mrf.mxu0  ;;  %v14220_v14 = vpop.permute.xlu1 %4454  ;;  %v16798_v22 = vld [vmem:[#allocation135_spill] sm:$0xff] }
 0x27c   : > { %11254 = vmatmul.mubr.msk.f32.gmra.mxu0 %vm4615_vm2, %v14196_v16  ;;  %v4578_v44 = vmul.f32 %v13955_v57, %v4242_v58  ;;  %v3960_v53 = vsel %vm3927_vm4, %v3957_v24, %v3959_v46  ;;  %v3962_v62 = vsel %vm3927_vm4, %v3959_v46, %v3961_v18  ;;  %v3965_v34 = vrot.slane %v14202_v31, 1  ;;  %v16796_v57 = vld [vmem:[#allocation54_spill] sm:$0xff]  ;;  %v16799_v58 = vld [vmem:[#allocation136_spill] sm:$0xff]  ;;  %v14236_v50 = vpop.permute.xlu0 %4449 }
 0x27d   : > { %v4579_v47 = vmul.f32 %v13993_v3, %v4243_v32  ;;  %v4189_v37 = vmul.f32 %v14002_v51, %v4134_v6  ;;  %v4190_v33 = vmul.f32 %v14002_v51, %v4135_v56  ;;  %v4088_v48 = vadd.f32 %v3960_v53, %v16795_v39  ;;  %v3450_v29 = vpop.f32.mrf.mxu0 }
 0x27e   : > { %4633 = vst.msk [vmem:[#allocation2 + $0x70] sm:$0xff] %vm4615_vm2, %v4578_v44  ;;  %v4089_v17 = vadd.f32 %v3962_v62, %v16796_v57  ;;  %v3963_v24 = vrot.slane %v3607_v59, 1  ;;  %v14225_v60 = vadd.f32 %v11125_v40, %v16797_v23  ;;  %v3609_v27 = vadd.f32 %v3450_v29, %v14019_v28  ;;  %v14228_v3 = vld [vmem:[#allocation2 + $0x50] sm:$0xff]  ;;  %v14230_v13 = vld [vmem:[#allocation2 + $0x58] sm:$0xff] }
 0x27f   : > { %v14234_v46 = vadd.f32 %v16799_v58, %v16798_v22  ;;  %4634 = vst.msk [vmem:[#allocation2 + $0x78] sm:$0xff] %vm4615_vm2, %v4579_v47  ;;  %v4244_v31 = vadd.f32 %v14024_v2, %v4189_v37  ;;  %v4245_v32 = vadd.f32 %v14024_v2, %v4190_v33  ;;  %v4136_v6 = vmax.f32 %v4088_v48, 0.0  ;;  %11177 = vmatmul.mubr.msk.f32.gmra.mxu1 %vm4615_vm2, %v14228_v3  ;;  %v11128_v28 = vpop.f32.mrf.mxu0  ;;  %v16800_v37 = vld [vmem:[#allocation10_spill] sm:$0xff]  ;;  %v16801_v29 = vld [vmem:[#allocation11_spill] sm:$0xff] }
 0x280   : > { %11256 = vmatprep.mubr.msk.f32.mxu0 %vm4615_vm2, %v14228_v3  ;;  %v4137_v56 = vmax.f32 %v4089_v17, 0.0  ;;  %v3964_v59 = vsel %vm3927_vm4, %v3961_v18, %v3963_v24  ;;  %v3966_v40 = vsel %vm3927_vm4, %v3963_v24, %v3965_v34  ;;  %v3969_v44 = vrot.slane %v14225_v60, 1  ;;  %11179 = vmatprep.mubr.msk.f32.mxu1 %vm4615_vm2, %v14230_v13  ;;  %v16802_v24 = vld [vmem:[#allocation109_spill] sm:$0xff]  ;;  %v16804_v60 = vld [vmem:[#allocation139_spill] sm:$0xff] }
 0x281   : > { %11257 = vmatmul.mubr.msk.f32.gmra.mxu0 %vm4615_vm2, %v14230_v13  ;;  %v4580_v53 = vmul.f32 %v13978_v61, %v4244_v31  ;;  %v4581_v62 = vmul.f32 %v14046_v0, %v4245_v32  ;;  %v4191_v47 = vmul.f32 %v14002_v51, %v4136_v6  ;;  %v4090_v33 = vadd.f32 %v3964_v59, %v16800_v37  ;;  %v3460_v39 = vpop.f32.mrf.mxu0  ;;  %v14256_v18 = vld [vmem:[#allocation2 + $0x60] sm:$0xff]  ;;  %v16803_v0 = vld [vmem:[#allocation138_spill] sm:$0xff]  ;;  %v14277_v6 = vpop.permute.xlu1 %4464 }
 0x282   : > { %v4192_v48 = vmul.f32 %v14002_v51, %v4137_v56  ;;  %v4091_v57 = vadd.f32 %v3966_v40, %v16801_v29  ;;  %v3967_v17 = vrot.slane %v3609_v27, 1  ;;  %v14261_v23 = vadd.f32 %v11128_v28, %v16802_v24  ;;  %11259 = vmatprep.mubr.msk.f32.mxu0 %vm4615_vm2, %v14256_v18  ;;  %v14265_v61 = vld [vmem:[#allocation2 + $0x68] sm:$0xff] }
 0x283   : > { %v14269_v22 = vadd.f32 %v16804_v60, %v16803_v0  ;;  %4635 = vst.msk [vmem:[#allocation2 + $0x80] sm:$0xff] %vm4615_vm2, %v4580_v53  ;;  %4636 = vst.msk [vmem:[#allocation2 + $0x88] sm:$0xff] %vm4615_vm2, %v4581_v62  ;;  %v4246_v58 = vadd.f32 %v14024_v2, %v4191_v47  ;;  %v4138_v31 = vmax.f32 %v4090_v33, 0.0  ;;  %v3611_v27 = vadd.f32 %v3460_v39, %v14030_v52  ;;  %v11131_v32 = vpop.f32.mrf.mxu0  ;;  %v14286_v52 = vpop.permute.xlu0 %4459  ;;  %v16805_v47 = vld [vmem:[#allocation55_spill] sm:$0xff]  ;;  %v16806_v33 = vld [vmem:[#allocation56_spill] sm:$0xff] }
 0x284   : > { %11180 = vmatmul.mubr.msk.f32.gmra.mxu1 %vm4615_vm2, %v14256_v18  ;;  %v4247_v28 = vadd.f32 %v14024_v2, %v4192_v48  ;;  %v4139_v56 = vmax.f32 %v4091_v57, 0.0  ;;  %v3968_v59 = vsel %vm3927_vm4, %v3965_v34, %v3967_v17  ;;  %v3970_v40 = vsel %vm3927_vm4, %v3967_v17, %v3969_v44 }
 0x285   : > { %11182 = vmatprep.mubr.msk.f32.mxu1 %vm4615_vm2, %v14265_v61  ;;  %11260 = vmatmul.mubr.msk.f32.gmra.mxu0 %vm4615_vm2, %v14265_v61  ;;  %v4582_v53 = vmul.f32 %v14039_v10, %v4246_v58  ;;  %v4193_v62 = vmul.f32 %v14002_v51, %v4138_v31  ;;  %v4092_v37 = vadd.f32 %v3968_v59, %v16805_v47  ;;  %v3470_v48 = vpop.f32.mrf.mxu0  ;;  %v14292_v34 = vld [vmem:[#allocation2 + $0x70] sm:$0xff]  ;;  %v3973_v17 = vrot.slane %v14261_v23, 1  ;;  %v16807_v31 = vld [vmem:[#allocation110_spill] sm:$0xff] }
 0x286   : > { %v4093_v39 = vadd.f32 %v3970_v40, %v16806_v33  ;;  %v4583_v29 = vmul.f32 %v14076_v42, %v4247_v28  ;;  %v4194_v57 = vmul.f32 %v14002_v51, %v4139_v56  ;;  %v3971_v24 = vrot.slane %v3611_v27, 1  ;;  %11262 = vmatprep.mubr.msk.f32.mxu0 %vm4615_vm2, %v14292_v34  ;;  %v14299_v10 = vld [vmem:[#allocation2 + $0x78] sm:$0xff] }
 0x287   : > { %4637 = vst.msk [vmem:[#allocation2 + $0x90] sm:$0xff] %vm4615_vm2, %v4582_v53  ;;  %v4248_v0 = vadd.f32 %v14024_v2, %v4193_v62  ;;  %v4140_v60 = vmax.f32 %v4092_v37, 0.0  ;;  %v14304_v59 = vadd.f32 %v11131_v32, %v16807_v31  ;;  %v11134_v42 = vpop.f32.mrf.mxu0  ;;  %v3613_v56 = vadd.f32 %v3470_v48, %v14037_v12  ;;  %v16808_v62 = vld [vmem:[#allocation12_spill] sm:$0xff]  ;;  %v16809_v12 = vld [vmem:[#allocation13_spill] sm:$0xff]  ;;  %v16810_v31 = vld [vmem:[#allocation111_spill] sm:$0xff] }
 0x288   : > { %v4141_v58 = vmax.f32 %v4093_v39, 0.0  ;;  %11183 = vmatmul.mubr.msk.f32.gmra.mxu1 %vm4615_vm2, %v14292_v34  ;;  %4638 = vst.msk [vmem:[#allocation2 + $0x98] sm:$0xff] %vm4615_vm2, %v4583_v29  ;;  %v4249_v23 = vadd.f32 %v14024_v2, %v4194_v57  ;;  %v3972_v27 = vsel %vm3927_vm4, %v3969_v44, %v3971_v24  ;;  %v3974_v28 = vsel %vm3927_vm4, %v3971_v24, %v3973_v17  ;;  %v14321_v44 = vpop.permute.xlu1 %4474  ;;  %v14330_v24 = vpop.permute.xlu0 %4469 }
 0x289   : > { %11185 = vmatprep.mubr.msk.f32.mxu1 %vm4615_vm2, %v14299_v10  ;;  %v4584_v32 = vmul.f32 %v14072_v38, %v4248_v0  ;;  %v4195_v40 = vmul.f32 %v14002_v51, %v4140_v60  ;;  %v4094_v47 = vadd.f32 %v3972_v27, %v16808_v62  ;;  %11263 = vmatmul.mubr.msk.f32.gmra.mxu0 %vm4615_vm2, %v14299_v10  ;;  %v3480_v37 = vpop.f32.mrf.mxu0  ;;  %v3977_v48 = vrot.slane %v14304_v59, 1 }
 0x28a   : > { %v4196_v53 = vmul.f32 %v14002_v51, %v4141_v58  ;;  %v4585_v33 = vmul.f32 %v14111_v49, %v4249_v23  ;;  %v4095_v39 = vadd.f32 %v3974_v28, %v16809_v12  ;;  %v3975_v29 = vrot.slane %v3613_v56, 1  ;;  %v14326_v38 = vld [vmem:[#allocation2 + $0x80] sm:$0xff]  ;;  %v14328_v57 = vld [vmem:[#allocation2 + $0x88] sm:$0xff] }
 0x28b   : > { %4639 = vst.msk [vmem:[#allocation2 + $0xa0] sm:$0xff] %vm4615_vm2, %v4584_v32  ;;  %v4250_v0 = vadd.f32 %v14024_v2, %v4195_v40  ;;  %v4142_v58 = vmax.f32 %v4094_v47, 0.0  ;;  %v3616_v49 = vadd.f32 %v11134_v42, %v16810_v31  ;;  %11265 = vmatprep.mubr.msk.f32.mxu0 %vm4615_vm2, %v14326_v38  ;;  %v11137_v59 = vpop.f32.mrf.mxu0  ;;  %v3615_v56 = vadd.f32 %v3480_v37, %v14044_v26 }
 0x28c   : > { %v4251_v60 = vadd.f32 %v14024_v2, %v4196_v53  ;;  %11186 = vmatmul.mubr.msk.f32.gmra.mxu1 %vm4615_vm2, %v14326_v38  ;;  %4640 = vst.msk [vmem:[#allocation2 + $0xa8] sm:$0xff] %vm4615_vm2, %v4585_v33  ;;  %v4143_v23 = vmax.f32 %v4095_v39, 0.0  ;;  %v3976_v27 = vsel %vm3927_vm4, %v3973_v17, %v3975_v29  ;;  %v3978_v28 = vsel %vm3927_vm4, %v3975_v29, %v3977_v48  ;;  %v16811_v53 = vld [vmem:[#allocation57_spill] sm:$0xff]  ;;  %v16812_v33 = vld [vmem:[#allocation58_spill] sm:$0xff]  ;;  %v16813_v29 = vld [vmem:[#allocation112_spill] sm:$0xff] }
 0x28d   : > { %11188 = vmatprep.mubr.msk.f32.mxu1 %vm4615_vm2, %v14328_v57  ;;  %v4586_v42 = vmul.f32 %v14105_v8, %v4250_v0  ;;  %v4197_v40 = vmul.f32 %v14002_v51, %v4142_v58  ;;  %v4096_v62 = vadd.f32 %v3976_v27, %v16811_v53  ;;  %11266 = vmatmul.mubr.msk.f32.gmra.mxu0 %vm4615_vm2, %v14328_v57  ;;  %v3490_v47 = vpop.f32.mrf.mxu0  ;;  %v3981_v26 = vrot.slane %v3616_v49, 1  ;;  %v14369_v49 = vpop.permute.xlu1 %4484  ;;  %v16815_v53 = vld [vmem:[#allocation15_spill] sm:$0xff] }
 0x28e   : > { %v4587_v32 = vmul.f32 %v14153_v41, %v4251_v60  ;;  %v4198_v17 = vmul.f32 %v14002_v51, %v4143_v23  ;;  %v4097_v12 = vadd.f32 %v3978_v28, %v16812_v33  ;;  %v3979_v37 = vrot.slane %v3615_v56, 1  ;;  %v14354_v39 = vld [vmem:[#allocation2 + $0x90] sm:$0xff] }
 0x28f   : > { %4641 = vst.msk [vmem:[#allocation2 + $0xb0] sm:$0xff] %vm4615_vm2, %v4586_v42  ;;  %v4252_v8 = vadd.f32 %v14024_v2, %v4197_v40  ;;  %v4144_v41 = vmax.f32 %v4096_v62, 0.0  ;;  %v14360_v0 = vadd.f32 %v11137_v59, %v16813_v29  ;;  %v3617_v60 = vadd.f32 %v3490_v47, %v14051_v21  ;;  %11268 = vmatprep.mubr.msk.f32.mxu0 %vm4615_vm2, %v14354_v39  ;;  %v14367_v58 = vld [vmem:[#allocation2 + $0x98] sm:$0xff]  ;;  %v11140_v31 = vpop.f32.mrf.mxu0  ;;  %v14376_v21 = vpop.permute.xlu0 %4479  ;;  %v16816_v29 = vld [vmem:[#allocation113_spill] sm:$0xff] }
 0x290   : > { %4642 = vst.msk [vmem:[#allocation2 + $0xb8] sm:$0xff] %vm4615_vm2, %v4587_v32  ;;  %11189 = vmatmul.mubr.msk.f32.gmra.mxu1 %vm4615_vm2, %v14354_v39  ;;  %v4253_v23 = vadd.f32 %v14024_v2, %v4198_v17  ;;  %v4145_v27 = vmax.f32 %v4097_v12, 0.0  ;;  %v3980_v28 = vsel %vm3927_vm4, %v3977_v48, %v3979_v37  ;;  %v3982_v59 = vsel %vm3927_vm4, %v3979_v37, %v3981_v26  ;;  %v16814_v32 = vld [vmem:[#allocation14_spill] sm:$0xff] }
 0x291   : > { %11191 = vmatprep.mubr.msk.f32.mxu1 %vm4615_vm2, %v14367_v58  ;;  %v4588_v56 = vmul.f32 %v14143_v36, %v4252_v8  ;;  %v4199_v42 = vmul.f32 %v14002_v51, %v4144_v41  ;;  %v4098_v40 = vadd.f32 %v3980_v28, %v16814_v32  ;;  %v4099_v62 = vadd.f32 %v3982_v59, %v16815_v53  ;;  %v3500_v47 = vpop.f32.mrf.mxu0  ;;  %v16817_v32 = vld [vmem:[#allocation59_spill] sm:$0xff] }
 0x292   : > { %11269 = vmatmul.mubr.msk.f32.gmra.mxu0 %vm4615_vm2, %v14367_v58  ;;  %v4589_v48 = vmul.f32 %v14189_v54, %v4253_v23  ;;  %v4200_v17 = vmul.f32 %v14002_v51, %v4145_v27  ;;  %v3985_v33 = vrot.slane %v14360_v0, 1  ;;  %v3983_v12 = vrot.slane %v3617_v60, 1  ;;  %v14387_v37 = vld [vmem:[#allocation2 + $0xa0] sm:$0xff] }
 0x293   : > { %4643 = vst.msk [vmem:[#allocation2 + $0xc0] sm:$0xff] %vm4615_vm2, %v4588_v56  ;;  %v4254_v36 = vadd.f32 %v14024_v2, %v4199_v42  ;;  %v4146_v8 = vmax.f32 %v4098_v40, 0.0  ;;  %v4147_v41 = vmax.f32 %v4099_v62, 0.0  ;;  %v14392_v28 = vadd.f32 %v11140_v31, %v16816_v29  ;;  %11271 = vmatprep.mubr.msk.f32.mxu0 %vm4615_vm2, %v14387_v37  ;;  %v14398_v54 = vld [vmem:[#allocation2 + $0xa8] sm:$0xff]  ;;  %v11143_v0 = vpop.f32.mrf.mxu0 }
 0x294   : > { %11192 = vmatmul.mubr.msk.f32.gmra.mxu1 %vm4615_vm2, %v14387_v37  ;;  %4644 = vst.msk [vmem:[#allocation2 + $0xc8] sm:$0xff] %vm4615_vm2, %v4589_v48  ;;  %v4255_v60 = vadd.f32 %v14024_v2, %v4200_v17  ;;  %v3984_v23 = vsel %vm3927_vm4, %v3981_v26, %v3983_v12  ;;  %v3986_v27 = vsel %vm3927_vm4, %v3983_v12, %v3985_v33  ;;  %v14413_v26 = vpop.permute.xlu1 %4494 }
 0x295   : > { %v3619_v31 = vadd.f32 %v3500_v47, %v14061_v43  ;;  %11194 = vmatprep.mubr.msk.f32.mxu1 %vm4615_vm2, %v14398_v54  ;;  %v4590_v59 = vmul.f32 %v14183_v5, %v4254_v36  ;;  %v4201_v56 = vmul.f32 %v14002_v51, %v4146_v8  ;;  %v4202_v42 = vmul.f32 %v14002_v51, %v4147_v41  ;;  %v3510_v53 = vpop.f32.mrf.mxu0  ;;  %v16818_v43 = vld [vmem:[#allocation60_spill] sm:$0xff]  ;;  %v14422_v36 = vpop.permute.xlu0 %4489 }
 0x296   : > { %v4100_v40 = vadd.f32 %v3984_v23, %v16817_v32  ;;  %11272 = vmatmul.mubr.msk.f32.gmra.mxu0 %vm4615_vm2, %v14398_v54  ;;  %v4591_v62 = vmul.f32 %v14236_v50, %v4255_v60  ;;  %v4101_v47 = vadd.f32 %v3986_v27, %v16818_v43  ;;  %v3989_v48 = vrot.slane %v14392_v28, 1  ;;  %v14418_v5 = vld [vmem:[#allocation2 + $0xb0] sm:$0xff]  ;;  %v16819_v23 = vld [vmem:[#allocation116_spill] sm:$0xff]  ;;  %v16821_v43 = vld [vmem:[#allocation62_spill] sm:$0xff] }
 0x297   : > { %v3987_v17 = vrot.slane %v3619_v31, 1  ;;  %v14420_v12 = vld [vmem:[#allocation2 + $0xb8] sm:$0xff]  ;;  %4645 = vst.msk [vmem:[#allocation2 + $0xd0] sm:$0xff] %vm4615_vm2, %v4590_v59  ;;  %v4256_v8 = vadd.f32 %v14024_v2, %v4201_v56  ;;  %v4257_v41 = vadd.f32 %v14024_v2, %v4202_v42  ;;  %v3622_v50 = vadd.f32 %v11143_v0, %v16819_v23  ;;  %11274 = vmatprep.mubr.msk.f32.mxu0 %vm4615_vm2, %v14418_v5  ;;  %v11146_v28 = vpop.f32.mrf.mxu0 }
 0x298   : > { %v4148_v29 = vmax.f32 %v4100_v40, 0.0  ;;  %11195 = vmatmul.mubr.msk.f32.gmra.mxu1 %vm4615_vm2, %v14418_v5  ;;  %4646 = vst.msk [vmem:[#allocation2 + $0xd8] sm:$0xff] %vm4615_vm2, %v4591_v62  ;;  %v4149_v60 = vmax.f32 %v4101_v47, 0.0  ;;  %v3621_v59 = vadd.f32 %v3510_v53, %v14070_v35  ;;  %v16820_v32 = vld [vmem:[#allocation16_spill] sm:$0xff] }
 0x299   : > { %v3988_v27 = vsel %vm3927_vm4, %v3985_v33, %v3987_v17  ;;  %v3990_v31 = vsel %vm3927_vm4, %v3987_v17, %v3989_v48  ;;  %11197 = vmatprep.mubr.msk.f32.mxu1 %vm4615_vm2, %v14420_v12  ;;  %v4592_v0 = vmul.f32 %v14220_v14, %v4256_v8  ;;  %v4593_v56 = vmul.f32 %v14286_v52, %v4257_v41  ;;  %v3520_v62 = vpop.f32.mrf.mxu0  ;;  %v16822_v8 = vld [vmem:[#allocation119_spill] sm:$0xff] }
 0x29a   : > { %v4203_v42 = vmul.f32 %v14002_v51, %v4148_v29  ;;  %v4102_v40 = vadd.f32 %v3988_v27, %v16820_v32  ;;  %11275 = vmatmul.mubr.msk.f32.gmra.mxu0 %vm4615_vm2, %v14420_v12  ;;  %v4204_v33 = vmul.f32 %v14002_v51, %v4149_v60  ;;  %v4103_v47 = vadd.f32 %v3990_v31, %v16821_v43  ;;  %v14446_v17 = vld [vmem:[#allocation2 + $0xc0] sm:$0xff]  ;;  %v14461_v60 = vpop.permute.xlu1 %4504 }
 0x29b   : > { %v3993_v35 = vrot.slane %v3622_v50, 1  ;;  %v3991_v53 = vrot.slane %v3621_v59, 1  ;;  %4647 = vst.msk [vmem:[#allocation2 + $0xe0] sm:$0xff] %vm4615_vm2, %v4592_v0  ;;  %4648 = vst.msk [vmem:[#allocation2 + $0xe8] sm:$0xff] %vm4615_vm2, %v4593_v56  ;;  %v14452_v41 = vadd.f32 %v11146_v28, %v16822_v8  ;;  %v3623_v29 = vadd.f32 %v3520_v62, %v14084_v63  ;;  %11277 = vmatprep.mubr.msk.f32.mxu0 %vm4615_vm2, %v14446_v17  ;;  %v14459_v23 = vld [vmem:[#allocation2 + $0xc8] sm:$0xff]  ;;  %v11149_v50 = vpop.f32.mrf.mxu0  ;;  %v14468_v63 = vpop.permute.xlu0 %4499 }
 0x29c   : > { %v4258_v14 = vadd.f32 %v14024_v2, %v4203_v42  ;;  %v4150_v52 = vmax.f32 %v4102_v40, 0.0  ;;  %11198 = vmatmul.mubr.msk.f32.gmra.mxu1 %vm4615_vm2, %v14446_v17  ;;  %v4259_v27 = vadd.f32 %v14024_v2, %v4204_v33  ;;  %v4151_v31 = vmax.f32 %v4103_v47, 0.0  ;;  %v16823_v42 = vld [vmem:[#allocation18_spill] sm:$0xff]  ;;  %v16824_v40 = vld [vmem:[#allocation19_spill] sm:$0xff] }
 0x29d   : > { %v3992_v59 = vsel %vm3927_vm4, %v3989_v48, %v3991_v53  ;;  %v3994_v28 = vsel %vm3927_vm4, %v3991_v53, %v3993_v35  ;;  %11200 = vmatprep.mubr.msk.f32.mxu1 %vm4615_vm2, %v14459_v23  ;;  %v3530_v33 = vpop.f32.mrf.mxu0  ;;  %v3997_v47 = vrot.slane %v14452_v41, 1  ;;  %v3995_v53 = vrot.slane %v3623_v29, 1 }
 0x29e   : > { %v4594_v0 = vmul.f32 %v14277_v6, %v4258_v14  ;;  %v4205_v56 = vmul.f32 %v14002_v51, %v4150_v52  ;;  %v4104_v32 = vadd.f32 %v3992_v59, %v16823_v42  ;;  %v4105_v62 = vadd.f32 %v3994_v28, %v16824_v40  ;;  %11278 = vmatmul.mubr.msk.f32.gmra.mxu0 %vm4615_vm2, %v14459_v23  ;;  %v14479_v8 = vld [vmem:[#allocation2 + $0xd0] sm:$0xff]  ;;  %v16825_v59 = vld [vmem:[#allocation122_spill] sm:$0xff] }
 0x29f   : > { %v4595_v48 = vmul.f32 %v14330_v24, %v4259_v27  ;;  %v4206_v43 = vmul.f32 %v14002_v51, %v4151_v31  ;;  %v14484_v28 = vadd.f32 %v11149_v50, %v16825_v59  ;;  %11280 = vmatprep.mubr.msk.f32.mxu0 %vm4615_vm2, %v14479_v8  ;;  %v14490_v24 = vld [vmem:[#allocation2 + $0xd8] sm:$0xff]  ;;  %v11152_v41 = vpop.f32.mrf.mxu0  ;;  %v3996_v27 = vsel %vm3927_vm4, %v3993_v35, %v3995_v53  ;;  %v14505_v35 = vpop.permute.xlu1 %4514 }
 0x2a0   : > { %4649 = vst.msk [vmem:[#allocation2 + $0xf0] sm:$0xff] %vm4615_vm2, %v4594_v0  ;;  %v4260_v6 = vadd.f32 %v14024_v2, %v4205_v56  ;;  %v4152_v14 = vmax.f32 %v4104_v32, 0.0  ;;  %v4153_v52 = vmax.f32 %v4105_v62, 0.0  ;;  %11201 = vmatmul.mubr.msk.f32.gmra.mxu1 %vm4615_vm2, %v14479_v8  ;;  %v3998_v31 = vsel %vm3927_vm4, %v3995_v53, %v3997_v47  ;;  %v16826_v32 = vld [vmem:[#allocation63_spill] sm:$0xff] }
 0x2a1   : > { %4650 = vst.msk [vmem:[#allocation2 + $0xf8] sm:$0xff] %vm4615_vm2, %v4595_v48  ;;  %v4261_v29 = vadd.f32 %v14024_v2, %v4206_v43  ;;  %v3625_v50 = vadd.f32 %v3530_v33, %v14091_v25  ;;  %11203 = vmatprep.mubr.msk.f32.mxu1 %vm4615_vm2, %v14490_v24  ;;  %v4106_v40 = vadd.f32 %v3996_v27, %v16826_v32  ;;  %v3540_v62 = vpop.f32.mrf.mxu0  ;;  %v16827_v25 = vld [vmem:[#allocation21_spill] sm:$0xff]  ;;  %v4001_v43 = vrot.slane %v14484_v28, 1 }
 0x2a2   : > { %v4596_v0 = vmul.f32 %v14321_v44, %v4260_v6  ;;  %v4207_v56 = vmul.f32 %v14002_v51, %v4152_v14  ;;  %v4208_v42 = vmul.f32 %v14002_v51, %v4153_v52  ;;  %11281 = vmatmul.mubr.msk.f32.gmra.mxu0 %vm4615_vm2, %v14490_v24  ;;  %v4107_v33 = vadd.f32 %v3998_v31, %v16827_v25  ;;  %v14510_v44 = vld [vmem:[#allocation2 + $0xe0] sm:$0xff]  ;;  %v14512_v6 = vld [vmem:[#allocation2 + $0xe8] sm:$0xff]  ;;  %v14514_v14 = vpop.permute.xlu0 %4509 }
 0x2a3   : > { %v4597_v48 = vmul.f32 %v14376_v21, %v4261_v29  ;;  %v3999_v53 = vrot.slane %v3625_v50, 1  ;;  %v4154_v27 = vmax.f32 %v4106_v40, 0.0  ;;  %v16828_v32 = vld [vmem:[#allocation125_spill] sm:$0xff]  ;;  %11283 = vmatprep.mubr.msk.f32.mxu0 %vm4615_vm2, %v14510_v44  ;;  %v11155_v28 = vpop.f32.mrf.mxu0 }
 0x2a4   : > { %4651 = vst.msk [vmem:[#allocation2 + $0x100] sm:$0xff] %vm4615_vm2, %v4596_v0  ;;  %v4262_v52 = vadd.f32 %v14024_v2, %v4207_v56  ;;  %v4263_v59 = vadd.f32 %v14024_v2, %v4208_v42  ;;  %v14520_v21 = vadd.f32 %v11152_v41, %v16828_v32  ;;  %11204 = vmatmul.mubr.msk.f32.gmra.mxu1 %vm4615_vm2, %v14510_v44  ;;  %v4155_v29 = vmax.f32 %v4107_v33, 0.0  ;;  %v16829_v40 = vld [vmem:[#allocation65_spill] sm:$0xff]  ;;  %v16830_v33 = vld [vmem:[#allocation23_spill] sm:$0xff] }
 0x2a5   : > { %4652 = vst.msk [vmem:[#allocation2 + $0x108] sm:$0xff] %vm4615_vm2, %v4597_v48  ;;  %v4000_v31 = vsel %vm3927_vm4, %v3997_v47, %v3999_v53  ;;  %v4002_v50 = vsel %vm3927_vm4, %v3999_v53, %v4001_v43  ;;  %v3627_v0 = vadd.f32 %v3540_v62, %v14100_v30  ;;  %11206 = vmatprep.mubr.msk.f32.mxu1 %vm4615_vm2, %v14512_v6  ;;  %v3550_v48 = vpop.f32.mrf.mxu0 }
 0x2a6   : > { %v4598_v41 = vmul.f32 %v14369_v49, %v4262_v52  ;;  %v4599_v56 = vmul.f32 %v14422_v36, %v4263_v59  ;;  %v4209_v42 = vmul.f32 %v14002_v51, %v4154_v27  ;;  %v4108_v25 = vadd.f32 %v4000_v31, %v16829_v40  ;;  %11284 = vmatmul.mubr.msk.f32.gmra.mxu0 %vm4615_vm2, %v14512_v6  ;;  %v16831_v52 = vld [vmem:[#allocation128_spill] sm:$0xff]  ;;  %v14556_v31 = vpop.permute.xlu1 %4524  ;;  %v16832_v40 = vld [vmem:[#allocation67_spill] sm:$0xff] }
 0x2a7   : > { %v4210_v47 = vmul.f32 %v14002_v51, %v4155_v29  ;;  %v4109_v53 = vadd.f32 %v4002_v50, %v16830_v33  ;;  %v4005_v30 = vrot.slane %v14520_v21, 1  ;;  %v4003_v62 = vrot.slane %v3627_v0, 1  ;;  %v14541_v32 = vld [vmem:[#allocation2 + $0xf0] sm:$0xff]  ;;  %v11158_v29 = vpop.f32.mrf.mxu0 }
 0x2a8   : > { %4653 = vst.msk [vmem:[#allocation2 + $0x110] sm:$0xff] %vm4615_vm2, %v4598_v41  ;;  %4654 = vst.msk [vmem:[#allocation2 + $0x118] sm:$0xff] %vm4615_vm2, %v4599_v56  ;;  %v4264_v49 = vadd.f32 %v14024_v2, %v4209_v42  ;;  %v4156_v36 = vmax.f32 %v4108_v25, 0.0  ;;  %v14547_v59 = vadd.f32 %v11155_v28, %v16831_v52  ;;  %v3629_v27 = vadd.f32 %v3550_v48, %v14129_v1  ;;  %v14554_v21 = vld [vmem:[#allocation2 + $0xf8] sm:$0xff]  ;;  %v4520_v1 = vpop.permute.xlu0 %4519 }
 0x2a9   : > { %11207 = vmatmul.mubr.msk.f32.gmra.mxu1 %vm4615_vm2, %v14541_v32  ;;  %11286 = vmatprep.mubr.msk.f32.mxu0 %vm4615_vm2, %v14541_v32  ;;  %v4265_v50 = vadd.f32 %v14024_v2, %v4210_v47  ;;  %v4157_v0 = vmax.f32 %v4109_v53, 0.0  ;;  %v4004_v41 = vsel %vm3927_vm4, %v4001_v43, %v4003_v62  ;;  %v4006_v28 = vsel %vm3927_vm4, %v4003_v62, %v4005_v30  ;;  %v16833_v48 = vld [vmem:[#allocation68_spill] sm:$0xff]  ;;  %v3560_v47 = vpop.f32.mrf.mxu0 }
 0x2aa   : > { %11209 = vmatprep.mubr.msk.f32.mxu1 %vm4615_vm2, %v14554_v21  ;;  %v4600_v56 = vmul.f32 %v14413_v26, %v4264_v49  ;;  %v4211_v42 = vmul.f32 %v14002_v51, %v4156_v36  ;;  %v4110_v25 = vadd.f32 %v4004_v41, %v16832_v40  ;;  %v4111_v33 = vadd.f32 %v4006_v28, %v16833_v48  ;;  %v16834_v41 = vld [vmem:[#allocation131_spill] sm:$0xff]  ;;  %v14608_v48 = vpop.permute.xlu1 %4534 }
 0x2ab   : > { %11287 = vmatmul.mubr.msk.f32.gmra.mxu0 %vm4615_vm2, %v14554_v21  ;;  %v4601_v43 = vmul.f32 %v14468_v63, %v4265_v50  ;;  %v4212_v53 = vmul.f32 %v14002_v51, %v4157_v0  ;;  %v4009_v62 = vrot.slane %v14547_v59, 1  ;;  %v4007_v52 = vrot.slane %v3629_v27, 1  ;;  %v14572_v15 = vld [vmem:[#allocation2 + $0x100] sm:$0xff]  ;;  %v11161_v63 = vpop.f32.mrf.mxu0  ;;  %v14588_v59 = vld [vmem:[%s16457_s5 + $0x10] sm:$0xff] }
 0x2ac   : > { %4655 = vst.msk [vmem:[#allocation2 + $0x120] sm:$0xff] %vm4615_vm2, %v4600_v56  ;;  %v4266_v26 = vadd.f32 %v14024_v2, %v4211_v42  ;;  %v4158_v49 = vmax.f32 %v4110_v25, 0.0  ;;  %v4159_v36 = vmax.f32 %v4111_v33, 0.0  ;;  %v14577_v28 = vadd.f32 %v11158_v29, %v16834_v41  ;;  %11289 = vmatprep.mubr.msk.f32.mxu0 %vm4615_vm2, %v14572_v15  ;;  %v14583_v51 = vld [vmem:[#allocation2 + $0x108] sm:$0xff]  ;;  %v14601_v42 = vld [vmem:[%s16455_s3] ss:$0 sm:$0xff]  ;;  %11535 = vmatprep.subr.mxu0 %v14588_v59 }
 0x2ad   : > { %11210 = vmatmul.mubr.msk.f32.gmra.mxu1 %vm4615_vm2, %v14572_v15  ;;  %4656 = vst.msk [vmem:[#allocation2 + $0x128] sm:$0xff] %vm4615_vm2, %v4601_v43  ;;  %v4267_v27 = vadd.f32 %v14024_v2, %v4212_v53  ;;  %v4008_v29 = vsel %vm3927_vm4, %v4005_v30, %v4007_v52  ;;  %v4010_v50 = vsel %vm3927_vm4, %v4007_v52, %v4009_v62  ;;  %v16835_v25 = vld [vmem:[#allocation24_spill] sm:$0xff] }
 0x2ae   : > { %v3631_v0 = vadd.f32 %v3560_v47, %v14176_v45  ;;  %11212 = vmatprep.mubr.msk.f32.mxu1 %vm4615_vm2, %v14583_v51  ;;  %v4602_v56 = vmul.f32 %v14461_v60, %v4266_v26  ;;  %v4213_v40 = vmul.f32 %v14601_v42, %v4158_v49  ;;  %v4214_v2 = vmul.f32 %v14601_v42, %v4159_v36  ;;  %v3570_v45 = vpop.f32.mrf.mxu0  ;;  %v16836_v60 = vld [vmem:[#allocation70_spill] sm:$0xff]  ;;  %v4530_v49 = vpop.permute.xlu0 %4529  ;;  %v14622_v36 = vld [vmem:[%s16456_s4] ss:$0 sm:$0xff] }
 0x2af   : > { %v4112_v30 = vadd.f32 %v4008_v29, %v16835_v25  ;;  %11290 = vmatmul.mubr.msk.f32.gmra.mxu0 %vm4615_vm2, %v14583_v51  ;;  %v4603_v33 = vmul.f32 %v14514_v14, %v4267_v27  ;;  %v4113_v47 = vadd.f32 %v4010_v50, %v16836_v60  ;;  %v4013_v43 = vrot.slane %v14577_v28, 1  ;;  %v14613_v52 = vld [vmem:[#allocation2 + $0x110] sm:$0xff]  ;;  %v14615_v26 = vld [vmem:[#allocation2 + $0x118] sm:$0xff]  ;;  %v16837_v27 = vld [vmem:[#allocation134_spill] sm:$0xff] }
 0x2b0   : > { %v4011_v53 = vrot.slane %v3631_v0, 1  ;;  %4657 = vst.msk [vmem:[#allocation2 + $0x130] sm:$0xff] %vm4615_vm2, %v4602_v56  ;;  %v4268_v14 = vadd.f32 %v14622_v36, %v4213_v40  ;;  %v4269_v41 = vadd.f32 %v14622_v36, %v4214_v2  ;;  %v3634_v29 = vadd.f32 %v11161_v63, %v16837_v27  ;;  %11292 = vmatprep.mubr.msk.f32.mxu0 %vm4615_vm2, %v14613_v52  ;;  %v11164_v50 = vpop.f32.mrf.mxu0  ;;  %v16838_v60 = vld [vmem:[#allocation26_spill] sm:$0xff] }
 0x2b1   : > { %v4160_v28 = vmax.f32 %v4112_v30, 0.0  ;;  %11213 = vmatmul.mubr.msk.f32.gmra.mxu1 %vm4615_vm2, %v14613_v52  ;;  %4658 = vst.msk [vmem:[#allocation2 + $0x138] sm:$0xff] %vm4615_vm2, %v4603_v33  ;;  %v4161_v0 = vmax.f32 %v4113_v47, 0.0  ;;  %v3633_v40 = vadd.f32 %v3570_v45, %v14234_v46 }
 0x2b2   : > { %v4012_v56 = vsel %vm3927_vm4, %v4009_v62, %v4011_v53  ;;  %v4014_v25 = vsel %vm3927_vm4, %v4011_v53, %v4013_v43  ;;  %11215 = vmatprep.mubr.msk.f32.mxu1 %vm4615_vm2, %v14615_v26  ;;  %v4604_v63 = vmul.f32 %v14505_v35, %v4268_v14  ;;  %v4605_v2 = vmul.f32 %v4520_v1, %v4269_v41  ;;  %v3580_v33 = vpop.f32.mrf.mxu0  ;;  %v16839_v14 = vld [vmem:[#allocation137_spill] sm:$0xff] }
 0x2b3   : > { %v4215_v30 = vmul.f32 %v14601_v42, %v4160_v28  ;;  %v4114_v27 = vadd.f32 %v4012_v56, %v16838_v60  ;;  %11293 = vmatmul.mubr.msk.f32.gmra.mxu0 %vm4615_vm2, %v14615_v26  ;;  %v4216_v62 = vmul.f32 %v14601_v42, %v4161_v0  ;;  %v4115_v47 = vadd.f32 %v4014_v25, %v13938_v55  ;;  %v14644_v45 = vld [vmem:[#allocation2 + $0x120] sm:$0xff] }
 0x2b4   : > { %v4017_v53 = vrot.slane %v3634_v29, 1  ;;  %v4015_v46 = vrot.slane %v3633_v40, 1  ;;  %4659 = vst.msk [vmem:[#allocation2 + $0x140] sm:$0xff] %vm4615_vm2, %v4604_v63  ;;  %4660 = vst.msk [vmem:[#allocation2 + $0x148] sm:$0xff] %vm4615_vm2, %v4605_v2  ;;  %v3636_v41 = vadd.f32 %v11164_v50, %v16839_v14  ;;  %v3635_v28 = vadd.f32 %v3580_v33, %v14269_v22  ;;  %11295 = vmatprep.mubr.msk.f32.mxu0 %vm4615_vm2, %v14644_v45  ;;  %v14655_v55 = vld [vmem:[#allocation2 + $0x128] sm:$0xff]  ;;  %v4545_v29 = vpop.permute.xlu1 %4544  ;;  %v4540_v22 = vpop.permute.xlu0 %4539 }
 0x2b5   : > { %v4270_v35 = vadd.f32 %v14622_v36, %v4215_v30  ;;  %v4162_v1 = vmax.f32 %v4114_v27, 0.0  ;;  %11216 = vmatmul.mubr.msk.f32.gmra.mxu1 %vm4615_vm2, %v14644_v45  ;;  %v4271_v0 = vadd.f32 %v14622_v36, %v4216_v62  ;;  %v4163_v56 = vmax.f32 %v4115_v47, 0.0 }
 0x2b6   : > { %v4016_v25 = vsel %vm3927_vm4, %v4013_v43, %v4015_v46  ;;  %v4018_v40 = vsel %vm3927_vm4, %v4015_v46, %v4017_v53  ;;  %11218 = vmatprep.mubr.msk.f32.mxu1 %vm4615_vm2, %v14655_v55  ;;  %v4021_v27 = vrot.slane %v3636_v41, 1  ;;  %v4019_v33 = vrot.slane %v3635_v28, 1 }
 0x2b7   : > { %v4606_v50 = vmul.f32 %v14556_v31, %v4270_v35  ;;  %v4217_v63 = vmul.f32 %v14601_v42, %v4162_v1  ;;  %v4116_v2 = vadd.f32 %v4016_v25, %v13936_v4  ;;  %v4117_v30 = vadd.f32 %v4018_v40, %v13951_v11  ;;  %11296 = vmatmul.mubr.msk.f32.gmra.mxu0 %vm4615_vm2, %v14655_v55  ;;  %v14669_v62 = vld [vmem:[#allocation2 + $0x130] sm:$0xff] }
 0x2b8   : > { %v4607_v60 = vmul.f32 %v4530_v49, %v4271_v0  ;;  %v4218_v43 = vmul.f32 %v14601_v42, %v4163_v56  ;;  %11298 = vmatprep.mubr.msk.f32.mxu0 %vm4615_vm2, %v14669_v62  ;;  %v14677_v4 = vld [vmem:[#allocation2 + $0x138] sm:$0xff]  ;;  %v16840_v49 = vrot.slane %v13966_v19, 1  ;;  %v4020_v1 = vsel %vm3927_vm4, %v4017_v53, %v4019_v33  ;;  %v4555_v19 = vpop.permute.xlu1 %4554 }
 0x2b9   : > { %4661 = vst.msk [vmem:[#allocation2 + $0x150] sm:$0xff] %vm4615_vm2, %v4606_v50  ;;  %v4272_v31 = vadd.f32 %v14622_v36, %v4217_v63  ;;  %v4164_v47 = vmax.f32 %v4116_v2, 0.0  ;;  %v4165_v46 = vmax.f32 %v4117_v30, 0.0  ;;  %11219 = vmatmul.mubr.msk.f32.gmra.mxu1 %vm4615_vm2, %v14669_v62  ;;  %v4022_v14 = vsel %vm3927_vm4, %v4019_v33, %v4021_v27 }
 0x2ba   : > { %4662 = vst.msk [vmem:[#allocation2 + $0x158] sm:$0xff] %vm4615_vm2, %v4607_v60  ;;  %v4273_v11 = vadd.f32 %v14622_v36, %v4218_v43  ;;  %v4072_v35 = vsel %vm3927_vm4, %v4021_v27, %v16840_v49  ;;  %11221 = vmatprep.mubr.msk.f32.mxu1 %vm4615_vm2, %v14677_v4  ;;  %v4118_v53 = vadd.f32 %v4020_v1, %v13949_v20 }
 0x2bb   : > { %v4608_v41 = vmul.f32 %v14608_v48, %v4272_v31  ;;  %v4219_v28 = vmul.f32 %v14601_v42, %v4164_v47  ;;  %v4220_v0 = vmul.f32 %v14601_v42, %v4165_v46  ;;  %v4120_v56 = vadd.f32 %v4072_v35, %v13968_v9  ;;  %11299 = vmatmul.mubr.msk.f32.gmra.mxu0 %vm4615_vm2, %v14677_v4  ;;  %v14696_v50 = vld [vmem:[#allocation2 + $0x140] sm:$0xff]  ;;  %v14698_v63 = vld [vmem:[#allocation2 + $0x148] sm:$0xff]  ;;  %v4550_v48 = vpop.permute.xlu0 %4549 }
 0x2bc   : > { %v4609_v25 = vmul.f32 %v4540_v22, %v4273_v11  ;;  %v4119_v40 = vadd.f32 %v4022_v14, %v13970_v7  ;;  %11301 = vmatprep.mubr.msk.f32.mxu0 %vm4615_vm2, %v14696_v50  ;;  %v4166_v20 = vmax.f32 %v4118_v53, 0.0  ;;  %v4565_v46 = vpop.permute.xlu1 %4564  ;;  %v14771_v53 = vld [vmem:[#allocation2 + $0x8] sm:$0xff] }
 0x2bd   : > { %4663 = vst.msk [vmem:[#allocation2 + $0x160] sm:$0xff] %vm4615_vm2, %v4608_v41  ;;  %v4274_v2 = vadd.f32 %v14622_v36, %v4219_v28  ;;  %v4275_v9 = vadd.f32 %v14622_v36, %v4220_v0  ;;  %v4168_v30 = vmax.f32 %v4120_v56, 0.0  ;;  %11222 = vmatmul.mubr.msk.f32.gmra.mxu1 %vm4615_vm2, %v14696_v50  ;;  %v14759_v56 = vld [vmem:[#allocation2] sm:$0xff] }
 0x2be   : > { %4664 = vst.msk [vmem:[#allocation2 + $0x168] sm:$0xff] %vm4615_vm2, %v4609_v25  ;;  %v4167_v7 = vmax.f32 %v4119_v40, 0.0  ;;  %11224 = vmatprep.mubr.msk.f32.mxu1 %vm4615_vm2, %v14698_v63  ;;  %v4221_v27 = vmul.f32 %v14601_v42, %v4166_v20  ;;  %v14775_v40 = vld [vmem:[#allocation2 + $0x10] sm:$0xff]  ;;  %v14804_v20 = vld [vmem:[#allocation2 + $0x28] sm:$0xff] }
 0x2bf   : > { %v4610_v22 = vmul.f32 %v4545_v29, %v4274_v2  ;;  %v4611_v60 = vmul.f32 %v4550_v48, %v4275_v9  ;;  %v4223_v43 = vmul.f32 %v14601_v42, %v4168_v30  ;;  %11302 = vmatmul.mubr.msk.f32.gmra.mxu0 %vm4615_vm2, %v14698_v63  ;;  %v4560_v49 = vpop.permute.xlu0 %4559  ;;  %v14784_v2 = vld [vmem:[#allocation2 + $0x18] sm:$0xff]  ;;  %v14790_v9 = vld [vmem:[#allocation2 + $0x20] sm:$0xff]  ;;  %v11860_v30 = vld [vmem:[%s16457_s5 + $0x28] sm:$0xff] }
 0x2c0   : > { %v4222_v33 = vmul.f32 %v14601_v42, %v4167_v7  ;;  %v14715_v31 = vld [vmem:[#allocation2 + $0x150] sm:$0xff]  ;;  %v4276_v11 = vadd.f32 %v14622_v36, %v4221_v27 }
 0x2c1   : > { %4665 = vst.msk [vmem:[#allocation2 + $0x170] sm:$0xff] %vm4615_vm2, %v4610_v22  ;;  %4666 = vst.msk [vmem:[#allocation2 + $0x178] sm:$0xff] %vm4615_vm2, %v4611_v60  ;;  %v4278_v47 = vadd.f32 %v14622_v36, %v4223_v43  ;;  %11225 = vmatmul.mubr.msk.f32.gmra.mxu1 %vm4615_vm2, %v14715_v31  ;;  %11304 = vmatprep.mubr.msk.f32.mxu0 %vm4615_vm2, %v14715_v31  ;;  %v14724_v29 = vld [vmem:[#allocation2 + $0x158] sm:$0xff]  ;;  %v14811_v7 = vld [vmem:[#allocation2 + $0x30] sm:$0xff] }
 0x2c2   : > { %v4277_v42 = vadd.f32 %v14622_v36, %v4222_v33  ;;  %11227 = vmatprep.mubr.msk.f32.mxu1 %vm4615_vm2, %v14724_v29  ;;  %v4612_v1 = vmul.f32 %v4555_v19, %v4276_v11  ;;  %v14817_v22 = vld [vmem:[#allocation2 + $0x38] sm:$0xff]  ;;  %v14823_v60 = vld [vmem:[#allocation2 + $0x40] sm:$0xff] }
 0x2c3   : > { %v4614_v35 = vmul.f32 %v4565_v46, %v4278_v47  ;;  %11305 = vmatmul.mubr.msk.f32.gmra.mxu0 %vm4615_vm2, %v14724_v29 }
 0x2c4   : > { %v4613_v14 = vmul.f32 %v4560_v49, %v4277_v42  ;;  %v14732_v41 = vld [vmem:[#allocation2 + $0x160] sm:$0xff]  ;;  %4667 = vst.msk [vmem:[#allocation2 + $0x180] sm:$0xff] %vm4615_vm2, %v4612_v1  ;;  %v11865_v1 = vld [vmem:[#allocation2 + $0x48] sm:$0xff] }
 0x2c5   : > { %4669 = vst.msk [vmem:[#allocation2 + $0x190] sm:$0xff] %vm4615_vm2, %v4614_v35  ;;  %11228 = vmatmul.mubr.msk.f32.gmra.mxu1 %vm4615_vm2, %v14732_v41  ;;  %11307 = vmatprep.mubr.msk.f32.mxu0 %vm4615_vm2, %v14732_v41  ;;  %v14739_v36 = vld [vmem:[#allocation2 + $0x168] sm:$0xff] }
 0x2c6   : > { %4668 = vst.msk [vmem:[#allocation2 + $0x188] sm:$0xff] %vm4615_vm2, %v4613_v14  ;;  %11230 = vmatprep.mubr.msk.f32.mxu1 %vm4615_vm2, %v14739_v36 }
 0x2c7   : > { %11308 = vmatmul.mubr.msk.f32.gmra.mxu0 %vm4615_vm2, %v14739_v36 }
 0x2c8   : > { %v14747_v28 = vld [vmem:[#allocation2 + $0x170] sm:$0xff]  ;;  %v14749_v0 = vld [vmem:[#allocation2 + $0x178] sm:$0xff] }
 0x2c9   : > { %11231 = vmatmul.mubr.msk.f32.gmra.mxu1 %vm4615_vm2, %v14747_v28  ;;  %11310 = vmatprep.mubr.msk.f32.mxu0 %vm4615_vm2, %v14747_v28 }
 0x2ca   : > { %11233 = vmatprep.mubr.msk.f32.mxu1 %vm4615_vm2, %v14749_v0 }
 0x2cb   : > { %11311 = vmatmul.mubr.msk.f32.gmra.mxu0 %vm4615_vm2, %v14749_v0  ;;  %v14763_v19 = vld [vmem:[#allocation2 + $0x180] sm:$0xff] }
 0x2cc   : > { %11389 = vmatprep.mubr.msk.f32.mxu0 %vm4615_vm2, %v14759_v56  ;;  %v14780_v48 = vld [vmem:[#allocation2 + $0x190] sm:$0xff] }
 0x2cd   : > { %v14765_v25 = vld [vmem:[#allocation2 + $0x188] sm:$0xff]  ;;  %11234 = vmatmul.mubr.msk.f32.gmra.mxu1 %vm4615_vm2, %v14763_v19 }
 0x2ce   : > { %11236 = vmatprep.mubr.msk.f32.mxu1 %vm4615_vm2, %v14765_v25 }
 0x2cf   : > { %11390 = vmatmul.mubr.msk.f32.vlgmr.msra.gmra.mxu0 %vm4615_vm2, %v14771_v53 }
 0x2d0   : > { %11392 = vmatprep.mubr.msk.f32.mxu0 %vm4615_vm2, %v14775_v40  ;;  %11536 = vmatpush3.msra.mxu0 %v14588_v59  ;;  %v14797_v59 = vld [vmem:[%s16457_s5 + $0x30] sm:$0xff] }
 0x2d1   : > { %11237 = vmatmul.mubr.msk.f32.gmra.mxu1 %vm4615_vm2, %v14780_v48 }
 0x2d2   : > { %11315 = vmatprep.mubr.msk.f32.mxu1 %vm4615_vm2, %v14784_v2 }
 0x2d3   : > { %11393 = vmatmul.mubr.msk.f32.gmra.mxu0 %vm4615_vm2, %v14784_v2 }
 0x2d4   : > { %11395 = vmatprep.mubr.msk.f32.mxu0 %vm4615_vm2, %v14790_v9 }
 0x2d5   : > { %11316 = vmatmul.mubr.msk.f32.vlgmr.msra.gmra.mxu1 %vm4615_vm2, %v14790_v9 }
 0x2d6   : > { %11462 = vmatpush3.msra.mxu1 %v11860_v30  ;;  %11318 = vmatprep.mubr.msk.f32.mxu1 %vm4615_vm2, %v14804_v20 }
 0x2d7   : > { %11396 = vmatmul.mubr.msk.f32.gmra.mxu0 %vm4615_vm2, %v14804_v20  ;;  %11609 = vmatprep.subr.mxu1 %v14797_v59 }
 0x2d8   : > { %11398 = vmatprep.mubr.msk.f32.mxu0 %vm4615_vm2, %v14811_v7 }
 0x2d9   : > { %11319 = vmatmul.mubr.msk.f32.gmra.mxu1 %vm4615_vm2, %v14811_v7 }
 0x2da   : > { %11321 = vmatprep.mubr.msk.f32.mxu1 %vm4615_vm2, %v14817_v22 }
 0x2db   : > { %11399 = vmatmul.mubr.msk.f32.gmra.mxu0 %vm4615_vm2, %v14817_v22 }
 0x2dc   : > { %11401 = vmatprep.mubr.msk.f32.mxu0 %vm4615_vm2, %v14823_v60 }
 0x2dd   : > { %11322 = vmatmul.mubr.msk.f32.gmra.mxu1 %vm4615_vm2, %v14823_v60 }
 0x2de   : > { %11324 = vmatprep.mubr.msk.f32.mxu1 %vm4615_vm2, %v14196_v16 }
 0x2df   : > { %11402 = vmatmul.mubr.msk.f32.gmra.mxu0 %vm4615_vm2, %v14196_v16  ;;  %v9515_v16 = vld [vmem:[%s16457_s5 + $0x38] sm:$0xff] }
 0x2e0   : > { %11404 = vmatprep.mubr.msk.f32.mxu0 %vm4615_vm2, %v14228_v3  ;;  %11683 = vmatprep.subr.mxu0 %v9515_v16 }
 0x2e1   : > { %11325 = vmatmul.mubr.msk.f32.gmra.mxu1 %vm4615_vm2, %v14228_v3  ;;  %v14978_v3 = vpop.f32.mrf.mxu0 }
 0x2e2   : > { %11327 = vmatprep.mubr.msk.f32.mxu1 %vm4615_vm2, %v14230_v13 }
 0x2e3   : > { %11405 = vmatmul.mubr.msk.f32.gmra.mxu0 %vm4615_vm2, %v14230_v13  ;;  %v5252_v13 = vpop.f32.mrf.mxu0 }
 0x2e4   : > { %11407 = vmatprep.mubr.msk.f32.mxu0 %vm4615_vm2, %v14256_v18 }
 0x2e5   : > { %11328 = vmatmul.mubr.msk.f32.gmra.mxu1 %vm4615_vm2, %v14256_v18 }
 0x2e6   : > { %11330 = vmatprep.mubr.msk.f32.mxu1 %vm4615_vm2, %v14265_v61 }
 0x2e7   : > { %11408 = vmatmul.mubr.msk.f32.gmra.mxu0 %vm4615_vm2, %v14265_v61 }
 0x2e8   : > { %11410 = vmatprep.mubr.msk.f32.mxu0 %vm4615_vm2, %v14292_v34 }
 0x2e9   : > { %11331 = vmatmul.mubr.msk.f32.gmra.mxu1 %vm4615_vm2, %v14292_v34 }
 0x2ea   : > { %11333 = vmatprep.mubr.msk.f32.mxu1 %vm4615_vm2, %v14299_v10 }
 0x2eb   : > { %11411 = vmatmul.mubr.msk.f32.gmra.mxu0 %vm4615_vm2, %v14299_v10 }
 0x2ec   : > { %11413 = vmatprep.mubr.msk.f32.mxu0 %vm4615_vm2, %v14326_v38 }
 0x2ed   : > { %11334 = vmatmul.mubr.msk.f32.gmra.mxu1 %vm4615_vm2, %v14326_v38 }
 0x2ee   : > { %11336 = vmatprep.mubr.msk.f32.mxu1 %vm4615_vm2, %v14328_v57 }
 0x2ef   : > { %11414 = vmatmul.mubr.msk.f32.gmra.mxu0 %vm4615_vm2, %v14328_v57  ;;  %v15013_v57 = vld [vmem:[%s16457_s5 + $0x40] sm:$0xff] }
 0x2f0   : > { %11416 = vmatprep.mubr.msk.f32.mxu0 %vm4615_vm2, %v14354_v39 }
 0x2f1   : > { %11337 = vmatmul.mubr.msk.f32.gmra.mxu1 %vm4615_vm2, %v14354_v39 }
 0x2f2   : > { %11339 = vmatprep.mubr.msk.f32.mxu1 %vm4615_vm2, %v14367_v58 }
 0x2f3   : > { %11417 = vmatmul.mubr.msk.f32.gmra.mxu0 %vm4615_vm2, %v14367_v58 }
 0x2f4   : > { %11419 = vmatprep.mubr.msk.f32.mxu0 %vm4615_vm2, %v14387_v37 }
 0x2f5   : > { %11340 = vmatmul.mubr.msk.f32.gmra.mxu1 %vm4615_vm2, %v14387_v37 }
 0x2f6   : > { %11342 = vmatprep.mubr.msk.f32.mxu1 %vm4615_vm2, %v14398_v54 }
 0x2f7   : > { %11420 = vmatmul.mubr.msk.f32.gmra.mxu0 %vm4615_vm2, %v14398_v54 }
 0x2f8   : > { %11422 = vmatprep.mubr.msk.f32.mxu0 %vm4615_vm2, %v14418_v5 }
 0x2f9   : > { %11343 = vmatmul.mubr.msk.f32.gmra.mxu1 %vm4615_vm2, %v14418_v5 }
 0x2fa   : > { %11345 = vmatprep.mubr.msk.f32.mxu1 %vm4615_vm2, %v14420_v12 }
 0x2fb   : > { %11423 = vmatmul.mubr.msk.f32.gmra.mxu0 %vm4615_vm2, %v14420_v12 }
 0x2fc   : > { %11425 = vmatprep.mubr.msk.f32.mxu0 %vm4615_vm2, %v14446_v17 }
 0x2fd   : > { %11346 = vmatmul.mubr.msk.f32.gmra.mxu1 %vm4615_vm2, %v14446_v17 }
 0x2fe   : > { %11348 = vmatprep.mubr.msk.f32.mxu1 %vm4615_vm2, %v14459_v23 }
 0x2ff   : > { %11426 = vmatmul.mubr.msk.f32.gmra.mxu0 %vm4615_vm2, %v14459_v23 }
 0x300   : > { %11428 = vmatprep.mubr.msk.f32.mxu0 %vm4615_vm2, %v14479_v8 }
 0x301   : > { %11349 = vmatmul.mubr.msk.f32.gmra.mxu1 %vm4615_vm2, %v14479_v8 }
 0x302   : > { %11351 = vmatprep.mubr.msk.f32.mxu1 %vm4615_vm2, %v14490_v24 }
 0x303   : > { %11429 = vmatmul.mubr.msk.f32.gmra.mxu0 %vm4615_vm2, %v14490_v24 }
 0x304   : > { %11431 = vmatprep.mubr.msk.f32.mxu0 %vm4615_vm2, %v14510_v44 }
 0x305   : > { %11352 = vmatmul.mubr.msk.f32.gmra.mxu1 %vm4615_vm2, %v14510_v44 }
 0x306   : > { %11354 = vmatprep.mubr.msk.f32.mxu1 %vm4615_vm2, %v14512_v6 }
 0x307   : > { %11432 = vmatmul.mubr.msk.f32.gmra.mxu0 %vm4615_vm2, %v14512_v6 }
 0x308   : > { %11434 = vmatprep.mubr.msk.f32.mxu0 %vm4615_vm2, %v14541_v32 }
 0x309   : > { %11355 = vmatmul.mubr.msk.f32.gmra.mxu1 %vm4615_vm2, %v14541_v32 }
 0x30a   : > { %11357 = vmatprep.mubr.msk.f32.mxu1 %vm4615_vm2, %v14554_v21 }
 0x30b   : > { %11435 = vmatmul.mubr.msk.f32.gmra.mxu0 %vm4615_vm2, %v14554_v21 }
 0x30c   : > { %11437 = vmatprep.mubr.msk.f32.mxu0 %vm4615_vm2, %v14572_v15 }
 0x30d   : > { %11358 = vmatmul.mubr.msk.f32.gmra.mxu1 %vm4615_vm2, %v14572_v15 }
 0x30e   : > { %11360 = vmatprep.mubr.msk.f32.mxu1 %vm4615_vm2, %v14583_v51 }
 0x30f   : > { %11438 = vmatmul.mubr.msk.f32.gmra.mxu0 %vm4615_vm2, %v14583_v51 }
 0x310   : > { %11440 = vmatprep.mubr.msk.f32.mxu0 %vm4615_vm2, %v14613_v52 }
 0x311   : > { %11361 = vmatmul.mubr.msk.f32.gmra.mxu1 %vm4615_vm2, %v14613_v52 }
 0x312   : > { %11363 = vmatprep.mubr.msk.f32.mxu1 %vm4615_vm2, %v14615_v26 }
 0x313   : > { %11441 = vmatmul.mubr.msk.f32.gmra.mxu0 %vm4615_vm2, %v14615_v26 }
 0x314   : > { %11443 = vmatprep.mubr.msk.f32.mxu0 %vm4615_vm2, %v14644_v45 }
 0x315   : > { %11364 = vmatmul.mubr.msk.f32.gmra.mxu1 %vm4615_vm2, %v14644_v45 }
 0x316   : > { %11366 = vmatprep.mubr.msk.f32.mxu1 %vm4615_vm2, %v14655_v55 }
 0x317   : > { %11444 = vmatmul.mubr.msk.f32.gmra.mxu0 %vm4615_vm2, %v14655_v55 }
 0x318   : > { %11446 = vmatprep.mubr.msk.f32.mxu0 %vm4615_vm2, %v14669_v62 }
 0x319   : > { %11367 = vmatmul.mubr.msk.f32.gmra.mxu1 %vm4615_vm2, %v14669_v62 }
 0x31a   : > { %11369 = vmatprep.mubr.msk.f32.mxu1 %vm4615_vm2, %v14677_v4 }
 0x31b   : > { %11447 = vmatmul.mubr.msk.f32.gmra.mxu0 %vm4615_vm2, %v14677_v4 }
 0x31c   : > { %11449 = vmatprep.mubr.msk.f32.mxu0 %vm4615_vm2, %v14696_v50 }
 0x31d   : > { %11370 = vmatmul.mubr.msk.f32.gmra.mxu1 %vm4615_vm2, %v14696_v50 }
 0x31e   : > { %11372 = vmatprep.mubr.msk.f32.mxu1 %vm4615_vm2, %v14698_v63 }
 0x31f   : > { %11450 = vmatmul.mubr.msk.f32.gmra.mxu0 %vm4615_vm2, %v14698_v63 }
 0x320   : > { %11452 = vmatprep.mubr.msk.f32.mxu0 %vm4615_vm2, %v14715_v31 }
 0x321   : > { %11373 = vmatmul.mubr.msk.f32.gmra.mxu1 %vm4615_vm2, %v14715_v31 }
 0x322   : > { %11375 = vmatprep.mubr.msk.f32.mxu1 %vm4615_vm2, %v14724_v29 }
 0x323   : > { %11453 = vmatmul.mubr.msk.f32.gmra.mxu0 %vm4615_vm2, %v14724_v29 }
 0x324   : > { %11455 = vmatprep.mubr.msk.f32.mxu0 %vm4615_vm2, %v14732_v41 }
 0x325   : > { %11376 = vmatmul.mubr.msk.f32.gmra.mxu1 %vm4615_vm2, %v14732_v41 }
 0x326   : > { %11378 = vmatprep.mubr.msk.f32.mxu1 %vm4615_vm2, %v14739_v36 }
 0x327   : > { %11456 = vmatmul.mubr.msk.f32.gmra.mxu0 %vm4615_vm2, %v14739_v36 }
 0x328   : > { %11458 = vmatprep.mubr.msk.f32.mxu0 %vm4615_vm2, %v14747_v28 }
 0x329   : > { %11379 = vmatmul.mubr.msk.f32.gmra.mxu1 %vm4615_vm2, %v14747_v28 }
 0x32a   : > { %11381 = vmatprep.mubr.msk.f32.mxu1 %vm4615_vm2, %v14749_v0 }
 0x32b   : > { %11459 = vmatmul.mubr.msk.f32.gmra.mxu0 %vm4615_vm2, %v14749_v0 }
 0x32c   : > { %11537 = vmatprep.mubr.msk.f32.mxu0 %vm4615_vm2, %v14759_v56  ;;  %v11866_v56 = vld [vmem:[#allocation2 + $0x50] sm:$0xff] }
 0x32d   : > { %11382 = vmatmul.mubr.msk.f32.gmra.mxu1 %vm4615_vm2, %v14763_v19 }
 0x32e   : > { %11384 = vmatprep.mubr.msk.f32.mxu1 %vm4615_vm2, %v14765_v25  ;;  %v11246_v18 = vpop.f32.mrf.mxu0 }
 0x32f   : > { %11538 = vmatmul.mubr.msk.f32.vlgmr.msra.gmra.mxu0 %vm4615_vm2, %v14771_v53 }
 0x330   : > { %11540 = vmatprep.mubr.msk.f32.mxu0 %vm4615_vm2, %v14775_v40  ;;  %v5262_v61 = vpop.f32.mrf.mxu0  ;;  %11684 = vmatpush3.msra.mxu0 %v9515_v16 }
 0x331   : > { %11385 = vmatmul.mubr.msk.f32.gmra.mxu1 %vm4615_vm2, %v14780_v48  ;;  %v15004_v34 = vpop.f32.mrf.mxu1 }
 0x332   : > { %11463 = vmatprep.mubr.msk.f32.mxu1 %vm4615_vm2, %v14784_v2 }
 0x333   : > { %11541 = vmatmul.mubr.msk.f32.gmra.mxu0 %vm4615_vm2, %v14784_v2  ;;  %v11249_v10 = vpop.f32.mrf.mxu0  ;;  %v4938_v38 = vpop.f32.mrf.mxu1 }
 0x334   : > { %11543 = vmatprep.mubr.msk.f32.mxu0 %vm4615_vm2, %v14790_v9  ;;  %v15017_v39 = vadd.f32 %v5252_v13, %v4938_v38  ;;  %v11869_v13 = vld [vmem:[#allocation2 + $0x68] sm:$0xff]  ;;  %v11870_v38 = vld [vmem:[#allocation2 + $0x70] sm:$0xff] }
 0x335   : > { %11464 = vmatmul.mubr.msk.f32.vlgmr.msra.gmra.mxu1 %vm4615_vm2, %v14790_v9  ;;  %v5272_v58 = vpop.f32.mrf.mxu0  ;;  %v11172_v37 = vpop.f32.mrf.mxu1  ;;  %v11867_v9 = vld [vmem:[#allocation2 + $0x58] sm:$0xff] }
 0x336   : > { %16841 = vst [vmem:[#allocation28_spill] sm:$0xff] %v15017_v39  ;;  %11610 = vmatpush3.msra.mxu1 %v14797_v59  ;;  %11466 = vmatprep.mubr.msk.f32.mxu1 %vm4615_vm2, %v14804_v20  ;;  %v15024_v54 = vadd.f32 %v11246_v18, %v11172_v37 }
 0x337   : > { %11544 = vmatmul.mubr.msk.f32.gmra.mxu0 %vm4615_vm2, %v14804_v20  ;;  %11757 = vmatprep.subr.mxu1 %v15013_v57  ;;  %v4948_v27 = vpop.f32.mrf.mxu1 }
 0x338   : > { %16842 = vst [vmem:[#allocation72_spill] sm:$0xff] %v15024_v54  ;;  %11546 = vmatprep.mubr.msk.f32.mxu0 %vm4615_vm2, %v14811_v7  ;;  %v11252_v43 = vpop.f32.mrf.mxu0  ;;  %v15031_v33 = vadd.f32 %v5262_v61, %v4948_v27  ;;  %v11871_v27 = vld [vmem:[#allocation2 + $0x78] sm:$0xff] }
 0x339   : > { %11467 = vmatmul.mubr.msk.f32.gmra.mxu1 %vm4615_vm2, %v14811_v7  ;;  %v11175_v46 = vpop.f32.mrf.mxu1  ;;  %v11868_v7 = vld [vmem:[#allocation2 + $0x60] sm:$0xff] }
 0x33a   : > { %16843 = vst [vmem:[#allocation73_spill] sm:$0xff] %v15031_v33  ;;  %11469 = vmatprep.mubr.msk.f32.mxu1 %vm4615_vm2, %v14817_v22  ;;  %v5282_v47 = vpop.f32.mrf.mxu0  ;;  %v15037_v11 = vadd.f32 %v11249_v10, %v11175_v46 }
 0x33b   : > { %11547 = vmatmul.mubr.msk.f32.gmra.mxu0 %vm4615_vm2, %v14817_v22  ;;  %v4958_v49 = vpop.f32.mrf.mxu1 }
 0x33c   : > { %16844 = vst [vmem:[#allocation29_spill] sm:$0xff] %v15037_v11  ;;  %11549 = vmatprep.mubr.msk.f32.mxu0 %vm4615_vm2, %v14823_v60  ;;  %v11255_v42 = vpop.f32.mrf.mxu0  ;;  %v15043_v35 = vadd.f32 %v5272_v58, %v4958_v49 }
 0x33d   : > { %11470 = vmatmul.mubr.msk.f32.gmra.mxu1 %vm4615_vm2, %v14823_v60 }
 0x33e   : > { %16845 = vst [vmem:[#allocation30_spill] sm:$0xff] %v15043_v35  ;;  %11472 = vmatprep.mubr.msk.f32.mxu1 %vm4615_vm2, %v11865_v1  ;;  %v5292_v14 = vpop.f32.mrf.mxu0  ;;  %v15608_v35 = vld [vmem:[#allocation2 + $0x198] sm:$0xff] }
 0x33f   : > { %11550 = vmatmul.mubr.msk.f32.gmra.mxu0 %vm4615_vm2, %v11865_v1  ;;  %v11178_v53 = vpop.f32.mrf.mxu1 }
 0x340   : > { %11552 = vmatprep.mubr.msk.f32.mxu0 %vm4615_vm2, %v11866_v56  ;;  %v15048_v40 = vadd.f32 %v11252_v43, %v11178_v53  ;;  %v11873_v53 = vld [vmem:[#allocation2 + $0x88] sm:$0xff] }
 0x341   : > { %11473 = vmatmul.mubr.msk.f32.gmra.mxu1 %vm4615_vm2, %v11866_v56  ;;  %v11258_v2 = vpop.f32.mrf.mxu0  ;;  %v4968_v59 = vpop.f32.mrf.mxu1 }
 0x342   : > { %16846 = vst [vmem:[#allocation74_spill] sm:$0xff] %v15048_v40  ;;  %11475 = vmatprep.mubr.msk.f32.mxu1 %vm4615_vm2, %v11867_v9  ;;  %v15053_v30 = vadd.f32 %v5282_v47, %v4968_v59  ;;  %v11874_v59 = vld [vmem:[#allocation2 + $0x90] sm:$0xff] }
 0x343   : > { %11553 = vmatmul.mubr.msk.f32.gmra.mxu0 %vm4615_vm2, %v11867_v9  ;;  %v5302_v20 = vpop.f32.mrf.mxu0 }
 0x344   : > { %16847 = vst [vmem:[#allocation75_spill] sm:$0xff] %v15053_v30  ;;  %11555 = vmatprep.mubr.msk.f32.mxu0 %vm4615_vm2, %v11868_v7  ;;  %v11181_v22 = vpop.f32.mrf.mxu1 }
 0x345   : > { %v15056_v60 = vadd.f32 %v11255_v42, %v11181_v22  ;;  %11476 = vmatmul.mubr.msk.f32.gmra.mxu1 %vm4615_vm2, %v11868_v7  ;;  %v11261_v16 = vpop.f32.mrf.mxu0  ;;  %v11872_v42 = vld [vmem:[#allocation2 + $0x80] sm:$0xff] }
 0x346   : > { %11478 = vmatprep.mubr.msk.f32.mxu1 %vm4615_vm2, %v11869_v13  ;;  %v4978_v18 = vpop.f32.mrf.mxu1 }
 0x347   : > { %16848 = vst [vmem:[#allocation31_spill] sm:$0xff] %v15056_v60  ;;  %11556 = vmatmul.mubr.msk.f32.gmra.mxu0 %vm4615_vm2, %v11869_v13  ;;  %v15061_v61 = vadd.f32 %v5292_v14, %v4978_v18  ;;  %v5312_v10 = vpop.f32.mrf.mxu0  ;;  %v11875_v13 = vld [vmem:[#allocation2 + $0x98] sm:$0xff] }
 0x348   : > { %11558 = vmatprep.mubr.msk.f32.mxu0 %vm4615_vm2, %v11870_v38  ;;  %v11184_v58 = vpop.f32.mrf.mxu1 }
 0x349   : > { %16849 = vst [vmem:[#allocation77_spill] sm:$0xff] %v15061_v61  ;;  %v15064_v37 = vadd.f32 %v11258_v2, %v11184_v58  ;;  %11479 = vmatmul.mubr.msk.f32.gmra.mxu1 %vm4615_vm2, %v11870_v38  ;;  %v11264_v43 = vpop.f32.mrf.mxu0 }
 0x34a   : > { %11481 = vmatprep.mubr.msk.f32.mxu1 %vm4615_vm2, %v11871_v27  ;;  %v4988_v47 = vpop.f32.mrf.mxu1 }
 0x34b   : > { %16850 = vst [vmem:[#allocation78_spill] sm:$0xff] %v15064_v37  ;;  %11559 = vmatmul.mubr.msk.f32.gmra.mxu0 %vm4615_vm2, %v11871_v27  ;;  %v15069_v46 = vadd.f32 %v5302_v20, %v4988_v47  ;;  %v5322_v49 = vpop.f32.mrf.mxu0 }
 0x34c   : > { %11561 = vmatprep.mubr.msk.f32.mxu0 %vm4615_vm2, %v11872_v42  ;;  %v11187_v1 = vpop.f32.mrf.mxu1 }
 0x34d   : > { %16851 = vst [vmem:[#allocation32_spill] sm:$0xff] %v15069_v46  ;;  %v15072_v14 = vadd.f32 %v11261_v16, %v11187_v1  ;;  %11482 = vmatmul.mubr.msk.f32.gmra.mxu1 %vm4615_vm2, %v11872_v42  ;;  %v11267_v56 = vpop.f32.mrf.mxu0  ;;  %v11877_v42 = vld [vmem:[#allocation2 + $0xa8] sm:$0xff] }
 0x34e   : > { %11484 = vmatprep.mubr.msk.f32.mxu1 %vm4615_vm2, %v11873_v53  ;;  %v4998_v2 = vpop.f32.mrf.mxu1 }
 0x34f   : > { %16852 = vst [vmem:[#allocation76_spill] sm:$0xff] %v15072_v14  ;;  %11562 = vmatmul.mubr.msk.f32.gmra.mxu0 %vm4615_vm2, %v11873_v53  ;;  %v15077_v9 = vadd.f32 %v5312_v10, %v4998_v2  ;;  %v5332_v20 = vpop.f32.mrf.mxu0  ;;  %v11876_v10 = vld [vmem:[#allocation2 + $0xa0] sm:$0xff] }
 0x350   : > { %11564 = vmatprep.mubr.msk.f32.mxu0 %vm4615_vm2, %v11874_v59  ;;  %v11190_v7 = vpop.f32.mrf.mxu1 }
 0x351   : > { %16853 = vst [vmem:[#allocation33_spill] sm:$0xff] %v15077_v9  ;;  %v15080_v22 = vadd.f32 %v11264_v43, %v11190_v7  ;;  %11485 = vmatmul.mubr.msk.f32.gmra.mxu1 %vm4615_vm2, %v11874_v59 }
 0x352   : > { %v11270_v16 = vpop.f32.mrf.mxu0  ;;  %11487 = vmatprep.mubr.msk.f32.mxu1 %vm4615_vm2, %v11875_v13  ;;  %v5008_v18 = vpop.f32.mrf.mxu1 }
 0x353   : > { %16854 = vst [vmem:[#allocation80_spill] sm:$0xff] %v15080_v22  ;;  %11565 = vmatmul.mubr.msk.f32.gmra.mxu0 %vm4615_vm2, %v11875_v13  ;;  %v15085_v38 = vadd.f32 %v5322_v49, %v5008_v18 }
 0x354   : > { %11567 = vmatprep.mubr.msk.f32.mxu0 %vm4615_vm2, %v11876_v10  ;;  %v5342_v58 = vpop.f32.mrf.mxu0  ;;  %v11193_v27 = vpop.f32.mrf.mxu1 }
 0x355   : > { %16855 = vst [vmem:[#allocation81_spill] sm:$0xff] %v15085_v38  ;;  %v15088_v47 = vadd.f32 %v11267_v56, %v11193_v27  ;;  %11488 = vmatmul.mubr.msk.f32.gmra.mxu1 %vm4615_vm2, %v11876_v10 }
 0x356   : > { %v11273_v43 = vpop.f32.mrf.mxu0  ;;  %11490 = vmatprep.mubr.msk.f32.mxu1 %vm4615_vm2, %v11877_v42  ;;  %v5018_v1 = vpop.f32.mrf.mxu1 }
 0x357   : > { %16856 = vst [vmem:[#allocation34_spill] sm:$0xff] %v15088_v47  ;;  %11568 = vmatmul.mubr.msk.f32.gmra.mxu0 %vm4615_vm2, %v11877_v42  ;;  %v15093_v53 = vadd.f32 %v5332_v20, %v5018_v1 }
 0x358   : > { %11570 = vmatprep.mubr.msk.f32.mxu0 %vm4615_vm2, %v14418_v5  ;;  %v5352_v49 = vpop.f32.mrf.mxu0  ;;  %v11196_v2 = vpop.f32.mrf.mxu1 }
 0x359   : > { %16857 = vst [vmem:[#allocation79_spill] sm:$0xff] %v15093_v53  ;;  %v15097_v59 = vadd.f32 %v11270_v16, %v11196_v2  ;;  %11491 = vmatmul.mubr.msk.f32.gmra.mxu1 %vm4615_vm2, %v14418_v5 }
 0x35a   : > { %v11276_v56 = vpop.f32.mrf.mxu0  ;;  %11493 = vmatprep.mubr.msk.f32.mxu1 %vm4615_vm2, %v14420_v12  ;;  %v5028_v7 = vpop.f32.mrf.mxu1 }
 0x35b   : > { %16858 = vst [vmem:[#allocation35_spill] sm:$0xff] %v15097_v59  ;;  %11571 = vmatmul.mubr.msk.f32.gmra.mxu0 %vm4615_vm2, %v14420_v12  ;;  %v15105_v20 = vadd.f32 %v5342_v58, %v5028_v7  ;;  %v15422_v59 = vld [vmem:[#allocation2 + $0xd8] sm:$0xff] }
 0x35c   : > { %11573 = vmatprep.mubr.msk.f32.mxu0 %vm4615_vm2, %v14446_v17  ;;  %v5362_v13 = vpop.f32.mrf.mxu0  ;;  %v11199_v18 = vpop.f32.mrf.mxu1 }
 0x35d   : > { %16859 = vst [vmem:[#allocation83_spill] sm:$0xff] %v15105_v20  ;;  %v15109_v16 = vadd.f32 %v11273_v43, %v11199_v18  ;;  %11494 = vmatmul.mubr.msk.f32.gmra.mxu1 %vm4615_vm2, %v14446_v17 }
 0x35e   : > { %v11279_v5 = vpop.f32.mrf.mxu0  ;;  %11496 = vmatprep.mubr.msk.f32.mxu1 %vm4615_vm2, %v14459_v23  ;;  %v5038_v10 = vpop.f32.mrf.mxu1 }
 0x35f   : > { %16860 = vst [vmem:[#allocation84_spill] sm:$0xff] %v15109_v16  ;;  %11574 = vmatmul.mubr.msk.f32.gmra.mxu0 %vm4615_vm2, %v14459_v23  ;;  %v15117_v12 = vadd.f32 %v5352_v49, %v5038_v10 }
 0x360   : > { %11576 = vmatprep.mubr.msk.f32.mxu0 %vm4615_vm2, %v14479_v8  ;;  %v5372_v58 = vpop.f32.mrf.mxu0  ;;  %v11202_v27 = vpop.f32.mrf.mxu1 }
 0x361   : > { %16861 = vst [vmem:[#allocation36_spill] sm:$0xff] %v15117_v12  ;;  %v15121_v43 = vadd.f32 %v11276_v56, %v11202_v27  ;;  %11497 = vmatmul.mubr.msk.f32.gmra.mxu1 %vm4615_vm2, %v14479_v8 }
 0x362   : > { %v11282_v17 = vpop.f32.mrf.mxu0  ;;  %11499 = vmatprep.mubr.msk.f32.mxu1 %vm4615_vm2, %v14490_v24  ;;  %v5048_v42 = vpop.f32.mrf.mxu1 }
 0x363   : > { %16862 = vst [vmem:[#allocation82_spill] sm:$0xff] %v15121_v43  ;;  %11577 = vmatmul.mubr.msk.f32.gmra.mxu0 %vm4615_vm2, %v14490_v24  ;;  %v15129_v23 = vadd.f32 %v5362_v13, %v5048_v42  ;;  %v15406_v43 = vld [vmem:[#allocation2 + $0xc8] sm:$0xff] }
 0x364   : > { %11579 = vmatprep.mubr.msk.f32.mxu0 %vm4615_vm2, %v14510_v44  ;;  %v5382_v1 = vpop.f32.mrf.mxu0  ;;  %v11205_v49 = vpop.f32.mrf.mxu1 }
 0x365   : > { %16863 = vst [vmem:[#allocation37_spill] sm:$0xff] %v15129_v23  ;;  %v15133_v2 = vadd.f32 %v11279_v5, %v11205_v49  ;;  %11500 = vmatmul.mubr.msk.f32.gmra.mxu1 %vm4615_vm2, %v14510_v44 }
 0x366   : > { %v11285_v8 = vpop.f32.mrf.mxu0  ;;  %11502 = vmatprep.mubr.msk.f32.mxu1 %vm4615_vm2, %v14512_v6  ;;  %v5058_v56 = vpop.f32.mrf.mxu1 }
 0x367   : > { %16864 = vst [vmem:[#allocation86_spill] sm:$0xff] %v15133_v2  ;;  %11580 = vmatmul.mubr.msk.f32.gmra.mxu0 %vm4615_vm2, %v14512_v6  ;;  %v15141_v24 = vadd.f32 %v5372_v58, %v5058_v56 }
 0x368   : > { %11582 = vmatprep.mubr.msk.f32.mxu0 %vm4615_vm2, %v14541_v32  ;;  %v5392_v7 = vpop.f32.mrf.mxu0 }
 0x369   : > { %16865 = vst [vmem:[#allocation87_spill] sm:$0xff] %v15141_v24  ;;  %v11208_v13 = vpop.f32.mrf.mxu1  ;;  %11503 = vmatmul.mubr.msk.f32.gmra.mxu1 %vm4615_vm2, %v14541_v32 }
 0x36a   : > { %v15145_v18 = vadd.f32 %v11282_v17, %v11208_v13  ;;  %11505 = vmatprep.mubr.msk.f32.mxu1 %vm4615_vm2, %v14554_v21 }
 0x36b   : > { %v11288_v44 = vpop.f32.mrf.mxu0  ;;  %v5068_v5 = vpop.f32.mrf.mxu1  ;;  %11583 = vmatmul.mubr.msk.f32.gmra.mxu0 %vm4615_vm2, %v14554_v21 }
 0x36c   : > { %16866 = vst [vmem:[#allocation38_spill] sm:$0xff] %v15145_v18  ;;  %v15153_v6 = vadd.f32 %v5382_v1, %v5068_v5  ;;  %11585 = vmatprep.mubr.msk.f32.mxu0 %vm4615_vm2, %v14572_v15  ;;  %v15390_v18 = vld [vmem:[#allocation2 + $0xb8] sm:$0xff] }
 0x36d   : > { %v5402_v10 = vpop.f32.mrf.mxu0  ;;  %v11211_v58 = vpop.f32.mrf.mxu1  ;;  %11506 = vmatmul.mubr.msk.f32.gmra.mxu1 %vm4615_vm2, %v14572_v15 }
 0x36e   : > { %16867 = vst [vmem:[#allocation85_spill] sm:$0xff] %v15153_v6  ;;  %v15157_v27 = vadd.f32 %v11285_v8, %v11211_v58  ;;  %11508 = vmatprep.mubr.msk.f32.mxu1 %vm4615_vm2, %v14583_v51 }
 0x36f   : > { %v11291_v32 = vpop.f32.mrf.mxu0  ;;  %v5078_v17 = vpop.f32.mrf.mxu1  ;;  %11586 = vmatmul.mubr.msk.f32.gmra.mxu0 %vm4615_vm2, %v14583_v51 }
 0x370   : > { %16868 = vst [vmem:[#allocation39_spill] sm:$0xff] %v15157_v27  ;;  %v15165_v21 = vadd.f32 %v5392_v7, %v5078_v17  ;;  %11588 = vmatprep.mubr.msk.f32.mxu0 %vm4615_vm2, %v14613_v52 }
 0x371   : > { %v5412_v42 = vpop.f32.mrf.mxu0  ;;  %v11214_v1 = vpop.f32.mrf.mxu1  ;;  %11509 = vmatmul.mubr.msk.f32.gmra.mxu1 %vm4615_vm2, %v14613_v52 }
 0x372   : > { %16869 = vst [vmem:[#allocation89_spill] sm:$0xff] %v15165_v21  ;;  %v15169_v49 = vadd.f32 %v11288_v44, %v11214_v1  ;;  %11511 = vmatprep.mubr.msk.f32.mxu1 %vm4615_vm2, %v14615_v26 }
 0x373   : > { %v11294_v15 = vpop.f32.mrf.mxu0  ;;  %v5088_v8 = vpop.f32.mrf.mxu1  ;;  %11589 = vmatmul.mubr.msk.f32.gmra.mxu0 %vm4615_vm2, %v14615_v26 }
 0x374   : > { %16870 = vst [vmem:[#allocation90_spill] sm:$0xff] %v15169_v49  ;;  %v15177_v51 = vadd.f32 %v5402_v10, %v5088_v8  ;;  %11591 = vmatprep.mubr.msk.f32.mxu0 %vm4615_vm2, %v14644_v45  ;;  %v15374_v49 = vld [vmem:[#allocation2 + $0xa8] sm:$0xff] }
 0x375   : > { %v5422_v56 = vpop.f32.mrf.mxu0  ;;  %v11217_v7 = vpop.f32.mrf.mxu1  ;;  %11512 = vmatmul.mubr.msk.f32.gmra.mxu1 %vm4615_vm2, %v14644_v45 }
 0x376   : > { %16871 = vst [vmem:[#allocation40_spill] sm:$0xff] %v15177_v51  ;;  %v15181_v13 = vadd.f32 %v11291_v32, %v11217_v7  ;;  %11514 = vmatprep.mubr.msk.f32.mxu1 %vm4615_vm2, %v14655_v55 }
 0x377   : > { %v11297_v52 = vpop.f32.mrf.mxu0  ;;  %v5098_v44 = vpop.f32.mrf.mxu1  ;;  %11592 = vmatmul.mubr.msk.f32.gmra.mxu0 %vm4615_vm2, %v14655_v55 }
 0x378   : > { %16872 = vst [vmem:[#allocation88_spill] sm:$0xff] %v15181_v13  ;;  %v15189_v26 = vadd.f32 %v5412_v42, %v5098_v44  ;;  %11594 = vmatprep.mubr.msk.f32.mxu0 %vm4615_vm2, %v14669_v62 }
 0x379   : > { %v5432_v5 = vpop.f32.mrf.mxu0  ;;  %v11220_v10 = vpop.f32.mrf.mxu1  ;;  %11515 = vmatmul.mubr.msk.f32.gmra.mxu1 %vm4615_vm2, %v14669_v62 }
 0x37a   : > { %16873 = vst [vmem:[#allocation41_spill] sm:$0xff] %v15189_v26  ;;  %v15193_v58 = vadd.f32 %v11294_v15, %v11220_v10  ;;  %11517 = vmatprep.mubr.msk.f32.mxu1 %vm4615_vm2, %v14677_v4 }
 0x37b   : > { %v11300_v45 = vpop.f32.mrf.mxu0  ;;  %v5108_v32 = vpop.f32.mrf.mxu1  ;;  %11595 = vmatmul.mubr.msk.f32.gmra.mxu0 %vm4615_vm2, %v14677_v4 }
 0x37c   : > { %16874 = vst [vmem:[#allocation92_spill] sm:$0xff] %v15193_v58  ;;  %v15201_v55 = vadd.f32 %v5422_v56, %v5108_v32  ;;  %11597 = vmatprep.mubr.msk.f32.mxu0 %vm4615_vm2, %v14696_v50  ;;  %v15358_v58 = vld [vmem:[#allocation2 + $0x98] sm:$0xff] }
 0x37d   : > { %v5442_v17 = vpop.f32.mrf.mxu0  ;;  %v11223_v42 = vpop.f32.mrf.mxu1  ;;  %11518 = vmatmul.mubr.msk.f32.gmra.mxu1 %vm4615_vm2, %v14696_v50 }
 0x37e   : > { %16875 = vst [vmem:[#allocation93_spill] sm:$0xff] %v15201_v55  ;;  %v15205_v1 = vadd.f32 %v11297_v52, %v11223_v42  ;;  %11520 = vmatprep.mubr.msk.f32.mxu1 %vm4615_vm2, %v14698_v63 }
 0x37f   : > { %v11303_v62 = vpop.f32.mrf.mxu0  ;;  %v5118_v15 = vpop.f32.mrf.mxu1  ;;  %11598 = vmatmul.mubr.msk.f32.gmra.mxu0 %vm4615_vm2, %v14698_v63 }
 0x380   : > { %16876 = vst [vmem:[#allocation42_spill] sm:$0xff] %v15205_v1  ;;  %v15213_v4 = vadd.f32 %v5432_v5, %v5118_v15  ;;  %11600 = vmatprep.mubr.msk.f32.mxu0 %vm4615_vm2, %v14715_v31  ;;  %v15251_v15 = vld [vmem:[#allocation2 + $0x30] sm:$0xff] }
 0x381   : > { %v5452_v8 = vpop.f32.mrf.mxu0  ;;  %v11226_v56 = vpop.f32.mrf.mxu1  ;;  %11521 = vmatmul.mubr.msk.f32.gmra.mxu1 %vm4615_vm2, %v14715_v31 }
 0x382   : > { %16877 = vst [vmem:[#allocation91_spill] sm:$0xff] %v15213_v4  ;;  %v15217_v7 = vadd.f32 %v11300_v45, %v11226_v56  ;;  %11523 = vmatprep.mubr.msk.f32.mxu1 %vm4615_vm2, %v14724_v29 }
 0x383   : > { %v11306_v50 = vpop.f32.mrf.mxu0  ;;  %v5128_v52 = vpop.f32.mrf.mxu1  ;;  %11601 = vmatmul.mubr.msk.f32.gmra.mxu0 %vm4615_vm2, %v14724_v29 }
 0x384   : > { %16878 = vst [vmem:[#allocation43_spill] sm:$0xff] %v15217_v7  ;;  %v15225_v63 = vadd.f32 %v5442_v17, %v5128_v52  ;;  %11603 = vmatprep.mubr.msk.f32.mxu0 %vm4615_vm2, %v14732_v41  ;;  %v15261_v52 = vld [vmem:[#allocation2 + $0x38] sm:$0xff]  ;;  %v15342_v7 = vld [vmem:[#allocation2 + $0x88] sm:$0xff] }
 0x385   : > { %v5462_v44 = vpop.f32.mrf.mxu0  ;;  %v11229_v5 = vpop.f32.mrf.mxu1  ;;  %11524 = vmatmul.mubr.msk.f32.gmra.mxu1 %vm4615_vm2, %v14732_v41 }
 0x386   : > { %16879 = vst [vmem:[#allocation95_spill] sm:$0xff] %v15225_v63  ;;  %v15229_v10 = vadd.f32 %v11303_v62, %v11229_v5  ;;  %11526 = vmatprep.mubr.msk.f32.mxu1 %vm4615_vm2, %v14739_v36 }
 0x387   : > { %v11309_v31 = vpop.f32.mrf.mxu0  ;;  %v5138_v45 = vpop.f32.mrf.mxu1  ;;  %11604 = vmatmul.mubr.msk.f32.gmra.mxu0 %vm4615_vm2, %v14739_v36 }
 0x388   : > { %16880 = vst [vmem:[#allocation96_spill] sm:$0xff] %v15229_v10  ;;  %v15237_v29 = vadd.f32 %v5452_v8, %v5138_v45  ;;  %11606 = vmatprep.mubr.msk.f32.mxu0 %vm4615_vm2, %v14747_v28 }
 0x389   : > { %v5472_v32 = vpop.f32.mrf.mxu0  ;;  %v11232_v17 = vpop.f32.mrf.mxu1  ;;  %11527 = vmatmul.mubr.msk.f32.gmra.mxu1 %vm4615_vm2, %v14747_v28 }
 0x38a   : > { %16881 = vst [vmem:[#allocation44_spill] sm:$0xff] %v15237_v29  ;;  %v15241_v42 = vadd.f32 %v11306_v50, %v11232_v17  ;;  %11529 = vmatprep.mubr.msk.f32.mxu1 %vm4615_vm2, %v14749_v0  ;;  %v15277_v17 = vld [vmem:[#allocation2 + $0x48] sm:$0xff] }
 0x38b   : > { %v11312_v41 = vpop.f32.mrf.mxu0  ;;  %v5148_v62 = vpop.f32.mrf.mxu1  ;;  %11607 = vmatmul.mubr.msk.f32.gmra.mxu0 %vm4615_vm2, %v14749_v0 }
 0x38c   : > { %16882 = vst [vmem:[#allocation94_spill] sm:$0xff] %v15241_v42  ;;  %v15249_v36 = vadd.f32 %v5462_v44, %v5148_v62  ;;  %11685 = vmatprep.mubr.msk.f32.mxu0 %vm4615_vm2, %v15251_v15  ;;  %v15265_v44 = vld [vmem:[#allocation2 + $0x40] sm:$0xff]  ;;  %v15281_v62 = vld [vmem:[#allocation2 + $0x50] sm:$0xff]  ;;  %v15326_v42 = vld [vmem:[#allocation2 + $0x78] sm:$0xff] }
 0x38d   : > { %v5482_v8 = vpop.f32.mrf.mxu0  ;;  %v11235_v56 = vpop.f32.mrf.mxu1  ;;  %11530 = vmatmul.mubr.msk.f32.gmra.mxu1 %vm4615_vm2, %v14763_v19 }
 0x38e   : > { %16883 = vst [vmem:[#allocation45_spill] sm:$0xff] %v15249_v36  ;;  %v15257_v28 = vadd.f32 %v11309_v31, %v11235_v56  ;;  %11532 = vmatprep.mubr.msk.f32.mxu1 %vm4615_vm2, %v14765_v25 }
 0x38f   : > { %v11391_v50 = vpop.f32.mrf.mxu0  ;;  %11686 = vmatmul.mubr.msk.f32.vlgmr.msra.gmra.mxu0 %vm4615_vm2, %v15261_v52  ;;  %v5158_v0 = vpop.f32.mrf.mxu1 }
 0x390   : > { %16884 = vst [vmem:[#allocation46_spill] sm:$0xff] %v15257_v28  ;;  %v15267_v5 = vadd.f32 %v5472_v32, %v5158_v0  ;;  %11688 = vmatprep.mubr.msk.f32.mxu0 %vm4615_vm2, %v15265_v44 }
 0x391   : > { %v5864_v19 = vpop.f32.mrf.mxu0  ;;  %v11238_v31 = vpop.f32.mrf.mxu1  ;;  %11533 = vmatmul.mubr.msk.f32.gmra.mxu1 %vm4615_vm2, %v14780_v48 }
 0x392   : > { %16885 = vst [vmem:[#allocation98_spill] sm:$0xff] %v15267_v5  ;;  %v15273_v45 = vadd.f32 %v11312_v41, %v11238_v31  ;;  %11611 = vmatprep.mubr.msk.f32.mxu1 %vm4615_vm2, %v15251_v15  ;;  %v15294_v31 = vld [vmem:[#allocation2 + $0x58] sm:$0xff]  ;;  %v15310_v5 = vld [vmem:[#allocation2 + $0x68] sm:$0xff] }
 0x393   : > { %v11394_v25 = vpop.f32.mrf.mxu0  ;;  %11689 = vmatmul.mubr.msk.f32.gmra.mxu0 %vm4615_vm2, %v15277_v17  ;;  %v5168_v32 = vpop.f32.mrf.mxu1 }
 0x394   : > { %16886 = vst [vmem:[#allocation97_spill] sm:$0xff] %v15273_v45  ;;  %v15283_v56 = vadd.f32 %v5482_v8, %v5168_v32  ;;  %11691 = vmatprep.mubr.msk.f32.mxu0 %vm4615_vm2, %v15281_v62  ;;  %v15298_v32 = vld [vmem:[#allocation2 + $0x60] sm:$0xff] }
 0x395   : > { %v5874_v48 = vpop.f32.mrf.mxu0  ;;  %v11317_v41 = vpop.f32.mrf.mxu1  ;;  %11612 = vmatmul.mubr.msk.f32.vlgmr.msra.gmra.mxu1 %vm4615_vm2, %v15261_v52 }
 0x396   : > { %16887 = vst [vmem:[#allocation99_spill] sm:$0xff] %v15283_v56  ;;  %v15289_v0 = vadd.f32 %v11391_v50, %v11317_v41  ;;  %11758 = vmatpush3.msra.mxu1 %v15013_v57  ;;  %11614 = vmatprep.mubr.msk.f32.mxu1 %vm4615_vm2, %v15265_v44 }
 0x397   : > { %v11397_v45 = vpop.f32.mrf.mxu0  ;;  %11692 = vmatmul.mubr.msk.f32.gmra.mxu0 %vm4615_vm2, %v15294_v31  ;;  %v5559_v8 = vpop.f32.mrf.mxu1 }
 0x398   : > { %16888 = vst [vmem:[#allocation100_spill] sm:$0xff] %v15289_v0  ;;  %v15300_v56 = vadd.f32 %v5864_v19, %v5559_v8  ;;  %11694 = vmatprep.mubr.msk.f32.mxu0 %vm4615_vm2, %v15298_v32  ;;  %v15314_v8 = vld [vmem:[#allocation2 + $0x70] sm:$0xff] }
 0x399   : > { %v5884_v50 = vpop.f32.mrf.mxu0  ;;  %v11320_v41 = vpop.f32.mrf.mxu1  ;;  %11615 = vmatmul.mubr.msk.f32.gmra.mxu1 %vm4615_vm2, %v15277_v17 }
 0x39a   : > { %16889 = vst [vmem:[#allocation101_spill] sm:$0xff] %v15300_v56  ;;  %v15306_v57 = vadd.f32 %v11394_v25, %v11320_v41  ;;  %11617 = vmatprep.mubr.msk.f32.mxu1 %vm4615_vm2, %v15281_v62 }
 0x39b   : > { %v11400_v28 = vpop.f32.mrf.mxu0  ;;  %11695 = vmatmul.mubr.msk.f32.gmra.mxu0 %vm4615_vm2, %v15310_v5  ;;  %v5569_v19 = vpop.f32.mrf.mxu1 }
 0x39c   : > { %16890 = vst [vmem:[#allocation61_spill] sm:$0xff] %v15306_v57  ;;  %v15316_v56 = vadd.f32 %v5874_v48, %v5569_v19  ;;  %11697 = vmatprep.mubr.msk.f32.mxu0 %vm4615_vm2, %v15314_v8  ;;  %v15330_v19 = vld [vmem:[#allocation2 + $0x80] sm:$0xff] }
 0x39d   : > { %v5894_v36 = vpop.f32.mrf.mxu0  ;;  %v11323_v25 = vpop.f32.mrf.mxu1  ;;  %11618 = vmatmul.mubr.msk.f32.gmra.mxu1 %vm4615_vm2, %v15294_v31 }
 0x39e   : > { %16891 = vst [vmem:[#allocation47_spill] sm:$0xff] %v15316_v56  ;;  %v15322_v41 = vadd.f32 %v11397_v45, %v11323_v25  ;;  %11620 = vmatprep.mubr.msk.f32.mxu1 %vm4615_vm2, %v15298_v32 }
 0x39f   : > { %v11403_v29 = vpop.f32.mrf.mxu0  ;;  %11698 = vmatmul.mubr.msk.f32.gmra.mxu0 %vm4615_vm2, %v15326_v42  ;;  %v5579_v48 = vpop.f32.mrf.mxu1 }
 0x3a0   : > { %16892 = vst [vmem:[#allocation114_spill] sm:$0xff] %v15322_v41  ;;  %v15332_v10 = vadd.f32 %v5884_v50, %v5579_v48  ;;  %11700 = vmatprep.mubr.msk.f32.mxu0 %vm4615_vm2, %v15330_v19  ;;  %v15346_v48 = vld [vmem:[#allocation2 + $0x90] sm:$0xff] }
 0x3a1   : > { %v5904_v63 = vpop.f32.mrf.mxu0  ;;  %v11326_v45 = vpop.f32.mrf.mxu1  ;;  %11621 = vmatmul.mubr.msk.f32.gmra.mxu1 %vm4615_vm2, %v15310_v5 }
 0x3a2   : > { %16893 = vst [vmem:[#allocation115_spill] sm:$0xff] %v15332_v10  ;;  %v15338_v25 = vadd.f32 %v11400_v28, %v11326_v45  ;;  %11623 = vmatprep.mubr.msk.f32.mxu1 %vm4615_vm2, %v15314_v8 }
 0x3a3   : > { %v11406_v4 = vpop.f32.mrf.mxu0  ;;  %11701 = vmatmul.mubr.msk.f32.gmra.mxu0 %vm4615_vm2, %v15342_v7  ;;  %v5589_v50 = vpop.f32.mrf.mxu1 }
 0x3a4   : > { %16894 = vst [vmem:[#allocation48_spill] sm:$0xff] %v15338_v25  ;;  %v15348_v1 = vadd.f32 %v5894_v36, %v5589_v50  ;;  %11703 = vmatprep.mubr.msk.f32.mxu0 %vm4615_vm2, %v15346_v48  ;;  %v15362_v50 = vld [vmem:[#allocation2 + $0xa0] sm:$0xff] }
 0x3a5   : > { %v5914_v55 = vpop.f32.mrf.mxu0  ;;  %v11329_v28 = vpop.f32.mrf.mxu1  ;;  %11624 = vmatmul.mubr.msk.f32.gmra.mxu1 %vm4615_vm2, %v15326_v42 }
 0x3a6   : > { %16895 = vst [vmem:[#allocation102_spill] sm:$0xff] %v15348_v1  ;;  %v15354_v45 = vadd.f32 %v11403_v29, %v11329_v28  ;;  %11626 = vmatprep.mubr.msk.f32.mxu1 %vm4615_vm2, %v15330_v19 }
 0x3a7   : > { %v11409_v26 = vpop.f32.mrf.mxu0  ;;  %11704 = vmatmul.mubr.msk.f32.gmra.mxu0 %vm4615_vm2, %v15358_v58  ;;  %v5599_v36 = vpop.f32.mrf.mxu1 }
 0x3a8   : > { %16896 = vst [vmem:[#allocation117_spill] sm:$0xff] %v15354_v45  ;;  %v15364_v13 = vadd.f32 %v5904_v63, %v5599_v36  ;;  %11706 = vmatprep.mubr.msk.f32.mxu0 %vm4615_vm2, %v15362_v50  ;;  %v15378_v36 = vld [vmem:[#allocation2 + $0xb0] sm:$0xff] }
 0x3a9   : > { %v5924_v51 = vpop.f32.mrf.mxu0  ;;  %v11332_v29 = vpop.f32.mrf.mxu1  ;;  %11627 = vmatmul.mubr.msk.f32.gmra.mxu1 %vm4615_vm2, %v15342_v7 }
 0x3aa   : > { %16897 = vst [vmem:[#allocation118_spill] sm:$0xff] %v15364_v13  ;;  %v15370_v28 = vadd.f32 %v11406_v4, %v11332_v29  ;;  %11629 = vmatprep.mubr.msk.f32.mxu1 %vm4615_vm2, %v15346_v48 }
 0x3ab   : > { %v11412_v21 = vpop.f32.mrf.mxu0  ;;  %11707 = vmatmul.mubr.msk.f32.gmra.mxu0 %vm4615_vm2, %v15374_v49  ;;  %v5609_v63 = vpop.f32.mrf.mxu1 }
 0x3ac   : > { %16898 = vst [vmem:[#allocation20_spill] sm:$0xff] %v15370_v28  ;;  %v15380_v27 = vadd.f32 %v5914_v55, %v5609_v63  ;;  %11709 = vmatprep.mubr.msk.f32.mxu0 %vm4615_vm2, %v15378_v36  ;;  %v15394_v63 = vld [vmem:[#allocation2 + $0xc0] sm:$0xff] }
 0x3ad   : > { %v5934_v6 = vpop.f32.mrf.mxu0  ;;  %v11335_v4 = vpop.f32.mrf.mxu1  ;;  %11630 = vmatmul.mubr.msk.f32.gmra.mxu1 %vm4615_vm2, %v15358_v58 }
 0x3ae   : > { %16899 = vst [vmem:[#allocation17_spill] sm:$0xff] %v15380_v27  ;;  %v15386_v29 = vadd.f32 %v11409_v26, %v11335_v4  ;;  %11632 = vmatprep.mubr.msk.f32.mxu1 %vm4615_vm2, %v15362_v50 }
 0x3af   : > { %v11415_v24 = vpop.f32.mrf.mxu0  ;;  %11710 = vmatmul.mubr.msk.f32.gmra.mxu0 %vm4615_vm2, %v15390_v18  ;;  %v5619_v55 = vpop.f32.mrf.mxu1 }
 0x3b0   : > { %16900 = vst [vmem:[#allocation4_spill] sm:$0xff] %v15386_v29  ;;  %v15396_v2 = vadd.f32 %v5924_v51, %v5619_v55  ;;  %11712 = vmatprep.mubr.msk.f32.mxu0 %vm4615_vm2, %v15394_v63  ;;  %v15410_v55 = vld [vmem:[#allocation2 + $0xd0] sm:$0xff] }
 0x3b1   : > { %v5944_v23 = vpop.f32.mrf.mxu0  ;;  %v11338_v26 = vpop.f32.mrf.mxu1  ;;  %11633 = vmatmul.mubr.msk.f32.gmra.mxu1 %vm4615_vm2, %v15374_v49 }
 0x3b2   : > { %16901 = vst [vmem:[#allocation120_spill] sm:$0xff] %v15396_v2  ;;  %v15402_v4 = vadd.f32 %v11412_v21, %v11338_v26  ;;  %11635 = vmatprep.mubr.msk.f32.mxu1 %vm4615_vm2, %v15378_v36 }
 0x3b3   : > { %v11418_v12 = vpop.f32.mrf.mxu0  ;;  %11713 = vmatmul.mubr.msk.f32.gmra.mxu0 %vm4615_vm2, %v15406_v43  ;;  %v5629_v51 = vpop.f32.mrf.mxu1 }
 0x3b4   : > { %16902 = vst [vmem:[#allocation121_spill] sm:$0xff] %v15402_v4  ;;  %v15412_v16 = vadd.f32 %v5934_v6, %v5629_v51  ;;  %11715 = vmatprep.mubr.msk.f32.mxu0 %vm4615_vm2, %v15410_v55  ;;  %v15426_v51 = vld [vmem:[#allocation2 + $0xe0] sm:$0xff] }
 0x3b5   : > { %v5954_v20 = vpop.f32.mrf.mxu0  ;;  %v11341_v21 = vpop.f32.mrf.mxu1  ;;  %11636 = vmatmul.mubr.msk.f32.gmra.mxu1 %vm4615_vm2, %v15390_v18 }
 0x3b6   : > { %16903 = vst [vmem:[#allocation5_spill] sm:$0xff] %v15412_v16  ;;  %v15418_v26 = vadd.f32 %v11415_v24, %v11341_v21  ;;  %11638 = vmatprep.mubr.msk.f32.mxu1 %vm4615_vm2, %v15394_v63 }
 0x3b7   : > { %v11421_v53 = vpop.f32.mrf.mxu0  ;;  %11716 = vmatmul.mubr.msk.f32.gmra.mxu0 %vm4615_vm2, %v15422_v59  ;;  %v5639_v6 = vpop.f32.mrf.mxu1 }
 0x3b8   : > { %16904 = vst [vmem:[#allocation123_spill] sm:$0xff] %v15418_v26  ;;  %v15428_v16 = vadd.f32 %v5944_v23, %v5639_v6  ;;  %11718 = vmatprep.mubr.msk.f32.mxu0 %vm4615_vm2, %v15426_v51  ;;  %v15438_v26 = vld [vmem:[#allocation2 + $0xe8] sm:$0xff]  ;;  %v15442_v6 = vld [vmem:[#allocation2 + $0xf0] sm:$0xff] }
 0x3b9   : > { %v5964_v4 = vpop.f32.mrf.mxu0  ;;  %v11344_v24 = vpop.f32.mrf.mxu1  ;;  %11639 = vmatmul.mubr.msk.f32.gmra.mxu1 %vm4615_vm2, %v15406_v43 }
 0x3ba   : > { %16905 = vst [vmem:[#allocation124_spill] sm:$0xff] %v15428_v16  ;;  %v15434_v21 = vadd.f32 %v11418_v12, %v11344_v24  ;;  %11641 = vmatprep.mubr.msk.f32.mxu1 %vm4615_vm2, %v15410_v55 }
 0x3bb   : > { %v11424_v47 = vpop.f32.mrf.mxu0  ;;  %11719 = vmatmul.mubr.msk.f32.gmra.mxu0 %vm4615_vm2, %v15438_v26  ;;  %v5649_v23 = vpop.f32.mrf.mxu1 }
 0x3bc   : > { %16906 = vst [vmem:[#allocation103_spill] sm:$0xff] %v15434_v21  ;;  %v15444_v16 = vadd.f32 %v5954_v20, %v5649_v23  ;;  %11721 = vmatprep.mubr.msk.f32.mxu0 %vm4615_vm2, %v15442_v6  ;;  %v15454_v21 = vld [vmem:[#allocation2 + $0xf8] sm:$0xff]  ;;  %v15458_v23 = vld [vmem:[#allocation2 + $0x100] sm:$0xff] }
 0x3bd   : > { %v5974_v38 = vpop.f32.mrf.mxu0  ;;  %v11347_v12 = vpop.f32.mrf.mxu1  ;;  %11642 = vmatmul.mubr.msk.f32.gmra.mxu1 %vm4615_vm2, %v15422_v59 }
 0x3be   : > { %16907 = vst [vmem:[#allocation126_spill] sm:$0xff] %v15444_v16  ;;  %v15450_v24 = vadd.f32 %v11421_v53, %v11347_v12  ;;  %11644 = vmatprep.mubr.msk.f32.mxu1 %vm4615_vm2, %v15426_v51 }
 0x3bf   : > { %v11427_v22 = vpop.f32.mrf.mxu0  ;;  %11722 = vmatmul.mubr.msk.f32.gmra.mxu0 %vm4615_vm2, %v15454_v21  ;;  %v5659_v20 = vpop.f32.mrf.mxu1 }
 0x3c0   : > { %16908 = vst [vmem:[#allocation127_spill] sm:$0xff] %v15450_v24  ;;  %v15460_v16 = vadd.f32 %v5964_v4, %v5659_v20  ;;  %11724 = vmatprep.mubr.msk.f32.mxu0 %vm4615_vm2, %v15458_v23  ;;  %v15470_v24 = vld [vmem:[#allocation2 + $0x108] sm:$0xff]  ;;  %v15474_v20 = vld [vmem:[#allocation2 + $0x110] sm:$0xff] }
 0x3c1   : > { %v5984_v2 = vpop.f32.mrf.mxu0  ;;  %v11350_v53 = vpop.f32.mrf.mxu1  ;;  %11645 = vmatmul.mubr.msk.f32.gmra.mxu1 %vm4615_vm2, %v15438_v26 }
 0x3c2   : > { %16909 = vst [vmem:[#allocation64_spill] sm:$0xff] %v15460_v16  ;;  %v15466_v12 = vadd.f32 %v11424_v47, %v11350_v53  ;;  %11647 = vmatprep.mubr.msk.f32.mxu1 %vm4615_vm2, %v15442_v6 }
 0x3c3   : > { %v11430_v29 = vpop.f32.mrf.mxu0  ;;  %11725 = vmatmul.mubr.msk.f32.gmra.mxu0 %vm4615_vm2, %v15470_v24  ;;  %v5669_v4 = vpop.f32.mrf.mxu1 }
 0x3c4   : > { %16910 = vst [vmem:[#allocation22_spill] sm:$0xff] %v15466_v12  ;;  %v15476_v16 = vadd.f32 %v5974_v38, %v5669_v4  ;;  %11727 = vmatprep.mubr.msk.f32.mxu0 %vm4615_vm2, %v15474_v20  ;;  %v15486_v12 = vld [vmem:[#allocation2 + $0x118] sm:$0xff]  ;;  %v15490_v4 = vld [vmem:[#allocation2 + $0x120] sm:$0xff] }
 0x3c5   : > { %v5994_v9 = vpop.f32.mrf.mxu0  ;;  %v11353_v47 = vpop.f32.mrf.mxu1  ;;  %11648 = vmatmul.mubr.msk.f32.gmra.mxu1 %vm4615_vm2, %v15454_v21 }
 0x3c6   : > { %16911 = vst [vmem:[#allocation49_spill] sm:$0xff] %v15476_v16  ;;  %v15482_v53 = vadd.f32 %v11427_v22, %v11353_v47  ;;  %11650 = vmatprep.mubr.msk.f32.mxu1 %vm4615_vm2, %v15458_v23 }
 0x3c7   : > { %v11433_v27 = vpop.f32.mrf.mxu0  ;;  %11728 = vmatmul.mubr.msk.f32.gmra.mxu0 %vm4615_vm2, %v15486_v12  ;;  %v5679_v38 = vpop.f32.mrf.mxu1 }
 0x3c8   : > { %16912 = vst [vmem:[#allocation50_spill] sm:$0xff] %v15482_v53  ;;  %v15492_v16 = vadd.f32 %v5984_v2, %v5679_v38  ;;  %11730 = vmatprep.mubr.msk.f32.mxu0 %vm4615_vm2, %v15490_v4  ;;  %v15502_v53 = vld [vmem:[#allocation2 + $0x128] sm:$0xff]  ;;  %v15506_v38 = vld [vmem:[#allocation2 + $0x130] sm:$0xff] }
 0x3c9   : > { %v6004_v28 = vpop.f32.mrf.mxu0  ;;  %v11356_v22 = vpop.f32.mrf.mxu1  ;;  %11651 = vmatmul.mubr.msk.f32.gmra.mxu1 %vm4615_vm2, %v15470_v24 }
 0x3ca   : > { %16913 = vst [vmem:[#allocation104_spill] sm:$0xff] %v15492_v16  ;;  %v15498_v47 = vadd.f32 %v11430_v29, %v11356_v22  ;;  %11653 = vmatprep.mubr.msk.f32.mxu1 %vm4615_vm2, %v15474_v20 }
 0x3cb   : > { %v11436_v14 = vpop.f32.mrf.mxu0  ;;  %11731 = vmatmul.mubr.msk.f32.gmra.mxu0 %vm4615_vm2, %v15502_v53  ;;  %v5689_v2 = vpop.f32.mrf.mxu1 }
 0x3cc   : > { %16914 = vst [vmem:[#allocation66_spill] sm:$0xff] %v15498_v47  ;;  %v15508_v16 = vadd.f32 %v5994_v9, %v5689_v2  ;;  %11733 = vmatprep.mubr.msk.f32.mxu0 %vm4615_vm2, %v15506_v38  ;;  %v15518_v47 = vld [vmem:[#allocation2 + $0x138] sm:$0xff]  ;;  %v15522_v2 = vld [vmem:[#allocation2 + $0x140] sm:$0xff] }
 0x3cd   : > { %v6014_v46 = vpop.f32.mrf.mxu0  ;;  %v11359_v29 = vpop.f32.mrf.mxu1  ;;  %11654 = vmatmul.mubr.msk.f32.gmra.mxu1 %vm4615_vm2, %v15486_v12 }
 0x3ce   : > { %16915 = vst [vmem:[#allocation129_spill] sm:$0xff] %v15508_v16  ;;  %v15514_v22 = vadd.f32 %v11433_v27, %v11359_v29  ;;  %11656 = vmatprep.mubr.msk.f32.mxu1 %vm4615_vm2, %v15490_v4 }
 0x3cf   : > { %v11439_v13 = vpop.f32.mrf.mxu0  ;;  %11734 = vmatmul.mubr.msk.f32.gmra.mxu0 %vm4615_vm2, %v15518_v47  ;;  %v5699_v9 = vpop.f32.mrf.mxu1 }
 0x3d0   : > { %16916 = vst [vmem:[#allocation130_spill] sm:$0xff] %v15514_v22  ;;  %v15524_v16 = vadd.f32 %v6004_v28, %v5699_v9  ;;  %11736 = vmatprep.mubr.msk.f32.mxu0 %vm4615_vm2, %v15522_v2  ;;  %v15534_v22 = vld [vmem:[#allocation2 + $0x148] sm:$0xff]  ;;  %v15538_v9 = vld [vmem:[#allocation2 + $0x150] sm:$0xff] }
 0x3d1   : > { %v6024_v45 = vpop.f32.mrf.mxu0  ;;  %v11362_v27 = vpop.f32.mrf.mxu1  ;;  %11657 = vmatmul.mubr.msk.f32.gmra.mxu1 %vm4615_vm2, %v15502_v53 }
 0x3d2   : > { %16917 = vst [vmem:[#allocation69_spill] sm:$0xff] %v15524_v16  ;;  %v15530_v29 = vadd.f32 %v11436_v14, %v11362_v27  ;;  %11659 = vmatprep.mubr.msk.f32.mxu1 %vm4615_vm2, %v15506_v38 }
 0x3d3   : > { %v11442_v37 = vpop.f32.mrf.mxu0  ;;  %11737 = vmatmul.mubr.msk.f32.gmra.mxu0 %vm4615_vm2, %v15534_v22  ;;  %v5709_v28 = vpop.f32.mrf.mxu1 }
 0x3d4   : > { %16918 = vst [vmem:[#allocation6_spill] sm:$0xff] %v15530_v29  ;;  %v15540_v16 = vadd.f32 %v6014_v46, %v5709_v28  ;;  %11739 = vmatprep.mubr.msk.f32.mxu0 %vm4615_vm2, %v15538_v9  ;;  %v15550_v29 = vld [vmem:[#allocation2 + $0x158] sm:$0xff]  ;;  %v15554_v28 = vld [vmem:[#allocation2 + $0x160] sm:$0xff] }
 0x3d5   : > { %v6034_v61 = vpop.f32.mrf.mxu0  ;;  %v11365_v14 = vpop.f32.mrf.mxu1  ;;  %11660 = vmatmul.mubr.msk.f32.gmra.mxu1 %vm4615_vm2, %v15518_v47 }
 0x3d6   : > { %16919 = vst [vmem:[#allocation7_spill] sm:$0xff] %v15540_v16  ;;  %v15546_v27 = vadd.f32 %v11439_v13, %v11365_v14  ;;  %11662 = vmatprep.mubr.msk.f32.mxu1 %vm4615_vm2, %v15522_v2 }
 0x3d7   : > { %v11445_v60 = vpop.f32.mrf.mxu0  ;;  %11740 = vmatmul.mubr.msk.f32.gmra.mxu0 %vm4615_vm2, %v15550_v29  ;;  %v5719_v46 = vpop.f32.mrf.mxu1 }
 0x3d8   : > { %16920 = vst [vmem:[#allocation105_spill] sm:$0xff] %v15546_v27  ;;  %v15556_v16 = vadd.f32 %v6024_v45, %v5719_v46  ;;  %11742 = vmatprep.mubr.msk.f32.mxu0 %vm4615_vm2, %v15554_v28  ;;  %v15566_v27 = vld [vmem:[#allocation2 + $0x168] sm:$0xff]  ;;  %v15570_v46 = vld [vmem:[#allocation2 + $0x170] sm:$0xff] }
 0x3d9   : > { %v6044_v1 = vpop.f32.mrf.mxu0  ;;  %v11368_v13 = vpop.f32.mrf.mxu1  ;;  %11663 = vmatmul.mubr.msk.f32.gmra.mxu1 %vm4615_vm2, %v15534_v22 }
 0x3da   : > { %16921 = vst [vmem:[#allocation3_spill] sm:$0xff] %v15556_v16  ;;  %v15562_v14 = vadd.f32 %v11442_v37, %v11368_v13  ;;  %11665 = vmatprep.mubr.msk.f32.mxu1 %vm4615_vm2, %v15538_v9 }
 0x3db   : > { %v11448_v25 = vpop.f32.mrf.mxu0  ;;  %11743 = vmatmul.mubr.msk.f32.gmra.mxu0 %vm4615_vm2, %v15566_v27  ;;  %v5729_v45 = vpop.f32.mrf.mxu1 }
 0x3dc   : > { %16922 = vst [vmem:[#allocation51_spill] sm:$0xff] %v15562_v14  ;;  %v15572_v16 = vadd.f32 %v6034_v61, %v5729_v45  ;;  %11745 = vmatprep.mubr.msk.f32.mxu0 %vm4615_vm2, %v15570_v46  ;;  %v15582_v14 = vld [vmem:[#allocation2 + $0x178] sm:$0xff]  ;;  %v15586_v45 = vld [vmem:[#allocation2 + $0x180] sm:$0xff] }
 0x3dd   : > { %v6054_v30 = vpop.f32.mrf.mxu0  ;;  %v11371_v37 = vpop.f32.mrf.mxu1  ;;  %11666 = vmatmul.mubr.msk.f32.gmra.mxu1 %vm4615_vm2, %v15550_v29 }
 0x3de   : > { %16923 = vst [vmem:[#allocation25_spill] sm:$0xff] %v15572_v16  ;;  %v15578_v13 = vadd.f32 %v11445_v60, %v11371_v37  ;;  %11668 = vmatprep.mubr.msk.f32.mxu1 %vm4615_vm2, %v15554_v28 }
 0x3df   : > { %v11451_v10 = vpop.f32.mrf.mxu0  ;;  %11746 = vmatmul.mubr.msk.f32.gmra.mxu0 %vm4615_vm2, %v15582_v14  ;;  %v5739_v61 = vpop.f32.mrf.mxu1 }
 0x3e0   : > { %16924 = vst [vmem:[#allocation71_spill] sm:$0xff] %v15578_v13  ;;  %v15588_v16 = vadd.f32 %v6044_v1, %v5739_v61  ;;  %11748 = vmatprep.mubr.msk.f32.mxu0 %vm4615_vm2, %v15586_v45  ;;  %v15598_v13 = vld [vmem:[#allocation2 + $0x188] sm:$0xff]  ;;  %v15602_v61 = vld [vmem:[#allocation2 + $0x190] sm:$0xff] }
 0x3e1   : > { %v6064_v41 = vpop.f32.mrf.mxu0  ;;  %v11374_v60 = vpop.f32.mrf.mxu1  ;;  %11669 = vmatmul.mubr.msk.f32.gmra.mxu1 %vm4615_vm2, %v15566_v27 }
 0x3e2   : > { %16925 = vst [vmem:[#allocation52_spill] sm:$0xff] %v15588_v16  ;;  %v15594_v37 = vadd.f32 %v11448_v25, %v11374_v60  ;;  %11671 = vmatprep.mubr.msk.f32.mxu1 %vm4615_vm2, %v15570_v46 }
 0x3e3   : > { %v11454_v40 = vpop.f32.mrf.mxu0  ;;  %11749 = vmatmul.mubr.msk.f32.gmra.mxu0 %vm4615_vm2, %v15598_v13  ;;  %v5749_v1 = vpop.f32.mrf.mxu1 }
 0x3e4   : > { %16926 = vst [vmem:[#allocation106_spill] sm:$0xff] %v15594_v37  ;;  %v15604_v16 = vadd.f32 %v6054_v30, %v5749_v1  ;;  %11751 = vmatprep.mubr.msk.f32.mxu0 %vm4615_vm2, %v15602_v61  ;;  %v15612_v37 = vld [vmem:[#allocation2 + $0x1a0] sm:$0xff] }
 0x3e5   : > { %v6074_v25 = vpop.f32.mrf.mxu0  ;;  %v11377_v60 = vpop.f32.mrf.mxu1  ;;  %11672 = vmatmul.mubr.msk.f32.gmra.mxu1 %vm4615_vm2, %v15582_v14 }
 0x3e6   : > { %16927 = vst [vmem:[#allocation132_spill] sm:$0xff] %v15604_v16  ;;  %v15614_v56 = vadd.f32 %v11451_v10, %v11377_v60  ;;  %11674 = vmatprep.mubr.msk.f32.mxu1 %vm4615_vm2, %v15586_v45  ;;  %v15624_v16 = vld [vmem:[#allocation2 + $0x1a8] sm:$0xff] }
 0x3e7   : > { %v11457_v57 = vpop.f32.mrf.mxu0  ;;  %11752 = vmatmul.mubr.msk.f32.gmra.mxu0 %vm4615_vm2, %v15608_v35  ;;  %v5759_v30 = vpop.f32.mrf.mxu1 }
 0x3e8   : > { %16928 = vst [vmem:[#allocation133_spill] sm:$0xff] %v15614_v56  ;;  %v15620_v1 = vadd.f32 %v6064_v41, %v5759_v30  ;;  %11754 = vmatprep.mubr.msk.f32.mxu0 %vm4615_vm2, %v15612_v37 }
 0x3e9   : > { %v6084_v11 = vpop.f32.mrf.mxu0  ;;  %v11380_v33 = vpop.f32.mrf.mxu1  ;;  %11675 = vmatmul.mubr.msk.f32.gmra.mxu1 %vm4615_vm2, %v15598_v13 }
 0x3ea   : > { %16929 = vst [vmem:[#allocation27_spill] sm:$0xff] %v15620_v1  ;;  %v15628_v10 = vadd.f32 %v11454_v40, %v11380_v33  ;;  %11677 = vmatprep.mubr.msk.f32.mxu1 %vm4615_vm2, %v15602_v61 }
 0x3eb   : > { %v11460_v60 = vpop.f32.mrf.mxu0  ;;  %11755 = vmatmul.mubr.msk.f32.gmra.mxu0 %vm4615_vm2, %v15624_v16  ;;  %v5769_v41 = vpop.f32.mrf.mxu1 }
 0x3ec   : > { %16930 = vst [vmem:[#allocation8_spill] sm:$0xff] %v15628_v10  ;;  %v15634_v30 = vadd.f32 %v6074_v25, %v5769_v41 }
 0x3ed   : > { %v6094_v1 = vpop.f32.mrf.mxu0  ;;  %v11383_v56 = vpop.f32.mrf.mxu1  ;;  %11678 = vmatmul.mubr.msk.f32.gmra.mxu1 %vm4615_vm2, %v15608_v35 }
 0x3ee   : > { %16931 = vst [vmem:[#allocation9_spill] sm:$0xff] %v15634_v30  ;;  %v15638_v0 = vadd.f32 %v11457_v57, %v11383_v56  ;;  %11680 = vmatprep.mubr.msk.f32.mxu1 %vm4615_vm2, %v15612_v37 }
 0x3ef   : > { %v11539_v33 = vpop.f32.mrf.mxu0  ;;  %v5779_v40 = vpop.f32.mrf.mxu1 }
 0x3f0   : > { %16932 = vst [vmem:[#allocation107_spill] sm:$0xff] %v15638_v0  ;;  %v15642_v10 = vadd.f32 %v6084_v11, %v5779_v40 }
 0x3f1   : > { %v6476_v54 = vpop.f32.mrf.mxu0  ;;  %v11386_v39 = vpop.f32.mrf.mxu1  ;;  %11681 = vmatmul.mubr.msk.f32.gmra.mxu1 %vm4615_vm2, %v15624_v16 }
 0x3f2   : > { %v15646_v25 = vadd.f32 %v11460_v60, %v11386_v39  ;;  %11759 = vmatprep.mubr.msk.f32.mxu1 %vm4615_vm2, %v15251_v15 }
 0x3f3   : > { %v11542_v41 = vpop.f32.mrf.mxu0  ;;  %v5789_v56 = vpop.f32.mrf.mxu1 }
 0x3f4   : > { %16933 = vst [vmem:[#allocation53_spill] sm:$0xff] %v15646_v25  ;;  %v15650_v57 = vadd.f32 %v6094_v1, %v5789_v56 }
 0x3f5   : > { %v6486_v0 = vpop.f32.mrf.mxu0  ;;  %v11465_v30 = vpop.f32.mrf.mxu1  ;;  %11760 = vmatmul.mubr.msk.f32.vlgmr.msra.gmra.mxu1 %vm4615_vm2, %v15261_v52 }
 0x3f6   : > { %v15654_v11 = vadd.f32 %v11539_v33, %v11465_v30  ;;  %11762 = vmatprep.mubr.msk.f32.mxu1 %vm4615_vm2, %v15265_v44 }
 0x3f7   : > { %v11545_v40 = vpop.f32.mrf.mxu0  ;;  %v6171_v39 = vpop.f32.mrf.mxu1 }
 0x3f8   : > { %v15658_v60 = vadd.f32 %v6476_v54, %v6171_v39 }
 0x3f9   : > { %v6496_v25 = vpop.f32.mrf.mxu0  ;;  %v11468_v15 = vpop.f32.mrf.mxu1  ;;  %11763 = vmatmul.mubr.msk.f32.gmra.mxu1 %vm4615_vm2, %v15277_v17 }
 0x3fa   : > { %v15662_v1 = vadd.f32 %v11542_v41, %v11468_v15  ;;  %11765 = vmatprep.mubr.msk.f32.mxu1 %vm4615_vm2, %v15281_v62 }
 0x3fb   : > { %v11548_v52 = vpop.f32.mrf.mxu0  ;;  %v6181_v30 = vpop.f32.mrf.mxu1 }
 0x3fc   : > { %v15666_v33 = vadd.f32 %v6486_v0, %v6181_v30 }
 0x3fd   : > { %v6506_v56 = vpop.f32.mrf.mxu0  ;;  %v11471_v44 = vpop.f32.mrf.mxu1  ;;  %11766 = vmatmul.mubr.msk.f32.gmra.mxu1 %vm4615_vm2, %v15294_v31 }
 0x3fe   : > { %v15670_v54 = vadd.f32 %v11545_v40, %v11471_v44  ;;  %11768 = vmatprep.mubr.msk.f32.mxu1 %vm4615_vm2, %v15298_v32 }
 0x3ff   : > { %v11551_v17 = vpop.f32.mrf.mxu0  ;;  %v6191_v41 = vpop.f32.mrf.mxu1 }
 0x400   : > { %v15674_v39 = vadd.f32 %v6496_v25, %v6191_v41 }
 0x401   : > { %v6516_v15 = vpop.f32.mrf.mxu0  ;;  %v11474_v62 = vpop.f32.mrf.mxu1  ;;  %11769 = vmatmul.mubr.msk.f32.gmra.mxu1 %vm4615_vm2, %v15310_v5 }
 0x402   : > { %v15678_v0 = vadd.f32 %v11548_v52, %v11474_v62  ;;  %11771 = vmatprep.mubr.msk.f32.mxu1 %vm4615_vm2, %v15314_v8 }
 0x403   : > { %v11554_v31 = vpop.f32.mrf.mxu0  ;;  %v6201_v40 = vpop.f32.mrf.mxu1 }
 0x404   : > { %v15682_v30 = vadd.f32 %v6506_v56, %v6201_v40 }
 0x405   : > { %v6526_v44 = vpop.f32.mrf.mxu0  ;;  %v11477_v32 = vpop.f32.mrf.mxu1  ;;  %11772 = vmatmul.mubr.msk.f32.gmra.mxu1 %vm4615_vm2, %v15326_v42 }
 0x406   : > { %v15686_v25 = vadd.f32 %v11551_v17, %v11477_v32  ;;  %11774 = vmatprep.mubr.msk.f32.mxu1 %vm4615_vm2, %v15330_v19 }
 0x407   : > { %v11557_v5 = vpop.f32.mrf.mxu0  ;;  %v6211_v52 = vpop.f32.mrf.mxu1 }
 0x408   : > { %v15690_v41 = vadd.f32 %v6516_v15, %v6211_v52 }
 0x409   : > { %v6536_v62 = vpop.f32.mrf.mxu0  ;;  %v11480_v8 = vpop.f32.mrf.mxu1  ;;  %11775 = vmatmul.mubr.msk.f32.gmra.mxu1 %vm4615_vm2, %v15342_v7 }
 0x40a   : > { %v15694_v56 = vadd.f32 %v11554_v31, %v11480_v8  ;;  %11777 = vmatprep.mubr.msk.f32.mxu1 %vm4615_vm2, %v15346_v48 }
 0x40b   : > { %v11560_v42 = vpop.f32.mrf.mxu0  ;;  %v6221_v17 = vpop.f32.mrf.mxu1 }
 0x40c   : > { %v15698_v40 = vadd.f32 %v6526_v44, %v6221_v17 }
 0x40d   : > { %v6546_v32 = vpop.f32.mrf.mxu0  ;;  %v11483_v19 = vpop.f32.mrf.mxu1  ;;  %11778 = vmatmul.mubr.msk.f32.gmra.mxu1 %vm4615_vm2, %v15358_v58 }
 0x40e   : > { %v15702_v15 = vadd.f32 %v11557_v5, %v11483_v19  ;;  %11780 = vmatprep.mubr.msk.f32.mxu1 %vm4615_vm2, %v15362_v50 }
 0x40f   : > { %v11563_v7 = vpop.f32.mrf.mxu0  ;;  %v6231_v31 = vpop.f32.mrf.mxu1 }
 0x410   : > { %v15706_v52 = vadd.f32 %v6536_v62, %v6231_v31 }
 0x411   : > { %v6556_v8 = vpop.f32.mrf.mxu0  ;;  %v11486_v48 = vpop.f32.mrf.mxu1  ;;  %11781 = vmatmul.mubr.msk.f32.gmra.mxu1 %vm4615_vm2, %v15374_v49 }
 0x412   : > { %v15710_v44 = vadd.f32 %v11560_v42, %v11486_v48  ;;  %11783 = vmatprep.mubr.msk.f32.mxu1 %vm4615_vm2, %v15378_v36 }
 0x413   : > { %v11566_v58 = vpop.f32.mrf.mxu0  ;;  %v6241_v5 = vpop.f32.mrf.mxu1 }
 0x414   : > { %v15714_v17 = vadd.f32 %v6546_v32, %v6241_v5 }
 0x415   : > { %v6566_v19 = vpop.f32.mrf.mxu0  ;;  %v11489_v50 = vpop.f32.mrf.mxu1  ;;  %11784 = vmatmul.mubr.msk.f32.gmra.mxu1 %vm4615_vm2, %v15390_v18 }
 0x416   : > { %v15718_v62 = vadd.f32 %v11563_v7, %v11489_v50  ;;  %11786 = vmatprep.mubr.msk.f32.mxu1 %vm4615_vm2, %v15394_v63 }
 0x417   : > { %v11569_v49 = vpop.f32.mrf.mxu0  ;;  %v6251_v42 = vpop.f32.mrf.mxu1 }
 0x418   : > { %v15722_v31 = vadd.f32 %v6556_v8, %v6251_v42 }
 0x419   : > { %v6576_v48 = vpop.f32.mrf.mxu0  ;;  %v11492_v36 = vpop.f32.mrf.mxu1  ;;  %11787 = vmatmul.mubr.msk.f32.gmra.mxu1 %vm4615_vm2, %v15406_v43 }
 0x41a   : > { %v15726_v32 = vadd.f32 %v11566_v58, %v11492_v36  ;;  %11789 = vmatprep.mubr.msk.f32.mxu1 %vm4615_vm2, %v15410_v55 }
 0x41b   : > { %v11572_v18 = vpop.f32.mrf.mxu0  ;;  %v6261_v7 = vpop.f32.mrf.mxu1 }
 0x41c   : > { %16934 = vst [vmem:[#allocation54_spill] sm:$0xff] %v15726_v32  ;;  %v15730_v5 = vadd.f32 %v6566_v19, %v6261_v7  ;;  %v17001_v32 = vld [vmem:[#allocation124_spill] sm:$0xff] }
 0x41d   : > { %v6586_v50 = vpop.f32.mrf.mxu0  ;;  %v11495_v63 = vpop.f32.mrf.mxu1  ;;  %11790 = vmatmul.mubr.msk.f32.gmra.mxu1 %vm4615_vm2, %v15422_v59 }
 0x41e   : > { %16935 = vst [vmem:[#allocation108_spill] sm:$0xff] %v15730_v5  ;;  %v15734_v8 = vadd.f32 %v11569_v49, %v11495_v63  ;;  %11792 = vmatprep.mubr.msk.f32.mxu1 %vm4615_vm2, %v15426_v51 }
 0x41f   : > { %v11575_v43 = vpop.f32.mrf.mxu0  ;;  %v6271_v58 = vpop.f32.mrf.mxu1 }
 0x420   : > { %16936 = vst [vmem:[#allocation135_spill] sm:$0xff] %v15734_v8  ;;  %v15738_v42 = vadd.f32 %v6576_v48, %v6271_v58 }
 0x421   : > { %v6596_v36 = vpop.f32.mrf.mxu0  ;;  %v11498_v55 = vpop.f32.mrf.mxu1  ;;  %11793 = vmatmul.mubr.msk.f32.gmra.mxu1 %vm4615_vm2, %v15438_v26 }
 0x422   : > { %16937 = vst [vmem:[#allocation136_spill] sm:$0xff] %v15738_v42  ;;  %v15742_v19 = vadd.f32 %v11572_v18, %v11498_v55  ;;  %11795 = vmatprep.mubr.msk.f32.mxu1 %vm4615_vm2, %v15442_v6 }
 0x423   : > { %v11578_v59 = vpop.f32.mrf.mxu0  ;;  %v6281_v49 = vpop.f32.mrf.mxu1 }
 0x424   : > { %16938 = vst [vmem:[#allocation10_spill] sm:$0xff] %v15742_v19  ;;  %v15746_v7 = vadd.f32 %v6586_v50, %v6281_v49  ;;  %v16989_v19 = vld [vmem:[#allocation120_spill] sm:$0xff] }
 0x425   : > { %v6606_v63 = vpop.f32.mrf.mxu0  ;;  %v11501_v51 = vpop.f32.mrf.mxu1  ;;  %11796 = vmatmul.mubr.msk.f32.gmra.mxu1 %vm4615_vm2, %v15454_v21 }
 0x426   : > { %16939 = vst [vmem:[#allocation11_spill] sm:$0xff] %v15746_v7  ;;  %v15750_v48 = vadd.f32 %v11575_v43, %v11501_v51  ;;  %11798 = vmatprep.mubr.msk.f32.mxu1 %vm4615_vm2, %v15458_v23  ;;  %v16987_v7 = vld [vmem:[#allocation33_spill] sm:$0xff] }
 0x427   : > { %v11581_v26 = vpop.f32.mrf.mxu0  ;;  %v6291_v18 = vpop.f32.mrf.mxu1 }
 0x428   : > { %16940 = vst [vmem:[#allocation109_spill] sm:$0xff] %v15750_v48  ;;  %v15754_v58 = vadd.f32 %v6596_v36, %v6291_v18  ;;  %v16986_v48 = vld [vmem:[#allocation17_spill] sm:$0xff] }
 0x429   : > { %v6616_v55 = vpop.f32.mrf.mxu0  ;;  %v11504_v6 = vpop.f32.mrf.mxu1  ;;  %11799 = vmatmul.mubr.msk.f32.gmra.mxu1 %vm4615_vm2, %v15470_v24 }
 0x42a   : > { %16941 = vst [vmem:[#allocation138_spill] sm:$0xff] %v15754_v58  ;;  %v15758_v50 = vadd.f32 %v11578_v59, %v11504_v6  ;;  %11801 = vmatprep.mubr.msk.f32.mxu1 %vm4615_vm2, %v15474_v20 }
 0x42b   : > { %v11584_v21 = vpop.f32.mrf.mxu0  ;;  %v6301_v43 = vpop.f32.mrf.mxu1 }
 0x42c   : > { %16942 = vst [vmem:[#allocation139_spill] sm:$0xff] %v15758_v50  ;;  %v15762_v49 = vadd.f32 %v6606_v63, %v6301_v43 }
 0x42d   : > { %v6626_v51 = vpop.f32.mrf.mxu0  ;;  %v11507_v23 = vpop.f32.mrf.mxu1  ;;  %11802 = vmatmul.mubr.msk.f32.gmra.mxu1 %vm4615_vm2, %v15486_v12 }
 0x42e   : > { %16943 = vst [vmem:[#allocation55_spill] sm:$0xff] %v15762_v49  ;;  %v15766_v36 = vadd.f32 %v11581_v26, %v11507_v23  ;;  %11804 = vmatprep.mubr.msk.f32.mxu1 %vm4615_vm2, %v15490_v4 }
 0x42f   : > { %v11587_v24 = vpop.f32.mrf.mxu0  ;;  %v6311_v59 = vpop.f32.mrf.mxu1 }
 0x430   : > { %16944 = vst [vmem:[#allocation56_spill] sm:$0xff] %v15766_v36  ;;  %v15770_v18 = vadd.f32 %v6616_v55, %v6311_v59  ;;  %v16977_v36 = vld [vmem:[#allocation102_spill] sm:$0xff] }
 0x431   : > { %v6636_v6 = vpop.f32.mrf.mxu0  ;;  %v11510_v20 = vpop.f32.mrf.mxu1  ;;  %11805 = vmatmul.mubr.msk.f32.gmra.mxu1 %vm4615_vm2, %v15502_v53 }
 0x432   : > { %16945 = vst [vmem:[#allocation110_spill] sm:$0xff] %v15770_v18  ;;  %v15774_v63 = vadd.f32 %v11584_v21, %v11510_v20  ;;  %11807 = vmatprep.mubr.msk.f32.mxu1 %vm4615_vm2, %v15506_v38  ;;  %v16975_v18 = vld [vmem:[#allocation75_spill] sm:$0xff] }
 0x433   : > { %v11590_v12 = vpop.f32.mrf.mxu0  ;;  %v6321_v26 = vpop.f32.mrf.mxu1 }
 0x434   : > { %16946 = vst [vmem:[#allocation12_spill] sm:$0xff] %v15774_v63  ;;  %v15778_v43 = vadd.f32 %v6626_v51, %v6321_v26  ;;  %v16974_v63 = vld [vmem:[#allocation115_spill] sm:$0xff] }
 0x435   : > { %v6646_v23 = vpop.f32.mrf.mxu0  ;;  %v11513_v4 = vpop.f32.mrf.mxu1  ;;  %11808 = vmatmul.mubr.msk.f32.gmra.mxu1 %vm4615_vm2, %v15518_v47 }
 0x436   : > { %16947 = vst [vmem:[#allocation13_spill] sm:$0xff] %v15778_v43  ;;  %v15782_v55 = vadd.f32 %v11587_v24, %v11513_v4  ;;  %11810 = vmatprep.mubr.msk.f32.mxu1 %vm4615_vm2, %v15522_v2 }
 0x437   : > { %v11593_v53 = vpop.f32.mrf.mxu0  ;;  %v6331_v21 = vpop.f32.mrf.mxu1 }
 0x438   : > { %16948 = vst [vmem:[#allocation111_spill] sm:$0xff] %v15782_v55  ;;  %v15786_v59 = vadd.f32 %v6636_v6, %v6331_v21 }
 0x439   : > { %v6656_v20 = vpop.f32.mrf.mxu0  ;;  %v11516_v38 = vpop.f32.mrf.mxu1  ;;  %11811 = vmatmul.mubr.msk.f32.gmra.mxu1 %vm4615_vm2, %v15534_v22 }
 0x43a   : > { %16949 = vst [vmem:[#allocation57_spill] sm:$0xff] %v15786_v59  ;;  %v15790_v51 = vadd.f32 %v11590_v12, %v11516_v38  ;;  %11813 = vmatprep.mubr.msk.f32.mxu1 %vm4615_vm2, %v15538_v9 }
 0x43b   : > { %v11596_v47 = vpop.f32.mrf.mxu0  ;;  %v6341_v24 = vpop.f32.mrf.mxu1 }
 0x43c   : > { %16950 = vst [vmem:[#allocation58_spill] sm:$0xff] %v15790_v51  ;;  %v15794_v26 = vadd.f32 %v6646_v23, %v6341_v24 }
 0x43d   : > { %v6666_v4 = vpop.f32.mrf.mxu0  ;;  %v11519_v2 = vpop.f32.mrf.mxu1  ;;  %11814 = vmatmul.mubr.msk.f32.gmra.mxu1 %vm4615_vm2, %v15550_v29 }
 0x43e   : > { %16951 = vst [vmem:[#allocation112_spill] sm:$0xff] %v15794_v26  ;;  %v15798_v6 = vadd.f32 %v11593_v53, %v11519_v2  ;;  %11816 = vmatprep.mubr.msk.f32.mxu1 %vm4615_vm2, %v15554_v28  ;;  %v16969_v26 = vld [vmem:[#allocation61_spill] sm:$0xff] }
 0x43f   : > { %v11599_v22 = vpop.f32.mrf.mxu0  ;;  %v6351_v12 = vpop.f32.mrf.mxu1 }
 0x440   : > { %16952 = vst [vmem:[#allocation14_spill] sm:$0xff] %v15798_v6  ;;  %v15802_v21 = vadd.f32 %v6656_v20, %v6351_v12 }
 0x441   : > { %v6676_v38 = vpop.f32.mrf.mxu0  ;;  %v11522_v9 = vpop.f32.mrf.mxu1  ;;  %11817 = vmatmul.mubr.msk.f32.gmra.mxu1 %vm4615_vm2, %v15566_v27 }
 0x442   : > { %16953 = vst [vmem:[#allocation15_spill] sm:$0xff] %v15802_v21  ;;  %v15806_v23 = vadd.f32 %v11596_v47, %v11522_v9  ;;  %11819 = vmatprep.mubr.msk.f32.mxu1 %vm4615_vm2, %v15570_v46  ;;  %v16968_v21 = vld [vmem:[#allocation29_spill] sm:$0xff] }
 0x443   : > { %v11602_v29 = vpop.f32.mrf.mxu0  ;;  %v6361_v53 = vpop.f32.mrf.mxu1 }
 0x444   : > { %16954 = vst [vmem:[#allocation113_spill] sm:$0xff] %v15806_v23  ;;  %v15810_v24 = vadd.f32 %v6666_v4, %v6361_v53 }
 0x445   : > { %v6686_v2 = vpop.f32.mrf.mxu0  ;;  %v11525_v28 = vpop.f32.mrf.mxu1  ;;  %11820 = vmatmul.mubr.msk.f32.gmra.mxu1 %vm4615_vm2, %v15582_v14 }
 0x446   : > { %16955 = vst [vmem:[#allocation59_spill] sm:$0xff] %v15810_v24  ;;  %v15814_v20 = vadd.f32 %v11599_v22, %v11525_v28  ;;  %11822 = vmatprep.mubr.msk.f32.mxu1 %vm4615_vm2, %v15586_v45  ;;  %v16966_v24 = vld [vmem:[#allocation100_spill] sm:$0xff] }
 0x447   : > { %v11605_v27 = vpop.f32.mrf.mxu0  ;;  %v6371_v47 = vpop.f32.mrf.mxu1 }
 0x448   : > { %16956 = vst [vmem:[#allocation60_spill] sm:$0xff] %v15814_v20  ;;  %v15818_v12 = vadd.f32 %v6676_v38, %v6371_v47 }
 0x449   : > { %v6696_v9 = vpop.f32.mrf.mxu0  ;;  %v11528_v46 = vpop.f32.mrf.mxu1  ;;  %11823 = vmatmul.mubr.msk.f32.gmra.mxu1 %vm4615_vm2, %v15598_v13 }
 0x44a   : > { %16957 = vst [vmem:[#allocation116_spill] sm:$0xff] %v15818_v12  ;;  %v15822_v4 = vadd.f32 %v11602_v29, %v11528_v46  ;;  %11825 = vmatprep.mubr.msk.f32.mxu1 %vm4615_vm2, %v15602_v61 }
 0x44b   : > { %v11608_v14 = vpop.f32.mrf.mxu0  ;;  %v6381_v22 = vpop.f32.mrf.mxu1 }
 0x44c   : > { %16958 = vst [vmem:[#allocation16_spill] sm:$0xff] %v15822_v4  ;;  %v15826_v53 = vadd.f32 %v6686_v2, %v6381_v22 }
 0x44d   : > { %v6706_v28 = vpop.f32.mrf.mxu0  ;;  %v11531_v45 = vpop.f32.mrf.mxu1  ;;  %11826 = vmatmul.mubr.msk.f32.gmra.mxu1 %vm4615_vm2, %v15608_v35  ;;  %v5258_v35 = vadd.f32 %v14978_v3, %v15004_v34 }
 0x44e   : > { %16959 = vst [vmem:[#allocation62_spill] sm:$0xff] %v15826_v53  ;;  %v15830_v38 = vadd.f32 %v11605_v27, %v11531_v45  ;;  %11828 = vmatprep.mubr.msk.f32.mxu1 %vm4615_vm2, %v15612_v37 }
 0x44f   : > { %v11687_v13 = vpop.f32.mrf.mxu0  ;;  %v6391_v29 = vpop.f32.mrf.mxu1 }
 0x450   : > { %16960 = vst [vmem:[#allocation119_spill] sm:$0xff] %v15830_v38  ;;  %v15834_v47 = vadd.f32 %v6696_v9, %v6391_v29  ;;  %v7570_v23 = vadd.f32 %v11687_v13, %v16966_v24 }
 0x451   : > { %v15836_v46 = vpop.f32.mrf.mxu0  ;;  %v11534_v61 = vpop.f32.mrf.mxu1  ;;  %11829 = vmatmul.mubr.msk.f32.gmra.mxu1 %vm4615_vm2, %v15624_v16 }
 0x452   : > { %16961 = vst [vmem:[#allocation18_spill] sm:$0xff] %v15834_v47  ;;  %v15840_v2 = vadd.f32 %v11608_v14, %v11534_v61  ;;  %v16964_v47 = vld [vmem:[#allocation28_spill] sm:$0xff] }
 0x453   : > { %v11690_v22 = vpop.f32.mrf.mxu0  ;;  %v6401_v53 = vpop.f32.mrf.mxu1  ;;  %v16965_v61 = vld [vmem:[#allocation72_spill] sm:$0xff] }
 0x454   : > { %16962 = vst [vmem:[#allocation19_spill] sm:$0xff] %v15840_v2  ;;  %v15844_v27 = vadd.f32 %v6706_v28, %v6401_v53  ;;  %v16967_v28 = vld [vmem:[#allocation73_spill] sm:$0xff] }
 0x455   : > { %v7340_v37 = vpop.f32.mrf.mxu0  ;;  %v11613_v45 = vpop.f32.mrf.mxu1 }
 0x456   : > { %16963 = vst [vmem:[#allocation122_spill] sm:$0xff] %v15844_v27  ;;  %v7215_v38 = vadd.f32 %v11613_v45, %v5258_v35 }
 0x457   : > { %v11693_v9 = vpop.f32.mrf.mxu0  ;;  %v6975_v29 = vpop.f32.mrf.mxu1 }
 0x458   : > { %v15847_v4 = vadd.f32 %v6975_v29, %v16964_v47  ;;  %v8023_v16 = vrot.slane %v7215_v38, 7 }
 0x459   : > { %v7350_v12 = vpop.f32.mrf.mxu0  ;;  %v11616_v20 = vpop.f32.mrf.mxu1 }
 0x45a   : > { %v16464_v14 = vrot.slane %v15847_v4, 7  ;;  %v7217_v2 = vadd.f32 %v11616_v20, %v16965_v61  ;;  %v7572_v20 = vadd.f32 %v11690_v22, %v16969_v26  ;;  %v16970_v61 = vld [vmem:[#allocation47_spill] sm:$0xff] }
 0x45b   : > { %v11696_v3 = vpop.f32.mrf.mxu0  ;;  %v6985_v34 = vpop.f32.mrf.mxu1  ;;  %v7571_v24 = vadd.f32 %v7340_v37, %v16970_v61  ;;  %v16973_v61 = vld [vmem:[#allocation114_spill] sm:$0xff] }
 0x45c   : > { %v8024_v53 = vsel %vm3687_vm3, %v16464_v14, %v8023_v16  ;;  %v7216_v35 = vadd.f32 %v6985_v34, %v16967_v28  ;;  %v8027_v27 = vrot.slane %v7217_v2, 7  ;;  %v16971_v34 = vld [vmem:[#allocation30_spill] sm:$0xff]  ;;  %v7574_v43 = vadd.f32 %v11693_v9, %v16973_v61  ;;  %v16978_v61 = vld [vmem:[#allocation31_spill] sm:$0xff] }
 0x45d   : > { %v15856_v45 = vadd.f32 %v8024_v53, %v7570_v23  ;;  %v7360_v47 = vpop.f32.mrf.mxu0  ;;  %v11619_v29 = vpop.f32.mrf.mxu1 }
 0x45e   : > { %v8025_v38 = vrot.slane %v7216_v35, 7  ;;  %v7219_v6 = vadd.f32 %v11619_v29, %v16968_v21  ;;  %v16972_v35 = vld [vmem:[#allocation74_spill] sm:$0xff]  ;;  %v7575_v9 = vadd.f32 %v7360_v47, %v16977_v36  ;;  %v16981_v47 = vld [vmem:[#allocation117_spill] sm:$0xff] }
 0x45f   : > { %v11699_v13 = vpop.f32.mrf.mxu0  ;;  %v6995_v51 = vpop.f32.mrf.mxu1 }
 0x460   : > { %v8026_v59 = vsel %vm3687_vm3, %v8023_v16, %v8025_v38  ;;  %v8028_v14 = vsel %vm3687_vm3, %v8025_v38, %v8027_v27  ;;  %v7218_v53 = vadd.f32 %v6995_v51, %v16971_v34  ;;  %v8031_v29 = vrot.slane %v7219_v6, 7 }
 0x461   : > { %v15863_v55 = vadd.f32 %v8026_v59, %v7571_v24  ;;  %v15865_v23 = vadd.f32 %v8028_v14, %v7572_v20  ;;  %v7370_v2 = vpop.f32.mrf.mxu0  ;;  %v11622_v28 = vpop.f32.mrf.mxu1  ;;  %v7573_v16 = vadd.f32 %v7350_v12, %v16974_v63 }
 0x462   : > { %v7221_v21 = vadd.f32 %v11622_v28, %v16972_v35  ;;  %v8029_v26 = vrot.slane %v7218_v53, 7  ;;  %v16976_v28 = vld [vmem:[#allocation48_spill] sm:$0xff] }
 0x463   : > { %v11702_v22 = vpop.f32.mrf.mxu0  ;;  %v7005_v37 = vpop.f32.mrf.mxu1  ;;  %v7576_v35 = vadd.f32 %v11696_v3, %v16976_v28  ;;  %v16982_v28 = vld [vmem:[#allocation118_spill] sm:$0xff] }
 0x464   : > { %v7220_v38 = vadd.f32 %v7005_v37, %v16975_v18  ;;  %v8030_v59 = vsel %vm3687_vm3, %v8027_v27, %v8029_v26  ;;  %v8032_v14 = vsel %vm3687_vm3, %v8029_v26, %v8031_v29  ;;  %v8035_v6 = vrot.slane %v7221_v21, 7  ;;  %v16979_v37 = vld [vmem:[#allocation77_spill] sm:$0xff] }
 0x465   : > { %v7380_v20 = vpop.f32.mrf.mxu0  ;;  %v11625_v51 = vpop.f32.mrf.mxu1  ;;  %v15874_v24 = vadd.f32 %v8030_v59, %v7573_v16  ;;  %v15876_v34 = vadd.f32 %v8032_v14, %v7574_v43  ;;  %v16980_v14 = vld [vmem:[#allocation78_spill] sm:$0xff] }
 0x466   : > { %v8033_v53 = vrot.slane %v7220_v38, 7  ;;  %v7223_v63 = vadd.f32 %v11625_v51, %v16978_v61  ;;  %v7578_v51 = vadd.f32 %v11699_v13, %v16981_v47  ;;  %v7577_v61 = vadd.f32 %v7370_v2, %v16982_v28  ;;  %v16985_v28 = vld [vmem:[#allocation20_spill] sm:$0xff] }
 0x467   : > { %v11705_v12 = vpop.f32.mrf.mxu0  ;;  %v7015_v18 = vpop.f32.mrf.mxu1  ;;  %v7580_v58 = vadd.f32 %v11702_v22, %v16985_v28  ;;  %v16990_v28 = vld [vmem:[#allocation80_spill] sm:$0xff] }
 0x468   : > { %v8034_v27 = vsel %vm3687_vm3, %v8031_v29, %v8033_v53  ;;  %v8036_v26 = vsel %vm3687_vm3, %v8033_v53, %v8035_v6  ;;  %v7222_v49 = vadd.f32 %v7015_v18, %v16979_v37  ;;  %v8039_v59 = vrot.slane %v7223_v63, 7  ;;  %v16984_v37 = vld [vmem:[#allocation76_spill] sm:$0xff] }
 0x469   : > { %v15884_v16 = vadd.f32 %v8034_v27, %v7575_v9  ;;  %v15886_v43 = vadd.f32 %v8036_v26, %v7576_v35  ;;  %v7390_v21 = vpop.f32.mrf.mxu0  ;;  %v11628_v38 = vpop.f32.mrf.mxu1  ;;  %v16983_v27 = vld [vmem:[#allocation32_spill] sm:$0xff] }
 0x46a   : > { %v8037_v3 = vrot.slane %v7222_v49, 7  ;;  %v7225_v36 = vadd.f32 %v11628_v38, %v16980_v14  ;;  %v7581_v22 = vadd.f32 %v7390_v21, %v16989_v19  ;;  %v16994_v21 = vld [vmem:[#allocation121_spill] sm:$0xff] }
 0x46b   : > { %v11708_v50 = vpop.f32.mrf.mxu0  ;;  %v7025_v29 = vpop.f32.mrf.mxu1 }
 0x46c   : > { %v8038_v53 = vsel %vm3687_vm3, %v8035_v6, %v8037_v3  ;;  %v8040_v18 = vsel %vm3687_vm3, %v8037_v3, %v8039_v59  ;;  %v7224_v26 = vadd.f32 %v7025_v29, %v16983_v27  ;;  %v8043_v14 = vrot.slane %v7225_v36, 7 }
 0x46d   : > { %v15893_v9 = vadd.f32 %v8038_v53, %v7577_v61  ;;  %v15895_v35 = vadd.f32 %v8040_v18, %v7578_v51  ;;  %v7400_v63 = vpop.f32.mrf.mxu0  ;;  %v11631_v49 = vpop.f32.mrf.mxu1  ;;  %v7579_v6 = vadd.f32 %v7380_v20, %v16986_v48 }
 0x46e   : > { %v7227_v38 = vadd.f32 %v11631_v49, %v16984_v37  ;;  %v8041_v13 = vrot.slane %v7224_v26, 7  ;;  %v16988_v49 = vld [vmem:[#allocation4_spill] sm:$0xff] }
 0x46f   : > { %v11711_v47 = vpop.f32.mrf.mxu0  ;;  %v7035_v2 = vpop.f32.mrf.mxu1  ;;  %v7582_v37 = vadd.f32 %v11705_v12, %v16988_v49  ;;  %v16995_v49 = vld [vmem:[#allocation5_spill] sm:$0xff] }
 0x470   : > { %v7226_v3 = vadd.f32 %v7035_v2, %v16987_v7  ;;  %v8042_v61 = vsel %vm3687_vm3, %v8039_v59, %v8041_v13  ;;  %v8044_v51 = vsel %vm3687_vm3, %v8041_v13, %v8043_v14  ;;  %v8047_v36 = vrot.slane %v7227_v38, 7  ;;  %v16991_v2 = vld [vmem:[#allocation81_spill] sm:$0xff] }
 0x471   : > { %v7410_v53 = vpop.f32.mrf.mxu0  ;;  %v11634_v29 = vpop.f32.mrf.mxu1  ;;  %v15904_v18 = vadd.f32 %v8042_v61, %v7579_v6  ;;  %v15906_v27 = vadd.f32 %v8044_v51, %v7580_v58  ;;  %v16993_v51 = vld [vmem:[#allocation34_spill] sm:$0xff] }
 0x472   : > { %v8045_v26 = vrot.slane %v7226_v3, 7  ;;  %v7229_v48 = vadd.f32 %v11634_v29, %v16990_v28  ;;  %v7584_v29 = vadd.f32 %v11708_v50, %v16994_v21  ;;  %v7583_v28 = vadd.f32 %v7400_v63, %v16995_v49  ;;  %v17000_v49 = vld [vmem:[#allocation123_spill] sm:$0xff] }
 0x473   : > { %v11714_v20 = vpop.f32.mrf.mxu0  ;;  %v7045_v7 = vpop.f32.mrf.mxu1  ;;  %v7586_v5 = vadd.f32 %v11711_v47, %v17000_v49  ;;  %v17007_v49 = vld [vmem:[#allocation84_spill] sm:$0xff] }
 0x474   : > { %v8046_v59 = vsel %vm3687_vm3, %v8043_v14, %v8045_v26  ;;  %v8048_v13 = vsel %vm3687_vm3, %v8045_v26, %v8047_v36  ;;  %v7228_v42 = vadd.f32 %v7045_v7, %v16991_v2  ;;  %v8051_v61 = vrot.slane %v7229_v48, 7  ;;  %v16999_v2 = vld [vmem:[#allocation35_spill] sm:$0xff] }
 0x475   : > { %v15914_v6 = vadd.f32 %v8046_v59, %v7581_v22  ;;  %v15916_v58 = vadd.f32 %v8048_v13, %v7582_v37  ;;  %v7420_v38 = vpop.f32.mrf.mxu0  ;;  %v11637_v3 = vpop.f32.mrf.mxu1  ;;  %v16998_v59 = vld [vmem:[#allocation79_spill] sm:$0xff] }
 0x476   : > { %v8049_v12 = vrot.slane %v7228_v42, 7  ;;  %v7231_v19 = vadd.f32 %v11637_v3, %v16993_v51 }
 0x477   : > { %16992 = vst [vmem:[#allocation63_spill] sm:$0xff] %v15916_v58  ;;  %v11717_v8 = vpop.f32.mrf.mxu0  ;;  %v7055_v14 = vpop.f32.mrf.mxu1  ;;  %v17002_v58 = vld [vmem:[#allocation83_spill] sm:$0xff] }
 0x478   : > { %v8050_v26 = vsel %vm3687_vm3, %v8047_v36, %v8049_v12  ;;  %v8052_v7 = vsel %vm3687_vm3, %v8049_v12, %v8051_v61  ;;  %v7230_v13 = vadd.f32 %v7055_v14, %v16998_v59  ;;  %v8055_v51 = vrot.slane %v7231_v19, 7 }
 0x479   : > { %v15923_v22 = vadd.f32 %v8050_v26, %v7583_v28  ;;  %v15925_v37 = vadd.f32 %v8052_v7, %v7584_v29  ;;  %v7430_v48 = vpop.f32.mrf.mxu0  ;;  %v11640_v42 = vpop.f32.mrf.mxu1  ;;  %v7585_v36 = vadd.f32 %v7410_v53, %v17001_v32 }
 0x47a   : > { %v7233_v3 = vadd.f32 %v11640_v42, %v16999_v2  ;;  %v8053_v50 = vrot.slane %v7230_v13, 7  ;;  %v17005_v42 = vld [vmem:[#allocation103_spill] sm:$0xff] }
 0x47b   : > { %16996 = vst [vmem:[#allocation21_spill] sm:$0xff] %v15923_v22  ;;  %16997 = vst [vmem:[#allocation125_spill] sm:$0xff] %v15925_v37  ;;  %v11720_v21 = vpop.f32.mrf.mxu0  ;;  %v7065_v63 = vpop.f32.mrf.mxu1  ;;  %v7588_v2 = vadd.f32 %v11714_v20, %v17005_v42  ;;  %v17006_v37 = vld [vmem:[#allocation126_spill] sm:$0xff]  ;;  %v17013_v42 = vld [vmem:[#allocation64_spill] sm:$0xff] }
 0x47c   : > { %v7232_v12 = vadd.f32 %v7065_v63, %v17002_v58  ;;  %v8054_v28 = vsel %vm3687_vm3, %v8051_v61, %v8053_v50  ;;  %v8056_v29 = vsel %vm3687_vm3, %v8053_v50, %v8055_v51  ;;  %v8059_v19 = vrot.slane %v7233_v3, 7  ;;  %v17008_v63 = vld [vmem:[#allocation36_spill] sm:$0xff] }
 0x47d   : > { %v7440_v26 = vpop.f32.mrf.mxu0  ;;  %v11643_v14 = vpop.f32.mrf.mxu1  ;;  %v15934_v7 = vadd.f32 %v8054_v28, %v7585_v36  ;;  %v15936_v59 = vadd.f32 %v8056_v29, %v7586_v5  ;;  %v7587_v47 = vadd.f32 %v7420_v38, %v17006_v37  ;;  %v17011_v29 = vld [vmem:[#allocation82_spill] sm:$0xff]  ;;  %v17012_v37 = vld [vmem:[#allocation127_spill] sm:$0xff] }
 0x47e   : > { %v8057_v13 = vrot.slane %v7232_v12, 7  ;;  %v7235_v32 = vadd.f32 %v11643_v14, %v17007_v49  ;;  %v7590_v14 = vadd.f32 %v11717_v8, %v17012_v37  ;;  %v7589_v49 = vadd.f32 %v7430_v48, %v17013_v42  ;;  %v17018_v42 = vld [vmem:[#allocation22_spill] sm:$0xff] }
 0x47f   : > { %17003 = vst [vmem:[#allocation65_spill] sm:$0xff] %v15934_v7  ;;  %17004 = vst [vmem:[#allocation23_spill] sm:$0xff] %v15936_v59  ;;  %v11723_v53 = vpop.f32.mrf.mxu0  ;;  %v7075_v58 = vpop.f32.mrf.mxu1  ;;  %v17020_v7 = vld [vmem:[#allocation87_spill] sm:$0xff] }
 0x480   : > { %v8058_v61 = vsel %vm3687_vm3, %v8055_v51, %v8057_v13  ;;  %v8060_v50 = vsel %vm3687_vm3, %v8057_v13, %v8059_v19  ;;  %v7234_v22 = vadd.f32 %v7075_v58, %v17008_v63  ;;  %v8063_v28 = vrot.slane %v7235_v32, 7  ;;  %v17017_v63 = vld [vmem:[#allocation86_spill] sm:$0xff] }
 0x481   : > { %v15944_v36 = vadd.f32 %v8058_v61, %v7587_v47  ;;  %v15946_v5 = vadd.f32 %v8060_v50, %v7588_v2  ;;  %v7450_v3 = vpop.f32.mrf.mxu0  ;;  %v11646_v12 = vpop.f32.mrf.mxu1  ;;  %v17016_v61 = vld [vmem:[#allocation37_spill] sm:$0xff] }
 0x482   : > { %v8061_v20 = vrot.slane %v7234_v22, 7  ;;  %v7237_v38 = vadd.f32 %v11646_v12, %v17011_v29 }
 0x483   : > { %17009 = vst [vmem:[#allocation128_spill] sm:$0xff] %v15944_v36  ;;  %17010 = vst [vmem:[#allocation67_spill] sm:$0xff] %v15946_v5  ;;  %v11726_v59 = vpop.f32.mrf.mxu0  ;;  %v7085_v51 = vpop.f32.mrf.mxu1  ;;  %v7592_v5 = vadd.f32 %v11720_v21, %v17018_v42  ;;  %v17019_v36 = vld [vmem:[#allocation49_spill] sm:$0xff]  ;;  %v17025_v42 = vld [vmem:[#allocation38_spill] sm:$0xff] }
 0x484   : > { %v8062_v13 = vsel %vm3687_vm3, %v8059_v19, %v8061_v20  ;;  %v8064_v58 = vsel %vm3687_vm3, %v8061_v20, %v8063_v28  ;;  %v7236_v50 = vadd.f32 %v7085_v51, %v17016_v61  ;;  %v8067_v29 = vrot.slane %v7237_v38, 7 }
 0x485   : > { %v15953_v47 = vadd.f32 %v8062_v13, %v7589_v49  ;;  %v15955_v2 = vadd.f32 %v8064_v58, %v7590_v14  ;;  %v7460_v32 = vpop.f32.mrf.mxu0  ;;  %v11649_v22 = vpop.f32.mrf.mxu1  ;;  %v7591_v19 = vadd.f32 %v7440_v26, %v17019_v36 }
 0x486   : > { %v7239_v12 = vadd.f32 %v11649_v22, %v17017_v63  ;;  %v8065_v8 = vrot.slane %v7236_v50, 7  ;;  %v17023_v22 = vld [vmem:[#allocation50_spill] sm:$0xff] }
 0x487   : > { %17014 = vst [vmem:[#allocation68_spill] sm:$0xff] %v15953_v47  ;;  %17015 = vst [vmem:[#allocation131_spill] sm:$0xff] %v15955_v2  ;;  %v11729_v37 = vpop.f32.mrf.mxu0  ;;  %v7095_v48 = vpop.f32.mrf.mxu1  ;;  %v7594_v63 = vadd.f32 %v11723_v53, %v17023_v22  ;;  %v17024_v2 = vld [vmem:[#allocation104_spill] sm:$0xff]  ;;  %v17031_v22 = vld [vmem:[#allocation129_spill] sm:$0xff] }
 0x488   : > { %v7238_v20 = vadd.f32 %v7095_v48, %v17020_v7  ;;  %v8066_v49 = vsel %vm3687_vm3, %v8063_v28, %v8065_v8  ;;  %v8068_v14 = vsel %vm3687_vm3, %v8065_v8, %v8067_v29  ;;  %v8071_v38 = vrot.slane %v7239_v12, 7  ;;  %v17026_v48 = vld [vmem:[#allocation85_spill] sm:$0xff] }
 0x489   : > { %v7470_v13 = vpop.f32.mrf.mxu0  ;;  %v11652_v51 = vpop.f32.mrf.mxu1  ;;  %v15964_v58 = vadd.f32 %v8066_v49, %v7591_v19  ;;  %v15966_v61 = vadd.f32 %v8068_v14, %v7592_v5  ;;  %v7593_v21 = vadd.f32 %v7450_v3, %v17024_v2  ;;  %v17029_v14 = vld [vmem:[#allocation39_spill] sm:$0xff]  ;;  %v17030_v2 = vld [vmem:[#allocation66_spill] sm:$0xff] }
 0x48a   : > { %v8069_v50 = vrot.slane %v7238_v20, 7  ;;  %v7241_v26 = vadd.f32 %v11652_v51, %v17025_v42  ;;  %v7596_v51 = vadd.f32 %v11726_v59, %v17030_v2  ;;  %v7595_v42 = vadd.f32 %v7460_v32, %v17031_v22  ;;  %v17036_v22 = vld [vmem:[#allocation130_spill] sm:$0xff] }
 0x48b   : > { %17021 = vst [vmem:[#allocation24_spill] sm:$0xff] %v15964_v58  ;;  %17022 = vst [vmem:[#allocation70_spill] sm:$0xff] %v15966_v61  ;;  %v11732_v36 = vpop.f32.mrf.mxu0  ;;  %v7105_v7 = vpop.f32.mrf.mxu1  ;;  %v17038_v58 = vld [vmem:[#allocation40_spill] sm:$0xff] }
 0x48c   : > { %v8070_v28 = vsel %vm3687_vm3, %v8067_v29, %v8069_v50  ;;  %v8072_v8 = vsel %vm3687_vm3, %v8069_v50, %v8071_v38  ;;  %v7240_v47 = vadd.f32 %v7105_v7, %v17026_v48  ;;  %v8075_v49 = vrot.slane %v7241_v26, 7  ;;  %v17035_v48 = vld [vmem:[#allocation90_spill] sm:$0xff] }
 0x48d   : > { %v15974_v19 = vadd.f32 %v8070_v28, %v7593_v21  ;;  %v15976_v5 = vadd.f32 %v8072_v8, %v7594_v63  ;;  %v7480_v12 = vpop.f32.mrf.mxu0  ;;  %v11655_v20 = vpop.f32.mrf.mxu1  ;;  %v17034_v28 = vld [vmem:[#allocation89_spill] sm:$0xff] }
 0x48e   : > { %v8073_v53 = vrot.slane %v7240_v47, 7  ;;  %v7243_v3 = vadd.f32 %v11655_v20, %v17029_v14 }
 0x48f   : > { %17027 = vst [vmem:[#allocation134_spill] sm:$0xff] %v15974_v19  ;;  %17028 = vst [vmem:[#allocation26_spill] sm:$0xff] %v15976_v5  ;;  %v11735_v61 = vpop.f32.mrf.mxu0  ;;  %v7115_v29 = vpop.f32.mrf.mxu1  ;;  %v7598_v5 = vadd.f32 %v11729_v37, %v17036_v22  ;;  %v17037_v19 = vld [vmem:[#allocation69_spill] sm:$0xff]  ;;  %v17043_v22 = vld [vmem:[#allocation88_spill] sm:$0xff] }
 0x490   : > { %v8074_v50 = vsel %vm3687_vm3, %v8071_v38, %v8073_v53  ;;  %v8076_v7 = vsel %vm3687_vm3, %v8073_v53, %v8075_v49  ;;  %v7242_v8 = vadd.f32 %v7115_v29, %v17034_v28  ;;  %v8079_v14 = vrot.slane %v7243_v3, 7 }
 0x491   : > { %v15983_v21 = vadd.f32 %v8074_v50, %v7595_v42  ;;  %v15985_v63 = vadd.f32 %v8076_v7, %v7596_v51  ;;  %v7490_v26 = vpop.f32.mrf.mxu0  ;;  %v11658_v47 = vpop.f32.mrf.mxu1  ;;  %v7597_v38 = vadd.f32 %v7470_v13, %v17037_v19 }
 0x492   : > { %v7245_v20 = vadd.f32 %v11658_v47, %v17035_v48  ;;  %v8077_v59 = vrot.slane %v7242_v8, 7  ;;  %v17041_v47 = vld [vmem:[#allocation6_spill] sm:$0xff] }
 0x493   : > { %17032 = vst [vmem:[#allocation137_spill] sm:$0xff] %v15983_v21  ;;  %17033 = vst [vmem:[#allocation28_spill] sm:$0xff] %v15985_v63  ;;  %v11738_v2 = vpop.f32.mrf.mxu0  ;;  %v7125_v32 = vpop.f32.mrf.mxu1  ;;  %v7600_v48 = vadd.f32 %v11732_v36, %v17041_v47  ;;  %v17042_v63 = vld [vmem:[#allocation7_spill] sm:$0xff] }
 0x494   : > { %v7244_v53 = vadd.f32 %v7125_v32, %v17038_v58  ;;  %v8078_v42 = vsel %vm3687_vm3, %v8075_v49, %v8077_v59  ;;  %v8080_v51 = vsel %vm3687_vm3, %v8077_v59, %v8079_v14  ;;  %v8083_v3 = vrot.slane %v7245_v20, 7  ;;  %v17044_v32 = vld [vmem:[#allocation41_spill] sm:$0xff]  ;;  %v17049_v47 = vld [vmem:[#allocation3_spill] sm:$0xff] }
 0x495   : > { %v7500_v50 = vpop.f32.mrf.mxu0  ;;  %v11661_v29 = vpop.f32.mrf.mxu1  ;;  %v15994_v7 = vadd.f32 %v8078_v42, %v7597_v38  ;;  %v15996_v28 = vadd.f32 %v8080_v51, %v7598_v5  ;;  %v7599_v37 = vadd.f32 %v7480_v12, %v17042_v63  ;;  %v17047_v51 = vld [vmem:[#allocation92_spill] sm:$0xff]  ;;  %v17048_v63 = vld [vmem:[#allocation105_spill] sm:$0xff] }
 0x496   : > { %v8081_v8 = vrot.slane %v7244_v53, 7  ;;  %v7247_v13 = vadd.f32 %v11661_v29, %v17043_v22  ;;  %v7602_v29 = vadd.f32 %v11735_v61, %v17048_v63  ;;  %v7601_v22 = vadd.f32 %v7490_v26, %v17049_v47  ;;  %v17054_v47 = vld [vmem:[#allocation51_spill] sm:$0xff] }
 0x497   : > { %17039 = vst [vmem:[#allocation72_spill] sm:$0xff] %v15994_v7  ;;  %17040 = vst [vmem:[#allocation100_spill] sm:$0xff] %v15996_v28  ;;  %v11741_v19 = vpop.f32.mrf.mxu0  ;;  %v7135_v58 = vpop.f32.mrf.mxu1  ;;  %v17056_v7 = vld [vmem:[#allocation91_spill] sm:$0xff] }
 0x498   : > { %v8082_v49 = vsel %vm3687_vm3, %v8079_v14, %v8081_v8  ;;  %v8084_v59 = vsel %vm3687_vm3, %v8081_v8, %v8083_v3  ;;  %v7246_v21 = vadd.f32 %v7135_v58, %v17044_v32  ;;  %v8087_v42 = vrot.slane %v7247_v13, 7  ;;  %v17053_v32 = vld [vmem:[#allocation42_spill] sm:$0xff] }
 0x499   : > { %v16004_v38 = vadd.f32 %v8082_v49, %v7599_v37  ;;  %v16006_v5 = vadd.f32 %v8084_v59, %v7600_v48  ;;  %v7510_v20 = vpop.f32.mrf.mxu0  ;;  %v11664_v53 = vpop.f32.mrf.mxu1  ;;  %v17052_v49 = vld [vmem:[#allocation93_spill] sm:$0xff] }
 0x49a   : > { %v8085_v36 = vrot.slane %v7246_v21, 7  ;;  %v7249_v12 = vadd.f32 %v11664_v53, %v17047_v51 }
 0x49b   : > { %17045 = vst [vmem:[#allocation73_spill] sm:$0xff] %v16004_v38  ;;  %17046 = vst [vmem:[#allocation29_spill] sm:$0xff] %v16006_v5  ;;  %v11744_v28 = vpop.f32.mrf.mxu0  ;;  %v7145_v14 = vpop.f32.mrf.mxu1  ;;  %v7604_v5 = vadd.f32 %v11738_v2, %v17054_v47  ;;  %v17055_v38 = vld [vmem:[#allocation25_spill] sm:$0xff]  ;;  %v17060_v47 = vld [vmem:[#allocation43_spill] sm:$0xff] }
 0x49c   : > { %v8086_v8 = vsel %vm3687_vm3, %v8083_v3, %v8085_v36  ;;  %v8088_v58 = vsel %vm3687_vm3, %v8085_v36, %v8087_v42  ;;  %v7248_v59 = vadd.f32 %v7145_v14, %v17052_v49  ;;  %v8091_v51 = vrot.slane %v7249_v12, 7 }
 0x49d   : > { %v16013_v37 = vadd.f32 %v8086_v8, %v7601_v22  ;;  %v16015_v48 = vadd.f32 %v8088_v58, %v7602_v29  ;;  %v7520_v13 = vpop.f32.mrf.mxu0  ;;  %v11667_v21 = vpop.f32.mrf.mxu1  ;;  %v7603_v3 = vadd.f32 %v7500_v50, %v17055_v38 }
 0x49e   : > { %v7251_v53 = vadd.f32 %v11667_v21, %v17053_v32  ;;  %v8089_v61 = vrot.slane %v7248_v59, 7  ;;  %v17058_v21 = vld [vmem:[#allocation71_spill] sm:$0xff] }
 0x49f   : > { %17050 = vst [vmem:[#allocation61_spill] sm:$0xff] %v16013_v37  ;;  %17051 = vst [vmem:[#allocation47_spill] sm:$0xff] %v16015_v48  ;;  %v11747_v63 = vpop.f32.mrf.mxu0  ;;  %v7155_v26 = vpop.f32.mrf.mxu1  ;;  %v7606_v32 = vadd.f32 %v11741_v19, %v17058_v21  ;;  %v17059_v48 = vld [vmem:[#allocation52_spill] sm:$0xff] }
 0x4a0   : > { %v7250_v36 = vadd.f32 %v7155_v26, %v17056_v7  ;;  %v8090_v22 = vsel %vm3687_vm3, %v8087_v42, %v8089_v61  ;;  %v8092_v29 = vsel %vm3687_vm3, %v8089_v61, %v8091_v51  ;;  %v8095_v12 = vrot.slane %v7251_v53, 7  ;;  %v17061_v26 = vld [vmem:[#allocation95_spill] sm:$0xff]  ;;  %v17066_v21 = vld [vmem:[#allocation132_spill] sm:$0xff] }
 0x4a1   : > { %v7530_v8 = vpop.f32.mrf.mxu0  ;;  %v11670_v14 = vpop.f32.mrf.mxu1  ;;  %v16024_v58 = vadd.f32 %v8090_v22, %v7603_v3  ;;  %v16026_v49 = vadd.f32 %v8092_v29, %v7604_v5  ;;  %v7605_v2 = vadd.f32 %v7510_v20, %v17059_v48  ;;  %v17064_v29 = vld [vmem:[#allocation96_spill] sm:$0xff]  ;;  %v17065_v48 = vld [vmem:[#allocation106_spill] sm:$0xff] }
 0x4a2   : > { %v8093_v59 = vrot.slane %v7250_v36, 7  ;;  %v7253_v50 = vadd.f32 %v11670_v14, %v17060_v47  ;;  %v7608_v14 = vadd.f32 %v11744_v28, %v17065_v48  ;;  %v7607_v47 = vadd.f32 %v7520_v13, %v17066_v21  ;;  %v17070_v48 = vld [vmem:[#allocation133_spill] sm:$0xff]  ;;  %v17071_v21 = vld [vmem:[#allocation27_spill] sm:$0xff] }
 0x4a3   : > { %17057 = vst [vmem:[#allocation30_spill] sm:$0xff] %v16026_v49  ;;  %v11750_v38 = vpop.f32.mrf.mxu0  ;;  %v7165_v7 = vpop.f32.mrf.mxu1  ;;  %v7610_v13 = vadd.f32 %v11747_v63, %v17070_v48  ;;  %v17075_v48 = vld [vmem:[#allocation46_spill] sm:$0xff] }
 0x4a4   : > { %v8094_v42 = vsel %vm3687_vm3, %v8091_v51, %v8093_v59  ;;  %v8096_v61 = vsel %vm3687_vm3, %v8093_v59, %v8095_v12  ;;  %v7252_v37 = vadd.f32 %v7165_v7, %v17061_v26  ;;  %v8099_v22 = vrot.slane %v7253_v50, 7 }
 0x4a5   : > { %v16034_v3 = vadd.f32 %v8094_v42, %v7605_v2  ;;  %v16036_v5 = vadd.f32 %v8096_v61, %v7606_v32  ;;  %v7540_v53 = vpop.f32.mrf.mxu0  ;;  %v11673_v36 = vpop.f32.mrf.mxu1  ;;  %v17068_v42 = vld [vmem:[#allocation44_spill] sm:$0xff] }
 0x4a6   : > { %v8097_v19 = vrot.slane %v7252_v37, 7  ;;  %v7255_v20 = vadd.f32 %v11673_v36, %v17064_v29  ;;  %v17069_v37 = vld [vmem:[#allocation94_spill] sm:$0xff] }
 0x4a7   : > { %17062 = vst [vmem:[#allocation74_spill] sm:$0xff] %v16034_v3  ;;  %17063 = vst [vmem:[#allocation114_spill] sm:$0xff] %v16036_v5  ;;  %v7175_v49 = vpop.f32.mrf.mxu1  ;;  %v11753_v7 = vpop.f32.mrf.mxu0  ;;  %v7609_v5 = vadd.f32 %v7530_v8, %v17071_v21  ;;  %v17072_v3 = vld [vmem:[#allocation45_spill] sm:$0xff] }
 0x4a8   : > { %v8098_v51 = vsel %vm3687_vm3, %v8095_v12, %v8097_v19  ;;  %v8100_v59 = vsel %vm3687_vm3, %v8097_v19, %v8099_v22  ;;  %v7254_v61 = vadd.f32 %v7175_v49, %v17068_v42  ;;  %v8103_v36 = vrot.slane %v7255_v20, 7 }
 0x4a9   : > { %v16043_v2 = vadd.f32 %v8098_v51, %v7607_v47  ;;  %v16045_v32 = vadd.f32 %v8100_v59, %v7608_v14  ;;  %v11676_v50 = vpop.f32.mrf.mxu1  ;;  %v7550_v12 = vpop.f32.mrf.mxu0 }
 0x4aa   : > { %v7257_v26 = vadd.f32 %v11676_v50, %v17069_v37  ;;  %v8101_v29 = vrot.slane %v7254_v61, 7  ;;  %v17073_v61 = vld [vmem:[#allocation8_spill] sm:$0xff]  ;;  %v17074_v37 = vld [vmem:[#allocation9_spill] sm:$0xff] }
 0x4ab   : > { %17067 = vst [vmem:[#allocation115_spill] sm:$0xff] %v16045_v32  ;;  %v7185_v28 = vpop.f32.mrf.mxu1  ;;  %v7612_v50 = vadd.f32 %v11750_v38, %v17073_v61  ;;  %v7611_v63 = vadd.f32 %v7540_v53, %v17074_v37  ;;  %v11756_v32 = vpop.f32.mrf.mxu0  ;;  %v17077_v38 = vld [vmem:[#allocation97_spill] sm:$0xff]  ;;  %v17078_v53 = vld [vmem:[#allocation107_spill] sm:$0xff] }
 0x4ac   : > { %v7256_v19 = vadd.f32 %v7185_v28, %v17072_v3  ;;  %v8102_v47 = vsel %vm3687_vm3, %v8099_v22, %v8101_v29  ;;  %v8104_v14 = vsel %vm3687_vm3, %v8101_v29, %v8103_v36  ;;  %v8107_v42 = vrot.slane %v7257_v26, 7  ;;  %v17076_v29 = vld [vmem:[#allocation98_spill] sm:$0xff] }
 0x4ad   : > { %v11679_v51 = vpop.f32.mrf.mxu1  ;;  %v16054_v59 = vadd.f32 %v8102_v47, %v7609_v5  ;;  %v16056_v49 = vadd.f32 %v8104_v14, %v7610_v13  ;;  %v7614_v61 = vadd.f32 %v11753_v7, %v17078_v53  ;;  %v17081_v7 = vrot.slane %v15847_v4, 7 }
 0x4ae   : > { %v8105_v20 = vrot.slane %v7256_v19, 7  ;;  %v7259_v8 = vadd.f32 %v11679_v51, %v17075_v48  ;;  %v7613_v51 = vadd.f32 %v7550_v12, %v15642_v10  ;;  %v7560_v48 = vpop.f32.mrf.mxu0 }
 0x4af   : > { %v7195_v21 = vpop.f32.mrf.mxu1 }
 0x4b0   : > { %v8106_v3 = vsel %vm3687_vm3, %v8103_v36, %v8105_v20  ;;  %v8108_v22 = vsel %vm3687_vm3, %v8105_v20, %v8107_v42  ;;  %v7258_v28 = vadd.f32 %v7195_v21, %v17076_v29  ;;  %v8111_v19 = vrot.slane %v7259_v8, 7 }
 0x4b1   : > { %v16064_v5 = vadd.f32 %v8106_v3, %v7611_v63  ;;  %v16066_v13 = vadd.f32 %v8108_v22, %v7612_v50  ;;  %v11682_v26 = vpop.f32.mrf.mxu1  ;;  %v17079_v63 = vld [vmem:[#allocation99_spill] sm:$0xff]  ;;  %v17080_v50 = vld [vmem:[#allocation101_spill] sm:$0xff] }
 0x4b2   : > { %v8109_v47 = vrot.slane %v7258_v28, 7  ;;  %v7261_v14 = vadd.f32 %v11682_v26, %v17077_v38  ;;  %v7569_v22 = vadd.f32 %v15836_v46, %v17080_v50  ;;  %v17082_v26 = vld [vmem:[#allocation53_spill] sm:$0xff]  ;;  %v7615_v38 = vadd.f32 %v7560_v48, %v15650_v57 }
 0x4b3   : > { %v7205_v37 = vpop.f32.mrf.mxu1 }
 0x4b4   : > { %v8110_v36 = vsel %vm3687_vm3, %v8107_v42, %v8109_v47  ;;  %v8112_v20 = vsel %vm3687_vm3, %v8109_v47, %v8111_v19  ;;  %v7973_v21 = vrot.slane %v7261_v14, 7  ;;  %v7260_v3 = vadd.f32 %v7205_v37, %v17079_v63  ;;  %v16105_v63 = vld [vmem:[%s16458_s6] ss:$0 sm:$0xff] }
 0x4b5   : > { %v16076_v8 = vadd.f32 %v8110_v36, %v7613_v51  ;;  %v16078_v29 = vadd.f32 %v8112_v20, %v7614_v61  ;;  %v11761_v28 = vpop.f32.mrf.mxu1  ;;  %v7616_v47 = vadd.f32 %v11756_v32, %v17082_v26 }
 0x4b6   : > { %v8164_v10 = vsel %vm3687_vm3, %v7973_v21, %v17081_v7  ;;  %v8113_v12 = vrot.slane %v7260_v3, 7  ;;  %v7925_v42 = vadd.f32 %v11761_v28, %v15654_v11  ;;  %v16111_v7 = vld [vmem:[%s16459_s7] ss:$0 sm:$0xff] }
 0x4b7   : > { %v8165_v14 = vadd.f32 %v8164_v10, %v7569_v22  ;;  %v7685_v53 = vpop.f32.mrf.mxu1 }
 0x4b8   : > { %v8114_v46 = vsel %vm3687_vm3, %v8111_v19, %v8113_v12  ;;  %v8115_v61 = vsel %vm3687_vm3, %v8113_v12, %v7973_v21  ;;  %v16089_v51 = vadd.f32 %v7685_v53, %v15658_v60  ;;  %v8262_v11 = vrot.slane %v7925_v42, 1 }
 0x4b9   : > { %v16091_v4 = vadd.f32 %v8114_v46, %v7615_v38  ;;  %v16093_v37 = vadd.f32 %v8115_v61, %v7616_v47  ;;  %v11764_v36 = vpop.f32.mrf.mxu1 }
 0x4ba   : > { %v8261_v32 = vrot.slane %v16089_v51, 1  ;;  %v7927_v57 = vadd.f32 %v11764_v36, %v15662_v1 }
 0x4bb   : > { %v7695_v48 = vpop.f32.mrf.mxu1 }
 0x4bc   : > { %v8263_v19 = vsel %vm3927_vm4, %v8261_v32, %v8262_v11  ;;  %v7926_v20 = vadd.f32 %v7695_v48, %v15666_v33  ;;  %v8266_v3 = vrot.slane %v7927_v57, 1 }
 0x4bd   : > { %v8406_v21 = vadd.f32 %v8263_v19, %v8165_v14  ;;  %v11767_v60 = vpop.f32.mrf.mxu1 }
 0x4be   : > { %v8264_v50 = vrot.slane %v7926_v20, 1  ;;  %v7929_v22 = vadd.f32 %v11767_v60, %v15670_v54 }
 0x4bf   : > { %v8454_v1 = vmax.f32 %v8406_v21, 0.0  ;;  %v7705_v28 = vpop.f32.mrf.mxu1 }
 0x4c0   : > { %v8265_v33 = vsel %vm3927_vm4, %v8262_v11, %v8264_v50  ;;  %v8267_v10 = vsel %vm3927_vm4, %v8264_v50, %v8266_v3  ;;  %v7928_v12 = vadd.f32 %v7705_v28, %v15674_v39  ;;  %v8270_v38 = vrot.slane %v7929_v22, 1 }
 0x4c1   : > { %v8509_v42 = vmul.f32 %v16105_v63, %v8454_v1  ;;  %v8407_v26 = vadd.f32 %v8265_v33, %v15856_v45  ;;  %v8408_v47 = vadd.f32 %v8267_v10, %v15863_v55  ;;  %v11770_v54 = vpop.f32.mrf.mxu1 }
 0x4c2   : > { %v8268_v14 = vrot.slane %v7928_v12, 1  ;;  %v7931_v53 = vadd.f32 %v11770_v54, %v15678_v0 }
 0x4c3   : > { %v8564_v46 = vadd.f32 %v16111_v7, %v8509_v42  ;;  %v8455_v39 = vmax.f32 %v8407_v26, 0.0  ;;  %v8456_v61 = vmax.f32 %v8408_v47, 0.0  ;;  %v7715_v36 = vpop.f32.mrf.mxu1 }
 0x4c4   : > { %v8269_v45 = vsel %vm3927_vm4, %v8266_v3, %v8268_v14  ;;  %v8271_v55 = vsel %vm3927_vm4, %v8268_v14, %v8270_v38  ;;  %v7930_v11 = vadd.f32 %v7715_v36, %v15682_v30  ;;  %v8274_v21 = vrot.slane %v7931_v53, 1 }
 0x4c5   : > { %8612 = vst.msk [vmem:[%s16122_s24] sm:$0xff] %vm4615_vm2, %v8564_v46  ;;  %v8510_v57 = vmul.f32 %v16105_v63, %v8455_v39  ;;  %v8511_v48 = vmul.f32 %v16105_v63, %v8456_v61  ;;  %v8409_v0 = vadd.f32 %v8269_v45, %v15865_v23  ;;  %v8410_v19 = vadd.f32 %v8271_v55, %v15874_v24  ;;  %v11773_v20 = vpop.f32.mrf.mxu1 }
 0x4c6   : > { %v8272_v60 = vrot.slane %v7930_v11, 1  ;;  %v7933_v3 = vadd.f32 %v11773_v20, %v15686_v25 }
 0x4c7   : > { %v8565_v50 = vadd.f32 %v16111_v7, %v8510_v57  ;;  %v8566_v30 = vadd.f32 %v16111_v7, %v8511_v48  ;;  %v8457_v22 = vmax.f32 %v8409_v0, 0.0  ;;  %v8458_v1 = vmax.f32 %v8410_v19, 0.0  ;;  %v7725_v28 = vpop.f32.mrf.mxu1 }
 0x4c8   : > { %v8273_v33 = vsel %vm3927_vm4, %v8270_v38, %v8272_v60  ;;  %v8275_v10 = vsel %vm3927_vm4, %v8272_v60, %v8274_v21  ;;  %v7932_v23 = vadd.f32 %v7725_v28, %v15690_v41  ;;  %v8278_v47 = vrot.slane %v7933_v3, 1 }
 0x4c9   : > { %8613 = vst.msk [vmem:[%s16122_s24 + $0x8] sm:$0xff] %vm4615_vm2, %v8565_v50  ;;  %8614 = vst.msk [vmem:[%s16122_s24 + $0x10] sm:$0xff] %vm4615_vm2, %v8566_v30  ;;  %v8512_v24 = vmul.f32 %v16105_v63, %v8457_v22  ;;  %v8513_v25 = vmul.f32 %v16105_v63, %v8458_v1  ;;  %v8411_v12 = vadd.f32 %v8273_v33, %v15876_v34  ;;  %v11776_v26 = vpop.f32.mrf.mxu1 }
 0x4ca   : > { %v8412_v42 = vadd.f32 %v8275_v10, %v15884_v16  ;;  %v8276_v54 = vrot.slane %v7932_v23, 1  ;;  %v7935_v38 = vadd.f32 %v11776_v26, %v15694_v56 }
 0x4cb   : > { %v8567_v41 = vadd.f32 %v16111_v7, %v8512_v24  ;;  %v8568_v14 = vadd.f32 %v16111_v7, %v8513_v25  ;;  %v8459_v53 = vmax.f32 %v8411_v12, 0.0  ;;  %v7735_v39 = vpop.f32.mrf.mxu1 }
 0x4cc   : > { %v8460_v46 = vmax.f32 %v8412_v42, 0.0  ;;  %v8277_v61 = vsel %vm3927_vm4, %v8274_v21, %v8276_v54  ;;  %v8279_v36 = vsel %vm3927_vm4, %v8276_v54, %v8278_v47  ;;  %v7934_v34 = vadd.f32 %v7735_v39, %v15698_v40 }
 0x4cd   : > { %8615 = vst.msk [vmem:[%s16122_s24 + $0x18] sm:$0xff] %vm4615_vm2, %v8567_v41  ;;  %8616 = vst.msk [vmem:[%s16122_s24 + $0x20] sm:$0xff] %vm4615_vm2, %v8568_v14  ;;  %v8514_v16 = vmul.f32 %v16105_v63, %v8459_v53  ;;  %v8413_v45 = vadd.f32 %v8277_v61, %v15886_v43  ;;  %v8414_v55 = vadd.f32 %v8279_v36, %v15893_v9  ;;  %v11779_v11 = vpop.f32.mrf.mxu1  ;;  %v8282_v57 = vrot.slane %v7935_v38, 1 }
 0x4ce   : > { %v8515_v56 = vmul.f32 %v16105_v63, %v8460_v46  ;;  %v8280_v48 = vrot.slane %v7934_v34, 1  ;;  %v7937_v0 = vadd.f32 %v11779_v11, %v15702_v15 }
 0x4cf   : > { %v8569_v40 = vadd.f32 %v16111_v7, %v8514_v16  ;;  %v8461_v20 = vmax.f32 %v8413_v45, 0.0  ;;  %v8462_v21 = vmax.f32 %v8414_v55, 0.0  ;;  %v7745_v60 = vpop.f32.mrf.mxu1  ;;  %v17084_v55 = vld [vmem:[#allocation21_spill] sm:$0xff] }
 0x4d0   : > { %v8570_v19 = vadd.f32 %v16111_v7, %v8515_v56  ;;  %v8281_v3 = vsel %vm3927_vm4, %v8278_v47, %v8280_v48  ;;  %v8283_v50 = vsel %vm3927_vm4, %v8280_v48, %v8282_v57  ;;  %v7936_v43 = vadd.f32 %v7745_v60, %v15706_v52  ;;  %v17083_v56 = vld [vmem:[#allocation63_spill] sm:$0xff] }
 0x4d1   : > { %8617 = vst.msk [vmem:[%s16122_s24 + $0x28] sm:$0xff] %vm4615_vm2, %v8569_v40  ;;  %v8516_v9 = vmul.f32 %v16105_v63, %v8461_v20  ;;  %v8517_v15 = vmul.f32 %v16105_v63, %v8462_v21  ;;  %v8415_v30 = vadd.f32 %v8281_v3, %v15895_v35  ;;  %v8416_v22 = vadd.f32 %v8283_v50, %v15904_v18  ;;  %v11782_v1 = vpop.f32.mrf.mxu1  ;;  %v17085_v40 = vld [vmem:[#allocation54_spill] sm:$0xff] }
 0x4d2   : > { %8618 = vst.msk [vmem:[%s16122_s24 + $0x30] sm:$0xff] %vm4615_vm2, %v8570_v19  ;;  %v8286_v28 = vrot.slane %v7937_v0, 1  ;;  %v8284_v33 = vrot.slane %v7936_v43, 1  ;;  %v7939_v10 = vadd.f32 %v11782_v1, %v15710_v44  ;;  %v17087_v1 = vld [vmem:[#allocation125_spill] sm:$0xff] }
 0x4d3   : > { %v8571_v52 = vadd.f32 %v16111_v7, %v8516_v9  ;;  %v8572_v23 = vadd.f32 %v16111_v7, %v8517_v15  ;;  %v8463_v24 = vmax.f32 %v8415_v30, 0.0  ;;  %v8464_v25 = vmax.f32 %v8416_v22, 0.0  ;;  %v7755_v12 = vpop.f32.mrf.mxu1  ;;  %v17086_v9 = vld [vmem:[#allocation108_spill] sm:$0xff] }
 0x4d4   : > { %v8285_v42 = vsel %vm3927_vm4, %v8282_v57, %v8284_v33  ;;  %v8287_v26 = vsel %vm3927_vm4, %v8284_v33, %v8286_v28  ;;  %v7938_v35 = vadd.f32 %v7755_v12, %v15714_v17  ;;  %v8290_v41 = vrot.slane %v7939_v10, 1  ;;  %v17088_v33 = vld [vmem:[#allocation65_spill] sm:$0xff] }
 0x4d5   : > { %8619 = vst.msk [vmem:[%s16122_s24 + $0x38] sm:$0xff] %vm4615_vm2, %v8571_v52  ;;  %8620 = vst.msk [vmem:[%s16122_s24 + $0x40] sm:$0xff] %vm4615_vm2, %v8572_v23  ;;  %v8518_v18 = vmul.f32 %v16105_v63, %v8463_v24  ;;  %v8519_v44 = vmul.f32 %v16105_v63, %v8464_v25  ;;  %v8417_v47 = vadd.f32 %v8285_v42, %v15906_v27  ;;  %v11785_v38 = vpop.f32.mrf.mxu1  ;;  %v17089_v25 = vld [vmem:[#allocation135_spill] sm:$0xff] }
 0x4d6   : > { %v8418_v54 = vadd.f32 %v8287_v26, %v15914_v6  ;;  %v8288_v14 = vrot.slane %v7938_v35, 1  ;;  %v7941_v53 = vadd.f32 %v11785_v38, %v15718_v62  ;;  %v17090_v38 = vld [vmem:[#allocation136_spill] sm:$0xff] }
 0x4d7   : > { %v8573_v17 = vadd.f32 %v16111_v7, %v8518_v18  ;;  %v8574_v46 = vadd.f32 %v16111_v7, %v8519_v44  ;;  %v8465_v39 = vmax.f32 %v8417_v47, 0.0  ;;  %v7765_v36 = vpop.f32.mrf.mxu1 }
 0x4d8   : > { %v8466_v61 = vmax.f32 %v8418_v54, 0.0  ;;  %v8289_v34 = vsel %vm3927_vm4, %v8286_v28, %v8288_v14  ;;  %v8291_v16 = vsel %vm3927_vm4, %v8288_v14, %v8290_v41  ;;  %v7940_v27 = vadd.f32 %v7765_v36, %v15722_v31 }
 0x4d9   : > { %8621 = vst.msk [vmem:[%s16122_s24 + $0x48] sm:$0xff] %vm4615_vm2, %v8573_v17  ;;  %8622 = vst.msk [vmem:[%s16122_s24 + $0x50] sm:$0xff] %vm4615_vm2, %v8574_v46  ;;  %v8520_v6 = vmul.f32 %v16105_v63, %v8465_v39  ;;  %v8419_v45 = vadd.f32 %v8289_v34, %v17083_v56  ;;  %v8420_v11 = vadd.f32 %v8291_v16, %v17084_v55  ;;  %v11788_v57 = vpop.f32.mrf.mxu1  ;;  %v8294_v48 = vrot.slane %v7941_v53, 1  ;;  %v17091_v17 = vld [vmem:[#allocation23_spill] sm:$0xff]  ;;  %v17092_v39 = vld [vmem:[#allocation128_spill] sm:$0xff] }
 0x4da   : > { %v8521_v62 = vmul.f32 %v16105_v63, %v8466_v61  ;;  %v8292_v0 = vrot.slane %v7940_v27, 1  ;;  %v7943_v19 = vadd.f32 %v11788_v57, %v17085_v40  ;;  %v17093_v27 = vld [vmem:[#allocation10_spill] sm:$0xff] }
 0x4db   : > { %v8575_v31 = vadd.f32 %v16111_v7, %v8520_v6  ;;  %v8467_v21 = vmax.f32 %v8419_v45, 0.0  ;;  %v8468_v60 = vmax.f32 %v8420_v11, 0.0  ;;  %v7775_v3 = vpop.f32.mrf.mxu1 }
 0x4dc   : > { %v8576_v20 = vadd.f32 %v16111_v7, %v8521_v62  ;;  %v8293_v50 = vsel %vm3927_vm4, %v8290_v41, %v8292_v0  ;;  %v8295_v43 = vsel %vm3927_vm4, %v8292_v0, %v8294_v48  ;;  %v7942_v15 = vadd.f32 %v7775_v3, %v17086_v9  ;;  %v17094_v0 = vld [vmem:[#allocation11_spill] sm:$0xff] }
 0x4dd   : > { %8623 = vst.msk [vmem:[%s16122_s24 + $0x58] sm:$0xff] %vm4615_vm2, %v8575_v31  ;;  %v8522_v30 = vmul.f32 %v16105_v63, %v8467_v21  ;;  %v8523_v22 = vmul.f32 %v16105_v63, %v8468_v60  ;;  %v8421_v28 = vadd.f32 %v8293_v50, %v17087_v1  ;;  %v8422_v10 = vadd.f32 %v8295_v43, %v17088_v33  ;;  %v11791_v52 = vpop.f32.mrf.mxu1  ;;  %v17096_v60 = vld [vmem:[#allocation68_spill] sm:$0xff] }
 0x4de   : > { %8624 = vst.msk [vmem:[%s16122_s24 + $0x60] sm:$0xff] %vm4615_vm2, %v8576_v20  ;;  %v8298_v23 = vrot.slane %v7943_v19, 1  ;;  %v8296_v24 = vrot.slane %v7942_v15, 1  ;;  %v7945_v12 = vadd.f32 %v11791_v52, %v17089_v25  ;;  %v17095_v20 = vld [vmem:[#allocation67_spill] sm:$0xff]  ;;  %v17097_v15 = vld [vmem:[#allocation109_spill] sm:$0xff] }
 0x4df   : > { %v8577_v42 = vadd.f32 %v16111_v7, %v8522_v30  ;;  %v8578_v26 = vadd.f32 %v16111_v7, %v8523_v22  ;;  %v8469_v35 = vmax.f32 %v8421_v28, 0.0  ;;  %v8470_v18 = vmax.f32 %v8422_v10, 0.0  ;;  %v7785_v44 = vpop.f32.mrf.mxu1 }
 0x4e0   : > { %v8297_v47 = vsel %vm3927_vm4, %v8294_v48, %v8296_v24  ;;  %v8299_v54 = vsel %vm3927_vm4, %v8296_v24, %v8298_v23  ;;  %v7944_v41 = vadd.f32 %v7785_v44, %v17090_v38  ;;  %v8302_v34 = vrot.slane %v7945_v12, 1  ;;  %v17098_v24 = vld [vmem:[#allocation138_spill] sm:$0xff] }
 0x4e1   : > { %8625 = vst.msk [vmem:[%s16122_s24 + $0x68] sm:$0xff] %vm4615_vm2, %v8577_v42  ;;  %8626 = vst.msk [vmem:[%s16122_s24 + $0x70] sm:$0xff] %vm4615_vm2, %v8578_v26  ;;  %v8524_v14 = vmul.f32 %v16105_v63, %v8469_v35  ;;  %v8525_v53 = vmul.f32 %v16105_v63, %v8470_v18  ;;  %v8423_v46 = vadd.f32 %v8297_v47, %v17091_v17  ;;  %v11794_v36 = vpop.f32.mrf.mxu1  ;;  %v17099_v26 = vld [vmem:[#allocation131_spill] sm:$0xff]  ;;  %v17100_v18 = vld [vmem:[#allocation24_spill] sm:$0xff] }
 0x4e2   : > { %v8424_v61 = vadd.f32 %v8299_v54, %v17092_v39  ;;  %v8300_v16 = vrot.slane %v7944_v41, 1  ;;  %v7947_v6 = vadd.f32 %v11794_v36, %v17093_v27  ;;  %v17101_v41 = vld [vmem:[#allocation139_spill] sm:$0xff] }
 0x4e3   : > { %v8579_v62 = vadd.f32 %v16111_v7, %v8524_v14  ;;  %v8580_v56 = vadd.f32 %v16111_v7, %v8525_v53  ;;  %v8471_v45 = vmax.f32 %v8423_v46, 0.0  ;;  %v7795_v11 = vpop.f32.mrf.mxu1 }
 0x4e4   : > { %v8472_v55 = vmax.f32 %v8424_v61, 0.0  ;;  %v8301_v57 = vsel %vm3927_vm4, %v8298_v23, %v8300_v16  ;;  %v8303_v48 = vsel %vm3927_vm4, %v8300_v16, %v8302_v34  ;;  %v7946_v40 = vadd.f32 %v7795_v11, %v17094_v0  ;;  %v17102_v16 = vld [vmem:[#allocation55_spill] sm:$0xff] }
 0x4e5   : > { %8627 = vst.msk [vmem:[%s16122_s24 + $0x78] sm:$0xff] %vm4615_vm2, %v8579_v62  ;;  %8628 = vst.msk [vmem:[%s16122_s24 + $0x80] sm:$0xff] %vm4615_vm2, %v8580_v56  ;;  %v8526_v19 = vmul.f32 %v16105_v63, %v8471_v45  ;;  %v8425_v21 = vadd.f32 %v8301_v57, %v17095_v20  ;;  %v8426_v3 = vadd.f32 %v8303_v48, %v17096_v60  ;;  %v11797_v50 = vpop.f32.mrf.mxu1  ;;  %v8306_v43 = vrot.slane %v7947_v6, 1  ;;  %v17103_v56 = vld [vmem:[#allocation70_spill] sm:$0xff] }
 0x4e6   : > { %v8527_v31 = vmul.f32 %v16105_v63, %v8472_v55  ;;  %v8304_v9 = vrot.slane %v7946_v40, 1  ;;  %v7949_v30 = vadd.f32 %v11797_v50, %v17097_v15  ;;  %v17104_v55 = vld [vmem:[#allocation134_spill] sm:$0xff]  ;;  %v17105_v40 = vld [vmem:[#allocation56_spill] sm:$0xff] }
 0x4e7   : > { %v8581_v22 = vadd.f32 %v16111_v7, %v8526_v19  ;;  %v8473_v28 = vmax.f32 %v8425_v21, 0.0  ;;  %v8474_v33 = vmax.f32 %v8426_v3, 0.0  ;;  %v7805_v10 = vpop.f32.mrf.mxu1 }
 0x4e8   : > { %v8582_v1 = vadd.f32 %v16111_v7, %v8527_v31  ;;  %v8305_v52 = vsel %vm3927_vm4, %v8302_v34, %v8304_v9  ;;  %v8307_v23 = vsel %vm3927_vm4, %v8304_v9, %v8306_v43  ;;  %v7948_v25 = vadd.f32 %v7805_v10, %v17098_v24  ;;  %v17106_v9 = vld [vmem:[#allocation110_spill] sm:$0xff] }
 0x4e9   : > { %8629 = vst.msk [vmem:[%s16122_s24 + $0x88] sm:$0xff] %vm4615_vm2, %v8581_v22  ;;  %v8528_v12 = vmul.f32 %v16105_v63, %v8473_v28  ;;  %v8529_v42 = vmul.f32 %v16105_v63, %v8474_v33  ;;  %v8427_v35 = vadd.f32 %v8305_v52, %v17099_v26  ;;  %v8428_v44 = vadd.f32 %v8307_v23, %v17100_v18  ;;  %v11800_v47 = vpop.f32.mrf.mxu1  ;;  %v17108_v33 = vld [vmem:[#allocation137_spill] sm:$0xff] }
 0x4ea   : > { %8630 = vst.msk [vmem:[%s16122_s24 + $0x90] sm:$0xff] %vm4615_vm2, %v8582_v1  ;;  %v8310_v54 = vrot.slane %v7949_v30, 1  ;;  %v8308_v38 = vrot.slane %v7948_v25, 1  ;;  %v7951_v14 = vadd.f32 %v11800_v47, %v17101_v41  ;;  %v17107_v1 = vld [vmem:[#allocation26_spill] sm:$0xff]  ;;  %v17109_v25 = vld [vmem:[#allocation12_spill] sm:$0xff] }
 0x4eb   : > { %v8583_v53 = vadd.f32 %v16111_v7, %v8528_v12  ;;  %v8584_v17 = vadd.f32 %v16111_v7, %v8529_v42  ;;  %v8475_v46 = vmax.f32 %v8427_v35, 0.0  ;;  %v8476_v39 = vmax.f32 %v8428_v44, 0.0  ;;  %v7815_v61 = vpop.f32.mrf.mxu1 }
 0x4ec   : > { %v8309_v36 = vsel %vm3927_vm4, %v8306_v43, %v8308_v38  ;;  %v8311_v34 = vsel %vm3927_vm4, %v8308_v38, %v8310_v54  ;;  %v7950_v27 = vadd.f32 %v7815_v61, %v17102_v16  ;;  %v8314_v48 = vrot.slane %v7951_v14, 1  ;;  %v17110_v38 = vld [vmem:[#allocation13_spill] sm:$0xff] }
 0x4ed   : > { %8631 = vst.msk [vmem:[%s16122_s24 + $0x98] sm:$0xff] %vm4615_vm2, %v8583_v53  ;;  %8632 = vst.msk [vmem:[%s16122_s24 + $0xa0] sm:$0xff] %vm4615_vm2, %v8584_v17  ;;  %v8530_v6 = vmul.f32 %v16105_v63, %v8475_v46  ;;  %v8531_v62 = vmul.f32 %v16105_v63, %v8476_v39  ;;  %v8429_v45 = vadd.f32 %v8309_v36, %v17103_v56  ;;  %v11803_v57 = vpop.f32.mrf.mxu1  ;;  %v17111_v17 = vld [vmem:[#allocation28_spill] sm:$0xff] }
 0x4ee   : > { %v8430_v11 = vadd.f32 %v8311_v34, %v17104_v55  ;;  %v8312_v0 = vrot.slane %v7950_v27, 1  ;;  %v7953_v19 = vadd.f32 %v11803_v57, %v17105_v40  ;;  %v17112_v39 = vld [vmem:[#allocation72_spill] sm:$0xff]  ;;  %v17113_v27 = vld [vmem:[#allocation111_spill] sm:$0xff] }
 0x4ef   : > { %v8585_v31 = vadd.f32 %v16111_v7, %v8530_v6  ;;  %v8586_v20 = vadd.f32 %v16111_v7, %v8531_v62  ;;  %v8477_v21 = vmax.f32 %v8429_v45, 0.0  ;;  %v7825_v3 = vpop.f32.mrf.mxu1 }
 0x4f0   : > { %v8478_v60 = vmax.f32 %v8430_v11, 0.0  ;;  %v8313_v50 = vsel %vm3927_vm4, %v8310_v54, %v8312_v0  ;;  %v8315_v43 = vsel %vm3927_vm4, %v8312_v0, %v8314_v48  ;;  %v7952_v15 = vadd.f32 %v7825_v3, %v17106_v9  ;;  %v17114_v0 = vld [vmem:[#allocation57_spill] sm:$0xff] }
 0x4f1   : > { %8633 = vst.msk [vmem:[%s16122_s24 + $0xa8] sm:$0xff] %vm4615_vm2, %v8585_v31  ;;  %8634 = vst.msk [vmem:[%s16122_s24 + $0xb0] sm:$0xff] %vm4615_vm2, %v8586_v20  ;;  %v8532_v30 = vmul.f32 %v16105_v63, %v8477_v21  ;;  %v8431_v28 = vadd.f32 %v8313_v50, %v17107_v1  ;;  %v8432_v10 = vadd.f32 %v8315_v43, %v17108_v33  ;;  %v11806_v52 = vpop.f32.mrf.mxu1  ;;  %v8318_v23 = vrot.slane %v7953_v19, 1  ;;  %v17115_v20 = vld [vmem:[#allocation100_spill] sm:$0xff] }
 0x4f2   : > { %v8533_v22 = vmul.f32 %v16105_v63, %v8478_v60  ;;  %v8316_v24 = vrot.slane %v7952_v15, 1  ;;  %v7955_v12 = vadd.f32 %v11806_v52, %v17109_v25  ;;  %v17116_v60 = vld [vmem:[#allocation73_spill] sm:$0xff]  ;;  %v17117_v15 = vld [vmem:[#allocation58_spill] sm:$0xff] }
 0x4f3   : > { %v8587_v42 = vadd.f32 %v16111_v7, %v8532_v30  ;;  %v8479_v35 = vmax.f32 %v8431_v28, 0.0  ;;  %v8480_v18 = vmax.f32 %v8432_v10, 0.0  ;;  %v7835_v44 = vpop.f32.mrf.mxu1 }
 0x4f4   : > { %v8588_v26 = vadd.f32 %v16111_v7, %v8533_v22  ;;  %v8317_v47 = vsel %vm3927_vm4, %v8314_v48, %v8316_v24  ;;  %v8319_v54 = vsel %vm3927_vm4, %v8316_v24, %v8318_v23  ;;  %v7954_v41 = vadd.f32 %v7835_v44, %v17110_v38  ;;  %v17118_v24 = vld [vmem:[#allocation112_spill] sm:$0xff] }
 0x4f5   : > { %8635 = vst.msk [vmem:[%s16122_s24 + $0xb8] sm:$0xff] %vm4615_vm2, %v8587_v42  ;;  %v8534_v14 = vmul.f32 %v16105_v63, %v8479_v35  ;;  %v8535_v53 = vmul.f32 %v16105_v63, %v8480_v18  ;;  %v8433_v46 = vadd.f32 %v8317_v47, %v17111_v17  ;;  %v8434_v61 = vadd.f32 %v8319_v54, %v17112_v39  ;;  %v11809_v36 = vpop.f32.mrf.mxu1  ;;  %v17120_v18 = vld [vmem:[#allocation61_spill] sm:$0xff] }
 0x4f6   : > { %8636 = vst.msk [vmem:[%s16122_s24 + $0xc0] sm:$0xff] %vm4615_vm2, %v8588_v26  ;;  %v8322_v34 = vrot.slane %v7955_v12, 1  ;;  %v8320_v16 = vrot.slane %v7954_v41, 1  ;;  %v7957_v6 = vadd.f32 %v11809_v36, %v17113_v27  ;;  %v17119_v26 = vld [vmem:[#allocation29_spill] sm:$0xff]  ;;  %v17121_v41 = vld [vmem:[#allocation14_spill] sm:$0xff] }
 0x4f7   : > { %v8589_v62 = vadd.f32 %v16111_v7, %v8534_v14  ;;  %v8590_v56 = vadd.f32 %v16111_v7, %v8535_v53  ;;  %v8481_v45 = vmax.f32 %v8433_v46, 0.0  ;;  %v8482_v55 = vmax.f32 %v8434_v61, 0.0  ;;  %v7845_v11 = vpop.f32.mrf.mxu1 }
 0x4f8   : > { %v8321_v57 = vsel %vm3927_vm4, %v8318_v23, %v8320_v16  ;;  %v8323_v48 = vsel %vm3927_vm4, %v8320_v16, %v8322_v34  ;;  %v7956_v40 = vadd.f32 %v7845_v11, %v17114_v0  ;;  %v8326_v43 = vrot.slane %v7957_v6, 1  ;;  %v17122_v16 = vld [vmem:[#allocation15_spill] sm:$0xff]  ;;  %v17124_v0 = vld [vmem:[#allocation113_spill] sm:$0xff] }
 0x4f9   : > { %8637 = vst.msk [vmem:[%s16122_s24 + $0xc8] sm:$0xff] %vm4615_vm2, %v8589_v62  ;;  %8638 = vst.msk [vmem:[%s16122_s24 + $0xd0] sm:$0xff] %vm4615_vm2, %v8590_v56  ;;  %v8536_v19 = vmul.f32 %v16105_v63, %v8481_v45  ;;  %v8537_v31 = vmul.f32 %v16105_v63, %v8482_v55  ;;  %v8435_v21 = vadd.f32 %v8321_v57, %v17115_v20  ;;  %v11812_v50 = vpop.f32.mrf.mxu1  ;;  %v17123_v56 = vld [vmem:[#allocation47_spill] sm:$0xff] }
 0x4fa   : > { %v8436_v3 = vadd.f32 %v8323_v48, %v17116_v60  ;;  %v8324_v9 = vrot.slane %v7956_v40, 1  ;;  %v7959_v30 = vadd.f32 %v11812_v50, %v17117_v15 }
 0x4fb   : > { %v8591_v22 = vadd.f32 %v16111_v7, %v8536_v19  ;;  %v8592_v1 = vadd.f32 %v16111_v7, %v8537_v31  ;;  %v8483_v28 = vmax.f32 %v8435_v21, 0.0  ;;  %v7855_v10 = vpop.f32.mrf.mxu1 }
 0x4fc   : > { %v8484_v33 = vmax.f32 %v8436_v3, 0.0  ;;  %v8325_v52 = vsel %vm3927_vm4, %v8322_v34, %v8324_v9  ;;  %v8327_v23 = vsel %vm3927_vm4, %v8324_v9, %v8326_v43  ;;  %v7958_v25 = vadd.f32 %v7855_v10, %v17118_v24 }
 0x4fd   : > { %8639 = vst.msk [vmem:[%s16122_s24 + $0xd8] sm:$0xff] %vm4615_vm2, %v8591_v22  ;;  %8640 = vst.msk [vmem:[%s16122_s24 + $0xe0] sm:$0xff] %vm4615_vm2, %v8592_v1  ;;  %v8538_v12 = vmul.f32 %v16105_v63, %v8483_v28  ;;  %v8437_v35 = vadd.f32 %v8325_v52, %v17119_v26  ;;  %v8438_v44 = vadd.f32 %v8327_v23, %v17120_v18  ;;  %v11815_v47 = vpop.f32.mrf.mxu1  ;;  %v8330_v54 = vrot.slane %v7959_v30, 1  ;;  %v17126_v30 = vld [vmem:[#allocation30_spill] sm:$0xff]  ;;  %v17128_v23 = vld [vmem:[#allocation60_spill] sm:$0xff] }
 0x4fe   : > { %v8539_v42 = vmul.f32 %v16105_v63, %v8484_v33  ;;  %v8328_v38 = vrot.slane %v7958_v25, 1  ;;  %v7961_v14 = vadd.f32 %v11815_v47, %v17121_v41  ;;  %v17127_v1 = vld [vmem:[#allocation74_spill] sm:$0xff]  ;;  %v17129_v47 = vld [vmem:[#allocation116_spill] sm:$0xff] }
 0x4ff   : > { %v8593_v53 = vadd.f32 %v16111_v7, %v8538_v12  ;;  %v8485_v46 = vmax.f32 %v8437_v35, 0.0  ;;  %v8486_v39 = vmax.f32 %v8438_v44, 0.0  ;;  %v7865_v61 = vpop.f32.mrf.mxu1 }
 0x500   : > { %v8594_v17 = vadd.f32 %v16111_v7, %v8539_v42  ;;  %v8329_v36 = vsel %vm3927_vm4, %v8326_v43, %v8328_v38  ;;  %v8331_v34 = vsel %vm3927_vm4, %v8328_v38, %v8330_v54  ;;  %v7960_v27 = vadd.f32 %v7865_v61, %v17122_v16  ;;  %v17125_v43 = vld [vmem:[#allocation59_spill] sm:$0xff] }
 0x501   : > { %8641 = vst.msk [vmem:[%s16122_s24 + $0xe8] sm:$0xff] %vm4615_vm2, %v8593_v53  ;;  %v8540_v6 = vmul.f32 %v16105_v63, %v8485_v46  ;;  %v8541_v62 = vmul.f32 %v16105_v63, %v8486_v39  ;;  %v8439_v45 = vadd.f32 %v8329_v36, %v17123_v56  ;;  %v8440_v55 = vadd.f32 %v8331_v34, %v16024_v58  ;;  %v11818_v11 = vpop.f32.mrf.mxu1  ;;  %v17131_v36 = vld [vmem:[#allocation16_spill] sm:$0xff] }
 0x502   : > { %8642 = vst.msk [vmem:[%s16122_s24 + $0xf0] sm:$0xff] %vm4615_vm2, %v8594_v17  ;;  %v8334_v57 = vrot.slane %v7961_v14, 1  ;;  %v8332_v48 = vrot.slane %v7960_v27, 1  ;;  %v7963_v40 = vadd.f32 %v11818_v11, %v17124_v0  ;;  %v17130_v14 = vld [vmem:[#allocation114_spill] sm:$0xff]  ;;  %v17133_v0 = vld [vmem:[#allocation115_spill] sm:$0xff] }
 0x503   : > { %v8595_v19 = vadd.f32 %v16111_v7, %v8540_v6  ;;  %v8596_v31 = vadd.f32 %v16111_v7, %v8541_v62  ;;  %v8487_v20 = vmax.f32 %v8439_v45, 0.0  ;;  %v8488_v21 = vmax.f32 %v8440_v55, 0.0  ;;  %v7875_v60 = vpop.f32.mrf.mxu1  ;;  %v17132_v11 = vld [vmem:[#allocation62_spill] sm:$0xff] }
 0x504   : > { %v8333_v3 = vsel %vm3927_vm4, %v8330_v54, %v8332_v48  ;;  %v8335_v50 = vsel %vm3927_vm4, %v8332_v48, %v8334_v57  ;;  %v7962_v9 = vadd.f32 %v7875_v60, %v17125_v43  ;;  %v8338_v10 = vrot.slane %v7963_v40, 1  ;;  %v17134_v60 = vld [vmem:[#allocation119_spill] sm:$0xff] }
 0x505   : > { %8643 = vst.msk [vmem:[%s16122_s24 + $0xf8] sm:$0xff] %vm4615_vm2, %v8595_v19  ;;  %8644 = vst.msk [vmem:[%s16122_s24 + $0x100] sm:$0xff] %vm4615_vm2, %v8596_v31  ;;  %v8542_v58 = vmul.f32 %v16105_v63, %v8487_v20  ;;  %v8543_v15 = vmul.f32 %v16105_v63, %v8488_v21  ;;  %v8441_v22 = vadd.f32 %v8333_v3, %v17126_v30  ;;  %v11821_v33 = vpop.f32.mrf.mxu1 }
 0x506   : > { %v8442_v28 = vadd.f32 %v8335_v50, %v17127_v1  ;;  %v8336_v52 = vrot.slane %v7962_v9, 1  ;;  %v7965_v24 = vadd.f32 %v11821_v33, %v17128_v23  ;;  %v17135_v1 = vld [vmem:[#allocation18_spill] sm:$0xff] }
 0x507   : > { %v8597_v25 = vadd.f32 %v16111_v7, %v8542_v58  ;;  %v8598_v12 = vadd.f32 %v16111_v7, %v8543_v15  ;;  %v8489_v42 = vmax.f32 %v8441_v22, 0.0  ;;  %v7885_v35 = vpop.f32.mrf.mxu1 }
 0x508   : > { %v8490_v26 = vmax.f32 %v8442_v28, 0.0  ;;  %v8337_v18 = vsel %vm3927_vm4, %v8334_v57, %v8336_v52  ;;  %v8339_v44 = vsel %vm3927_vm4, %v8336_v52, %v8338_v10  ;;  %v7964_v54 = vadd.f32 %v7885_v35, %v17129_v47 }
 0x509   : > { %8645 = vst.msk [vmem:[%s16122_s24 + $0x108] sm:$0xff] %vm4615_vm2, %v8597_v25  ;;  %8646 = vst.msk [vmem:[%s16122_s24 + $0x110] sm:$0xff] %vm4615_vm2, %v8598_v12  ;;  %v8544_v38 = vmul.f32 %v16105_v63, %v8489_v42  ;;  %v8443_v53 = vadd.f32 %v8337_v18, %v17130_v14  ;;  %v8444_v17 = vadd.f32 %v8339_v44, %v16043_v2  ;;  %v11824_v46 = vpop.f32.mrf.mxu1  ;;  %v8342_v39 = vrot.slane %v7965_v24, 1  ;;  %v17136_v12 = vld [vmem:[#allocation19_spill] sm:$0xff] }
 0x50a   : > { %v8545_v41 = vmul.f32 %v16105_v63, %v8490_v26  ;;  %v8340_v61 = vrot.slane %v7964_v54, 1  ;;  %v7967_v34 = vadd.f32 %v11824_v46, %v17131_v36 }
 0x50b   : > { %v8599_v16 = vadd.f32 %v16111_v7, %v8544_v38  ;;  %v8491_v6 = vmax.f32 %v8443_v53, 0.0  ;;  %v8492_v62 = vmax.f32 %v8444_v17, 0.0  ;;  %v7895_v56 = vpop.f32.mrf.mxu1 }
 0x50c   : > { %v8600_v27 = vadd.f32 %v16111_v7, %v8545_v41  ;;  %v8341_v45 = vsel %vm3927_vm4, %v8338_v10, %v8340_v61  ;;  %v8343_v55 = vsel %vm3927_vm4, %v8340_v61, %v8342_v39  ;;  %v7966_v57 = vadd.f32 %v7895_v56, %v17132_v11  ;;  %v17137_v41 = vld [vmem:[#allocation122_spill] sm:$0xff] }
 0x50d   : > { %8647 = vst.msk [vmem:[%s16122_s24 + $0x118] sm:$0xff] %vm4615_vm2, %v8599_v16  ;;  %v8546_v2 = vmul.f32 %v16105_v63, %v8491_v6  ;;  %v8547_v48 = vmul.f32 %v16105_v63, %v8492_v62  ;;  %v8445_v40 = vadd.f32 %v8341_v45, %v17133_v0  ;;  %v8446_v19 = vadd.f32 %v8343_v55, %v16054_v59  ;;  %v11827_v31 = vpop.f32.mrf.mxu1 }
 0x50e   : > { %8648 = vst.msk [vmem:[%s16122_s24 + $0x120] sm:$0xff] %vm4615_vm2, %v8600_v27  ;;  %v8346_v20 = vrot.slane %v7967_v34, 1  ;;  %v8344_v21 = vrot.slane %v7966_v57, 1  ;;  %v7969_v3 = vadd.f32 %v11827_v31, %v17134_v60 }
 0x50f   : > { %v8601_v50 = vadd.f32 %v16111_v7, %v8546_v2  ;;  %v8602_v43 = vadd.f32 %v16111_v7, %v8547_v48  ;;  %v8493_v9 = vmax.f32 %v8445_v40, 0.0  ;;  %v8494_v58 = vmax.f32 %v8446_v19, 0.0  ;;  %v7905_v15 = vpop.f32.mrf.mxu1 }
 0x510   : > { %v8345_v30 = vsel %vm3927_vm4, %v8342_v39, %v8344_v21  ;;  %v8347_v22 = vsel %vm3927_vm4, %v8344_v21, %v8346_v20  ;;  %v7968_v28 = vadd.f32 %v7905_v15, %v17135_v1  ;;  %v8350_v24 = vrot.slane %v7969_v3, 1 }
 0x511   : > { %8649 = vst.msk [vmem:[%s16122_s24 + $0x128] sm:$0xff] %vm4615_vm2, %v8601_v50  ;;  %8650 = vst.msk [vmem:[%s16122_s24 + $0x130] sm:$0xff] %vm4615_vm2, %v8602_v43  ;;  %v8548_v59 = vmul.f32 %v16105_v63, %v8493_v9  ;;  %v8549_v33 = vmul.f32 %v16105_v63, %v8494_v58  ;;  %v8447_v10 = vadd.f32 %v8345_v30, %v16056_v49  ;;  %v11830_v23 = vpop.f32.mrf.mxu1 }
 0x512   : > { %v8448_v52 = vadd.f32 %v8347_v22, %v16064_v5  ;;  %v8348_v25 = vrot.slane %v7968_v28, 1  ;;  %v7971_v42 = vadd.f32 %v11830_v23, %v17136_v12 }
 0x513   : > { %v8603_v26 = vadd.f32 %v16111_v7, %v8548_v59  ;;  %v8604_v35 = vadd.f32 %v16111_v7, %v8549_v33  ;;  %v8495_v18 = vmax.f32 %v8447_v10, 0.0  ;;  %v7915_v47 = vpop.f32.mrf.mxu1 }
 0x514   : > { %v8496_v44 = vmax.f32 %v8448_v52, 0.0  ;;  %v8349_v54 = vsel %vm3927_vm4, %v8346_v20, %v8348_v25  ;;  %v8351_v38 = vsel %vm3927_vm4, %v8348_v25, %v8350_v24  ;;  %v8354_v49 = vrot.slane %v7971_v42, 1 }
 0x515   : > { %v7970_v14 = vadd.f32 %v7915_v47, %v17137_v41  ;;  %8651 = vst.msk [vmem:[%s16122_s24 + $0x138] sm:$0xff] %vm4615_vm2, %v8603_v26  ;;  %8652 = vst.msk [vmem:[%s16122_s24 + $0x140] sm:$0xff] %vm4615_vm2, %v8604_v35  ;;  %v8550_v5 = vmul.f32 %v16105_v63, %v8495_v18  ;;  %v8449_v17 = vadd.f32 %v8349_v54, %v16066_v13 }
 0x516   : > { %v8551_v53 = vmul.f32 %v16105_v63, %v8496_v44  ;;  %v8450_v46 = vadd.f32 %v8351_v38, %v16076_v8  ;;  %v8405_v39 = vsel %vm3927_vm4, %v8354_v49, %v8261_v32 }
 0x517   : > { %v8352_v61 = vrot.slane %v7970_v14, 1  ;;  %v8605_v36 = vadd.f32 %v16111_v7, %v8550_v5  ;;  %v8497_v16 = vmax.f32 %v8449_v17, 0.0  ;;  %v8453_v6 = vadd.f32 %v8405_v39, %v16093_v37 }
 0x518   : > { %v8606_v34 = vadd.f32 %v16111_v7, %v8551_v53  ;;  %v8498_v27 = vmax.f32 %v8450_v46, 0.0 }
 0x519   : > { %v8353_v62 = vsel %vm3927_vm4, %v8350_v24, %v8352_v61  ;;  %v8355_v13 = vsel %vm3927_vm4, %v8352_v61, %v8354_v49  ;;  %8653 = vst.msk [vmem:[%s16122_s24 + $0x148] sm:$0xff] %vm4615_vm2, %v8605_v36  ;;  %v8552_v8 = vmul.f32 %v16105_v63, %v8497_v16  ;;  %v8501_v37 = vmax.f32 %v8453_v6, 0.0 }
 0x51a   : > { %8654 = vst.msk [vmem:[%s16122_s24 + $0x150] sm:$0xff] %vm4615_vm2, %v8606_v34  ;;  %v8553_v51 = vmul.f32 %v16105_v63, %v8498_v27  ;;  %v8451_v32 = vadd.f32 %v8353_v62, %v16078_v29  ;;  %v8452_v56 = vadd.f32 %v8355_v13, %v16091_v4 }
 0x51b   : > { %v8607_v45 = vadd.f32 %v16111_v7, %v8552_v8  ;;  %v8556_v2 = vmul.f32 %v16105_v63, %v8501_v37 }
 0x51c   : > { %v8608_v55 = vadd.f32 %v16111_v7, %v8553_v51  ;;  %v8499_v11 = vmax.f32 %v8451_v32, 0.0  ;;  %v8500_v57 = vmax.f32 %v8452_v56, 0.0 }
 0x51d   : > { %8655 = vst.msk [vmem:[%s16122_s24 + $0x158] sm:$0xff] %vm4615_vm2, %v8607_v45  ;;  %v8611_v4 = vadd.f32 %v16111_v7, %v8556_v2 }
 0x51e   : > { %8656 = vst.msk [vmem:[%s16122_s24 + $0x160] sm:$0xff] %vm4615_vm2, %v8608_v55  ;;  %v8554_v48 = vmul.f32 %v16105_v63, %v8499_v11  ;;  %v8555_v29 = vmul.f32 %v16105_v63, %v8500_v57 }
 0x51f   : > { %8659 = vst.msk [vmem:[%s16122_s24 + $0x178] sm:$0xff] %vm4615_vm2, %v8611_v4 }
 0x520   : > { %v8609_v0 = vadd.f32 %v16111_v7, %v8554_v48  ;;  %v8610_v40 = vadd.f32 %v16111_v7, %v8555_v29 }
 0x522   : > { %8657 = vst.msk [vmem:[%s16122_s24 + $0x168] sm:$0xff] %vm4615_vm2, %v8609_v0  ;;  %8658 = vst.msk [vmem:[%s16122_s24 + $0x170] sm:$0xff] %vm4615_vm2, %v8610_v40 }
 0x523 PF: > { %s18_s27 = sadd.s32 1, %s11884_s27  }
 0x524   : > { %p15_p4 = scmp.ge.s32.totalorder %s18_s27, 4  }
 0x526   :  { %17 = sbr.rel (!%p15_p4) target bundleno = 1 (0x1), region = 98 }

</bundles_post_ra>
